<compile_context>
chip_gen: v5e
topology: v5e:2x2
jax: 0.10.0
libtpu: 0.0.40
codegen_flags: <defaults>
</compile_context>

<pallas_src>
import itertools

import jax
import jax.numpy as jnp
from jax.experimental import pallas as pl
from jax.experimental.pallas import tpu as pltpu

# ---- scaled-down hyperparameters (original: D_IN=1024, H=512, C=INSTANCE_NUM)
D_IN = 256        # box-feature dim              (orig 1024)
H = 128           # per-direction LSTM hidden    (orig 512)
C = 128           # instance_num / #classes      (orig cfg INSTANCE_NUM)
TILE_N = 128      # instance rows per grid step

NUM_IMAGES = 2
N_PER_IMAGE = 80  # instances per image in the demo


def _lstm_cell_from_zero(gates, hidden):
    """Single LSTM-cell step with h0 = c0 = 0, forget gate pruned.

    Gate order after pruning is [i, g, o] (PyTorch order [i, f, g, o] with the
    irrelevant f block removed at parameter-prep time).
    """
    i = jax.nn.sigmoid(gates[:, 0 * hidden:1 * hidden])
    g = jnp.tanh(gates[:, 1 * hidden:2 * hidden])
    o = jax.nn.sigmoid(gates[:, 2 * hidden:3 * hidden])
    return o * jnp.tanh(i * g)


def instance_encoder_kernel(
    x_ref,       # (TILE_N, D_IN)      f32  box features
    w_ctx_ref,   # (D_IN, 6H)          bf16 [fwd i,g,o | bwd i,g,o] obj_ctx_rnn W_ih^T
    b_ctx_ref,   # (1, 6H)             f32  b_ih + b_hh, both directions, pruned
    w_fc_ref,    # (D_IN + 2H, D_IN)   bf16 cls_fc weight^T
    b_fc_ref,    # (1, D_IN)           f32
    w_dec_ref,   # (D_IN, 3C)          bf16 decoder_rnn W_ih^T, forget gate pruned
    b_dec_ref,   # (1, 3C)             f32
    feat_ref,    # out: (TILE_N, D_IN) f32  instance_feature_1024
    probs_ref,   # out: (TILE_N, C)    f32  softmax output
):
    x = x_ref[...]
    x_bf = x.astype(jnp.bfloat16)

    # --- bidirectional obj_ctx_rnn (seq_len==1, zero state): one fused matmul
    gates = jnp.dot(x_bf, w_ctx_ref[...], preferred_element_type=jnp.float32)
    gates = gates + b_ctx_ref[...]
    h_f = _lstm_cell_from_zero(gates[:, :3 * H], H)
    h_b = _lstm_cell_from_zero(gates[:, 3 * H:], H)

    # --- cls_fc on cat([x, h_fwd, h_bwd], dim=1): single matmul ------------
    cat = jnp.concatenate(
        [x_bf, h_f.astype(jnp.bfloat16), h_b.astype(jnp.bfloat16)], axis=1)
    feat = jnp.dot(cat, w_fc_ref[...], preferred_element_type=jnp.float32)
    feat = feat + b_fc_ref[...]
    feat_ref[...] = feat.astype(feat_ref.dtype)

    # --- decoder_rnn: another single LSTM-cell step from zero state --------
    gates_d = jnp.dot(feat.astype(jnp.bfloat16), w_dec_ref[...],
                      preferred_element_type=jnp.float32)
    gates_d = gates_d + b_dec_ref[...]
    h_d = _lstm_cell_from_zero(gates_d, C)

    # --- cls_ac = Softmax(dim=1); divide goes to the EUP --------------------
    m = jnp.max(h_d, axis=1, keepdims=True)
    e = jnp.exp(h_d - m)
    denom = jnp.sum(e, axis=1, keepdims=True)
    probs_ref[...] = (e * pl.reciprocal(denom, approx=True)).astype(probs_ref.dtype)


def _const_spec(shape):
    # full-array block, identical at every grid step (resident weights/biases)
    return pl.BlockSpec(shape, lambda i: (0,) * len(shape))


@jax.jit
def _encode_batched(x_padded, params):
    """One pallas_call over ALL images' instances, padded to TILE_N rows."""
    n_pad = x_padded.shape[0]
    grid = (n_pad // TILE_N,)
    return pl.pallas_call(
        instance_encoder_kernel,
        out_shape=(
            jax.ShapeDtypeStruct((n_pad, D_IN), jnp.float32),  # instance_feature_1024
            jax.ShapeDtypeStruct((n_pad, C), jnp.float32),     # softmax output
        ),
        grid=grid,
        in_specs=[
            pl.BlockSpec((TILE_N, D_IN), lambda i: (i, 0)),    # x (tiled over instances)
            _const_spec((D_IN, 6 * H)),                        # w_ctx (fused fwd|bwd)
            _const_spec((1, 6 * H)),                           # b_ctx
            _const_spec((D_IN + 2 * H, D_IN)),                 # w_fc
            _const_spec((1, D_IN)),                            # b_fc
            _const_spec((D_IN, 3 * C)),                        # w_dec
            _const_spec((1, 3 * C)),                           # b_dec
        ],
        out_specs=(
            pl.BlockSpec((TILE_N, D_IN), lambda i: (i, 0)),
            pl.BlockSpec((TILE_N, C), lambda i: (i, 0)),
        ),
        compiler_params=pltpu.CompilerParams(
            dimension_semantics=("parallel",),
            vmem_limit_bytes=64 * 1024 * 1024,
        ),
    )(
        x_padded,
        params["w_ctx"], params["b_ctx"],
        params["w_fc"], params["b_fc"],
        params["w_dec"], params["b_dec"],
    )


def _prune_forget(p, hidden):
    """Drop the forget-gate block from a PyTorch-ordered [i,f,g,o] param."""
    return jnp.concatenate([p[0 * hidden:1 * hidden], p[2 * hidden:4 * hidden]], axis=0)


def init_params(key):
    """Synthetic parameters matching the module's __init__ shapes (scaled:
    LSTM(D_IN, H, bidirectional), Linear(D_IN + 2H, D_IN), LSTM(D_IN, C)),
    then pruned / fused / cast for the kernel."""
    ks = jax.random.split(key, 11)
    u = lambda k, shape, s: jax.random.uniform(k, shape, jnp.float32, -s, s)

    s_ctx = 1.0 / jnp.sqrt(H)
    # obj_ctx_rnn (bidirectional): W_ih (4H, D_IN), b_ih + b_hh (4H,) per direction
    w_ih_f = u(ks[0], (4 * H, D_IN), s_ctx)
    b_f = u(ks[1], (4 * H,), s_ctx) + u(ks[2], (4 * H,), s_ctx)
    w_ih_b = u(ks[3], (4 * H, D_IN), s_ctx)
    b_b = u(ks[4], (4 * H,), s_ctx) + u(ks[5], (4 * H,), s_ctx)

    # cls_fc: Linear(D_IN + 2H, D_IN), weight (D_IN, D_IN + 2H)
    s_fc = 1.0 / jnp.sqrt(D_IN + 2 * H)
    w_fc = u(ks[6], (D_IN, D_IN + 2 * H), s_fc)
    b_fc = u(ks[7], (D_IN,), s_fc)

    # decoder_rnn: LSTM(D_IN, C): W_ih (4C, D_IN), b_ih + b_hh (4C,)
    s_dec = 1.0 / jnp.sqrt(C)
    w_dec = u(ks[8], (4 * C, D_IN), s_dec)
    b_dec = u(ks[9], (4 * C,), s_dec) + u(ks[10], (4 * C,), s_dec)

    # prune forget gates, fuse both directions, transpose to x @ W layout
    w_ctx = jnp.concatenate(
        [_prune_forget(w_ih_f, H).T, _prune_forget(w_ih_b, H).T], axis=1)   # (D_IN, 6H)
    b_ctx = jnp.concatenate([_prune_forget(b_f, H), _prune_forget(b_b, H)])  # (6H,)

    return {
        "w_ctx": w_ctx.astype(jnp.bfloat16),
        "b_ctx": b_ctx.reshape(1, 6 * H),
        "w_fc": w_fc.T.astype(jnp.bfloat16),                  # (D_IN + 2H, D_IN)
        "b_fc": b_fc.reshape(1, D_IN),
        "w_dec": _prune_forget(w_dec, C).T.astype(jnp.bfloat16),   # (D_IN, 3C)
        "b_dec": _prune_forget(b_dec, C).reshape(1, 3 * C),
    }


def instance_encoder2_forward(box_features_list, pred_classes_list,
                              pred_gt_classes_list, params, training=True):
    """Mirrors InstanceEncoder2.forward, but runs ONE fused kernel for the
    whole batch instead of one launch per image."""
    losses, metrics = {}, {}
    counts = [int(x.shape[0]) for x in box_features_list]
    total = sum(counts)

    # batch + pad all instances to a multiple of TILE_N, single kernel launch
    x_all = jnp.concatenate(box_features_list, axis=0)
    n_pad = TILE_N * pl.cdiv(total, TILE_N)
    x_padded = jnp.pad(x_all, ((0, n_pad - total), (0, 0)))
    feat_all, probs_all = _encode_batched(x_padded, params)
    feat_all = feat_all[:total]
    probs_mix = probs_all[:total]

    offsets = [0] + list(itertools.accumulate(counts))
    instance_feature_1024s = [feat_all[offsets[i]:offsets[i + 1]]
                              for i in range(len(counts))]
    pred_instance_logits = [probs_mix[offsets[i]:offsets[i + 1]]
                            for i in range(len(counts))]

    if training:
        gt = jnp.concatenate(pred_gt_classes_list)
        pred_cls = jnp.concatenate(pred_classes_list)
        # nn.CrossEntropyLoss applied to the (already-softmaxed) outputs,
        # exactly as in the reference: log_softmax of the softmax probabilities.
        log_probs = jax.nn.log_softmax(probs_mix, axis=1)
        losses["pred_class_loss"] = -jnp.mean(
            jnp.take_along_axis(log_probs, gt[:, None], axis=1))
        pred_score = jnp.argmax(probs_mix, axis=1)
        # metrics stay as device arrays: no device->host sync in the hot path
        metrics["pred_class_tp"] = jnp.sum(pred_score == gt)
        metrics["pred_class_p"] = gt.shape[0]
        metrics["raw_pred_class_tp"] = jnp.sum(pred_cls == gt)
        metrics["raw_pred_class_p"] = gt.shape[0]
    # TODO(synk): mask_on / image_features are unused in the reference forward as well.
    return instance_feature_1024s, pred_instance_logits, losses, metrics


if __name__ == "__main__":
    key = jax.random.PRNGKey(0)
    kp, kx, kc, kg = jax.random.split(key, 4)
    params = init_params(kp)

    # synthetic "pred_instances": NUM_IMAGES images, N_PER_IMAGE instances each
    box_features_list = [
        jax.random.normal(jax.random.fold_in(kx, i), (N_PER_IMAGE, D_IN), jnp.float32)
        for i in range(NUM_IMAGES)
    ]
    pred_classes_list = [
        jax.random.randint(jax.random.fold_in(kc, i), (N_PER_IMAGE,), 0, C)
        for i in range(NUM_IMAGES)
    ]
    pred_gt_classes_list = [
        jax.random.randint(jax.random.fold_in(kg, i), (N_PER_IMAGE,), 0, C)
        for i in range(NUM_IMAGES)
    ]

    feats, logits, losses, metrics = instance_encoder2_forward(
        box_features_list, pred_classes_list, pred_gt_classes_list, params,
        training=True)

    for f in feats:
        jax.block_until_ready(f)
    for l in logits:
        jax.block_until_ready(l)
    loss = jax.block_until_ready(losses["pred_class_loss"])
    tp = jax.block_until_ready(metrics["pred_class_tp"])

    assert feats[0].shape == (N_PER_IMAGE, D_IN)
    assert logits[0].shape == (N_PER_IMAGE, C)
    assert bool(jnp.all(jnp.isfinite(loss)))
    assert int(tp) >= 0
    # softmax rows must sum to ~1 (approx reciprocal in the epilogue)
    assert bool(jnp.allclose(jnp.sum(logits[0], axis=1), 1.0, atol=2e-2))

    print("KERNEL_OK")
</pallas_src>

<mosaic_0001>
module attributes {stable_mosaic.version = 11 : i64} {
  func.func @instance_encoder_kernel(%arg0: i32, %arg1: memref<128x256xf32, #tpu.memory_space<vmem>>, %arg2: memref<256x768xbf16, #tpu.memory_space<vmem>>, %arg3: memref<1x768xf32, #tpu.memory_space<vmem>>, %arg4: memref<512x256xbf16, #tpu.memory_space<vmem>>, %arg5: memref<1x256xf32, #tpu.memory_space<vmem>>, %arg6: memref<256x384xbf16, #tpu.memory_space<vmem>>, %arg7: memref<1x384xf32, #tpu.memory_space<vmem>>, %arg8: memref<128x256xf32, #tpu.memory_space<vmem>>, %arg9: memref<128x128xf32, #tpu.memory_space<vmem>>) attributes {dimension_semantics = [#tpu.dimension_semantics<parallel>], iteration_bounds = array<i64: 2>, scalar_prefetch = 0 : i64, scratch_operands = 0 : i64, tpu.core_type = #tpu.core_type<tc>, window_params = [{transform_indices = @transform_0, window_bounds = array<i64: 128, 256>}, {pipeline_mode = #tpu.pipeline_mode<synchronous>, transform_indices = @transform_1, window_bounds = array<i64: 256, 768>}, {pipeline_mode = #tpu.pipeline_mode<synchronous>, transform_indices = @transform_2, window_bounds = array<i64: 1, 768>}, {pipeline_mode = #tpu.pipeline_mode<synchronous>, transform_indices = @transform_3, window_bounds = array<i64: 512, 256>}, {pipeline_mode = #tpu.pipeline_mode<synchronous>, transform_indices = @transform_4, window_bounds = array<i64: 1, 256>}, {pipeline_mode = #tpu.pipeline_mode<synchronous>, transform_indices = @transform_5, window_bounds = array<i64: 256, 384>}, {pipeline_mode = #tpu.pipeline_mode<synchronous>, transform_indices = @transform_6, window_bounds = array<i64: 1, 384>}, {transform_indices = @transform_7, window_bounds = array<i64: 128, 256>}, {transform_indices = @transform_8, window_bounds = array<i64: 128, 128>}]} {
    %c0 = arith.constant 0 : index
    %c0_0 = arith.constant 0 : index
    %0 = vector.load %arg1[%c0, %c0_0] : memref<128x256xf32, #tpu.memory_space<vmem>>, vector<128x256xf32>
    %1 = arith.truncf %0 : vector<128x256xf32> to vector<128x256xbf16>
    %c0_1 = arith.constant 0 : index
    %c0_2 = arith.constant 0 : index
    %2 = vector.load %arg2[%c0_1, %c0_2] : memref<256x768xbf16, #tpu.memory_space<vmem>>, vector<256x768xbf16>
    %cst = arith.constant dense<0.000000e+00> : vector<128x768xf32>
    %3 = tpu.matmul %1, %2, %cst {dimension_numbers = #tpu.dot_dimension_numbers<[1], [0], [0], [1], [0, 0, 1, 1], [], []>} : vector<128x256xbf16>, vector<256x768xbf16>, vector<128x768xf32> -> vector<128x768xf32>
    %c0_3 = arith.constant 0 : index
    %c0_4 = arith.constant 0 : index
    %4 = vector.load %arg3[%c0_3, %c0_4] : memref<1x768xf32, #tpu.memory_space<vmem>>, vector<1x768xf32>
    %5 = vector.broadcast %4 : vector<1x768xf32> to vector<128x768xf32>
    %6 = arith.addf %3, %5 : vector<128x768xf32>
    %7 = vector.extract_strided_slice %6 {offsets = [0, 0], sizes = [128, 384], strides = [1, 1]} : vector<128x768xf32> to vector<128x384xf32>
    %8 = vector.extract_strided_slice %7 {offsets = [0, 0], sizes = [128, 128], strides = [1, 1]} : vector<128x384xf32> to vector<128x128xf32>
    %9 = arith.negf %8 : vector<128x128xf32>
    %10 = math.exp %9 : vector<128x128xf32>
    %cst_5 = arith.constant 1.000000e+00 : f32
    %11 = vector.broadcast %cst_5 : f32 to vector<128x128xf32>
    %12 = arith.addf %11, %10 : vector<128x128xf32>
    %13 = arith.divf %11, %12 : vector<128x128xf32>
    %14 = vector.extract_strided_slice %7 {offsets = [0, 128], sizes = [128, 128], strides = [1, 1]} : vector<128x384xf32> to vector<128x128xf32>
    %15 = math.tanh %14 : vector<128x128xf32>
    %16 = vector.extract_strided_slice %7 {offsets = [0, 256], sizes = [128, 128], strides = [1, 1]} : vector<128x384xf32> to vector<128x128xf32>
    %17 = arith.negf %16 : vector<128x128xf32>
    %18 = math.exp %17 : vector<128x128xf32>
    %cst_6 = arith.constant 1.000000e+00 : f32
    %19 = vector.broadcast %cst_6 : f32 to vector<128x128xf32>
    %20 = arith.addf %19, %18 : vector<128x128xf32>
    %21 = arith.divf %19, %20 : vector<128x128xf32>
    %22 = arith.mulf %13, %15 : vector<128x128xf32>
    %23 = math.tanh %22 : vector<128x128xf32>
    %24 = arith.mulf %21, %23 : vector<128x128xf32>
    %25 = vector.extract_strided_slice %6 {offsets = [0, 384], sizes = [128, 384], strides = [1, 1]} : vector<128x768xf32> to vector<128x384xf32>
    %26 = vector.extract_strided_slice %25 {offsets = [0, 0], sizes = [128, 128], strides = [1, 1]} : vector<128x384xf32> to vector<128x128xf32>
    %27 = arith.negf %26 : vector<128x128xf32>
    %28 = math.exp %27 : vector<128x128xf32>
    %cst_7 = arith.constant 1.000000e+00 : f32
    %29 = vector.broadcast %cst_7 : f32 to vector<128x128xf32>
    %30 = arith.addf %29, %28 : vector<128x128xf32>
    %31 = arith.divf %29, %30 : vector<128x128xf32>
    %32 = vector.extract_strided_slice %25 {offsets = [0, 128], sizes = [128, 128], strides = [1, 1]} : vector<128x384xf32> to vector<128x128xf32>
    %33 = math.tanh %32 : vector<128x128xf32>
    %34 = vector.extract_strided_slice %25 {offsets = [0, 256], sizes = [128, 128], strides = [1, 1]} : vector<128x384xf32> to vector<128x128xf32>
    %35 = arith.negf %34 : vector<128x128xf32>
    %36 = math.exp %35 : vector<128x128xf32>
    %cst_8 = arith.constant 1.000000e+00 : f32
    %37 = vector.broadcast %cst_8 : f32 to vector<128x128xf32>
    %38 = arith.addf %37, %36 : vector<128x128xf32>
    %39 = arith.divf %37, %38 : vector<128x128xf32>
    %40 = arith.mulf %31, %33 : vector<128x128xf32>
    %41 = math.tanh %40 : vector<128x128xf32>
    %42 = arith.mulf %39, %41 : vector<128x128xf32>
    %43 = arith.truncf %24 : vector<128x128xf32> to vector<128x128xbf16>
    %44 = arith.truncf %42 : vector<128x128xf32> to vector<128x128xbf16>
    %45 = tpu.concatenate %1, %43, %44 in 1 : vector<128x256xbf16>, vector<128x128xbf16>, vector<128x128xbf16> -> vector<128x512xbf16>
    %c0_9 = arith.constant 0 : index
    %c0_10 = arith.constant 0 : index
    %46 = vector.load %arg4[%c0_9, %c0_10] : memref<512x256xbf16, #tpu.memory_space<vmem>>, vector<512x256xbf16>
    %cst_11 = arith.constant dense<0.000000e+00> : vector<128x256xf32>
    %47 = tpu.matmul %45, %46, %cst_11 {dimension_numbers = #tpu.dot_dimension_numbers<[1], [0], [0], [1], [0, 0, 1, 1], [], []>} : vector<128x512xbf16>, vector<512x256xbf16>, vector<128x256xf32> -> vector<128x256xf32>
    %c0_12 = arith.constant 0 : index
    %c0_13 = arith.constant 0 : index
    %48 = vector.load %arg5[%c0_12, %c0_13] : memref<1x256xf32, #tpu.memory_space<vmem>>, vector<1x256xf32>
    %49 = vector.broadcast %48 : vector<1x256xf32> to vector<128x256xf32>
    %50 = arith.addf %47, %49 : vector<128x256xf32>
    %c0_14 = arith.constant 0 : index
    %c0_15 = arith.constant 0 : index
    %51 = vector.load %arg8[%c0_14, %c0_15] : memref<128x256xf32, #tpu.memory_space<vmem>>, vector<128x256xf32>
    tpu.vector_store %arg8[%c0_14, %c0_15], %50 {strides = array<i32>} : memref<128x256xf32, #tpu.memory_space<vmem>>, vector<128x256xf32>,
    %52 = arith.truncf %50 : vector<128x256xf32> to vector<128x256xbf16>
    %c0_16 = arith.constant 0 : index
    %c0_17 = arith.constant 0 : index
    %53 = vector.load %arg6[%c0_16, %c0_17] : memref<256x384xbf16, #tpu.memory_space<vmem>>, vector<256x384xbf16>
    %cst_18 = arith.constant dense<0.000000e+00> : vector<128x384xf32>
    %54 = tpu.matmul %52, %53, %cst_18 {dimension_numbers = #tpu.dot_dimension_numbers<[1], [0], [0], [1], [0, 0, 1, 1], [], []>} : vector<128x256xbf16>, vector<256x384xbf16>, vector<128x384xf32> -> vector<128x384xf32>
    %c0_19 = arith.constant 0 : index
    %c0_20 = arith.constant 0 : index
    %55 = vector.load %arg7[%c0_19, %c0_20] : memref<1x384xf32, #tpu.memory_space<vmem>>, vector<1x384xf32>
    %56 = vector.broadcast %55 : vector<1x384xf32> to vector<128x384xf32>
    %57 = arith.addf %54, %56 : vector<128x384xf32>
    %58 = vector.extract_strided_slice %57 {offsets = [0, 0], sizes = [128, 128], strides = [1, 1]} : vector<128x384xf32> to vector<128x128xf32>
    %59 = arith.negf %58 : vector<128x128xf32>
    %60 = math.exp %59 : vector<128x128xf32>
    %cst_21 = arith.constant 1.000000e+00 : f32
    %61 = vector.broadcast %cst_21 : f32 to vector<128x128xf32>
    %62 = arith.addf %61, %60 : vector<128x128xf32>
    %63 = arith.divf %61, %62 : vector<128x128xf32>
    %64 = vector.extract_strided_slice %57 {offsets = [0, 128], sizes = [128, 128], strides = [1, 1]} : vector<128x384xf32> to vector<128x128xf32>
    %65 = math.tanh %64 : vector<128x128xf32>
    %66 = vector.extract_strided_slice %57 {offsets = [0, 256], sizes = [128, 128], strides = [1, 1]} : vector<128x384xf32> to vector<128x128xf32>
    %67 = arith.negf %66 : vector<128x128xf32>
    %68 = math.exp %67 : vector<128x128xf32>
    %cst_22 = arith.constant 1.000000e+00 : f32
    %69 = vector.broadcast %cst_22 : f32 to vector<128x128xf32>
    %70 = arith.addf %69, %68 : vector<128x128xf32>
    %71 = arith.divf %69, %70 : vector<128x128xf32>
    %72 = arith.mulf %63, %65 : vector<128x128xf32>
    %73 = math.tanh %72 : vector<128x128xf32>
    %74 = arith.mulf %71, %73 : vector<128x128xf32>
    %cst_23 = arith.constant dense<0xFF800000> : vector<128xf32>
    %75 = vector.multi_reduction <maximumf>, %74, %cst_23 [1] : vector<128x128xf32> to vector<128xf32>
    %76 = vector.shape_cast %75 : vector<128xf32> to vector<128x1xf32>
    %77 = vector.broadcast %76 : vector<128x1xf32> to vector<128x128xf32>
    %78 = arith.subf %74, %77 : vector<128x128xf32>
    %79 = math.exp %78 : vector<128x128xf32>
    %cst_24 = arith.constant dense<0.000000e+00> : vector<128xf32>
    %80 = vector.multi_reduction <add>, %79, %cst_24 [1] : vector<128x128xf32> to vector<128xf32>
    %81 = vector.shape_cast %80 : vector<128xf32> to vector<128x1xf32>
    %82 = tpu.reciprocal %81 {approx = true} : vector<128x1xf32> -> vector<128x1xf32>
    %83 = vector.broadcast %82 : vector<128x1xf32> to vector<128x128xf32>
    %84 = arith.mulf %79, %83 : vector<128x128xf32>
    %c0_25 = arith.constant 0 : index
    %c0_26 = arith.constant 0 : index
    %85 = vector.load %arg9[%c0_25, %c0_26] : memref<128x128xf32, #tpu.memory_space<vmem>>, vector<128x128xf32>
    tpu.vector_store %arg9[%c0_25, %c0_26], %84 {strides = array<i32>} : memref<128x128xf32, #tpu.memory_space<vmem>>, vector<128x128xf32>,
    return
  }
  func.func @transform_0(%arg0: i32) -> (i32, i32) {
    %c0_i32 = arith.constant 0 : i32
    %c0_i32_0 = arith.constant 0 : i32
    return %arg0, %c0_i32 : i32, i32
  }
  func.func @transform_1(%arg0: i32) -> (i32, i32) {
    %c0_i32 = arith.constant 0 : i32
    %c0_i32_0 = arith.constant 0 : i32
    %c0_i32_1 = arith.constant 0 : i32
    return %c0_i32, %c0_i32_0 : i32, i32
  }
  func.func @transform_2(%arg0: i32) -> (i32, i32) {
    %c0_i32 = arith.constant 0 : i32
    %c0_i32_0 = arith.constant 0 : i32
    %c0_i32_1 = arith.constant 0 : i32
    return %c0_i32, %c0_i32_0 : i32, i32
  }
  func.func @transform_3(%arg0: i32) -> (i32, i32) {
    %c0_i32 = arith.constant 0 : i32
    %c0_i32_0 = arith.constant 0 : i32
    %c0_i32_1 = arith.constant 0 : i32
    return %c0_i32, %c0_i32_0 : i32, i32
  }
  func.func @transform_4(%arg0: i32) -> (i32, i32) {
    %c0_i32 = arith.constant 0 : i32
    %c0_i32_0 = arith.constant 0 : i32
    %c0_i32_1 = arith.constant 0 : i32
    return %c0_i32, %c0_i32_0 : i32, i32
  }
  func.func @transform_5(%arg0: i32) -> (i32, i32) {
    %c0_i32 = arith.constant 0 : i32
    %c0_i32_0 = arith.constant 0 : i32
    %c0_i32_1 = arith.constant 0 : i32
    return %c0_i32, %c0_i32_0 : i32, i32
  }
  func.func @transform_6(%arg0: i32) -> (i32, i32) {
    %c0_i32 = arith.constant 0 : i32
    %c0_i32_0 = arith.constant 0 : i32
    %c0_i32_1 = arith.constant 0 : i32
    return %c0_i32, %c0_i32_0 : i32, i32
  }
  func.func @transform_7(%arg0: i32) -> (i32, i32) {
    %c0_i32 = arith.constant 0 : i32
    %c0_i32_0 = arith.constant 0 : i32
    return %arg0, %c0_i32 : i32, i32
  }
  func.func @transform_8(%arg0: i32) -> (i32, i32) {
    %c0_i32 = arith.constant 0 : i32
    %c0_i32_0 = arith.constant 0 : i32
    return %arg0, %c0_i32 : i32, i32
  }
}

</mosaic_0001>

<bundles_post_ra>
// kernel: _encode_batched.1
= control target key start
LH: loop header
LB: loop body
LE: loop exit
PB: predicated region body
PF: predicated region fallthrough
CT: control target
= control target key end

     0   :  { %s12021_s0 = inlined_call_operand.hbm [shape: f32[256,256], index: 0, kind: input, shape index: {}]   ;;  %s12022_s1 = inlined_call_operand.hbm [shape: bf16[256,768], index: 1, kind: input, shape index: {}]   ;;  %s12023_s2 = inlined_call_operand.hbm [shape: f32[1,768], index: 2, kind: input, shape index: {}]   ;;  %s12024_s3 = inlined_call_operand.hbm [shape: bf16[512,256], index: 3, kind: input, shape index: {}]   ;;  %s12025_s4 = inlined_call_operand.vmem [shape: f32[1,256], index: 4, kind: input, shape index: {}]   ;;  %s12026_s5 = inlined_call_operand.hbm [shape: bf16[256,384], index: 5, kind: input, shape index: {}]   ;;  %s12027_s6 = inlined_call_operand.hbm [shape: f32[1,384], index: 6, kind: input, shape index: {}]   ;;  %s12028_s7 = inlined_call_operand.hbm [shape: f32[256,256], index: 7, kind: output, shape index: {0}]   ;;  %s12029_s8 = inlined_call_operand.hbm [shape: f32[256,128], index: 8, kind: output, shape index: {1}]  }
   0x1   :  { %12073 = sst [smem:[#allocation43_spill]] %s12022_s1 }
   0x2   :  { %12074 = sst [smem:[#allocation44_spill]] %s12023_s2 }
   0x3   :  { %12075 = sst [smem:[#allocation45_spill]] %s12024_s3 }
   0x4   :  { %14 = vsyncpa [#allocation3], 0 }
   0x5   :  { %16 = vsyncpa [#allocation3 + $0x1], 0 }
   0x6   :  { %17 = vsyncpa [#allocation6], 0 }
   0x7   :  { %18 = vsyncpa [#allocation9], 0 }
   0x8   :  { %19 = vsyncpa [#allocation12], 0 }
   0x9   :  { %20 = vsyncpa [#allocation4], 0 }
   0xa   :  { %22 = vsyncpa [#allocation4 + $0x1], 0 }
   0xb   :  { %23 = vsyncpa [#allocation15], 0 }
   0xc   :  { %25 = vsyncpa [#allocation15 + $0x1], 0  ;;  %s7971_s27 = smov 0   ;;  %s7973_s28 = smov 0  }
   0xd   :  { %s7975_s29 = smov 0   ;;  %s7977_s30 = smov 0  }
   0xe LB: > { %s12076_s1 = sld [smem:[#allocation43_spill]]  ;;  %s7995_s12 = sadd.s32 4294967295, %s7907_s30   ;;  %s7907_s30 = sphi %s7977_s30, %s12399_s30   ;;  %s7903_s29 = sphi %s7975_s29, %s12398_s29   ;;  %s7899_s28 = sphi %s7973_s28, %s12397_s28   ;;  %s7895_s27 = sphi %s7971_s27, %s12396_s27  }
   0xf   : > { %p5676_p0 = scmp.ge.s32.totalorder %s7907_s30, 1  ;;  %p52_p1 = scmp.eq.s32.totalorder %s7995_s12, 0 }
  0x10   : > { %p240_p2 = scmp.lt.s32.totalorder %s7907_s30, 3  ;;  %s7909_s14 = smov [#allocation5]  }
  0x11   : > { %s253_s15 = sshll.u32 %s7909_s14, 4  ;;  %s12078_s3 = sld [smem:[#allocation45_spill]]  ;;  %s254_s15 = int_to_ptr.vmem [resolvable:$true] %s253_s15 }
  0x12   : > { %p8000_p3 = pnand %p5676_p0, %p240_p2  ;;  %s7910_s20 = smov [#allocation8]  }
  0x13   : > { %s279_s21 = sshll.u32 %s7910_s20, 4  ;;  %s7911_s22 = smov 384   ;;  %s280_s21 = int_to_ptr.vmem [resolvable:$true] %s279_s21 }
  0x14   : > { %s251_s11 = sshll.u32 %s12076_s1, 4  ;;  %p6888_p4 = pneg %p8000_p3  ;;  %s252_s11 = int_to_ptr.hbm [resolvable:$true] %s251_s11 }
  0x15   : > { %s7912_s23 = smov 24   ;;  %s7913_s24 = smov 128  }
  0x16   : > { %p8012_p6 = pnand %p6888_p4, %p52_p1  ;;  %s7914_s25 = smov 8  }
  0x17   : > { %s277_s18 = sshll.u32 %s12078_s3, 4  ;;  %s12080_s2 = sld [smem:[#allocation44_spill]]  ;;  %s278_s18 = int_to_ptr.hbm [resolvable:$true] %s277_s18 }
  0x18   : > { %6891 = dma.hbm_to_vmem [thread:$0]  (!%p8012_p6), %s252_s11, 12288, %s254_s15, [#allocation6], %s7911_s22, %s7911_s22, %s7912_s23  }
  0x19   : > { %6897 = dma.hbm_to_vmem [thread:$0]  (!%p8012_p6), %s278_s18, 8192, %s280_s21, [#allocation9], %s7913_s24, %s7913_s24, %s7914_s25  }
  0x1a   : > { %s7915_s14 = smov [#allocation7]   ;;  %s294_s11 = sshll.u32 %s12026_s5, 4  ;;  %s295_s11 = int_to_ptr.hbm [resolvable:$true] %s294_s11 }
  0x1b   : > { %s268_s16 = sshll.u32 %s7915_s14, 4  ;;  %s7916_s15 = smov [#allocation10]   ;;  %s269_s16 = int_to_ptr.vmem [resolvable:$true] %s268_s16 }
  0x1c   : > { %s296_s18 = sshll.u32 %s7916_s15, 4  ;;  %s7917_s21 = smov 192   ;;  %s297_s18 = int_to_ptr.vmem [resolvable:$true] %s296_s18 }
  0x1d   : > { %s266_s10 = sshll.u32 %s12080_s2, 4  ;;  %s7918_s22 = smov 12   ;;  %s267_s10 = int_to_ptr.hbm [resolvable:$true] %s266_s10 }
  0x1e   : > { %6894 = dma.hbm_to_vmem [thread:$0]  (!%p8012_p6), %s267_s10, 96, %s269_s16, [#allocation6]  }
  0x1f   : > { %6900 = dma.hbm_to_vmem [thread:$0]  (!%p8012_p6), %s295_s11, 6144, %s297_s18, [#allocation9], %s7917_s21, %s7917_s21, %s7918_s22  }
  0x20   : > { %s309_s25 = sshll.u32 %s12027_s6, 4  ;;  %s7919_s26 = smov [#allocation11]   ;;  %s310_s25 = int_to_ptr.hbm [resolvable:$true] %s309_s25 }
  0x21   : > { %s311_s9 = sshll.u32 %s7919_s26, 4  ;;  %s5675_s10 = sadd.s32 4294967294, %s7907_s30   ;;  %s312_s9 = int_to_ptr.vmem [resolvable:$true] %s311_s9 }
  0x22   : > { %6903 = dma.hbm_to_vmem [thread:$0]  (!%p8012_p6), %s310_s25, 48, %s312_s9, [#allocation12]  }
  0x23   : > { %s8037_s14 = sadd.s32 1, %s7907_s30   ;;  %s38_s16 = sadd.s32 1, %s7903_s29 }
  0x24   : > { %s35_s17 = ssub.s32 %s7907_s30, %s8037_s14  ;;  %p45_p7 = scmp.ne.s32.totalorder %s7903_s29, %s7899_s28 }
  0x25   : > { %p36_p8 = scmp.eq.s32.totalorder %s35_s17, 0  ;;  %p46_p9 = scmp.eq.s32.totalorder %s7907_s30, 0 }
  0x26   : > { %p51_p10 = scmp.ne.s32.totalorder %s7899_s28, %s7895_s27  ;;  %p201_p11 = scmp.eq.s32.totalorder %s7995_s12, 1 }
  0x27   : > { %s8049_s20 = scalar_select %p36_p8, %s7903_s29, %s38_s16  }
  0x28   : > { %p8051_p12 = por %p46_p9, %p45_p7  ;;  %p8057_p13 = por %p52_p1, %p51_p10 }
  0x29   : > { %p8061_p0 = por %p201_p11, %p45_p7  ;;  %p207_p2 = scmp.eq.s32.totalorder %s5675_s10, 1 }
  0x2a   : > { %p6920_p4 = scmp.lt.s32.totalorder %s7907_s30, 2  ;;  %s322_s18 = sand.u32 1, %s7903_s29  }
  0x2b   : > { %p8067_p6 = por %p207_p2, %p51_p10  ;;  %s5683_s22 = sshll.u32 %s322_s18, 8 }
  0x2c   : > { %s6634_s23 = sshll.u32 %s7907_s30, 8  ;;  %s326_s16 = scalar_lea.vmem [#allocation2], %s5683_s22 }
  0x2d   : > { %s332_s26 = scalar_lea.hbm %s12021_s0, %s6634_s23  ;;  %s335_s17 = sshll.u32 %s326_s16, 4  ;;  %s336_s17 = int_to_ptr.vmem [resolvable:$true] %s335_s17 }
  0x2e   : > { %s333_s9 = sshll.u32 %s332_s26, 4  ;;  %p8077_p7 = pnand %p6920_p4, %p8051_p12  ;;  %s334_s9 = int_to_ptr.hbm [resolvable:$true] %s333_s9 }
  0x2f   : > { %s323_s1 = scalar_lea.sflag [#allocation3], %s322_s18  ;;  %s7767_s2 = sshra.s32 %s334_s9, 4  ;;  %s7768_s2 = int_to_ptr.hbm [resolvable:$true] %s7767_s2 }
  0x30   : > { %s7769_s3 = scalar_lea.hbm %s7768_s2, 256  ;;  %p7771_p9 = pneg %p8077_p7 }
  0x31   : > { %p7770_p8 = scmp.ne.s32.totalorder %s7768_s2, %s7769_s3  ;;  %s7774_s24 = scalar_lea.hbm %s12021_s0, 512 }
  0x32   : > { %p7775_p12 = scmp.lt.s32.totalorder %s7768_s2, %s12021_s0  ;;  %p7776_p2 = scmp.lt.s32.totalorder %s7774_s24, %s7769_s3 }
  0x33   : > { %p7772_p10 = pnand %p7771_p9, %p7770_p8 }
  0x34   : > { %p7777_p4 = por %p7776_p2, %p7775_p12 }
  0x35   : > { %p7773_p11 = pneg %p7772_p10 }
  0x37   : > { %p7778_p5 = pnand %p7777_p4, %p7773_p11 }
  0x39   : > { %7781 = shalt.err (!%p7778_p5)
}
  0x3a   : > { %s7920_s18 = smov 256   ;;  %s7921_s26 = smov 16  }
  0x3b   : > { %6907 = dma.hbm_to_vmem [thread:$0]  (!%p8077_p7), %s334_s9, 4096, %s336_s17, %s323_s1, %s7920_s18, %s7920_s18, %s7921_s26  }
  0x3c   : > { %347 = sbr.rel (%p8000_p3) target bundleno = 1550 (0x60e), region = 48 }
  0x41   : > { %s8094_s16 = sand.u32 1, %s7899_s28  }
  0x42   : > { %s5688_s2 = sshll.u32 %s8094_s16, 8  ;;  %s350_s3 = scalar_lea.sflag [#allocation3], %s8094_s16 }
  0x43   : > { %s8100_s23 = scalar_lea.vmem [#allocation2], %s5688_s2 }
  0x44   : > { %7870 = dma.done.wait (%p8057_p13), %s350_s3, 4096  }
  0x45   : > { %7872 = vsyncadd (%p8057_p13), %s350_s3, 4294963200 }
  0x46   : > { %7874 = dma.done.wait (%p52_p1), [#allocation6], 12384  }
  0x47   : > { %7876 = vsyncadd (%p52_p1), [#allocation6], 4294954912 }
  0x48   : > { %7878 = dma.done.wait (%p52_p1), [#allocation9], 14336  }
  0x49   : > { %7880 = vsyncadd (%p52_p1), [#allocation9], 4294952960 }
  0x4a   : > { %7882 = dma.done.wait (%p52_p1), [#allocation12], 48  }
  0x4b   : > { %7884 = vsyncadd (%p52_p1), [#allocation12], 4294967248  ;;  %v5866_v0 = vld [vmem:[#allocation5 + $0x150] sm:$0xf]  ;;  %v6680_v1 = vld [vmem:[#allocation5 + $0x164] sm:$0xf0] }
  0x4c   : > { %v6058_v2 = vld [vmem:[#allocation5 + $0x2d0] sm:$0xf]  ;;  %v5867_v3 = vor.u32 %v6680_v1, %v5866_v0  ;;  %v6728_v4 = vld [vmem:[#allocation5 + $0x2e4] sm:$0xf0]  ;;  %v5842_v5 = vld [vmem:[#allocation5 + $0x120] sm:$0xf] }
  0x4d   : > { %v6674_v6 = vld [vmem:[#allocation5 + $0x134] sm:$0xf0]  ;;  %v6059_v7 = vor.u32 %v6728_v4, %v6058_v2  ;;  %v6034_v8 = vld [vmem:[#allocation5 + $0x2a0] sm:$0xf]  ;;  %v5818_v12 = vld [vmem:[#allocation5 + $0xf0] sm:$0xf] }
  0x4e   : > { %v6722_v9 = vld [vmem:[#allocation5 + $0x2b4] sm:$0xf0]  ;;  %1138 = vmatpush.bf16.msra.mxu0 %v5867_v3  ;;  %6846 = vmatpush.bf16.msra.mxu2 %v5867_v3  ;;  %v5843_v10 = vor.u32 %v6674_v6, %v5842_v5  ;;  %v6668_v13 = vld [vmem:[#allocation5 + $0x104] sm:$0xf0]  ;;  %v6010_v14 = vld [vmem:[#allocation5 + $0x270] sm:$0xf] }
  0x4f   : > { %6854 = vmatpush.bf16.msra.mxu3 %v6059_v7  ;;  %1187 = vmatpush.bf16.msra.mxu1 %v6059_v7  ;;  %v6035_v11 = vor.u32 %v6722_v9, %v6034_v8  ;;  %v6716_v15 = vld [vmem:[#allocation5 + $0x284] sm:$0xf0]  ;;  %v5819_v16 = vor.u32 %v6668_v13, %v5818_v12  ;;  %v5794_v18 = vld [vmem:[#allocation5 + $0xc0] sm:$0xf]  ;;  %v6662_v19 = vld [vmem:[#allocation5 + $0xd4] sm:$0xf0] }
  0x50   : > { %v6011_v17 = vor.u32 %v6716_v15, %v6010_v14  ;;  %v5986_v20 = vld [vmem:[#allocation5 + $0x240] sm:$0xf]  ;;  %v6710_v21 = vld [vmem:[#allocation5 + $0x254] sm:$0xf0]  ;;  %v5795_v22 = vor.u32 %v6662_v19, %v5794_v18  ;;  %v5770_v24 = vld [vmem:[#allocation5 + $0x90] sm:$0xf] }
  0x51   : > { %v5987_v23 = vor.u32 %v6710_v21, %v5986_v20  ;;  %v6656_v25 = vld [vmem:[#allocation5 + $0xa4] sm:$0xf0]  ;;  %v5962_v26 = vld [vmem:[#allocation5 + $0x210] sm:$0xf]  ;;  %v5746_v30 = vld [vmem:[#allocation5 + $0x60] sm:$0xf] }
  0x52   : > { %1139 = vmatpush.bf16.msra.mxu0 %v5843_v10  ;;  %6847 = vmatpush.bf16.msra.mxu2 %v5843_v10  ;;  %v6704_v27 = vld [vmem:[#allocation5 + $0x224] sm:$0xf0]  ;;  %v5771_v28 = vor.u32 %v6656_v25, %v5770_v24  ;;  %v6650_v31 = vld [vmem:[#allocation5 + $0x74] sm:$0xf0]  ;;  %v5938_v32 = vld [vmem:[#allocation5 + $0x1e0] sm:$0xf] }
  0x53   : > { %6855 = vmatpush.bf16.msra.mxu3 %v6035_v11  ;;  %1188 = vmatpush.bf16.msra.mxu1 %v6035_v11  ;;  %v5963_v29 = vor.u32 %v6704_v27, %v5962_v26  ;;  %v6698_v33 = vld [vmem:[#allocation5 + $0x1f4] sm:$0xf0]  ;;  %v420_v34 = vld [vmem:[%s8100_s23] sm:$0xff]  ;;  %v421_v35 = vld [vmem:[%s8100_s23 + $0x8] sm:$0xff]  ;;  %v5747_v39 = vor.u32 %v6650_v31, %v5746_v30  ;;  %s10609_s19 = scalar_lea.vmem [#allocation13], %s5688_s2  ;;  %s5695_s9 = sshll.u32 %s8094_s16, 7 }
  0x54   : > { %v422_v36 = vld [vmem:[%s8100_s23 + $0x10] sm:$0xff]  ;;  %v423_v37 = vld [vmem:[%s8100_s23 + $0x18] sm:$0xff]  ;;  %v436_v38 = vld [vmem:[%s8100_s23 + $0x80] sm:$0xff]  ;;  %v5939_v43 = vor.u32 %v6698_v33, %v5938_v32  ;;  %v452_v50 = vpack.c.bf16 %v421_v35, %v420_v34  ;;  %s6844_s17 = sshll.u32 %s7995_s12, 8  ;;  %s5501_s25 = sshll.u32 %s10609_s19, 4  ;;  %s5502_s25 = int_to_ptr.vmem [resolvable:$true] %s5501_s25 }
  0x55   : > { %v437_v40 = vld [vmem:[%s8100_s23 + $0x88] sm:$0xff]  ;;  %v438_v41 = vld [vmem:[%s8100_s23 + $0x90] sm:$0xff]  ;;  %v439_v42 = vld [vmem:[%s8100_s23 + $0x98] sm:$0xff]  ;;  %v453_v51 = vpack.c.bf16 %v423_v37, %v422_v36  ;;  %s5500_s24 = scalar_lea.hbm %s12028_s7, %s6844_s17  ;;  %s5483_s18 = scalar_lea.sflag [#allocation4], %s8094_s16 }
  0x56   : > { %1140 = vmatpush.bf16.msra.mxu0 %v5819_v16  ;;  %6848 = vmatpush.bf16.msra.mxu2 %v5819_v16  ;;  %v5722_v44 = vld [vmem:[#allocation5 + $0x30] sm:$0xf]  ;;  %v6644_v45 = vld [vmem:[#allocation5 + $0x44] sm:$0xf0]  ;;  %v5698_v48 = vld [vmem:[#allocation5] sm:$0xf]  ;;  %v460_v52 = vpack.c.bf16 %v437_v40, %v436_v38  ;;  %v461_v53 = vpack.c.bf16 %v439_v42, %v438_v41  ;;  %v594_v60 = vunpack.c.l.b16 %v452_v50  ;;  %v595_v5 = vunpack.c.h.b16 %v452_v50 }
  0x57   : > { %6856 = vmatpush.bf16.msra.mxu3 %v6011_v17  ;;  %1189 = vmatpush.bf16.msra.mxu1 %v6011_v17  ;;  %v5914_v46 = vld [vmem:[#allocation5 + $0x1b0] sm:$0xf]  ;;  %v6692_v47 = vld [vmem:[#allocation5 + $0x1c4] sm:$0xf0]  ;;  %v6638_v49 = vld [vmem:[#allocation5 + $0x14] sm:$0xf0]  ;;  %v5723_v54 = vor.u32 %v6644_v45, %v5722_v44  ;;  %v596_v61 = vunpack.c.l.b16 %v453_v51  ;;  %v597_v6 = vunpack.c.h.b16 %v453_v51 }
  0x58   : > { %v5915_v55 = vor.u32 %v6692_v47, %v5914_v46  ;;  %v5699_v56 = vor.u32 %v6638_v49, %v5698_v48  ;;  %v5890_v57 = vld [vmem:[#allocation5 + $0x180] sm:$0xf]  ;;  %v6686_v58 = vld [vmem:[#allocation5 + $0x194] sm:$0xf0]  ;;  %v6677_v59 = vld [vmem:[#allocation5 + $0x154] sm:$0xf]  ;;  %v610_v62 = vunpack.c.l.b16 %v460_v52  ;;  %v612_v63 = vunpack.c.l.b16 %v461_v53 }
  0x59   : > { %v5868_v0 = vld [vmem:[#allocation5 + $0x168] sm:$0xf0]  ;;  %v6725_v1 = vld [vmem:[#allocation5 + $0x2d4] sm:$0xf]  ;;  %v611_v3 = vunpack.c.h.b16 %v460_v52  ;;  %v613_v4 = vunpack.c.h.b16 %v461_v53  ;;  %v5891_v7 = vor.u32 %v6686_v58, %v5890_v57  ;;  %v6671_v10 = vld [vmem:[#allocation5 + $0x124] sm:$0xf]  ;;  %v8126_v11 = vpack.c.b16 %v596_v61, %v594_v60 }
  0x5a   : > { %1141 = vmatpush.bf16.msra.mxu0 %v5795_v22  ;;  %6849 = vmatpush.bf16.msra.mxu2 %v5795_v22  ;;  %v6060_v2 = vld [vmem:[#allocation5 + $0x2e8] sm:$0xf0]  ;;  %v5871_v8 = vor.u32 %v6677_v59, %v5868_v0  ;;  %v8128_v12 = vpack.c.b16 %v612_v63, %v610_v62  ;;  %v5844_v13 = vld [vmem:[#allocation5 + $0x138] sm:$0xf0]  ;;  %v6719_v14 = vld [vmem:[#allocation5 + $0x2a4] sm:$0xf]  ;;  %v8132_v17 = vpack.c.b16 %v597_v6, %v595_v5 }
  0x5b   : > { %6857 = vmatpush.bf16.msra.mxu3 %v5987_v23  ;;  %1190 = vmatpush.bf16.msra.mxu1 %v5987_v23  ;;  %v6063_v9 = vor.u32 %v6725_v1, %v6060_v2  ;;  %12086 = vst [vmem:[#allocation22_spill] sm:$0xff] %v8126_v11  ;;  %v6036_v15 = vld [vmem:[#allocation5 + $0x2b8] sm:$0xf0]  ;;  %v8130_v16 = vpack.c.b16 %v613_v4, %v611_v3  ;;  %v424_v18 = vld [vmem:[%s8100_s23 + $0x20] sm:$0xff]  ;;  %v425_v19 = vld [vmem:[%s8100_s23 + $0x28] sm:$0xff]  ;;  %s5503_s11 = sshll.u32 %s5500_s24, 4  ;;  %s5504_s11 = int_to_ptr.hbm [resolvable:$true] %s5503_s11 }
  0x5c   : > { %12088 = vst [vmem:[#allocation24_spill] sm:$0xff] %v8132_v17  ;;  %v5847_v20 = vor.u32 %v6671_v10, %v5844_v13  ;;  %v6039_v21 = vor.u32 %v6719_v14, %v6036_v15  ;;  %v426_v22 = vld [vmem:[%s8100_s23 + $0x30] sm:$0xff]  ;;  %v427_v23 = vld [vmem:[%s8100_s23 + $0x38] sm:$0xff]  ;;  %v440_v24 = vld [vmem:[%s8100_s23 + $0xa0] sm:$0xff]  ;;  %v8146_v35 = vpack.c.bf16 %v425_v19, %v424_v18  ;;  %s7811_s26 = sshra.s32 %s5504_s11, 4  ;;  %s7817_s1 = scalar_lea.hbm %s12028_s7, 512  ;;  %s7812_s26 = int_to_ptr.hbm [resolvable:$true] %s7811_s26 }
  0x5d   : > { %12087 = vst [vmem:[#allocation23_spill] sm:$0xff] %v8130_v16  ;;  %v6665_v25 = vld [vmem:[#allocation5 + $0xf4] sm:$0xf]  ;;  %v5874_v26 = vld [vmem:[#allocation5 + $0x158] sm:$0xf]  ;;  %v441_v32 = vld [vmem:[%s8100_s23 + $0xa8] sm:$0xff]  ;;  %v455_v46 = vpack.c.bf16 %v427_v23, %v426_v22  ;;  %p7818_p13 = scmp.lt.s32.totalorder %s7812_s26, %s12028_s7 }
  0x5e   : > { %1142 = vmatpush.bf16.msra.mxu0 %v5771_v28  ;;  %6850 = vmatpush.bf16.msra.mxu2 %v5771_v28  ;;  %v6681_v27 = vld [vmem:[#allocation5 + $0x16c] sm:$0xf0]  ;;  %v5820_v28 = vld [vmem:[#allocation5 + $0x108] sm:$0xf0]  ;;  %v443_v34 = vld [vmem:[%s8100_s23 + $0xb8] sm:$0xff]  ;;  %v462_v47 = vpack.c.bf16 %v441_v32, %v440_v24  ;;  %v598_v59 = vunpack.c.l.b16 %v8146_v35  ;;  %v599_v4 = vunpack.c.h.b16 %v8146_v35  ;;  %s7813_s2 = scalar_lea.hbm %s7812_s26, 256 }
  0x5f   : > { %6858 = vmatpush.bf16.msra.mxu3 %v5963_v29  ;;  %1191 = vmatpush.bf16.msra.mxu1 %v5963_v29  ;;  %v6713_v29 = vld [vmem:[#allocation5 + $0x274] sm:$0xf]  ;;  %v6012_v30 = vld [vmem:[#allocation5 + $0x288] sm:$0xf0]  ;;  %v5875_v31 = vor.u32 %v6681_v27, %v5874_v26  ;;  %v6659_v36 = vld [vmem:[#allocation5 + $0xc4] sm:$0xf]  ;;  %v5823_v40 = vor.u32 %v6665_v25, %v5820_v28  ;;  %v600_v1 = vunpack.c.l.b16 %v455_v46  ;;  %v601_v10 = vunpack.c.h.b16 %v455_v46  ;;  %p7814_p1 = scmp.ne.s32.totalorder %s7812_s26, %s7813_s2  ;;  %p7819_p7 = scmp.lt.s32.totalorder %s7817_s1, %s7813_s2 }
  0x60   : > { %v442_v33 = vld [vmem:[%s8100_s23 + $0xb0] sm:$0xff]  ;;  %v5796_v37 = vld [vmem:[#allocation5 + $0xd8] sm:$0xf0]  ;;  %v6066_v38 = vld [vmem:[#allocation5 + $0x2d8] sm:$0xf]  ;;  %v6015_v41 = vor.u32 %v6713_v29, %v6012_v30  ;;  %v614_v2 = vunpack.c.l.b16 %v462_v47 }
  0x61   : > { %v6675_v44 = vld [vmem:[#allocation5 + $0x13c] sm:$0xf0]  ;;  %v6042_v45 = vld [vmem:[#allocation5 + $0x2a8] sm:$0xf]  ;;  %v463_v48 = vpack.c.bf16 %v443_v34, %v442_v33  ;;  %v6707_v49 = vld [vmem:[#allocation5 + $0x244] sm:$0xf]  ;;  %v5799_v60 = vor.u32 %v6659_v36, %v5796_v37  ;;  %v8150_v22 = vpack.c.b16 %v600_v1, %v598_v59  ;;  %v8156_v28 = vpack.c.b16 %v601_v10, %v599_v4  ;;  %p7815_p3 = pnand %p7814_p1, %p8061_p0  ;;  %p7820_p8 = por %p7819_p7, %p7818_p13 }
  0x62   : > { %1143 = vmatpush.bf16.msra.mxu0 %v5747_v39  ;;  %6851 = vmatpush.bf16.msra.mxu2 %v5747_v39  ;;  %v6729_v39 = vld [vmem:[#allocation5 + $0x2ec] sm:$0xf0]  ;;  %v5988_v50 = vld [vmem:[#allocation5 + $0x258] sm:$0xf0]  ;;  %v6723_v52 = vld [vmem:[#allocation5 + $0x2bc] sm:$0xf0] }
  0x63   : > { %6859 = vmatpush.bf16.msra.mxu3 %v5939_v43  ;;  %1192 = vmatpush.bf16.msra.mxu1 %v5939_v43  ;;  %v6067_v42 = vor.u32 %v6729_v39, %v6066_v38  ;;  %v5850_v43 = vld [vmem:[#allocation5 + $0x128] sm:$0xf]  ;;  %v6043_v53 = vor.u32 %v6723_v52, %v6042_v45  ;;  %v6018_v57 = vld [vmem:[#allocation5 + $0x278] sm:$0xf]  ;;  %v6717_v58 = vld [vmem:[#allocation5 + $0x28c] sm:$0xf0]  ;;  %v5991_v61 = vor.u32 %v6707_v49, %v5988_v50  ;;  %v616_v3 = vunpack.c.l.b16 %v463_v48  ;;  %p7816_p5 = pneg %p7815_p3 }
  0x64   : > { %v5851_v51 = vor.u32 %v6675_v44, %v5850_v43  ;;  %v6653_v62 = vld [vmem:[#allocation5 + $0x94] sm:$0xf]  ;;  %v5802_v63 = vld [vmem:[#allocation5 + $0xc8] sm:$0xf]  ;;  %v6663_v0 = vld [vmem:[#allocation5 + $0xdc] sm:$0xf0]  ;;  %v6019_v13 = vor.u32 %v6717_v58, %v6018_v57 }
  0x65   : > { %v5772_v5 = vld [vmem:[#allocation5 + $0xa8] sm:$0xf0]  ;;  %v6701_v6 = vld [vmem:[#allocation5 + $0x214] sm:$0xf]  ;;  %v5803_v14 = vor.u32 %v6663_v0, %v5802_v63  ;;  %v6647_v19 = vld [vmem:[#allocation5 + $0x64] sm:$0xf]  ;;  %v8152_v23 = vpack.c.b16 %v616_v3, %v614_v2  ;;  %p7821_p9 = pnand %p7820_p8, %p7816_p5 }
  0x66   : > { %1144 = vmatpush.bf16.msra.mxu0 %v5723_v54  ;;  %6852 = vmatpush.bf16.msra.mxu2 %v5723_v54  ;;  %v5826_v54 = vld [vmem:[#allocation5 + $0xf8] sm:$0xf]  ;;  %v5775_v15 = vor.u32 %v6653_v62, %v5772_v5  ;;  %12089 = vst [vmem:[#allocation25_spill] sm:$0xff] %v8150_v22  ;;  %v5748_v24 = vld [vmem:[#allocation5 + $0x78] sm:$0xf0]  ;;  %v428_v29 = vld [vmem:[%s8100_s23 + $0x40] sm:$0xff] }
  0x67   : > { %6860 = vmatpush.bf16.msra.mxu3 %v5915_v55  ;;  %1193 = vmatpush.bf16.msra.mxu1 %v5915_v55  ;;  %v6669_v55 = vld [vmem:[#allocation5 + $0x10c] sm:$0xf0]  ;;  %12090 = vst [vmem:[#allocation26_spill] sm:$0xff] %v8152_v23  ;;  %v6695_v25 = vld [vmem:[#allocation5 + $0x1e4] sm:$0xf]  ;;  %v429_v30 = vld [vmem:[%s8100_s23 + $0x48] sm:$0xff]  ;;  %v5751_v35 = vor.u32 %v6647_v19, %v5748_v24 }
  0x68   : > { %v5940_v26 = vld [vmem:[#allocation5 + $0x1f8] sm:$0xf0]  ;;  %12092 = vst [vmem:[#allocation28_spill] sm:$0xff] %v8156_v28  ;;  %v430_v32 = vld [vmem:[%s8100_s23 + $0x50] sm:$0xff]  ;;  %v444_v34 = vld [vmem:[%s8100_s23 + $0xc0] sm:$0xff]  ;;  %v456_v46 = vpack.c.bf16 %v429_v30, %v428_v29 }
  0x69   : > { %v431_v33 = vld [vmem:[%s8100_s23 + $0x58] sm:$0xff]  ;;  %v5943_v36 = vor.u32 %v6695_v25, %v5940_v26  ;;  %v6657_v38 = vld [vmem:[#allocation5 + $0xac] sm:$0xf0]  ;;  %v445_v39 = vld [vmem:[%s8100_s23 + $0xc8] sm:$0xff] }
  0x6a   : > { %1145 = vmatpush.bf16.msra.mxu0 %v5699_v56  ;;  %6853 = vmatpush.bf16.msra.mxu2 %v5699_v56  ;;  %v5827_v56 = vor.u32 %v6669_v55, %v5826_v54  ;;  %v5778_v37 = vld [vmem:[#allocation5 + $0x98] sm:$0xf]  ;;  %v6641_v43 = vld [vmem:[#allocation5 + $0x34] sm:$0xf]  ;;  %v5724_v44 = vld [vmem:[#allocation5 + $0x48] sm:$0xf0]  ;;  %v464_v57 = vpack.c.bf16 %v445_v39, %v444_v34 }
  0x6b   : > { %6861 = vmatpush.bf16.msra.mxu3 %v5891_v7  ;;  %1194 = vmatpush.bf16.msra.mxu1 %v5891_v7  ;;  %v5964_v7 = vld [vmem:[#allocation5 + $0x228] sm:$0xf0]  ;;  %v6689_v45 = vld [vmem:[#allocation5 + $0x1b4] sm:$0xf]  ;;  %v6705_v49 = vld [vmem:[#allocation5 + $0x22c] sm:$0xf0]  ;;  %v5727_v50 = vor.u32 %v6641_v43, %v5724_v44 }
  0x6c   : > { %v5967_v18 = vor.u32 %v6701_v6, %v5964_v7  ;;  %v6651_v54 = vld [vmem:[#allocation5 + $0x7c] sm:$0xf0]  ;;  %v5946_v55 = vld [vmem:[#allocation5 + $0x1e8] sm:$0xf]  ;;  %v5700_v62 = vld [vmem:[#allocation5 + $0x18] sm:$0xf0]  ;;  %v619_v19 = vunpack.c.h.b16 %v464_v57 }
  0x6d   : > { %1146 = vmatmul.bf16.vlgmr.msra.gmra.mxu0 %v8126_v11  ;;  %1166 = vmatmul.bf16.vlgmr.msra.gmra.mxu2 %v8128_v12  ;;  %v5730_v63 = vld [vmem:[#allocation5 + $0x38] sm:$0xf]  ;;  %v6645_v0 = vld [vmem:[#allocation5 + $0x4c] sm:$0xf0]  ;;  %v6683_v1 = vld [vmem:[#allocation5 + $0x184] sm:$0xf] }
  0x6e   : > { %1236 = vmatpush.bf16.msrb.mxu2 %v5871_v8  ;;  %1215 = vmatmul.bf16.vlgmr.msra.gmra.mxu3 %v8130_v16  ;;  %v615_v8 = vunpack.c.h.b16 %v462_v47  ;;  %v5916_v47 = vld [vmem:[#allocation5 + $0x1c8] sm:$0xf0]  ;;  %v5731_v3 = vor.u32 %v6645_v0, %v5730_v63  ;;  %v5892_v4 = vld [vmem:[#allocation5 + $0x198] sm:$0xf0]  ;;  %v5922_v5 = vld [vmem:[#allocation5 + $0x1b8] sm:$0xf] }
  0x6f   : > { %1285 = vmatpush.bf16.msrb.mxu3 %v6063_v9  ;;  %1195 = vmatmul.bf16.vlgmr.msra.gmra.mxu1 %v8132_v17  ;;  %v617_v9 = vunpack.c.h.b16 %v463_v48  ;;  %v5970_v48 = vld [vmem:[#allocation5 + $0x218] sm:$0xf]  ;;  %v5895_v7 = vor.u32 %v6683_v1, %v5892_v4  ;;  %v6639_v10 = vld [vmem:[#allocation5 + $0x1c] sm:$0xf0]  ;;  %v5898_v29 = vld [vmem:[#allocation5 + $0x188] sm:$0xf] }
  0x70   : > { %1334 = vmatpush.bf16.msrb.mxu0 %v5875_v31  ;;  %1383 = vmatpush.bf16.msrb.mxu1 %v6067_v42  ;;  %v5779_v42 = vor.u32 %v6657_v38, %v5778_v37  ;;  %v5971_v52 = vor.u32 %v6705_v49, %v5970_v48  ;;  %v6687_v30 = vld [vmem:[#allocation5 + $0x19c] sm:$0xf0]  ;;  %v433_v37 = vld [vmem:[%s8100_s23 + $0x68] sm:$0xff]  ;;  %v434_v38 = vld [vmem:[%s8100_s23 + $0x70] sm:$0xff] }
  0x71   : > { %v8154_v27 = vpack.c.b16 %v617_v9, %v615_v8  ;;  %v6693_v8 = vld [vmem:[#allocation5 + $0x1cc] sm:$0xf0]  ;;  %v5706_v9 = vld [vmem:[#allocation5 + $0x8] sm:$0xf]  ;;  %v435_v39 = vld [vmem:[%s8100_s23 + $0x78] sm:$0xff] }
  0x72   : > { %1237 = vmatpush.bf16.msrb.mxu2 %v5847_v20  ;;  %v5994_v20 = vld [vmem:[#allocation5 + $0x248] sm:$0xf]  ;;  %v5923_v25 = vor.u32 %v6693_v8, %v5922_v5  ;;  %v5707_v26 = vor.u32 %v6639_v10, %v5706_v9  ;;  %v451_v43 = vld [vmem:[%s8100_s23 + $0xf8] sm:$0xff]  ;;  %v6068_v48 = vld [vmem:[#allocation5 + $0x2f0] sm:$0xf0] }
  0x73   : > { %1286 = vmatpush.bf16.msrb.mxu3 %v6039_v21  ;;  %v6711_v21 = vld [vmem:[#allocation5 + $0x25c] sm:$0xf0]  ;;  %12091 = vst [vmem:[#allocation27_spill] sm:$0xff] %v8154_v27  ;;  %v6678_v44 = vld [vmem:[#allocation5 + $0x15c] sm:$0xf] }
  0x74   : > { %1335 = vmatpush.bf16.msrb.mxu0 %v5851_v51  ;;  %1384 = vmatpush.bf16.msrb.mxu1 %v6043_v53  ;;  %v5995_v31 = vor.u32 %v6711_v21, %v5994_v20  ;;  %v5919_v51 = vor.u32 %v6689_v45, %v5916_v47  ;;  %v5754_v53 = vld [vmem:[#allocation5 + $0x68] sm:$0xf]  ;;  %v603_v21 = vunpack.c.h.b16 %v456_v46  ;;  %v5876_v45 = vld [vmem:[#allocation5 + $0x170] sm:$0xf0]  ;;  %v6720_v4 = vld [vmem:[#allocation5 + $0x2ac] sm:$0xf] }
  0x75   : > { %v5755_v59 = vor.u32 %v6651_v54, %v5754_v53  ;;  %v5879_v47 = vor.u32 %v6678_v44, %v5876_v45  ;;  %v6666_v8 = vld [vmem:[#allocation5 + $0xfc] sm:$0xf]  ;;  %v5828_v9 = vld [vmem:[#allocation5 + $0x110] sm:$0xf0] }
  0x76   : > { %1238 = vmatpush.bf16.msrb.mxu2 %v5823_v40  ;;  %v446_v40 = vld [vmem:[%s8100_s23 + $0xd0] sm:$0xff]  ;;  %v6714_v10 = vld [vmem:[#allocation5 + $0x27c] sm:$0xf] }
  0x77   : > { %1287 = vmatpush.bf16.msrb.mxu3 %v6015_v41  ;;  %v447_v41 = vld [vmem:[%s8100_s23 + $0xd8] sm:$0xff] }
  0x78   : > { %1336 = vmatpush.bf16.msrb.mxu0 %v5827_v56  ;;  %1385 = vmatpush.bf16.msrb.mxu1 %v6019_v13  ;;  %v457_v56 = vpack.c.bf16 %v431_v33, %v430_v32  ;;  %v465_v58 = vpack.c.bf16 %v447_v41, %v446_v40  ;;  %v602_v13 = vunpack.c.l.b16 %v456_v46  ;;  %v448_v40 = vld [vmem:[%s8100_s23 + $0xe0] sm:$0xff]  ;;  %v449_v41 = vld [vmem:[%s8100_s23 + $0xe8] sm:$0xff]  ;;  %v6726_v46 = vld [vmem:[#allocation5 + $0x2dc] sm:$0xf] }
  0x79   : > { %v6071_v49 = vor.u32 %v6726_v46, %v6068_v48 }
  0x7a   : > { %1239 = vmatpush.bf16.msrb.mxu2 %v5799_v60  ;;  %v6699_v60 = vld [vmem:[#allocation5 + $0x1fc] sm:$0xf0]  ;;  %v621_v20 = vunpack.c.h.b16 %v465_v58  ;;  %v605_v24 = vunpack.c.h.b16 %v457_v56 }
  0x7b   : > { %1288 = vmatpush.bf16.msrb.mxu3 %v5991_v61  ;;  %v6635_v61 = vld [vmem:[#allocation5 + $0x4] sm:$0xf]  ;;  %v5947_v2 = vor.u32 %v6699_v60, %v5946_v55 }
  0x7c   : > { %1337 = vmatpush.bf16.msrb.mxu0 %v5803_v14  ;;  %1386 = vmatpush.bf16.msrb.mxu1 %v5995_v31  ;;  %v5703_v6 = vor.u32 %v6635_v61, %v5700_v62  ;;  %v604_v14 = vunpack.c.l.b16 %v457_v56  ;;  %v8174_v33 = vpack.c.b16 %v621_v20, %v619_v19  ;;  %v8176_v34 = vpack.c.b16 %v605_v24, %v603_v21  ;;  %v5804_v19 = vld [vmem:[#allocation5 + $0xe0] sm:$0xf0]  ;;  %v6708_v20 = vld [vmem:[#allocation5 + $0x24c] sm:$0xf] }
  0x7d   : > { %1151 = vmatmul.bf16.gmra.mxu0 %v8150_v22  ;;  %1171 = vmatmul.bf16.gmra.mxu2 %v8152_v23  ;;  %v5996_v24 = vld [vmem:[#allocation5 + $0x260] sm:$0xf0] }
  0x7e   : > { %1240 = vmatpush.bf16.msrb.mxu2 %v5775_v15  ;;  %1220 = vmatmul.bf16.gmra.mxu3 %v8154_v27  ;;  %v618_v15 = vunpack.c.l.b16 %v464_v57  ;;  %v8170_v31 = vpack.c.b16 %v604_v14, %v602_v13  ;;  %12095 = vst [vmem:[#allocation31_spill] sm:$0xff] %v8174_v33  ;;  %v5831_v13 = vor.u32 %v6666_v8, %v5828_v9  ;;  %v6020_v14 = vld [vmem:[#allocation5 + $0x290] sm:$0xf0] }
  0x7f   : > { %1289 = vmatpush.bf16.msrb.mxu3 %v5967_v18  ;;  %1200 = vmatmul.bf16.gmra.mxu1 %v8156_v28  ;;  %v620_v18 = vunpack.c.l.b16 %v465_v58  ;;  %12096 = vst [vmem:[#allocation32_spill] sm:$0xff] %v8176_v34 }
  0x80   : > { %1338 = vmatpush.bf16.msrb.mxu0 %v5779_v42  ;;  %1387 = vmatpush.bf16.msrb.mxu1 %v5971_v52  ;;  %12093 = vst [vmem:[#allocation29_spill] sm:$0xff] %v8170_v31  ;;  %v450_v42 = vld [vmem:[%s8100_s23 + $0xf0] sm:$0xff]  ;;  %v466_v52 = vpack.c.bf16 %v449_v41, %v448_v40 }
  0x81   : > { %v8172_v32 = vpack.c.b16 %v620_v18, %v618_v15  ;;  %v467_v53 = vpack.c.bf16 %v451_v43, %v450_v42  ;;  %v6023_v15 = vor.u32 %v6714_v10, %v6020_v14  ;;  %v6660_v18 = vld [vmem:[#allocation5 + $0xcc] sm:$0xf] }
  0x82   : > { %1241 = vmatpush.bf16.msrb.mxu2 %v5751_v35  ;;  %v5899_v35 = vor.u32 %v6687_v30, %v5898_v29  ;;  %v622_v56 = vunpack.c.l.b16 %v466_v52  ;;  %v623_v58 = vunpack.c.h.b16 %v466_v52  ;;  %v5807_v21 = vor.u32 %v6660_v18, %v5804_v19  ;;  %v5780_v29 = vld [vmem:[#allocation5 + $0xb0] sm:$0xf0]  ;;  %v6702_v30 = vld [vmem:[#allocation5 + $0x21c] sm:$0xf]  ;;  %v5756_v52 = vld [vmem:[#allocation5 + $0x80] sm:$0xf0] }
  0x83   : > { %1290 = vmatpush.bf16.msrb.mxu3 %v5943_v36  ;;  %12094 = vst [vmem:[#allocation30_spill] sm:$0xff] %v8172_v32  ;;  %v432_v36 = vld [vmem:[%s8100_s23 + $0x60] sm:$0xff]  ;;  %v624_v57 = vunpack.c.l.b16 %v467_v53  ;;  %v5732_v18 = vld [vmem:[#allocation5 + $0x50] sm:$0xf0] }
  0x84   : > { %1339 = vmatpush.bf16.msrb.mxu0 %v5755_v59  ;;  %1388 = vmatpush.bf16.msrb.mxu1 %v5947_v2  ;;  %v625_v59 = vunpack.c.h.b16 %v467_v53  ;;  %v6672_v2 = vld [vmem:[#allocation5 + $0x12c] sm:$0xf] }
  0x85   : > { %v8192_v63 = vpack.c.b16 %v624_v57, %v622_v56  ;;  %v6696_v53 = vld [vmem:[#allocation5 + $0x1ec] sm:$0xf] }
  0x86   : > { %1242 = vmatpush.bf16.msrb.mxu2 %v5727_v50  ;;  %v458_v50 = vpack.c.bf16 %v433_v37, %v432_v36  ;;  %v8194_v0 = vpack.c.b16 %v625_v59, %v623_v58  ;;  %v5972_v36 = vld [vmem:[#allocation5 + $0x230] sm:$0xf0] }
  0x87   : > { %1291 = vmatpush.bf16.msrb.mxu3 %v5919_v51  ;;  %v459_v51 = vpack.c.bf16 %v435_v39, %v434_v38  ;;  %12098 = vst [vmem:[#allocation34_spill] sm:$0xff] %v8192_v63  ;;  %v5975_v37 = vor.u32 %v6702_v30, %v5972_v36  ;;  %v8218_v38 = vld [vmem:[#allocation7] sm:$0x3f]  ;;  %v6682_v30 = vld [vmem:[#allocation5 + $0x174] sm:$0xf0] }
  0x88   : > { %1340 = vmatpush.bf16.msrb.mxu0 %v5731_v3  ;;  %1389 = vmatpush.bf16.msrb.mxu1 %v5923_v25  ;;  %v606_v54 = vunpack.c.l.b16 %v458_v50  ;;  %v607_v60 = vunpack.c.h.b16 %v458_v50  ;;  %12099 = vst [vmem:[#allocation35_spill] sm:$0xff] %v8194_v0  ;;  %v5852_v3 = vld [vmem:[#allocation5 + $0x140] sm:$0xf0]  ;;  %v5999_v25 = vor.u32 %v6708_v20, %v5996_v24  ;;  %v8221_v39 = vperm.slane %v8218_v38, 0  ;;  %v5924_v24 = vld [vmem:[#allocation5 + $0x1d0] sm:$0xf0] }
  0x89   : > { %v608_v55 = vunpack.c.l.b16 %v459_v51  ;;  %v609_v61 = vunpack.c.h.b16 %v459_v51  ;;  %v5855_v5 = vor.u32 %v6672_v2, %v5852_v3  ;;  %v6648_v51 = vld [vmem:[#allocation5 + $0x6c] sm:$0xf] }
  0x8a   : > { %1243 = vmatpush.bf16.msrb.mxu2 %v5703_v6  ;;  %v6044_v6 = vld [vmem:[#allocation5 + $0x2c0] sm:$0xf0]  ;;  %v6636_v36 = vld [vmem:[#allocation5 + $0xc] sm:$0xf] }
  0x8b   : > { %1292 = vmatpush.bf16.msrb.mxu3 %v5895_v7  ;;  %v8190_v62 = vpack.c.b16 %v608_v55, %v606_v54  ;;  %v8196_v1 = vpack.c.b16 %v609_v61, %v607_v60  ;;  %v6047_v7 = vor.u32 %v6720_v4, %v6044_v6  ;;  %v5759_v54 = vor.u32 %v6648_v51, %v5756_v52  ;;  %v5948_v55 = vld [vmem:[#allocation5 + $0x200] sm:$0xf0] }
  0x8c   : > { %1341 = vmatpush.bf16.msrb.mxu0 %v5707_v26  ;;  %1390 = vmatpush.bf16.msrb.mxu1 %v5899_v35  ;;  %v6654_v26 = vld [vmem:[#allocation5 + $0x9c] sm:$0xf]  ;;  %v5951_v57 = vor.u32 %v6696_v53, %v5948_v55 }
  0x8d   : > { %1156 = vmatmul.bf16.gmra.mxu0 %v8170_v31  ;;  %1176 = vmatmul.bf16.gmra.mxu2 %v8172_v32  ;;  %12097 = vst [vmem:[#allocation33_spill] sm:$0xff] %v8190_v62  ;;  %v5783_v35 = vor.u32 %v6654_v26, %v5780_v29  ;;  %v5882_v29 = vld [vmem:[#allocation5 + $0x160] sm:$0xf] }
  0x8e   : > { %1225 = vmatmul.bf16.gmra.mxu3 %v8174_v33  ;;  %1432 = vmatpush.bf16.msra.mxu2 %v5879_v47  ;;  %12100 = vst [vmem:[#allocation36_spill] sm:$0xff] %v8196_v1 }
  0x8f   : > { %1205 = vmatmul.bf16.gmra.mxu1 %v8176_v34  ;;  %1481 = vmatpush.bf16.msra.mxu3 %v6071_v49 }
  0x92   : > { %1433 = vmatpush.bf16.msra.mxu2 %v5855_v5 }
  0x93   : > { %1482 = vmatpush.bf16.msra.mxu3 %v6047_v7 }
  0x96   : > { %1434 = vmatpush.bf16.msra.mxu2 %v5831_v13 }
  0x97   : > { %1483 = vmatpush.bf16.msra.mxu3 %v6023_v15  ;;  %v6642_v15 = vld [vmem:[#allocation5 + $0x3c] sm:$0xf] }
  0x98   : > { %v5735_v20 = vor.u32 %v6642_v15, %v5732_v18 }
  0x9a   : > { %1435 = vmatpush.bf16.msra.mxu2 %v5807_v21  ;;  %v6690_v21 = vld [vmem:[#allocation5 + $0x1bc] sm:$0xf] }
  0x9b   : > { %1484 = vmatpush.bf16.msra.mxu3 %v5999_v25  ;;  %v5927_v26 = vor.u32 %v6690_v21, %v5924_v24 }
  0x9d   : > { %1161 = vmatmul.bf16.gmra.mxu0 %v8190_v62  ;;  %1181 = vmatmul.bf16.gmra.mxu2 %v8192_v63 }
  0x9e   : > { %1230 = vmatmul.bf16.gmra.mxu3 %v8194_v0  ;;  %1436 = vmatpush.bf16.msra.mxu2 %v5783_v35 }
  0x9f   : > { %1210 = vmatmul.bf16.gmra.mxu1 %v8196_v1  ;;  %1485 = vmatpush.bf16.msra.mxu3 %v5975_v37  ;;  %v5708_v37 = vld [vmem:[#allocation5 + $0x20] sm:$0xf0] }
  0xa2   : > { %1437 = vmatpush.bf16.msra.mxu2 %v5759_v54 }
  0xa3   : > { %1486 = vmatpush.bf16.msra.mxu3 %v5951_v57  ;;  %v5858_v57 = vld [vmem:[#allocation5 + $0x130] sm:$0xf] }
  0xa6   : > { %1438 = vmatpush.bf16.msra.mxu2 %v5735_v20 }
  0xa7   : > { %1487 = vmatpush.bf16.msra.mxu3 %v5927_v26 }
  0xad   : > { %1244 = vmatmul.bf16.vlgmr.msrb.gmra.mxu2 %v8126_v11  ;;  %1342 = vmatmul.bf16.vlgmr.msrb.gmra.mxu0 %v8126_v11 }
  0xae   : > { %1293 = vmatmul.bf16.vlgmr.msrb.gmra.mxu3 %v8132_v17 }
  0xaf   : > { %1391 = vmatmul.bf16.vlgmr.msrb.gmra.mxu1 %v8132_v17 }
  0xbd   : > { %1249 = vmatmul.bf16.gmra.mxu2 %v8150_v22  ;;  %1347 = vmatmul.bf16.gmra.mxu0 %v8150_v22 }
  0xbe   : > { %1298 = vmatmul.bf16.gmra.mxu3 %v8156_v28 }
  0xbf   : > { %1396 = vmatmul.bf16.gmra.mxu1 %v8156_v28 }
  0xcd   : > { %1254 = vmatmul.bf16.gmra.mxu2 %v8170_v31  ;;  %1352 = vmatmul.bf16.gmra.mxu0 %v8170_v31 }
  0xce   : > { %1303 = vmatmul.bf16.gmra.mxu3 %v8176_v34 }
  0xcf   : > { %1401 = vmatmul.bf16.gmra.mxu1 %v8176_v34 }
  0xdd   : > { %1259 = vmatmul.bf16.gmra.mxu2 %v8190_v62  ;;  %1357 = vmatmul.bf16.gmra.mxu0 %v8190_v62 }
  0xde   : > { %1308 = vmatmul.bf16.gmra.mxu3 %v8196_v1 }
  0xdf   : > { %1406 = vmatmul.bf16.gmra.mxu1 %v8196_v1 }
  0xea   : > { %v1147_v40 = vpop.f32.mrf.mxu0 }
  0xeb   : > { %v1148_v41 = vadd.f32 %v1147_v40, %v8221_v39  ;;  %v5883_v40 = vor.u32 %v6682_v30, %v5882_v29 }
  0xec   : > { %v1196_v42 = vpop.f32.mrf.mxu1 }
  0xed   : > { %v8224_v43 = vadd.f32 %v1196_v42, %v1148_v41  ;;  %1264 = vmatmul.bf16.gmra.mxu2 %v8128_v12  ;;  %1362 = vmatmul.bf16.gmra.mxu0 %v8128_v12 }
  0xee   : > { %1313 = vmatmul.bf16.gmra.mxu3 %v8130_v16  ;;  %1530 = vmatpush.bf16.msra.mxu0 %v5883_v40 }
  0xef   : > { %1411 = vmatmul.bf16.gmra.mxu1 %v8130_v16  ;;  %v6080_v51 = vmul.f32 -1.442695, %v8224_v43  ;;  %v6724_v43 = vld [vmem:[#allocation5 + $0x2c4] sm:$0xf0] }
  0xf0   : > { %v1167_v44 = vpop.f32.mrf.mxu2 }
  0xf1   : > { %v1168_v45 = vadd.f32 %v1167_v44, %v8221_v39  ;;  %v1216_v46 = vpop.f32.mrf.mxu3  ;;  %v6684_v44 = vld [vmem:[#allocation5 + $0x18c] sm:$0xf] }
  0xf2   : > { %v1149_v47 = vpop.f32.mrf.mxu0 }
  0xf3   : > { %v1217_v48 = vadd.f32 %v1216_v46, %v1168_v45  ;;  %v1150_v49 = vadd.f32 %v1149_v47, %v8221_v39  ;;  %v5900_v45 = vld [vmem:[#allocation5 + $0x1a0] sm:$0xf0]  ;;  %v5711_v47 = vor.u32 %v6636_v36, %v5708_v37  ;;  %v6664_v36 = vld [vmem:[#allocation5 + $0xe4] sm:$0xf0] }
  0xf4   : > { %v1198_v50 = vpop.f32.mrf.mxu1 }
  0xf5   : > { %v8232_v56 = vadd.f32 %v1198_v50, %v1150_v49  ;;  %v6088_v19 = vmul.f32 -1.442695, %v1217_v48  ;;  %v5903_v48 = vor.u32 %v6684_v44, %v5900_v45  ;;  %v6074_v49 = vld [vmem:[#allocation5 + $0x2e0] sm:$0xf]  ;;  %v6730_v50 = vld [vmem:[#allocation5 + $0x2f4] sm:$0xf0]  ;;  %1439 = vmatpush.bf16.msra.mxu2 %v5711_v47 }
  0xf6   : > { %v6075_v55 = vor.u32 %v6730_v50, %v6074_v49  ;;  %v6712_v44 = vld [vmem:[#allocation5 + $0x264] sm:$0xf0]  ;;  %v5786_v47 = vld [vmem:[#allocation5 + $0xa0] sm:$0xf] }
  0xf7   : > { %6976 = vpow2.f32 %v6088_v19  ;;  %1488 = vmatpush.bf16.msra.mxu3 %v5903_v48  ;;  %v6026_v19 = vld [vmem:[#allocation5 + $0x280] sm:$0xf]  ;;  %v6658_v48 = vld [vmem:[#allocation5 + $0xb4] sm:$0xf0] }
  0xf8   : > { %v1169_v58 = vpop.f32.mrf.mxu2  ;;  %6978 = vpow2.f32 %v6080_v51  ;;  %1579 = vmatpush.bf16.msra.mxu1 %v6075_v55 }
  0xf9   : > { %v1170_v59 = vadd.f32 %v1169_v58, %v8221_v39  ;;  %v1218_v60 = vpop.f32.mrf.mxu3  ;;  %v6676_v58 = vld [vmem:[#allocation5 + $0x144] sm:$0xf0] }
  0xfa   : > { %v1152_v61 = vpop.f32.mrf.mxu0 }
  0xfb   : > { %v1219_v2 = vadd.f32 %v1218_v60, %v1170_v59  ;;  %v1153_v3 = vadd.f32 %v1152_v61, %v8221_v39  ;;  %v5859_v59 = vor.u32 %v6676_v58, %v5858_v57  ;;  %v5978_v57 = vld [vmem:[#allocation5 + $0x220] sm:$0xf]  ;;  %v6706_v58 = vld [vmem:[#allocation5 + $0x234] sm:$0xf0] }
  0xfc   : > { %v1201_v4 = vpop.f32.mrf.mxu1 }
  0xfd   : > { %v8236_v5 = vadd.f32 %v1201_v4, %v1153_v3  ;;  %1269 = vmatmul.bf16.gmra.mxu2 %v8152_v23  ;;  %1367 = vmatmul.bf16.gmra.mxu0 %v8152_v23  ;;  %v6089_v60 = vmul.f32 -1.442695, %v1219_v2  ;;  %v6050_v3 = vld [vmem:[#allocation5 + $0x2b0] sm:$0xf]  ;;  %v6977_v4 = vpop.eup %6976  ;;  %v5834_v2 = vld [vmem:[#allocation5 + $0x100] sm:$0xf] }
  0xfe   : > { %1318 = vmatmul.bf16.gmra.mxu3 %v8154_v27  ;;  %1531 = vmatpush.bf16.msra.mxu0 %v5859_v59  ;;  %v6979_v40 = vpop.eup %6978 }
  0xff   : > { %1416 = vmatmul.bf16.gmra.mxu1 %v8154_v27  ;;  %6980 = vpow2.f32 %v6089_v60  ;;  %v6082_v20 = vmul.f32 -1.442695, %v8236_v5  ;;  %v8271_v50 = vadd.f32 1.0, %v6979_v40  ;;  %v5738_v40 = vld [vmem:[#allocation5 + $0x40] sm:$0xf] }
 0x100   : > { %v1172_v6 = vpop.f32.mrf.mxu2 }
 0x101   : > { %v1173_v7 = vadd.f32 %v1172_v6, %v8221_v39  ;;  %v1221_v8 = vpop.f32.mrf.mxu3  ;;  %v6081_v6 = vmul.f32 -1.442695, %v8232_v56  ;;  %v6718_v56 = vld [vmem:[#allocation5 + $0x294] sm:$0xf0]  ;;  %vm1795_vm5 = vweird.f32 %v8271_v50 }
 0x102   : > { %v1154_v9 = vpop.f32.mrf.mxu0  ;;  %v6027_v30 = vor.u32 %v6718_v56, %v6026_v19  ;;  %v5954_v19 = vld [vmem:[#allocation5 + $0x1f0] sm:$0xf] }
 0x103   : > { %v8243_v10 = vadd.f32 %v1221_v8, %v1173_v7  ;;  %v1155_v13 = vadd.f32 %v1154_v9, %v8221_v39  ;;  %v6051_v7 = vor.u32 %v6724_v43, %v6050_v3  ;;  %v6670_v8 = vld [vmem:[#allocation5 + $0x114] sm:$0xf0]  ;;  %6982 = vpow2.f32 %v6081_v6 }
 0x104   : > { %v1203_v14 = vpop.f32.mrf.mxu1 }
 0x105   : > { %v8246_v25 = vadd.f32 %v1203_v14, %v1155_v13  ;;  %v5835_v13 = vor.u32 %v6670_v8, %v5834_v2  ;;  %v8260_v14 = vadd.f32 1.0, %v6977_v4  ;;  %1580 = vmatpush.bf16.msra.mxu1 %v6051_v7  ;;  %v6981_v5 = vpop.eup %6980  ;;  %v6090_v45 = vmul.f32 -1.442695, %v8243_v10  ;;  %v5762_v7 = vld [vmem:[#allocation5 + $0x70] sm:$0xf] }
 0x106   : > { %v8274_v59 = vadd.f32 1.0, %v6981_v5  ;;  %v5979_v8 = vor.u32 %v6706_v58, %v5978_v57  ;;  %v5714_v57 = vld [vmem:[#allocation5 + $0x10] sm:$0xf]  ;;  %v6640_v58 = vld [vmem:[#allocation5 + $0x24] sm:$0xf0] }
 0x107   : > { %1532 = vmatpush.bf16.msra.mxu0 %v5835_v13  ;;  %6984 = vrcp.f32 %v8260_v14  ;;  %v6083_v13 = vmul.f32 -1.442695, %v8246_v25  ;;  %vm1915_vm1 = vweird.f32 %v8260_v14 }
 0x108   : > { %v1174_v35 = vpop.f32.mrf.mxu2  ;;  %6986 = vpow2.f32 %v6082_v20  ;;  %v6700_v20 = vld [vmem:[#allocation5 + $0x204] sm:$0xf0]  ;;  %vm1930_vm7 = vweird.f32 %v8274_v59 }
 0x109   : > { %v1175_v41 = vadd.f32 %v1174_v35, %v8221_v39  ;;  %v1223_v42 = vpop.f32.mrf.mxu3  ;;  %v5810_v35 = vld [vmem:[#allocation5 + $0xd0] sm:$0xf]  ;;  %1581 = vmatpush.bf16.msra.mxu1 %v6027_v30  ;;  %v6983_v49 = vpop.eup %6982  ;;  %6988 = vpow2.f32 %v6090_v45 }
 0x10a   : > { %v1157_v46 = vpop.f32.mrf.mxu0  ;;  %v5811_v37 = vor.u32 %v6664_v36, %v5810_v35  ;;  %v8278_v10 = vadd.f32 1.0, %v6983_v49  ;;  %6990 = vrcp.f32 %v8271_v50 }
 0x10b   : > { %v8250_v52 = vadd.f32 %v1223_v42, %v1175_v41  ;;  %v1158_v53 = vadd.f32 %v1157_v46, %v8221_v39  ;;  %v6002_v42 = vld [vmem:[#allocation5 + $0x250] sm:$0xf]  ;;  %6992 = vrcp.f32 %v8274_v59 }
 0x10c   : > { %v1206_v54 = vpop.f32.mrf.mxu1  ;;  %1533 = vmatpush.bf16.msra.mxu0 %v5811_v37  ;;  %v6003_v46 = vor.u32 %v6712_v44, %v6002_v42  ;;  %6994 = vrcp.f32 %v8278_v10  ;;  %v6646_v42 = vld [vmem:[#allocation5 + $0x54] sm:$0xf0]  ;;  %vm1810_vm11 = vweird.f32 %v8278_v10 }
 0x10d   : > { %v8253_v61 = vadd.f32 %v1206_v54, %v1158_v53  ;;  %1274 = vmatmul.bf16.gmra.mxu2 %v8172_v32  ;;  %1372 = vmatmul.bf16.gmra.mxu0 %v8172_v32  ;;  %v5787_v53 = vor.u32 %v6658_v48, %v5786_v47  ;;  %v8276_v3 = vpop.eup %6984  ;;  %6996 = vpow2.f32 %v6083_v13  ;;  %v6694_v47 = vld [vmem:[#allocation5 + $0x1d4] sm:$0xf0] }
 0x10e   : > { %1323 = vmatmul.bf16.gmra.mxu3 %v8174_v33  ;;  %1582 = vmatpush.bf16.msra.mxu1 %v6003_v46  ;;  %v6987_v2 = vpop.eup %6986  ;;  %v1911_v56 = vmul.f32 %v8276_v3, %v8260_v14  ;;  %v5930_v46 = vld [vmem:[#allocation5 + $0x1c0] sm:$0xf]  ;;  %vm1916_vm0 = vweird.f32 %v8276_v3 }
 0x10f   : > { %1421 = vmatmul.bf16.gmra.mxu1 %v8174_v33  ;;  %v8295_v25 = vadd.f32 1.0, %v6987_v2  ;;  %v6989_v30 = vpop.eup %6988  ;;  %v6084_v35 = vmul.f32 -1.442695, %v8253_v61  ;;  %v5715_v2 = vor.u32 %v6640_v58, %v5714_v57  ;;  %vm8374_vm2 = vmor %vm1915_vm1, %vm1916_vm0 }
 0x110   : > { %v1177_v9 = vpop.f32.mrf.mxu2  ;;  %1534 = vmatpush.bf16.msra.mxu0 %v5787_v53  ;;  %v8300_v44 = vpop.eup %6990  ;;  %v1912_v5 = vsub.f32 1.0, %v1911_v56  ;;  %v8309_v53 = vadd.f32 1.0, %v6989_v30  ;;  %v5884_v56 = vld [vmem:[#allocation5 + $0x178] sm:$0xf0]  ;;  %v6727_v30 = vld [vmem:[#allocation5 + $0x2e4] sm:$0xf] }
 0x111   : > { %v1178_v15 = vadd.f32 %v1177_v9, %v8221_v39  ;;  %v1226_v18 = vpop.f32.mrf.mxu3  ;;  %v6652_v9 = vld [vmem:[#allocation5 + $0x84] sm:$0xf0]  ;;  %6998 = vrcp.f32 %v8295_v25  ;;  %vm1796_vm6 = vweird.f32 %v8300_v44  ;;  %vm1825_vm0 = vweird.f32 %v8295_v25 }
 0x112   : > { %v1159_v21 = vpop.f32.mrf.mxu0  ;;  %1583 = vmatpush.bf16.msra.mxu1 %v5979_v8  ;;  %v5906_v8 = vld [vmem:[#allocation5 + $0x190] sm:$0xf]  ;;  %vm8412_vm8 = vmor %vm1795_vm5, %vm1796_vm6 }
 0x113   : > { %v8264_v24 = vadd.f32 %v1226_v18, %v1178_v15  ;;  %v1160_v26 = vadd.f32 %v1159_v21, %v8221_v39  ;;  %v5763_v18 = vor.u32 %v6652_v9, %v5762_v7  ;;  %v6091_v21 = vmul.f32 -1.442695, %v8250_v52  ;;  %v6688_v9 = vld [vmem:[#allocation5 + $0x1a4] sm:$0xf0] }
 0x114   : > { %v1208_v29 = vpop.f32.mrf.mxu1 }
 0x115   : > { %v8268_v41 = vadd.f32 %v1208_v29, %v1160_v26  ;;  %1535 = vmatpush.bf16.msra.mxu0 %v5763_v18  ;;  %v5955_v29 = vor.u32 %v6700_v20, %v5954_v19  ;;  %v6092_v52 = vmul.f32 -1.442695, %v8264_v24  ;;  %7000 = vpow2.f32 %v6091_v21  ;;  %v6679_v19 = vld [vmem:[#allocation5 + $0x164] sm:$0xf] }
 0x116   : > { %v1791_v24 = vmul.f32 %v8300_v44, %v8271_v50  ;;  %7002 = vpow2.f32 %v6084_v35  ;;  %v5907_v20 = vor.u32 %v6688_v9, %v5906_v8  ;;  %v1913_v21 = vmul.f32 %v8276_v3, %v1912_v5  ;;  %v6076_v35 = vld [vmem:[#allocation5 + $0x2f8] sm:$0xf0] }
 0x117   : > { %1584 = vmatpush.bf16.msra.mxu1 %v5955_v29  ;;  %v6085_v7 = vmul.f32 -1.442695, %v8268_v41  ;;  %7004 = vpow2.f32 %v6092_v52  ;;  %v5887_v29 = vor.u32 %v6679_v19, %v5884_v56  ;;  %v1919_v5 = vand.u32 2147483647, %v8260_v14 }
 0x118   : > { %v1179_v51 = vpop.f32.mrf.mxu2  ;;  %7006 = vrcp.f32 %v8309_v53  ;;  %v8359_v56 = vperm.slane %v8218_v38, 1 }
 0x119   : > { %v1180_v54 = vadd.f32 %v1179_v51, %v8221_v39  ;;  %v1228_v55 = vpop.f32.mrf.mxu3  ;;  %v8307_v51 = vpop.eup %6992  ;;  %7008 = vpow2.f32 %v6085_v7  ;;  %1628 = vmatpush.bf16.msrb.mxu2 %v5887_v29  ;;  %vm8384_vm4 = vcmp.eq.f32.partialorder %v1919_v5, 8.507059e+37 }
 0x11a   : > { %v1162_v60 = vpop.f32.mrf.mxu0  ;;  %v1926_v18 = vmul.f32 %v8307_v51, %v8274_v59  ;;  %vm1931_vm3 = vweird.f32 %v8307_v51 }
 0x11b   : > { %v8280_v43 = vadd.f32 %v1228_v55, %v1180_v54  ;;  %v1163_v4 = vadd.f32 %v1162_v60, %v8221_v39  ;;  %v5739_v54 = vor.u32 %v6646_v42, %v5738_v40  ;;  %v5931_v55 = vor.u32 %v6694_v47, %v5930_v46  ;;  %v8311_v60 = vpop.eup %6994  ;;  %vm8463_vm13 = vmor %vm1930_vm7, %vm1931_vm3 }
 0x11c   : > { %v1211_v6 = vpop.f32.mrf.mxu1  ;;  %v6997_v13 = vpop.eup %6996  ;;  %v1792_v40 = vsub.f32 1.0, %v1791_v24  ;;  %v8342_v24 = vadd.f32 %v8276_v3, %v1913_v21  ;;  %vm1811_vm12 = vweird.f32 %v8311_v60 }
 0x11d   : > { %v8285_v15 = vadd.f32 %v1211_v6, %v1163_v4  ;;  %1279 = vmatmul.bf16.gmra.mxu2 %v8192_v63  ;;  %1377 = vmatmul.bf16.gmra.mxu0 %v8192_v63  ;;  %v8318_v6 = vperm.slane %v8218_v38, 2  ;;  %v8335_v47 = vadd.f32 1.0, %v6997_v13  ;;  %vm8477_vm14 = vmor %vm1810_vm11, %vm1811_vm12 }
 0x11e   : > { %1328 = vmatmul.bf16.gmra.mxu3 %v8194_v0  ;;  %1536 = vmatpush.bf16.msra.mxu0 %v5739_v54  ;;  %v1918_v29 = vsel %vm8374_vm2, %v8276_v3, %v8342_v24 }
 0x11f   : > { %1426 = vmatmul.bf16.gmra.mxu1 %v8194_v0  ;;  %7010 = vrcp.f32 %v8335_v47  ;;  %vm1840_vm6 = vweird.f32 %v8335_v47 }
 0x120   : > { %v1182_v26 = vpop.f32.mrf.mxu2  ;;  %1585 = vmatpush.bf16.msra.mxu1 %v5931_v55  ;;  %v1927_v55 = vsub.f32 1.0, %v1926_v18 }
 0x121   : > { %v1183_v36 = vadd.f32 %v1182_v26, %v8221_v39  ;;  %v1231_v37 = vpop.f32.mrf.mxu3  ;;  %v8326_v26 = vmul.f32 %v8311_v60, %v8278_v10 }
 0x122   : > { %v1164_v45 = vpop.f32.mrf.mxu0  ;;  %1537 = vmatpush.bf16.msra.mxu0 %v5715_v2  ;;  %v1934_v2 = vand.u32 2147483647, %v8274_v59 }
 0x123   : > { %v8304_v48 = vadd.f32 %v1231_v37, %v1183_v36  ;;  %v1165_v49 = vadd.f32 %v1164_v45, %v8221_v39  ;;  %v1921_v36 = vand.u32 2147483648, %v8260_v14  ;;  %v8330_v37 = vpop.eup %6998  ;;  %v1807_v8 = vsub.f32 1.0, %v8326_v26 }
 0x124   : > { %v1213_v61 = vpop.f32.mrf.mxu1  ;;  %v7001_v46 = vpop.eup %7000  ;;  %1586 = vmatpush.bf16.msra.mxu1 %v5907_v20  ;;  %v8351_v13 = vmul.f32 %v8330_v37, %v8295_v25  ;;  %v1793_v26 = vmul.f32 %v8300_v44, %v1792_v40  ;;  %vm8431_vm10 = vcmp.eq.f32.partialorder %v1934_v2, 8.507059e+37  ;;  %vm1826_vm1 = vweird.f32 %v8330_v37 }
 0x125   : > { %v8315_v4 = vadd.f32 %v1213_v61, %v1165_v49  ;;  %v6079_v49 = vor.u32 %v6727_v30, %v6076_v35  ;;  %v1936_v61 = vand.u32 2147483648, %v8274_v59  ;;  %v7003_v54 = vpop.eup %7002  ;;  %v8346_v7 = vor.u32 1.1754944e-38, %v1921_v36  ;;  %vm8548_vm2 = vmor %vm1825_vm0, %vm1826_vm1 }
 0x126   : > { %v7005_v9 = vpop.eup %7004  ;;  %v8353_v18 = vadd.f32 1.0, %v7001_v46  ;;  %v8365_v21 = vadd.f32 1.0, %v7003_v54  ;;  %v1928_v35 = vmul.f32 %v8307_v51, %v1927_v55  ;;  %v1808_v3 = vmul.f32 %v8311_v60, %v1807_v8 }
 0x127   : > { %1677 = vmatpush.bf16.msrb.mxu3 %v6079_v49  ;;  %v8362_v20 = vpop.eup %7006  ;;  %v8389_v14 = vor.u32 1.1754944e-38, %v1936_v61  ;;  %v8391_v40 = vadd.f32 1.0, %v7005_v9  ;;  %v1794_v49 = vadd.f32 %v8300_v44, %v1793_v26  ;;  %v1799_v61 = vand.u32 2147483647, %v8271_v50  ;;  %v6673_v9 = vld [vmem:[#allocation5 + $0x134] sm:$0xf] }
 0x128   : > { %v1184_v41 = vpop.f32.mrf.mxu2  ;;  %v7009_v36 = vpop.eup %7008  ;;  %7012 = vrcp.f32 %v8353_v18  ;;  %v5860_v26 = vld [vmem:[#allocation5 + $0x148] sm:$0xf0]  ;;  %v6087_v8 = vmul.f32 -1.442695, %v8315_v4  ;;  %v1814_v59 = vand.u32 2147483647, %v8278_v10  ;;  %vm1946_vm3 = vweird.f32 %v8362_v20 }
 0x129   : > { %v1185_v42 = vadd.f32 %v1184_v41, %v8221_v39  ;;  %v1233_v45 = vpop.f32.mrf.mxu3  ;;  %v6093_v41 = vmul.f32 -1.442695, %v8280_v43  ;;  %v1801_v43 = vand.u32 2147483648, %v8271_v50  ;;  %7014 = vrcp.f32 %v8365_v21  ;;  %v8417_v38 = vpop.eup %7010 }
 0x12a   : > { %v1343_v52 = vpop.f32.mrf.mxu0  ;;  %v8406_v55 = vadd.f32 1.0, %v7009_v36  ;;  %vm8427_vm9 = vcmp.eq.f32.partialorder %v1799_v61, 8.507059e+37  ;;  %vm8508_vm15 = vcmp.eq.f32.partialorder %v1814_v59, 8.507059e+37  ;;  %vm1841_vm7 = vweird.f32 %v8417_v38 }
 0x12b   : > { %v8338_v57 = vadd.f32 %v1233_v45, %v1185_v42  ;;  %v1344_v39 = vadd.f32 %v1343_v52, %v8318_v6  ;;  %v1941_v45 = vmul.f32 %v8362_v20, %v8309_v53  ;;  %v6086_v52 = vmul.f32 -1.442695, %v8285_v15 }
 0x12c   : > { %v1392_v58 = vpop.f32.mrf.mxu1  ;;  %7016 = vpow2.f32 %v6093_v41  ;;  %v1802_v36 = vor.u32 1.1754944e-38, %v1801_v43  ;;  %v5863_v41 = vor.u32 %v6673_v9, %v5860_v26  ;;  %vm1870_vm0 = vweird.f32 %v8406_v55 }
 0x12d   : > { %v8355_v19 = vadd.f32 %v1392_v58, %v1344_v39  ;;  %1440 = vmatmul.bf16.vlgmr.msra.gmra.mxu2 %v8126_v11  ;;  %1538 = vmatmul.bf16.vlgmr.msra.gmra.mxu0 %v8126_v11  ;;  %7018 = vrcp.f32 %v8391_v40  ;;  %v1798_v11 = vsel %vm8412_vm8, %v8300_v44, %v1794_v49  ;;  %v8451_v49 = vsel %vm8384_vm4, %v8346_v7, %v1918_v29 }
 0x12e   : > { %1489 = vmatmul.bf16.vlgmr.msra.gmra.mxu3 %v8132_v17  ;;  %1629 = vmatpush.bf16.msrb.mxu2 %v5863_v41  ;;  %vm1945_vm4 = vweird.f32 %v8309_v53  ;;  %v6095_v33 = vmul.f32 -1.442695, %v8338_v57 }
 0x12f   : > { %1587 = vmatmul.bf16.vlgmr.msra.gmra.mxu1 %v8132_v17  ;;  %v6096_v2 = vmul.f32 -1.442695, %v8355_v19 }
 0x130   : > { %v1245_v42 = vpop.f32.mrf.mxu2 }
 0x131   : > { %v1246_v5 = vadd.f32 %v1245_v42, %v8359_v56  ;;  %v1294_v46 = vpop.f32.mrf.mxu3  ;;  %v6721_v42 = vld [vmem:[#allocation5 + $0x2b4] sm:$0xf] }
 0x132   : > { %v1345_v54 = vpop.f32.mrf.mxu0 }
 0x133   : > { %v1295_v39 = vadd.f32 %v1294_v46, %v1246_v5  ;;  %v1346_v24 = vadd.f32 %v1345_v54, %v8318_v6  ;;  %v6052_v5 = vld [vmem:[#allocation5 + $0x2c8] sm:$0xf0]  ;;  %v8421_v46 = vadd.f32 %v8307_v51, %v1928_v35  ;;  %v1942_v54 = vsub.f32 1.0, %v1941_v45  ;;  %v8435_v35 = vpop.eup %7012 }
 0x134   : > { %v1394_v15 = vpop.f32.mrf.mxu1  ;;  %v6055_v17 = vor.u32 %v6721_v42, %v6052_v5  ;;  %v8441_v44 = vpop.eup %7014  ;;  %v8445_v45 = vmul.f32 %v8417_v38, %v8335_v47 }
 0x135   : > { %7020 = vtanh.f32 %v1295_v39  ;;  %v1395_v50 = vadd.f32 %v1394_v15, %v1346_v24  ;;  %v7017_v61 = vpop.eup %7016  ;;  %v1809_v24 = vadd.f32 %v8311_v60, %v1808_v3  ;;  %v1816_v15 = vand.u32 2147483648, %v8278_v10 }
 0x136   : > { %7022 = vpow2.f32 %v6086_v52  ;;  %1678 = vmatpush.bf16.msrb.mxu3 %v6055_v17  ;;  %v1803_v17 = vsel %vm8427_vm9, %v1802_v36, %v1798_v11  ;;  %v8467_v19 = vpop.eup %7018  ;;  %v8471_v11 = vmul.f32 %v8435_v35, %v8353_v18  ;;  %v1933_v30 = vsel %vm8463_vm13, %v8307_v51, %v8421_v46  ;;  %vm8605_vm9 = vmor %vm1840_vm6, %vm1841_vm7 }
 0x137   : > { %7024 = vrcp.f32 %v8406_v55  ;;  %v1943_v3 = vmul.f32 %v8362_v20, %v1942_v54  ;;  %v6097_v26 = vmul.f32 -1.442695, %v1395_v50  ;;  %v6094_v10 = vmul.f32 -1.442695, %v8304_v48  ;;  %vm8643_vm13 = vmor %vm1945_vm4, %vm1946_vm3 }
 0x138   : > { %v1247_v52 = vpop.f32.mrf.mxu2  ;;  %7026 = vpow2.f32 %v6087_v8  ;;  %v1813_v46 = vsel %vm8477_vm14, %v8311_v60, %v1809_v24  ;;  %v1817_v50 = vor.u32 1.1754944e-38, %v1816_v15  ;;  %v8504_v8 = vmul.f32 %v8467_v19, %v8391_v40 }
 0x139   : > { %v1248_v39 = vadd.f32 %v1247_v52, %v8359_v56  ;;  %v1296_v58 = vpop.f32.mrf.mxu3  ;;  %v8490_v52 = vmul.f32 %v8441_v44, %v8365_v21  ;;  %7028 = vpow2.f32 %v6096_v2  ;;  %v8506_v48 = vadd.f32 1.0, %v7017_v61 }
 0x13a   : > { %v1348_v29 = vpop.f32.mrf.mxu0  ;;  %v12117_v60 = vsub.f32 1.0, %v8351_v13  ;;  %v8523_v61 = vsel %vm8431_vm10, %v8389_v14, %v1933_v30  ;;  %v1818_v43 = vsel %vm8508_vm15, %v1817_v50, %v1813_v46  ;;  %v8536_v0 = vadd.f32 %v8362_v20, %v1943_v3 }
 0x13b   : > { %v7021_v9 = vpop.eup %7020  ;;  %v1297_v36 = vadd.f32 %v1296_v58, %v1248_v39  ;;  %v1349_v41 = vadd.f32 %v1348_v29, %v8318_v6  ;;  %v1837_v39 = vsub.f32 1.0, %v8445_v45  ;;  %v1957_v45 = vsub.f32 1.0, %v8471_v11 }
 0x13c   : > { %v1397_v42 = vpop.f32.mrf.mxu1  ;;  %v7023_v5 = vpop.eup %7022  ;;  %v8493_v4 = vmul.f32 %v7021_v9, %v1803_v17  ;;  %v1823_v17 = vmul.f32 %v8330_v37, %v12117_v60  ;;  %v1852_v7 = vsub.f32 1.0, %v8490_v52  ;;  %v1829_v9 = vand.u32 2147483647, %v8295_v25  ;;  %v6667_v52 = vld [vmem:[#allocation5 + $0x104] sm:$0xf] }
 0x13d   : > { %v8495_v51 = vpop.eup %7024  ;;  %7030 = vtanh.f32 %v1297_v36  ;;  %v1398_v54 = vadd.f32 %v1397_v42, %v1349_v41  ;;  %1445 = vmatmul.bf16.gmra.mxu2 %v8150_v22  ;;  %1543 = vmatmul.bf16.gmra.mxu0 %v8150_v22  ;;  %v8518_v58 = vadd.f32 1.0, %v7023_v5  ;;  %v1831_v41 = vand.u32 2147483648, %v8295_v25  ;;  %v6715_v60 = vld [vmem:[#allocation5 + $0x284] sm:$0xf] }
 0x13e   : > { %1494 = vmatmul.bf16.gmra.mxu3 %v8156_v28  ;;  %7032 = vpow2.f32 %v6097_v26  ;;  %v8527_v24 = vmul.f32 %v8495_v51, %v8406_v55  ;;  %v7027_v15 = vpop.eup %7026  ;;  %v1824_v30 = vadd.f32 %v8330_v37, %v1823_v17  ;;  %v6028_v17 = vld [vmem:[#allocation5 + $0x298] sm:$0xf0]  ;;  %vm8576_vm5 = vcmp.eq.f32.partialorder %v1829_v9, 8.507059e+37 }
 0x13f   : > { %1592 = vmatmul.bf16.gmra.mxu1 %v8156_v28  ;;  %7034 = vpow2.f32 %v6094_v10  ;;  %v7029_v59 = vpop.eup %7028  ;;  %v5836_v10 = vld [vmem:[#allocation5 + $0x118] sm:$0xf0]  ;;  %v8559_v28 = vadd.f32 1.0, %v7027_v15  ;;  %v6098_v15 = vmul.f32 -1.442695, %v1398_v54  ;;  %vm1855_vm10 = vweird.f32 %v8365_v21 }
 0x140   : > { %v1250_v13 = vpop.f32.mrf.mxu2  ;;  %7036 = vrcp.f32 %v8506_v48  ;;  %v5839_v2 = vor.u32 %v6667_v52, %v5836_v10  ;;  %v8565_v46 = vadd.f32 1.0, %v7029_v59  ;;  %v1832_v52 = vor.u32 1.1754944e-38, %v1831_v41 }
 0x141   : > { %v1299_v14 = vpop.f32.mrf.mxu3  ;;  %7038 = vrcp.f32 %v8518_v58  ;;  %v1251_v36 = vadd.f32 %v1250_v13, %v8359_v56  ;;  %v1951_v13 = vand.u32 2147483648, %v8309_v53  ;;  %vm1856_vm11 = vweird.f32 %v8441_v44 }
 0x142   : > { %v1350_v26 = vpop.f32.mrf.mxu0  ;;  %1630 = vmatpush.bf16.msrb.mxu2 %v5839_v2  ;;  %vm8653_vm14 = vmor %vm1855_vm10, %vm1856_vm11  ;;  %vm1871_vm1 = vweird.f32 %v8495_v51  ;;  %vm1885_vm4 = vweird.f32 %v8518_v58 }
 0x143   : > { %v7031_v11 = vpop.eup %7030  ;;  %v1351_v42 = vadd.f32 %v1350_v26, %v8318_v6  ;;  %v1300_v25 = vadd.f32 %v1299_v14, %v1251_v36  ;;  %v6031_v26 = vor.u32 %v6715_v60, %v6028_v17  ;;  %v1958_v14 = vmul.f32 %v8435_v35, %v1957_v45  ;;  %vm8732_vm3 = vmor %vm1870_vm0, %vm1871_vm1 }
 0x144   : > { %v1399_v5 = vpop.f32.mrf.mxu1  ;;  %v8556_v50 = vmul.f32 %v7031_v11, %v1818_v43  ;;  %v7033_v29 = vpop.eup %7032  ;;  %v1828_v43 = vsel %vm8548_vm2, %v8330_v37, %v1824_v30  ;;  %v1838_v11 = vmul.f32 %v8417_v38, %v1837_v39  ;;  %v12122_v30 = vand.u32 2147483647, %v8309_v53 }
 0x145   : > { %v8561_v22 = vadd.f32 %v1399_v5, %v1351_v42  ;;  %v7035_v63 = vpop.eup %7034  ;;  %7040 = vtanh.f32 %v1300_v25  ;;  %1679 = vmatpush.bf16.msrb.mxu3 %v6031_v26  ;;  %v8574_v42 = vadd.f32 1.0, %v7033_v29  ;;  %v1846_v29 = vand.u32 2147483648, %v8335_v47 }
 0x146   : > { %v8572_v36 = vpop.eup %7036  ;;  %v8584_v54 = vadd.f32 1.0, %v7035_v63  ;;  %7042 = vrcp.f32 %v8559_v28  ;;  %vm8591_vm8 = vcmp.eq.f32.partialorder %v12122_v30, 8.507059e+37  ;;  %v1839_v3 = vadd.f32 %v8417_v38, %v1838_v11 }
 0x147   : > { %v8582_v37 = vpop.eup %7038  ;;  %7044 = vrcp.f32 %v8565_v46  ;;  %v1844_v63 = vand.u32 2147483647, %v8335_v47  ;;  %v1853_v5 = vmul.f32 %v8441_v44, %v1852_v7  ;;  %v1833_v10 = vsel %vm8576_vm5, %v1832_v52, %v1828_v43 }
 0x148   : > { %v1252_v59 = vpop.f32.mrf.mxu2  ;;  %7046 = vpow2.f32 %v6098_v15  ;;  %v8612_v26 = vmul.f32 %v8572_v36, %v8506_v48  ;;  %v8619_v47 = vmul.f32 %v8582_v37, %v8518_v58  ;;  %v1847_v43 = vor.u32 1.1754944e-38, %v1846_v29 }
 0x149   : > { %v1253_v39 = vadd.f32 %v1252_v59, %v8359_v56  ;;  %v1301_v45 = vpop.f32.mrf.mxu3  ;;  %7048 = vrcp.f32 %v8574_v42  ;;  %v1843_v52 = vsel %vm8605_vm9, %v8417_v38, %v1839_v3  ;;  %vm8630_vm12 = vcmp.eq.f32.partialorder %v1844_v63, 8.507059e+37 }
 0x14a   : > { %v1353_v41 = vpop.f32.mrf.mxu0  ;;  %v8636_v59 = vadd.f32 %v8441_v44, %v1853_v5  ;;  %v1859_v29 = vand.u32 2147483647, %v8365_v21  ;;  %v1948_v30 = vsel %vm8643_vm13, %v8362_v20, %v8536_v0  ;;  %v1952_v3 = vor.u32 1.1754944e-38, %v1951_v13 }
 0x14b   : > { %v1302_v2 = vadd.f32 %v1301_v45, %v1253_v39  ;;  %v1354_v17 = vadd.f32 %v1353_v41, %v8318_v6  ;;  %v7041_v7 = vpop.eup %7040  ;;  %v6099_v41 = vmul.f32 -1.442695, %v8561_v22  ;;  %v1882_v60 = vsub.f32 1.0, %v8619_v47  ;;  %v6661_v45 = vld [vmem:[#allocation5 + $0xd4] sm:$0xf] }
 0x14c   : > { %v1402_v25 = vpop.f32.mrf.mxu1  ;;  %v8625_v15 = vmul.f32 %v7041_v7, %v1833_v10  ;;  %v8647_v38 = vpop.eup %7042  ;;  %v8670_v10 = vadd.f32 %v8435_v35, %v1958_v14  ;;  %v1848_v20 = vsel %vm8630_vm12, %v1847_v43, %v1843_v52  ;;  %v1861_v13 = vand.u32 2147483648, %v8365_v21 }
 0x14d   : > { %7050 = vtanh.f32 %v1302_v2  ;;  %v8621_v11 = vadd.f32 %v1402_v25, %v1354_v17  ;;  %1450 = vmatmul.bf16.gmra.mxu2 %v8170_v31  ;;  %1548 = vmatmul.bf16.gmra.mxu0 %v8170_v31  ;;  %v8664_v63 = vpop.eup %7044  ;;  %v8681_v22 = vmul.f32 %v8647_v38, %v8559_v28  ;;  %v2121_v14 = vand.u32 2147483648, %v8565_v46 }
 0x14e   : > { %1499 = vmatmul.bf16.gmra.mxu3 %v8176_v34  ;;  %7052 = vpow2.f32 %v6095_v33  ;;  %v7047_v2 = vpop.eup %7046  ;;  %v1858_v25 = vsel %vm8653_vm14, %v8441_v44, %v8636_v59  ;;  %v8690_v47 = vsel %vm8591_vm8, %v1952_v3, %v1948_v30  ;;  %vm8692_vm15 = vcmp.eq.f32.partialorder %v1859_v29, 8.507059e+37  ;;  %v5812_v44 = vld [vmem:[#allocation5 + $0xe8] sm:$0xf0]  ;;  %v6709_v29 = vld [vmem:[#allocation5 + $0x254] sm:$0xf] }
 0x14f   : > { %1597 = vmatmul.bf16.gmra.mxu1 %v8176_v34  ;;  %7054 = vrcp.f32 %v8584_v54  ;;  %v8677_v17 = vpop.eup %7048  ;;  %v2111_v9 = vmul.f32 %v8664_v63, %v8565_v46  ;;  %v5815_v30 = vor.u32 %v6661_v45, %v5812_v44  ;;  %v6004_v3 = vld [vmem:[#allocation5 + $0x268] sm:$0xf0]  ;;  %v8712_v31 = vadd.f32 1.0, %v7047_v2 }
 0x150   : > { %v1255_v5 = vpop.f32.mrf.mxu2  ;;  %7056 = vpow2.f32 %v6099_v41  ;;  %vm2115_vm2 = vweird.f32 %v8565_v46  ;;  %v2134_v2 = vand.u32 2147483647, %v8574_v42  ;;  %v2136_v52 = vand.u32 2147483648, %v8574_v42 }
 0x151   : > { %v1256_v53 = vadd.f32 %v1255_v5, %v8359_v56  ;;  %v1304_v0 = vpop.f32.mrf.mxu3  ;;  %v12135_v5 = vsub.f32 1.0, %v8527_v24  ;;  %v6007_v24 = vor.u32 %v6709_v29, %v6004_v3  ;;  %1631 = vmatpush.bf16.msrb.mxu2 %v5815_v30  ;;  %vm1886_vm5 = vweird.f32 %v8582_v37 }
 0x152   : > { %v1355_v7 = vpop.f32.mrf.mxu0  ;;  %vm8771_vm8 = vmor %vm1885_vm4, %vm1886_vm5  ;;  %vm2116_vm9 = vweird.f32 %v8664_v63  ;;  %vm2130_vm10 = vweird.f32 %v8574_v42  ;;  %vm8779_vm11 = vcmp.eq.f32.partialorder %v2134_v2, 8.507059e+37  ;;  %vm2131_vm12 = vweird.f32 %v8677_v17 }
 0x153   : > { %v7051_v43 = vpop.eup %7050  ;;  %v1305_v21 = vadd.f32 %v1304_v0, %v1256_v53  ;;  %v1356_v57 = vadd.f32 %v1355_v7, %v8318_v6  ;;  %v1868_v33 = vmul.f32 %v8495_v51, %v12135_v5  ;;  %v1862_v0 = vor.u32 1.1754944e-38, %v1861_v13  ;;  %1680 = vmatpush.bf16.msrb.mxu3 %v6007_v24  ;;  %vm8804_vm13 = vmor %vm2115_vm2, %vm2116_vm9 }
 0x154   : > { %v1404_v39 = vpop.f32.mrf.mxu1  ;;  %v8702_v59 = vmul.f32 %v7051_v43, %v1848_v20  ;;  %v8704_v53 = vpop.eup %7052  ;;  %v2126_v5 = vmul.f32 %v8677_v17, %v8574_v42  ;;  %v2119_v20 = vand.u32 2147483647, %v8565_v46  ;;  %v8718_v13 = vor.u32 1.1754944e-38, %v2121_v14  ;;  %vm8819_vm0 = vmor %vm2130_vm10, %vm2131_vm12 }
 0x155   : > { %7058 = vtanh.f32 %v1305_v21  ;;  %v8706_v7 = vadd.f32 %v1404_v39, %v1356_v57  ;;  %v8708_v34 = vpop.eup %7054  ;;  %v2112_v43 = vsub.f32 1.0, %v2111_v9  ;;  %v6100_v21 = vmul.f32 -1.442695, %v8621_v11 }
 0x156   : > { %7060 = vtanh.f32 %v8493_v4  ;;  %v1869_v39 = vadd.f32 %v8495_v51, %v1868_v33  ;;  %v1863_v45 = vsel %vm8692_vm15, %v1862_v0, %v1858_v25  ;;  %v1876_v9 = vand.u32 2147483648, %v8406_v55  ;;  %v7057_v30 = vpop.eup %7056 }
 0x157   : > { %v1883_v11 = vmul.f32 %v8582_v37, %v1882_v60  ;;  %v2127_v33 = vsub.f32 1.0, %v2126_v5  ;;  %7062 = vrcp.f32 %v8712_v31  ;;  %v1874_v25 = vand.u32 2147483647, %v8406_v55 }
 0x158   : > { %v1257_v57 = vpop.f32.mrf.mxu2  ;;  %v2113_v60 = vmul.f32 %v8664_v63, %v2112_v43  ;;  %vm8745_vm6 = vcmp.eq.f32.partialorder %v2119_v20, 8.507059e+37  ;;  %7064 = vpow2.f32 %v6100_v21  ;;  %v1873_v55 = vsel %vm8732_vm3, %v8495_v51, %v1869_v39 }
 0x159   : > { %v1258_v44 = vadd.f32 %v1257_v57, %v8359_v56  ;;  %v1306_v14 = vpop.f32.mrf.mxu3  ;;  %v8760_v20 = vadd.f32 %v8582_v37, %v1883_v11  ;;  %v2128_v43 = vmul.f32 %v8677_v17, %v2127_v33  ;;  %v8764_v21 = vadd.f32 1.0, %v7057_v30 }
 0x15a   : > { %v1358_v29 = vpop.f32.mrf.mxu0  ;;  %vm1875_vm7 = vcmp.eq.f32.partialorder %v1874_v25, 8.507059e+37  ;;  %v1891_v39 = vand.u32 2147483648, %v8518_v58  ;;  %v2137_v4 = vor.u32 1.1754944e-38, %v2136_v52  ;;  %v2114_v11 = vadd.f32 %v8664_v63, %v2113_v60 }
 0x15b   : > { %v7059_v3 = vpop.eup %7058  ;;  %v1307_v0 = vadd.f32 %v1306_v14, %v1258_v44  ;;  %v1359_v24 = vadd.f32 %v1358_v29, %v8318_v6  ;;  %v1877_v14 = vor.u32 1.1754944e-38, %v1876_v9  ;;  %v6101_v30 = vmul.f32 -1.442695, %v8706_v7 }
 0x15c   : > { %v1407_v57 = vpop.f32.mrf.mxu1  ;;  %v8749_v41 = vmul.f32 %v7059_v3, %v1863_v45  ;;  %v8754_v44 = vpop.eup %7060  ;;  %v1888_v2 = vsel %vm8771_vm8, %v8582_v37, %v8760_v20  ;;  %v1889_v52 = vand.u32 2147483647, %v8518_v58  ;;  %v12144_v7 = vsub.f32 1.0, %v8681_v22  ;;  %v6655_v22 = vld [vmem:[#allocation5 + $0xa4] sm:$0xf] }
 0x15d   : > { %7066 = vtanh.f32 %v1307_v0  ;;  %v8756_v29 = vadd.f32 %v1407_v57, %v1359_v24  ;;  %1455 = vmatmul.bf16.gmra.mxu2 %v8190_v62  ;;  %1553 = vmatmul.bf16.gmra.mxu0 %v8190_v62  ;;  %v8783_v9 = vpop.eup %7062  ;;  %v1878_v25 = vsel %vm1875_vm7, %v1877_v14, %v1873_v55  ;;  %v2129_v57 = vadd.f32 %v8677_v17, %v2128_v43 }
 0x15e   : > { %1504 = vmatmul.bf16.gmra.mxu3 %v8196_v1  ;;  %7068 = vtanh.f32 %v8556_v50  ;;  %v7065_v24 = vpop.eup %7064  ;;  %v1892_v50 = vor.u32 1.1754944e-38, %v1891_v39  ;;  %v1898_v55 = vmul.f32 %v8647_v38, %v12144_v7  ;;  %v2141_v58 = vmul.f32 %v8783_v9, %v8712_v31  ;;  %v5788_v39 = vld [vmem:[#allocation5 + $0xb8] sm:$0xf0]  ;;  %v6703_v7 = vld [vmem:[#allocation5 + $0x224] sm:$0xf] }
 0x15f   : > { %1602 = vmatmul.bf16.gmra.mxu1 %v8196_v1  ;;  %7070 = vrcp.f32 %v8764_v21  ;;  %vm1900_vm14 = vweird.f32 %v8559_v28  ;;  %vm1901_vm15 = vweird.f32 %v8647_v38  ;;  %v5791_v46 = vor.u32 %v6655_v22, %v5788_v39  ;;  %v5980_v1 = vld [vmem:[#allocation5 + $0x238] sm:$0xf0] }
 0x160   : > { %v1260_v33 = vpop.f32.mrf.mxu2  ;;  %7072 = vpow2.f32 %v6101_v30  ;;  %v5983_v30 = vor.u32 %v6703_v7, %v5980_v1  ;;  %vm8826_vm1 = vcmp.eq.f32.partialorder %v1889_v52, 8.507059e+37  ;;  %v8831_v39 = vadd.f32 %v8647_v38, %v1898_v55  ;;  %vm8844_vm2 = vmor %vm1900_vm14, %vm1901_vm15  ;;  %v6649_v7 = vld [vmem:[#allocation5 + $0x74] sm:$0xf] }
 0x161   : > { %v1261_v3 = vadd.f32 %v1260_v33, %v8359_v56  ;;  %v1309_v0 = vpop.f32.mrf.mxu3  ;;  %1632 = vmatpush.bf16.msrb.mxu2 %v5791_v46  ;;  %v2118_v42 = vsel %vm8804_vm13, %v8664_v63, %v2114_v11  ;;  %v1904_v52 = vand.u32 2147483647, %v8559_v28  ;;  %v2133_v55 = vsel %vm8819_vm0, %v8677_v17, %v2129_v57 }
 0x162   : > { %v1360_v60 = vpop.f32.mrf.mxu0  ;;  %1681 = vmatpush.bf16.msrb.mxu3 %v5983_v30  ;;  %v2123_v63 = vsel %vm8745_vm6, %v8718_v13, %v2118_v42  ;;  %v2138_v13 = vsel %vm8779_vm11, %v2137_v4, %v2133_v55  ;;  %v1903_v17 = vsel %vm8844_vm2, %v8647_v38, %v8831_v39  ;;  %vm1961_vm4 = vweird.f32 %v8435_v35 }
 0x163   : > { %v7067_v14 = vpop.eup %7066  ;;  %v1310_v20 = vadd.f32 %v1309_v0, %v1261_v3  ;;  %v1361_v43 = vadd.f32 %v1360_v60, %v8318_v6  ;;  %v1906_v60 = vand.u32 2147483648, %v8559_v28  ;;  %v2382_v37 = vmul.f32 %v8754_v44, %v2123_v63 }
 0x164   : > { %v1409_v51 = vpop.f32.mrf.mxu1  ;;  %v8812_v33 = vmul.f32 %v7067_v14, %v1878_v25  ;;  %v7069_v25 = vpop.eup %7068  ;;  %v8824_v14 = vadd.f32 1.0, %v7065_v24  ;;  %v1893_v28 = vsel %vm8826_vm1, %v1892_v50, %v1888_v2  ;;  %vm8871_vm3 = vcmp.eq.f32.partialorder %v1904_v52, 8.507059e+37 }
 0x165   : > { %7074 = vtanh.f32 %v1310_v20  ;;  %v1410_v0 = vadd.f32 %v1409_v51, %v1361_v43  ;;  %v8837_v20 = vadd.f32 1.0, %v8704_v53  ;;  %v8852_v11 = vpop.eup %7070  ;;  %v2142_v53 = vsub.f32 1.0, %v2141_v58 }
 0x166   : > { %7076 = vtanh.f32 %v8625_v15  ;;  %v6102_v15 = vmul.f32 -1.442695, %v8756_v29  ;;  %v1907_v5 = vor.u32 1.1754944e-38, %v1906_v60  ;;  %v7073_v58 = vpop.eup %7072  ;;  %v2383_v44 = vmul.f32 %v7069_v25, %v2138_v13 }
 0x167   : > { %7078 = vrcp.f32 %v8824_v14  ;;  %v3070_v57 = vpack.c.bf16 %v2382_v37, %v2382_v37  ;;  %v2156_v2 = vmul.f32 %v8852_v11, %v8764_v21  ;;  %v2143_v60 = vmul.f32 %v8783_v9, %v2142_v53 }
 0x168   : > { %v1262_v24 = vpop.f32.mrf.mxu2  ;;  %7080 = vpow2.f32 %v6102_v15  ;;  %v3071_v38 = vpack.c.bf16 %v2383_v44, %v2383_v44  ;;  %v8880_v25 = vadd.f32 1.0, %v7073_v58  ;;  %vm1960_vm5 = vweird.f32 %v8353_v18 }
 0x169   : > { %v1263_v43 = vadd.f32 %v1262_v24, %v8359_v56  ;;  %v1311_v51 = vpop.f32.mrf.mxu3  ;;  %v2151_v39 = vand.u32 2147483648, %v8712_v31  ;;  %v3118_v42 = vunpack.c.l.b16 %v3070_v57  ;;  %v2144_v52 = vadd.f32 %v8783_v9, %v2143_v60  ;;  %v5956_v60 = vld [vmem:[#allocation5 + $0x208] sm:$0xf0]  ;;  %vm8932_vm10 = vmor %vm1960_vm5, %vm1961_vm4 }
 0x16a   : > { %v1363_v29 = vpop.f32.mrf.mxu0  ;;  %v3119_v1 = vunpack.c.l.b16 %v3071_v38  ;;  %vm2145_vm6 = vweird.f32 %v8712_v31  ;;  %v6103_v63 = vmul.f32 -1.442695, %v1410_v0  ;;  %vm2146_vm7 = vweird.f32 %v8783_v9 }
 0x16b   : > { %v7075_v46 = vpop.eup %7074  ;;  %v1312_v50 = vadd.f32 %v1311_v51, %v1263_v43  ;;  %v1364_v45 = vadd.f32 %v1363_v29, %v8318_v6  ;;  %v2149_v53 = vand.u32 2147483647, %v8712_v31  ;;  %v2152_v15 = vor.u32 1.1754944e-38, %v2151_v39  ;;  %vm8903_vm8 = vmor %vm2145_vm6, %vm2146_vm7 }
 0x16c   : > { %v1412_v4 = vpop.f32.mrf.mxu1  ;;  %v8877_v3 = vmul.f32 %v7075_v46, %v1893_v28  ;;  %v7077_v30 = vpop.eup %7076  ;;  %v8898_v55 = vmul.f32 %v8708_v34, %v8584_v54  ;;  %v2157_v37 = vsub.f32 1.0, %v2156_v2  ;;  %v8901_v43 = vpack.c.b16 %v3119_v1, %v3118_v42 }
 0x16d   : > { %7082 = vtanh.f32 %v1312_v50  ;;  %v8882_v22 = vadd.f32 %v1412_v4, %v1364_v45  ;;  %1460 = vmatmul.bf16.gmra.mxu2 %v8128_v12  ;;  %1558 = vmatmul.bf16.gmra.mxu0 %v8128_v12  ;;  %v8894_v24 = vpop.eup %7078  ;;  %v1908_v31 = vsel %vm8871_vm3, %v1907_v5, %v1903_v17  ;;  %v2148_v58 = vsel %vm8903_vm8, %v8783_v9, %v2144_v52  ;;  %v5764_v45 = vld [vmem:[#allocation5 + $0x88] sm:$0xf0] }
 0x16e   : > { %1509 = vmatmul.bf16.gmra.mxu3 %v8130_v16  ;;  %7084 = vrcp.f32 %v8837_v20  ;;  %v7081_v29 = vpop.eup %7080  ;;  %v1964_v57 = vand.u32 2147483647, %v8353_v18  ;;  %v1966_v46 = vand.u32 2147483648, %v8353_v18  ;;  %vm2150_vm9 = vcmp.eq.f32.partialorder %v2149_v53, 8.507059e+37 }
 0x16f   : > { %1607 = vmatmul.bf16.gmra.mxu1 %v8130_v16  ;;  %7086 = vrcp.f32 %v8880_v25  ;;  %v2171_v5 = vmul.f32 %v8894_v24, %v8824_v14  ;;  %v2153_v4 = vsel %vm2150_vm9, %v2152_v15, %v2148_v58  ;;  %v5767_v38 = vor.u32 %v6649_v7, %v5764_v45 }
 0x170   : > { %v1265_v28 = vpop.f32.mrf.mxu2  ;;  %7088 = vtanh.f32 %v8702_v59  ;;  %v6697_v59 = vld [vmem:[#allocation5 + $0x1f4] sm:$0xf]  ;;  %v2158_v39 = vmul.f32 %v8852_v11, %v2157_v37  ;;  %v2384_v42 = vmul.f32 %v7077_v30, %v2153_v4  ;;  %v8922_v1 = vadd.f32 1.0, %v7081_v29 }
 0x171   : > { %v1266_v0 = vadd.f32 %v1265_v28, %v8359_v56  ;;  %v1314_v13 = vpop.f32.mrf.mxu3  ;;  %7090 = vpow2.f32 %v6103_v63  ;;  %v5959_v52 = vor.u32 %v6697_v59, %v5956_v60  ;;  %v2166_v53 = vand.u32 2147483648, %v8764_v21  ;;  %1633 = vmatpush.bf16.msrb.mxu2 %v5767_v38 }
 0x172   : > { %v1365_v44 = vpop.f32.mrf.mxu0  ;;  %v2159_v30 = vadd.f32 %v8852_v11, %v2158_v39  ;;  %vm2160_vm11 = vweird.f32 %v8764_v21  ;;  %vm2161_vm12 = vweird.f32 %v8852_v11  ;;  %v1967_v7 = vor.u32 1.1754944e-38, %v1966_v46 }
 0x173   : > { %v7083_v2 = vpop.eup %7082  ;;  %v1315_v17 = vadd.f32 %v1314_v13, %v1266_v0  ;;  %v1366_v28 = vadd.f32 %v1365_v44, %v8318_v6  ;;  %1682 = vmatpush.bf16.msrb.mxu3 %v5959_v52  ;;  %vm8946_vm13 = vmor %vm2160_vm11, %vm2161_vm12  ;;  %v2164_v13 = vand.u32 2147483647, %v8764_v21  ;;  %v2167_v58 = vor.u32 1.1754944e-38, %v2166_v53 }
 0x174   : > { %v1414_v50 = vpop.f32.mrf.mxu1  ;;  %v8919_v9 = vmul.f32 %v7083_v2, %v1908_v31  ;;  %v8925_v63 = vpop.eup %7084  ;;  %v1963_v31 = vsel %vm8932_vm10, %v8435_v35, %v8670_v10  ;;  %v2172_v44 = vsub.f32 1.0, %v2171_v5  ;;  %v6104_v2 = vmul.f32 -1.442695, %v8882_v22 }
 0x175   : > { %7092 = vtanh.f32 %v1315_v17  ;;  %v8939_v37 = vpop.eup %7086  ;;  %v2163_v45 = vsel %vm8946_vm13, %v8852_v11, %v2159_v30  ;;  %v12161_v38 = vsub.f32 1.0, %v8504_v8  ;;  %vm2165_vm14 = vcmp.eq.f32.partialorder %v2164_v13, 8.507059e+37 }
 0x176   : > { %v7089_v29 = vpop.eup %7088  ;;  %7094 = vtanh.f32 %v8749_v41  ;;  %v8962_v22 = vmul.f32 %v8939_v37, %v8880_v25  ;;  %v1415_v46 = vadd.f32 %v1414_v50, %v1366_v28  ;;  %v2168_v11 = vsel %vm2165_vm14, %v2167_v58, %v2163_v45 }
 0x177   : > { %v7091_v4 = vpop.eup %7090  ;;  %v1973_v21 = vmul.f32 %v8467_v19, %v12161_v38  ;;  %7096 = vrcp.f32 %v8922_v1  ;;  %v2385_v52 = vmul.f32 %v7089_v29, %v2168_v11  ;;  %v3072_v53 = vpack.c.bf16 %v2384_v42, %v2384_v42 }
 0x178   : > { %v1267_v17 = vpop.f32.mrf.mxu2  ;;  %v8966_v8 = vadd.f32 1.0, %v7091_v4  ;;  %7098 = vpow2.f32 %v6104_v2  ;;  %v2173_v30 = vmul.f32 %v8894_v24, %v2172_v44  ;;  %v2181_v28 = vand.u32 2147483648, %v8824_v14 }
 0x179   : > { %v1268_v35 = vadd.f32 %v1267_v17, %v8359_v56  ;;  %v1316_v10 = vpop.f32.mrf.mxu3  ;;  %v3073_v50 = vpack.c.bf16 %v2385_v52, %v2385_v52  ;;  %v6105_v13 = vmul.f32 -1.442695, %v1415_v46  ;;  %vm2175_vm15 = vweird.f32 %v8824_v14 }
 0x17a   : > { %v1368_v5 = vpop.f32.mrf.mxu0  ;;  %vm2176_vm0 = vweird.f32 %v8894_v24  ;;  %v3120_v58 = vunpack.c.l.b16 %v3072_v53  ;;  %v2179_v2 = vand.u32 2147483647, %v8824_v14  ;;  %v2182_v17 = vor.u32 1.1754944e-38, %v2181_v28  ;;  %v6691_v53 = vld [vmem:[#allocation5 + $0x1c4] sm:$0xf] }
 0x17b   : > { %v7093_v59 = vpop.eup %7092  ;;  %v1317_v60 = vadd.f32 %v1316_v10, %v1268_v35  ;;  %v1369_v41 = vadd.f32 %v1368_v5, %v8318_v6  ;;  %v3121_v29 = vunpack.c.l.b16 %v3073_v50  ;;  %vm8982_vm1 = vmor %vm2175_vm15, %vm2176_vm0  ;;  %v8991_v4 = vmul.f32 %v8925_v63, %v8837_v20 }
 0x17c   : > { %v1417_v39 = vpop.f32.mrf.mxu1  ;;  %v8969_v15 = vmul.f32 %v7093_v59, %v8451_v49  ;;  %v2174_v49 = vadd.f32 %v8894_v24, %v2173_v30  ;;  %v7095_v42 = vpop.eup %7094  ;;  %v2187_v35 = vsub.f32 1.0, %v8962_v22  ;;  %vm1965_vm2 = vcmp.eq.f32.partialorder %v1964_v57, 8.507059e+37 }
 0x17d   : > { %7100 = vtanh.f32 %v1317_v60  ;;  %v8972_v0 = vadd.f32 %v1417_v39, %v1369_v41  ;;  %1465 = vmatmul.bf16.gmra.mxu2 %v8152_v23  ;;  %1563 = vmatmul.bf16.gmra.mxu0 %v8152_v23  ;;  %v8987_v45 = vpop.eup %7096  ;;  %v9001_v5 = vsel %vm1965_vm2, %v1967_v7, %v1963_v31  ;;  %v9003_v11 = vpack.c.b16 %v3121_v29, %v3120_v58  ;;  %v6643_v7 = vld [vmem:[#allocation5 + $0x44] sm:$0xf]  ;;  %v5740_v41 = vld [vmem:[#allocation5 + $0x58] sm:$0xf0] }
 0x17e   : > { %1514 = vmatmul.bf16.gmra.mxu3 %v8154_v27  ;;  %v2178_v38 = vsel %vm8982_vm1, %v8894_v24, %v2174_v49  ;;  %7102 = vrcp.f32 %v8966_v8  ;;  %v7099_v59 = vpop.eup %7098  ;;  %v9007_v18 = vadd.f32 %v8467_v19, %v1973_v21  ;;  %vm1975_vm3 = vweird.f32 %v8391_v40  ;;  %v5932_v21 = vld [vmem:[#allocation5 + $0x1d8] sm:$0xf0] }
 0x17f   : > { %1612 = vmatmul.bf16.gmra.mxu1 %v8154_v27  ;;  %12164 = vst [vmem:[#allocation37_spill] sm:$0xff] %v9003_v11  ;;  %7104 = vtanh.f32 %v8812_v33  ;;  %vm2180_vm4 = vcmp.eq.f32.partialorder %v2179_v2, 8.507059e+37  ;;  %v2201_v57 = vmul.f32 %v8987_v45, %v8922_v1  ;;  %v5743_v33 = vor.u32 %v6643_v7, %v5740_v41 }
 0x180   : > { %v1270_v10 = vpop.f32.mrf.mxu2  ;;  %7106 = vpow2.f32 %v6105_v13  ;;  %v2183_v39 = vsel %vm2180_vm4, %v2182_v17, %v2178_v38  ;;  %v2188_v30 = vmul.f32 %v8939_v37, %v2187_v35  ;;  %v5935_v28 = vor.u32 %v6691_v53, %v5932_v21 }
 0x181   : > { %v1271_v14 = vadd.f32 %v1270_v10, %v8359_v56  ;;  %v1319_v46 = vpop.f32.mrf.mxu3  ;;  %v2386_v50 = vmul.f32 %v7095_v42, %v2183_v39  ;;  %vm1976_vm5 = vweird.f32 %v8467_v19  ;;  %v2196_v13 = vand.u32 2147483648, %v8880_v25  ;;  %1634 = vmatpush.bf16.msrb.mxu2 %v5743_v33 }
 0x182   : > { %v1370_v22 = vpop.f32.mrf.mxu0  ;;  %v9018_v49 = vadd.f32 1.0, %v7099_v59  ;;  %v2189_v58 = vadd.f32 %v8939_v37, %v2188_v30  ;;  %vm2190_vm6 = vweird.f32 %v8880_v25  ;;  %vm2191_vm7 = vweird.f32 %v8939_v37  ;;  %1683 = vmatpush.bf16.msrb.mxu3 %v5935_v28  ;;  %vm9037_vm9 = vmor %vm1975_vm3, %vm1976_vm5 }
 0x183   : > { %v7101_v24 = vpop.eup %7100  ;;  %v1320_v60 = vadd.f32 %v1319_v46, %v1271_v14  ;;  %v1979_v42 = vand.u32 2147483647, %v8391_v40  ;;  %v1981_v29 = vand.u32 2147483648, %v8391_v40  ;;  %vm9027_vm8 = vmor %vm2190_vm6, %vm2191_vm7  ;;  %v2194_v2 = vand.u32 2147483647, %v8880_v25 }
 0x184   : > { %v1419_v31 = vpop.f32.mrf.mxu1  ;;  %v9013_v52 = vmul.f32 %v7101_v24, %v8523_v61  ;;  %v9023_v61 = vpop.eup %7102  ;;  %v2197_v17 = vor.u32 1.1754944e-38, %v2196_v13  ;;  %v2202_v10 = vsub.f32 1.0, %v2201_v57  ;;  %v6106_v38 = vmul.f32 -1.442695, %v8972_v0 }
 0x185   : > { %7108 = vtanh.f32 %v1320_v60  ;;  %v7105_v35 = vpop.eup %7104  ;;  %v12169_v59 = vsub.f32 1.0, %v8612_v26  ;;  %v2193_v25 = vsel %vm9027_vm8, %v8939_v37, %v2189_v58  ;;  %v1978_v7 = vsel %vm9037_vm9, %v8467_v19, %v9007_v18 }
 0x186   : > { %v7107_v57 = vpop.eup %7106  ;;  %7110 = vtanh.f32 %v8877_v3  ;;  %vm2195_vm10 = vcmp.eq.f32.partialorder %v2194_v2, 8.507059e+37  ;;  %v9055_v26 = vmul.f32 %v9023_v61, %v8966_v8  ;;  %v1371_v37 = vadd.f32 %v1370_v22, %v8318_v6 }
 0x187   : > { %v1988_v24 = vmul.f32 %v8572_v36, %v12169_v59  ;;  %7112 = vrcp.f32 %v9018_v49  ;;  %v2198_v39 = vsel %vm2195_vm10, %v2197_v17, %v2193_v25  ;;  %v3074_v28 = vpack.c.bf16 %v2386_v50, %v2386_v50  ;;  %v5908_v59 = vld [vmem:[#allocation5 + $0x1a8] sm:$0xf0] }
 0x188   : > { %v1272_v14 = vpop.f32.mrf.mxu2  ;;  %v2387_v30 = vmul.f32 %v7105_v35, %v2198_v39  ;;  %v9060_v13 = vadd.f32 1.0, %v7107_v57  ;;  %7114 = vpow2.f32 %v6106_v38  ;;  %v2203_v44 = vmul.f32 %v8987_v45, %v2202_v10  ;;  %v12170_v35 = vld [vmem:[#allocation31_spill] sm:$0xff] }
 0x189   : > { %v1273_v0 = vadd.f32 %v1272_v14, %v8359_v56  ;;  %v1321_v60 = vpop.f32.mrf.mxu3  ;;  %vm1990_vm11 = vweird.f32 %v8506_v48  ;;  %v2211_v50 = vand.u32 2147483648, %v8922_v1  ;;  %v1420_v17 = vadd.f32 %v1419_v31, %v1371_v37 }
 0x18a   : > { %v1373_v41 = vpop.f32.mrf.mxu0  ;;  %v3075_v22 = vpack.c.bf16 %v2387_v30, %v2387_v30  ;;  %vm2205_vm12 = vweird.f32 %v8922_v1  ;;  %vm2206_vm13 = vweird.f32 %v8987_v45  ;;  %v3122_v38 = vunpack.c.l.b16 %v3074_v28 }
 0x18b   : > { %v7109_v3 = vpop.eup %7108  ;;  %v1322_v33 = vadd.f32 %v1321_v60, %v1273_v0  ;;  %v1374_v53 = vadd.f32 %v1373_v41, %v8318_v6  ;;  %vm9077_vm14 = vmor %vm2205_vm12, %vm2206_vm13  ;;  %v2209_v25 = vand.u32 2147483647, %v8922_v1  ;;  %v2212_v31 = vor.u32 1.1754944e-38, %v2211_v50  ;;  %v5716_v50 = vld [vmem:[#allocation5 + $0x28] sm:$0xf0] }
 0x18c   : > { %v1422_v21 = vpop.f32.mrf.mxu1  ;;  %v9063_v58 = vmul.f32 %v7109_v3, %v8690_v47  ;;  %v2204_v47 = vadd.f32 %v8987_v45, %v2203_v44  ;;  %v7111_v10 = vpop.eup %7110  ;;  %v3123_v14 = vunpack.c.l.b16 %v3075_v22  ;;  %v2217_v0 = vsub.f32 1.0, %v9055_v26  ;;  %v6637_v22 = vld [vmem:[#allocation5 + $0x14] sm:$0xf] }
 0x18d   : > { %7116 = vtanh.f32 %v1322_v33  ;;  %v9066_v2 = vadd.f32 %v1422_v21, %v1374_v53  ;;  %1470 = vmatmul.bf16.gmra.mxu2 %v8172_v32  ;;  %1568 = vmatmul.bf16.gmra.mxu0 %v8172_v32  ;;  %v9082_v57 = vpop.eup %7112  ;;  %v1982_v37 = vor.u32 1.1754944e-38, %v1981_v29  ;;  %v9086_v41 = vadd.f32 %v8572_v36, %v1988_v24 }
 0x18e   : > { %1519 = vmatmul.bf16.gmra.mxu3 %v12170_v35  ;;  %v2208_v39 = vsel %vm9077_vm14, %v8987_v45, %v2204_v47  ;;  %vm1991_vm15 = vweird.f32 %v8572_v36  ;;  %v1994_v1 = vand.u32 2147483647, %v8506_v48  ;;  %v9094_v53 = vpack.c.b16 %v3123_v14, %v3122_v38  ;;  %v7115_v21 = vpop.eup %7114  ;;  %v6685_v14 = vld [vmem:[#allocation5 + $0x194] sm:$0xf] }
 0x18f   : > { %1617 = vmatmul.bf16.gmra.mxu1 %v12170_v35  ;;  %7118 = vrcp.f32 %v9060_v13  ;;  %v6107_v29 = vmul.f32 -1.442695, %v1420_v17  ;;  %v1996_v24 = vand.u32 2147483648, %v8506_v48  ;;  %vm2210_vm0 = vcmp.eq.f32.partialorder %v2209_v25, 8.507059e+37  ;;  %vm9116_vm1 = vmor %vm1990_vm11, %vm1991_vm15 }
 0x190   : > { %v1275_v60 = vpop.f32.mrf.mxu2  ;;  %12173 = vst [vmem:[#allocation38_spill] sm:$0xff] %v9094_v53  ;;  %7120 = vtanh.f32 %v8919_v9  ;;  %v2231_v45 = vmul.f32 %v9082_v57, %v9018_v49  ;;  %v2213_v47 = vsel %vm2210_vm0, %v2212_v31, %v2208_v39  ;;  %v5719_v17 = vor.u32 %v6637_v22, %v5716_v50 }
 0x191   : > { %v1276_v3 = vadd.f32 %v1275_v60, %v8359_v56  ;;  %v1324_v33 = vpop.f32.mrf.mxu3  ;;  %v2218_v25 = vmul.f32 %v9023_v61, %v2217_v0  ;;  %v9107_v60 = vmul.f32 %v7111_v10, %v2213_v47  ;;  %v9109_v9 = vadd.f32 1.0, %v7115_v21 }
 0x192   : > { %v1375_v26 = vpop.f32.mrf.mxu0  ;;  %v5911_v51 = vor.u32 %v6685_v14, %v5908_v59  ;;  %1635 = vmatpush.bf16.msrb.mxu2 %v5719_v17  ;;  %vm2220_vm2 = vweird.f32 %v8966_v8  ;;  %vm2221_vm3 = vweird.f32 %v9023_v61  ;;  %v2017_v10 = vsub.f32 1.0, %v8991_v4  ;;  %v12181_v59 = vld [vmem:[#allocation34_spill] sm:$0xff] }
 0x193   : > { %v7117_v30 = vpop.eup %7116  ;;  %v1325_v28 = vadd.f32 %v1324_v33, %v1276_v3  ;;  %v2226_v3 = vand.u32 2147483648, %v8966_v8  ;;  %v2219_v31 = vadd.f32 %v9023_v61, %v2218_v25  ;;  %vm1980_vm4 = vcmp.eq.f32.partialorder %v1979_v42, 8.507059e+37  ;;  %vm9126_vm5 = vmor %vm2220_vm2, %vm2221_vm3 }
 0x194   : > { %v9101_v44 = vpop.f32.mrf.mxu1  ;;  %v9104_v38 = vmul.f32 %v7117_v30, %v9001_v5  ;;  %1684 = vmatpush.bf16.msrb.mxu3 %v5911_v51  ;;  %v2224_v48 = vand.u32 2147483647, %v8966_v8  ;;  %v2232_v21 = vsub.f32 1.0, %v2231_v45  ;;  %v1993_v40 = vsel %vm9116_vm1, %v8572_v36, %v9086_v41 }
 0x195   : > { %7122 = vtanh.f32 %v1325_v28  ;;  %v2227_v39 = vor.u32 1.1754944e-38, %v2226_v3  ;;  %v9131_v33 = vpop.eup %7118  ;;  %v2223_v51 = vsel %vm9126_vm5, %v9023_v61, %v2219_v31  ;;  %vm9147_vm6 = vcmp.eq.f32.partialorder %v1994_v1, 8.507059e+37  ;;  %v12182_v3 = vld [vmem:[#allocation35_spill] sm:$0xff] }
 0x196   : > { %7124 = vpow2.f32 %v6107_v29  ;;  %v1983_v29 = vsel %vm1980_vm4, %v1982_v37, %v1978_v7  ;;  %v7121_v8 = vpop.eup %7120  ;;  %v12180_v19 = vsub.f32 1.0, %v8898_v55  ;;  %vm2225_vm7 = vcmp.eq.f32.partialorder %v2224_v48, 8.507059e+37 }
 0x197   : > { %7126 = vtanh.f32 %v8969_v15  ;;  %v6108_v36 = vmul.f32 -1.442695, %v9066_v2  ;;  %v1997_v61 = vor.u32 1.1754944e-38, %v1996_v24  ;;  %v2228_v37 = vsel %vm2225_vm7, %v2227_v39, %v2223_v51 }
 0x198   : > { %v1277_v30 = vpop.f32.mrf.mxu2  ;;  %v2003_v18 = vmul.f32 %v8708_v34, %v12180_v19  ;;  %7128 = vrcp.f32 %v9109_v9  ;;  %v2246_v41 = vmul.f32 %v9131_v33, %v9060_v13  ;;  %v1376_v1 = vadd.f32 %v1375_v26, %v8318_v6 }
 0x199   : > { %v1278_v42 = vadd.f32 %v1277_v30, %v8359_v56  ;;  %v1326_v46 = vpop.f32.mrf.mxu3  ;;  %vm2006_vm8 = vweird.f32 %v8708_v34  ;;  %v2389_v17 = vmul.f32 %v7121_v8, %v2228_v37  ;;  %v3076_v2 = vpack.c.bf16 %v9107_v60, %v9107_v60 }
 0x19a   : > { %v1378_v7 = vpop.f32.mrf.mxu0  ;;  %v2233_v24 = vmul.f32 %v9082_v57, %v2232_v21  ;;  %v2009_v26 = vand.u32 2147483647, %v8584_v54  ;;  %v2241_v25 = vand.u32 2147483648, %v9018_v49  ;;  %vm2235_vm9 = vweird.f32 %v9018_v49 }
 0x19b   : > { %v7123_v15 = vpop.eup %7122  ;;  %v1327_v28 = vadd.f32 %v1326_v46, %v1278_v42  ;;  %v1379_v22 = vadd.f32 %v1378_v7, %v8318_v6  ;;  %v3077_v5 = vpack.c.bf16 %v2389_v17, %v2389_v17  ;;  %vm2236_vm10 = vweird.f32 %v9082_v57 }
 0x19c   : > { %v1427_v55 = vpop.f32.mrf.mxu1  ;;  %v7125_v50 = vpop.eup %7124  ;;  %v9161_v47 = vmul.f32 %v7123_v15, %v1983_v29  ;;  %v2234_v60 = vadd.f32 %v9082_v57, %v2233_v24  ;;  %v2239_v48 = vand.u32 2147483647, %v9018_v49  ;;  %v2242_v39 = vor.u32 1.1754944e-38, %v2241_v25  ;;  %vm2237_vm11 = vmor %vm2235_vm9, %vm2236_vm10 }
 0x19d   : > { %7130 = vtanh.f32 %v1327_v28  ;;  %v9166_v14 = vadd.f32 %v1427_v55, %v1379_v22  ;;  %1475 = vmatmul.bf16.gmra.mxu2 %v12181_v59  ;;  %1573 = vmatmul.bf16.gmra.mxu0 %v12181_v59  ;;  %v7127_v31 = vpop.eup %7126  ;;  %v9176_v0 = vadd.f32 1.0, %v7125_v50  ;;  %v2247_v29 = vsub.f32 1.0, %v2246_v41 }
 0x19e   : > { %7132 = vpow2.f32 %v6108_v36  ;;  %1524 = vmatmul.bf16.gmra.mxu3 %v12182_v3  ;;  %v9180_v21 = vpop.eup %7128  ;;  %v1425_v30 = vadd.f32 %v9101_v44, %v1376_v1  ;;  %v3124_v8 = vunpack.c.l.b16 %v3076_v2  ;;  %v3125_v42 = vunpack.c.l.b16 %v3077_v5 }
 0x19f   : > { %1622 = vmatmul.bf16.gmra.mxu1 %v12182_v3  ;;  %v2004_v36 = vadd.f32 %v8708_v34, %v2003_v18  ;;  %v2011_v7 = vand.u32 2147483648, %v8584_v54  ;;  %v2238_v37 = vsel %vm2237_vm11, %v9082_v57, %v2234_v60  ;;  %7134 = vtanh.f32 %v9013_v52 }
 0x1a0   : > { %v1280_v51 = vpop.f32.mrf.mxu2  ;;  %v1998_v49 = vsel %vm9147_vm6, %v1997_v61, %v1993_v40  ;;  %v9190_v15 = vpack.c.b16 %v3125_v42, %v3124_v8  ;;  %vm2240_vm12 = vcmp.eq.f32.partialorder %v2239_v48, 8.507059e+37  ;;  %v2261_v41 = vmul.f32 %v9180_v21, %v9109_v9 }
 0x1a1   : > { %v1281_v46 = vadd.f32 %v1280_v51, %v8359_v56  ;;  %v1329_v19 = vpop.f32.mrf.mxu3  ;;  %7136 = vrcp.f32 %v9176_v0  ;;  %v2243_v18 = vsel %vm2240_vm12, %v2242_v39, %v2238_v37  ;;  %v6109_v22 = vmul.f32 -1.442695, %v1425_v30  ;;  %v9246_v37 = vld [vmem:[#allocation7] sm:$0x3f] }
 0x1a2   : > { %12183 = vst [vmem:[#allocation34_spill] sm:$0xff] %v9190_v15  ;;  %v2248_v52 = vmul.f32 %v9131_v33, %v2247_v29  ;;  %v2390_v57 = vmul.f32 %v7127_v31, %v2243_v18  ;;  %vm2005_vm13 = vweird.f32 %v8584_v54  ;;  %v2018_v40 = vmul.f32 %v8925_v63, %v2017_v10  ;;  %v6768_v15 = vld [vmem:[#allocation8 + $0x124] sm:$0xf0] }
 0x1a3   : > { %v7131_v44 = vpop.eup %7130  ;;  %v1330_v1 = vadd.f32 %v1329_v19, %v1281_v46  ;;  %v2256_v45 = vand.u32 2147483648, %v9060_v13  ;;  %vm9205_vm14 = vmor %vm2005_vm13, %vm2006_vm8  ;;  %vm9209_vm15 = vcmp.eq.f32.partialorder %v2009_v26, 8.507059e+37  ;;  %vm2250_vm0 = vweird.f32 %v9060_v13 }
 0x1a4   : > { %v7133_v28 = vpop.eup %7132  ;;  %v9195_v55 = vmul.f32 %v7131_v44, %v1998_v49  ;;  %v2249_v17 = vadd.f32 %v9131_v33, %v2248_v52  ;;  %vm2251_vm1 = vweird.f32 %v9131_v33  ;;  %v2008_v4 = vsel %vm9205_vm14, %v8708_v34, %v2004_v36 }
 0x1a5   : > { %7138 = vtanh.f32 %v1330_v1  ;;  %v9216_v54 = vadd.f32 1.0, %v7133_v28  ;;  %vm9221_vm2 = vmor %vm2250_vm0, %vm2251_vm1  ;;  %v2254_v2 = vand.u32 2147483647, %v9060_v13  ;;  %v2257_v24 = vor.u32 1.1754944e-38, %v2256_v45  ;;  %v7135_v26 = vpop.eup %7134  ;;  %v12193_v28 = vld [vmem:[#allocation24_spill] sm:$0xff] }
 0x1a6   : > { %v2262_v25 = vsub.f32 1.0, %v2261_v41  ;;  %7140 = vpow2.f32 %v6109_v22  ;;  %v2012_v5 = vor.u32 1.1754944e-38, %v2011_v7  ;;  %v2253_v31 = vsel %vm9221_vm2, %v9131_v33, %v2249_v17  ;;  %v12190_v7 = vld [vmem:[#allocation22_spill] sm:$0xff] }
 0x1a7   : > { %v9229_v48 = vpop.eup %7136  ;;  %v2019_v29 = vadd.f32 %v8925_v63, %v2018_v40  ;;  %vm2020_vm3 = vweird.f32 %v8837_v20  ;;  %vm2255_vm4 = vcmp.eq.f32.partialorder %v2254_v2, 8.507059e+37  ;;  %vm2021_vm5 = vweird.f32 %v8925_v63  ;;  %v1429_v40 = vpop.f32.mrf.mxu1 }
 0x1a8   : > { %v1282_v60 = vpop.f32.mrf.mxu2  ;;  %v2013_v13 = vsel %vm9209_vm15, %v2012_v5, %v2008_v4  ;;  %v2026_v30 = vand.u32 2147483648, %v8837_v20  ;;  %v2258_v51 = vsel %vm2255_vm4, %v2257_v24, %v2253_v31  ;;  %7142 = vrcp.f32 %v9216_v54  ;;  %vm9256_vm6 = vmor %vm2020_vm3, %vm2021_vm5 }
 0x1a9   : > { %v1283_v34 = vadd.f32 %v1282_v60, %v8359_v56  ;;  %v1331_v39 = vpop.f32.mrf.mxu3  ;;  %v2391_v42 = vmul.f32 %v7135_v26, %v2258_v51  ;;  %v3078_v56 = vpack.c.bf16 %v2390_v57, %v2390_v57  ;;  %7144 = vtanh.f32 %v9063_v58 }
 0x1aa   : > { %v2276_v46 = vmul.f32 %v9229_v48, %v9176_v0  ;;  %v2263_v36 = vmul.f32 %v9180_v21, %v2262_v25  ;;  %v9249_v49 = vperm.slane %v9246_v37, 3  ;;  %v2271_v41 = vand.u32 2147483648, %v9109_v9 }
 0x1ab   : > { %v7139_v8 = vpop.eup %7138  ;;  %v1332_v33 = vadd.f32 %v1331_v39, %v1283_v34  ;;  %v3079_v44 = vpack.c.bf16 %v2391_v42, %v2391_v42  ;;  %v2024_v18 = vand.u32 2147483647, %v8837_v20  ;;  %vm2265_vm7 = vweird.f32 %v9109_v9 }
 0x1ac   : > { %v9242_v19 = vmul.f32 %v7139_v8, %v2013_v13  ;;  %v7141_v1 = vpop.eup %7140  ;;  %v2264_v22 = vadd.f32 %v9180_v21, %v2263_v36  ;;  %vm2266_vm8 = vweird.f32 %v9180_v21  ;;  %v3126_v52 = vunpack.c.l.b16 %v3078_v56 }
 0x1ad   : > { %7146 = vtanh.f32 %v1332_v33  ;;  %1636 = vmatmul.bf16.vlgmr.msrb.gmra.mxu2 %v12190_v7  ;;  %v3127_v57 = vunpack.c.l.b16 %v3079_v44  ;;  %vm9265_vm9 = vmor %vm2265_vm7, %vm2266_vm8  ;;  %v2269_v45 = vand.u32 2147483647, %v9109_v9  ;;  %v2272_v61 = vor.u32 1.1754944e-38, %v2271_v41 }
 0x1ae   : > { %1685 = vmatmul.bf16.vlgmr.msrb.gmra.mxu3 %v12193_v28  ;;  %v2277_v50 = vsub.f32 1.0, %v2276_v46  ;;  %v2023_v20 = vsel %vm9256_vm6, %v8925_v63, %v2019_v29  ;;  %v2027_v17 = vor.u32 1.1754944e-38, %v2026_v30  ;;  %v2268_v10 = vsel %vm9265_vm9, %v9180_v21, %v2264_v22  ;;  %v9276_v2 = vpop.eup %7142  ;;  %v1380_v46 = vpop.f32.mrf.mxu0 }
 0x1af   : > { %v9278_v24 = vadd.f32 1.0, %v7141_v1  ;;  %v9281_v9 = vpack.c.b16 %v3127_v57, %v3126_v52  ;;  %vm2270_vm10 = vcmp.eq.f32.partialorder %v2269_v45, 8.507059e+37  ;;  %v7145_v5 = vpop.eup %7144  ;;  %vm2025_vm11 = vcmp.eq.f32.partialorder %v2024_v18, 8.507059e+37  ;;  %v12197_v45 = vld [vmem:[#allocation25_spill] sm:$0xff] }
 0x1b0   : > { %v1441_v4 = vpop.f32.mrf.mxu2  ;;  %v2273_v60 = vsel %vm2270_vm10, %v2272_v61, %v2268_v10  ;;  %v2028_v31 = vsel %vm2025_vm11, %v2027_v17, %v2023_v20  ;;  %7148 = vtanh.f32 %v9104_v38  ;;  %v2291_v21 = vmul.f32 %v9276_v2, %v9216_v54  ;;  %v12198_v17 = vld [vmem:[#allocation28_spill] sm:$0xff] }
 0x1b1   : > { %v1442_v26 = vadd.f32 %v1441_v4, %v9249_v49  ;;  %v1490_v25 = vpop.f32.mrf.mxu3  ;;  %12196 = vst [vmem:[#allocation24_spill] sm:$0xff] %v9281_v9  ;;  %v2392_v39 = vmul.f32 %v7145_v5, %v2273_v60  ;;  %v2278_v13 = vmul.f32 %v9229_v48, %v2277_v50  ;;  %7150 = vrcp.f32 %v9278_v24 }
 0x1b2   : > { %v2286_v30 = vand.u32 2147483648, %v9176_v0  ;;  %vm2280_vm12 = vweird.f32 %v9176_v0  ;;  %vm2281_vm13 = vweird.f32 %v9229_v48  ;;  %v2284_v38 = vand.u32 2147483647, %v9176_v0 }
 0x1b3   : > { %v7147_v63 = vpop.eup %7146  ;;  %v9283_v34 = vadd.f32 %v1490_v25, %v1442_v26  ;;  %v2279_v51 = vadd.f32 %v9229_v48, %v2278_v13  ;;  %vm2282_vm14 = vmor %vm2280_vm12, %vm2281_vm13  ;;  %v2292_v33 = vsub.f32 1.0, %v2291_v21  ;;  %v3080_v52 = vpack.c.bf16 %v2392_v39, %v2392_v39 }
 0x1b4   : > { %v9288_v29 = vmul.f32 %v7147_v63, %v2028_v31  ;;  %v2287_v8 = vor.u32 1.1754944e-38, %v2286_v30  ;;  %vm2285_vm15 = vcmp.eq.f32.partialorder %v2284_v38, 8.507059e+37  ;;  %v1381_v0 = vadd.f32 %v1380_v46, %v8318_v6  ;;  %v6202_v46 = vld [vmem:[#allocation8 + $0x70] sm:$0xf] }
 0x1b5   : > { %v2283_v56 = vsel %vm2282_vm14, %v9229_v48, %v2279_v51  ;;  %v2293_v57 = vmul.f32 %v9276_v2, %v2292_v33  ;;  %7152 = vtanh.f32 %v9161_v47  ;;  %v6110_v48 = vmul.f32 -1.442695, %v9166_v14 }
 0x1b6   : > { %v7149_v41 = vpop.eup %7148  ;;  %v2288_v1 = vsel %vm2285_vm15, %v2287_v8, %v2283_v56  ;;  %v2301_v50 = vand.u32 2147483648, %v9216_v54  ;;  %vm2295_vm0 = vweird.f32 %v9216_v54  ;;  %vm2296_vm1 = vweird.f32 %v9276_v2 }
 0x1b7   : > { %v9299_v58 = vpop.eup %7150  ;;  %v2393_v22 = vmul.f32 %v7149_v41, %v2288_v1  ;;  %v2294_v4 = vadd.f32 %v9276_v2, %v2293_v57  ;;  %v3128_v6 = vunpack.c.l.b16 %v3080_v52  ;;  %vm2297_vm2 = vmor %vm2295_vm0, %vm2296_vm1  ;;  %v2299_v14 = vand.u32 2147483647, %v9216_v54  ;;  %v6194_v41 = vld [vmem:[#allocation8 + $0x60] sm:$0xf]  ;;  %v6744_v1 = vld [vmem:[#allocation8 + $0x64] sm:$0xf0]  ;;  %v9334_v57 = vpop.f32.mrf.mxu0 }
 0x1b8   : > { %v1443_v42 = vpop.f32.mrf.mxu2  ;;  %v2306_v20 = vmul.f32 %v9299_v58, %v9278_v24  ;;  %v2302_v10 = vor.u32 1.1754944e-38, %v2301_v50  ;;  %v1430_v26 = vadd.f32 %v1429_v40, %v1381_v0  ;;  %7154 = vpow2.f32 %v6110_v48  ;;  %v12202_v50 = vld [vmem:[#allocation29_spill] sm:$0xff] }
 0x1b9   : > { %v1444_v36 = vadd.f32 %v1443_v42, %v9249_v49  ;;  %v1492_v44 = vpop.f32.mrf.mxu3  ;;  %v3081_v61 = vpack.c.bf16 %v2393_v22, %v2393_v22  ;;  %v2298_v31 = vsel %vm2297_vm2, %v9276_v2, %v2294_v4  ;;  %vm2300_vm3 = vcmp.eq.f32.partialorder %v2299_v14, 8.507059e+37  ;;  %v12203_v4 = vld [vmem:[#allocation32_spill] sm:$0xff] }
 0x1ba   : > { %v2307_v21 = vsub.f32 1.0, %v2306_v20  ;;  %v2303_v30 = vsel %vm2300_vm3, %v2302_v10, %v2298_v31  ;;  %v6111_v51 = vmul.f32 -1.442695, %v1430_v26  ;;  %vm2310_vm4 = vweird.f32 %v9278_v24  ;;  %v6186_v26 = vld [vmem:[#allocation8 + $0x50] sm:$0xf] }
 0x1bb   : > { %v9301_v18 = vadd.f32 %v1492_v44, %v1444_v36  ;;  %v3129_v47 = vunpack.c.l.b16 %v3081_v61  ;;  %v7153_v39 = vpop.eup %7152  ;;  %v6746_v36 = vld [vmem:[#allocation8 + $0x74] sm:$0xf0]  ;;  %vm2311_vm5 = vweird.f32 %v9299_v58  ;;  %v2316_v22 = vand.u32 2147483648, %v9278_v24  ;;  %v6740_v31 = vld [vmem:[#allocation8 + $0x44] sm:$0xf0] }
 0x1bc   : > { %v9322_v38 = vmul.f32 %v7153_v39, %v2303_v30  ;;  %v2308_v8 = vmul.f32 %v9299_v58, %v2307_v21  ;;  %7156 = vpow2.f32 %v6111_v51  ;;  %v6203_v44 = vor.u32 %v6746_v36, %v6202_v46  ;;  %vm9336_vm6 = vmor %vm2310_vm4, %vm2311_vm5  ;;  %v6330_v51 = vld [vmem:[#allocation8 + $0x170] sm:$0xf] }
 0x1bd   : > { %1641 = vmatmul.bf16.gmra.mxu2 %v12197_v45  ;;  %v9317_v63 = vpack.c.b16 %v3129_v47, %v3128_v6  ;;  %v6195_v48 = vor.u32 %v6744_v1, %v6194_v41  ;;  %v2314_v61 = vand.u32 2147483647, %v9278_v24  ;;  %7158 = vtanh.f32 %v9195_v55 }
 0x1be   : > { %1690 = vmatmul.bf16.gmra.mxu3 %v12198_v17  ;;  %v7155_v54 = vpop.eup %7154  ;;  %v2309_v0 = vadd.f32 %v9299_v58, %v2308_v8  ;;  %3588 = vmatpush.bf16.msrb.mxu0 %v6203_v44  ;;  %v2317_v6 = vor.u32 1.1754944e-38, %v2316_v22  ;;  %v3082_v46 = vpack.c.bf16 %v9322_v38, %v9322_v38 }
 0x1bf   : > { %12199 = vst [vmem:[#allocation39_spill] sm:$0xff] %v9317_v63  ;;  %v9328_v2 = vadd.f32 1.0, %v7155_v54  ;;  %vm2315_vm7 = vcmp.eq.f32.partialorder %v2314_v61, 8.507059e+37  ;;  %v6778_v54 = vld [vmem:[#allocation8 + $0x174] sm:$0xf0] }
 0x1c0   : > { %v1446_v25 = vpop.f32.mrf.mxu2  ;;  %v2313_v47 = vsel %vm9336_vm6, %v9299_v58, %v2309_v0  ;;  %v6394_v0 = vld [vmem:[#allocation8 + $0x1f0] sm:$0xf] }
 0x1c1   : > { %v1447_v5 = vadd.f32 %v1446_v25, %v9249_v49  ;;  %v1495_v60 = vpop.f32.mrf.mxu3  ;;  %7160 = vrcp.f32 %v9328_v2  ;;  %v6742_v25 = vld [vmem:[#allocation8 + $0x54] sm:$0xf0]  ;;  %v2318_v39 = vsel %vm2315_vm7, %v2317_v6, %v2313_v47  ;;  %v6170_v61 = vld [vmem:[#allocation8 + $0x30] sm:$0xf]  ;;  %v3130_v6 = vunpack.c.l.b16 %v3082_v46 }
 0x1c2   : > { %v7157_v20 = vpop.eup %7156  ;;  %3589 = vmatpush.bf16.msrb.mxu0 %v6195_v48  ;;  %v6794_v48 = vld [vmem:[#allocation8 + $0x1f4] sm:$0xf0]  ;;  %vm2325_vm8 = vweird.f32 %v9328_v2 }
 0x1c3   : > { %v9320_v13 = vadd.f32 %v1495_v60, %v1447_v5  ;;  %v9348_v10 = vadd.f32 1.0, %v7157_v20  ;;  %v6187_v5 = vor.u32 %v6742_v25, %v6186_v26  ;;  %v6178_v60 = vld [vmem:[#allocation8 + $0x40] sm:$0xf]  ;;  %v7159_v21 = vpop.eup %7158  ;;  %v6395_v40 = vor.u32 %v6794_v48, %v6394_v0  ;;  %v6738_v20 = vld [vmem:[#allocation8 + $0x34] sm:$0xf0] }
 0x1c4   : > { %v6179_v8 = vor.u32 %v6740_v31, %v6178_v60  ;;  %v6762_v26 = vld [vmem:[#allocation8 + $0xf4] sm:$0xf0]  ;;  %v6171_v25 = vor.u32 %v6738_v20, %v6170_v61  ;;  %v6162_v60 = vld [vmem:[#allocation8 + $0x20] sm:$0xf]  ;;  %v6736_v31 = vld [vmem:[#allocation8 + $0x24] sm:$0xf0] }
 0x1c5   : > { %7162 = vrcp.f32 %v9348_v10  ;;  %3735 = vmatpush.bf16.msra.mxu3 %v6395_v40  ;;  %v6146_v48 = vld [vmem:[#allocation8] sm:$0xf]  ;;  %v2329_v40 = vand.u32 2147483647, %v9328_v2  ;;  %v2331_v61 = vand.u32 2147483648, %v9328_v2  ;;  %vm2340_vm12 = vweird.f32 %v9348_v10 }
 0x1c6   : > { %3590 = vmatpush.bf16.msrb.mxu0 %v6187_v5  ;;  %7164 = vtanh.f32 %v9242_v19 }
 0x1c7   : > { %v9353_v58 = vpop.eup %7160  ;;  %vm2330_vm11 = vcmp.eq.f32.partialorder %v2329_v40, 8.507059e+37  ;;  %7166 = vtanh.f32 %v9288_v29  ;;  %v6314_v29 = vld [vmem:[#allocation8 + $0x150] sm:$0xf] }
 0x1c8   : > { %v1448_v33 = vpop.f32.mrf.mxu2  ;;  %v2321_v44 = vmul.f32 %v9353_v58, %v9328_v2  ;;  %vm2326_vm9 = vweird.f32 %v9353_v58 }
 0x1c9   : > { %v1449_v42 = vadd.f32 %v1448_v33, %v9249_v49  ;;  %v1497_v56 = vpop.f32.mrf.mxu3  ;;  %v6331_v33 = vor.u32 %v6778_v54, %v6330_v51  ;;  %v12205_v51 = vld [vmem:[#allocation36_spill] sm:$0xff]  ;;  %v6163_v54 = vor.u32 %v6736_v31, %v6162_v60  ;;  %vm9388_vm10 = vmor %vm2325_vm8, %vm2326_vm9  ;;  %v2332_v60 = vor.u32 1.1754944e-38, %v2331_v61 }
 0x1ca   : > { %3591 = vmatpush.bf16.msrb.mxu0 %v6179_v8  ;;  %v6112_v61 = vmul.f32 -1.442695, %v9283_v34 }
 0x1cb   : > { %v9331_v52 = vadd.f32 %v1497_v56, %v1449_v42  ;;  %v2395_v42 = vmul.f32 %v7159_v21, %v2318_v39  ;;  %v9356_v56 = vpop.f32.mrf.mxu0  ;;  %3686 = vmatpush.bf16.msra.mxu2 %v6331_v33 }
 0x1cc   : > { %7168 = vpow2.f32 %v6112_v61  ;;  %v6378_v61 = vld [vmem:[#allocation8 + $0x1d0] sm:$0xf] }
 0x1cd   : > { %1646 = vmatmul.bf16.gmra.mxu2 %v12202_v50  ;;  %v3083_v36 = vpack.c.bf16 %v2395_v42, %v2395_v42 }
 0x1ce   : > { %1695 = vmatmul.bf16.gmra.mxu3 %v12203_v4  ;;  %3592 = vmatpush.bf16.msrb.mxu0 %v6171_v25 }
 0x1cf   : > { %v3131_v47 = vunpack.c.l.b16 %v3083_v36 }
 0x1d0   : > { %v1451_v14 = vpop.f32.mrf.mxu2 }
 0x1d1   : > { %v1452_v24 = vadd.f32 %v1451_v14, %v9249_v49  ;;  %v1500_v55 = vpop.f32.mrf.mxu3  ;;  %v9363_v14 = vpop.eup %7162  ;;  %v9367_v39 = vpack.c.b16 %v3131_v47, %v3130_v6  ;;  %v6732_v6 = vld [vmem:[#allocation8 + $0x4] sm:$0xf0]  ;;  %v6322_v47 = vld [vmem:[#allocation8 + $0x160] sm:$0xf] }
 0x1d2   : > { %v2336_v21 = vmul.f32 %v9363_v14, %v9348_v10  ;;  %3593 = vmatpush.bf16.msrb.mxu0 %v6163_v54  ;;  %vm2341_vm13 = vweird.f32 %v9363_v14  ;;  %v7165_v40 = vpop.eup %7164 }
 0x1d3   : > { %v9351_v30 = vadd.f32 %v1500_v55, %v1452_v24  ;;  %v2322_v24 = vsub.f32 1.0, %v2321_v44  ;;  %v6266_v55 = vld [vmem:[#allocation8 + $0xf0] sm:$0xf]  ;;  %12204 = vst [vmem:[#allocation40_spill] sm:$0xff] %v9367_v39  ;;  %v9374_v33 = vpop.f32.mrf.mxu0  ;;  %vm9413_vm14 = vmor %vm2340_vm12, %vm2341_vm13 }
 0x1d4   : > { %v6267_v5 = vor.u32 %v6762_v26, %v6266_v55  ;;  %v6154_v44 = vld [vmem:[#allocation8 + $0x10] sm:$0xf] }
 0x1d5   : > { %v2323_v8 = vmul.f32 %v9353_v58, %v2322_v24  ;;  %v6776_v24 = vld [vmem:[#allocation8 + $0x164] sm:$0xf0] }
 0x1d6   : > { %3637 = vmatpush.bf16.msrb.mxu1 %v6267_v5  ;;  %v6323_v26 = vor.u32 %v6776_v24, %v6322_v47  ;;  %v6147_v5 = vor.u32 %v6732_v6, %v6146_v48  ;;  %v2344_v48 = vand.u32 2147483647, %v9348_v10 }
 0x1d7   : > { %v2324_v55 = vadd.f32 %v9353_v58, %v2323_v8 }
 0x1d8   : > { %v1453_v41 = vpop.f32.mrf.mxu2  ;;  %3687 = vmatpush.bf16.msra.mxu2 %v6323_v26  ;;  %vm2345_vm15 = vcmp.eq.f32.partialorder %v2344_v48, 8.507059e+37 }
 0x1d9   : > { %v1454_v1 = vadd.f32 %v1453_v41, %v9249_v49  ;;  %v1502_v22 = vpop.f32.mrf.mxu3  ;;  %v6734_v41 = vld [vmem:[#allocation8 + $0x14] sm:$0xf0]  ;;  %v2328_v31 = vsel %vm9388_vm10, %v9353_v58, %v2324_v55  ;;  %v2346_v55 = vand.u32 2147483648, %v9348_v10 }
 0x1da   : > { %v6155_v0 = vor.u32 %v6734_v41, %v6154_v44  ;;  %v6258_v44 = vld [vmem:[#allocation8 + $0xe0] sm:$0xf]  ;;  %v6760_v41 = vld [vmem:[#allocation8 + $0xe4] sm:$0xf0]  ;;  %v2333_v58 = vsel %vm2330_vm11, %v2332_v60, %v2328_v31  ;;  %v6774_v31 = vld [vmem:[#allocation8 + $0x154] sm:$0xf0] }
 0x1db   : > { %v9365_v38 = vadd.f32 %v1502_v22, %v1454_v1  ;;  %v2337_v1 = vsub.f32 1.0, %v2336_v21  ;;  %v9379_v22 = vpop.f32.mrf.mxu1  ;;  %v9400_v19 = vpop.f32.mrf.mxu0  ;;  %v6259_v47 = vor.u32 %v6760_v41, %v6258_v44  ;;  %v2396_v34 = vmul.f32 %v7165_v40, %v2333_v58 }
 0x1dc   : > { %3594 = vmatpush.bf16.msrb.mxu0 %v6155_v0  ;;  %v2347_v26 = vor.u32 1.1754944e-38, %v2346_v55  ;;  %v6250_v55 = vld [vmem:[#allocation8 + $0xd0] sm:$0xf] }
 0x1dd   : > { %1651 = vmatmul.bf16.gmra.mxu2 %v8190_v62  ;;  %v2338_v21 = vmul.f32 %v9363_v14, %v2337_v1  ;;  %3638 = vmatpush.bf16.msrb.mxu1 %v6259_v47  ;;  %v3084_v41 = vpack.c.bf16 %v2396_v34, %v2396_v34  ;;  %v6790_v47 = vld [vmem:[#allocation8 + $0x1d4] sm:$0xf0] }
 0x1de   : > { %1700 = vmatmul.bf16.gmra.mxu3 %v12205_v51  ;;  %v6379_v24 = vor.u32 %v6790_v47, %v6378_v61  ;;  %v6290_v51 = vld [vmem:[#allocation8 + $0x120] sm:$0xf] }
 0x1df   : > { %v2339_v1 = vadd.f32 %v9363_v14, %v2338_v21  ;;  %v6315_v21 = vor.u32 %v6774_v31, %v6314_v29  ;;  %v6115_v31 = vmul.f32 -1.442695, %v9331_v52  ;;  %v6116_v52 = vmul.f32 -1.442695, %v9351_v30 }
 0x1e0   : > { %v1456_v42 = vpop.f32.mrf.mxu2  ;;  %3595 = vmatpush.bf16.msrb.mxu0 %v6147_v5 }
 0x1e1   : > { %v1457_v46 = vadd.f32 %v1456_v42, %v9249_v49  ;;  %v1505_v36 = vpop.f32.mrf.mxu3  ;;  %v6386_v42 = vld [vmem:[#allocation8 + $0x1e0] sm:$0xf]  ;;  %v2343_v25 = vsel %vm9413_vm14, %v9363_v14, %v2339_v1  ;;  %3688 = vmatpush.bf16.msra.mxu2 %v6315_v21  ;;  %v6113_v14 = vmul.f32 -1.442695, %v9301_v18  ;;  %v6114_v18 = vmul.f32 -1.442695, %v9320_v13 }
 0x1e3   : > { %v9383_v20 = vadd.f32 %v1505_v36, %v1457_v46  ;;  %v6792_v46 = vld [vmem:[#allocation8 + $0x1e4] sm:$0xf0]  ;;  %v9407_v6 = vpop.f32.mrf.mxu1  ;;  %3596 = vmatmul.bf16.vlgmr.msrb.gmra.mxu0 %v12190_v7  ;;  %7170 = vpow2.f32 %v6113_v14  ;;  %v6786_v7 = vld [vmem:[#allocation8 + $0x1b4] sm:$0xf0] }
 0x1e4   : > { %v6387_v36 = vor.u32 %v6792_v46, %v6386_v42  ;;  %v9428_v42 = vpop.f32.mrf.mxu0 }
 0x1e6   : > { %3736 = vmatpush.bf16.msra.mxu3 %v6387_v36 }
 0x1e8   : > { %v1458_v54 = vpop.f32.mrf.mxu2 }
 0x1e9   : > { %v1459_v2 = vadd.f32 %v1458_v54, %v9249_v49  ;;  %v1507_v8 = vpop.f32.mrf.mxu3  ;;  %v2348_v54 = vsel %vm2345_vm15, %v2347_v26, %v2343_v25  ;;  %v6758_v26 = vld [vmem:[#allocation8 + $0xd4] sm:$0xf0]  ;;  %v3132_v25 = vunpack.c.l.b16 %v3084_v41 }
 0x1ea   : > { %3737 = vmatpush.bf16.msra.mxu3 %v6379_v24 }
 0x1eb   : > { %v9402_v0 = vadd.f32 %v1507_v8, %v1459_v2  ;;  %v7167_v2 = vpop.eup %7166  ;;  %v9431_v44 = vpop.f32.mrf.mxu1 }
 0x1ec   : > { %v2397_v46 = vmul.f32 %v7167_v2, %v2348_v54  ;;  %v7169_v36 = vpop.eup %7168 }
 0x1ed   : > { %1656 = vmatmul.bf16.gmra.mxu2 %v8128_v12  ;;  %v9435_v48 = vadd.f32 1.0, %v7169_v36  ;;  %v7171_v29 = vpop.eup %7170  ;;  %v6772_v36 = vld [vmem:[#allocation8 + $0x144] sm:$0xf0] }
 0x1ee   : > { %1705 = vmatmul.bf16.gmra.mxu3 %v8130_v16  ;;  %v3085_v58 = vpack.c.bf16 %v2397_v46, %v2397_v46  ;;  %v6306_v46 = vld [vmem:[#allocation8 + $0x140] sm:$0xf]  ;;  %v9452_v41 = vadd.f32 1.0, %v7171_v29  ;;  %v6788_v29 = vld [vmem:[#allocation8 + $0x1c4] sm:$0xf0] }
 0x1ef   : > { %7172 = vrcp.f32 %v9435_v48  ;;  %v6307_v14 = vor.u32 %v6772_v36, %v6306_v46  ;;  %v6117_v36 = vmul.f32 -1.442695, %v9365_v38  ;;  %vm2467_vm1 = vweird.f32 %v9435_v48 }
 0x1f0   : > { %v1461_v5 = vpop.f32.mrf.mxu2  ;;  %7174 = vpow2.f32 %v6114_v18  ;;  %vm2482_vm4 = vweird.f32 %v9452_v41 }
 0x1f1   : > { %v1462_v10 = vadd.f32 %v1461_v5, %v9249_v49  ;;  %v1510_v60 = vpop.f32.mrf.mxu3  ;;  %v3133_v5 = vunpack.c.l.b16 %v3085_v58  ;;  %7176 = vpow2.f32 %v6115_v31  ;;  %3689 = vmatpush.bf16.msra.mxu2 %v6307_v14 }
 0x1f2   : > { %7178 = vrcp.f32 %v9452_v41 }
 0x1f3   : > { %v9426_v8 = vadd.f32 %v1510_v60, %v1462_v10  ;;  %v6251_v10 = vor.u32 %v6758_v26, %v6250_v55  ;;  %v9440_v34 = vpack.c.b16 %v3133_v5, %v3132_v25  ;;  %3601 = vmatmul.bf16.gmra.mxu0 %v12197_v45  ;;  %v9445_v60 = vpop.f32.mrf.mxu0  ;;  %v9449_v13 = vpop.f32.mrf.mxu1  ;;  %v9469_v5 = vperm.slane %v9246_v37, 4 }
 0x1f4   : > { %7180 = vpow2.f32 %v6116_v52 }
 0x1f5   : > { %12210 = vst [vmem:[#allocation41_spill] sm:$0xff] %v9440_v34  ;;  %3639 = vmatpush.bf16.msrb.mxu1 %v6251_v10  ;;  %v9456_v61 = vpop.eup %7172  ;;  %v6370_v10 = vld [vmem:[#allocation8 + $0x1c0] sm:$0xf]  ;;  %v1540_v34 = vadd.f32 %v9334_v57, %v9469_v5  ;;  %v1542_v57 = vadd.f32 %v9356_v56, %v9469_v5 }
 0x1f6   : > { %v7175_v47 = vpop.eup %7174  ;;  %v2463_v24 = vmul.f32 %v9456_v61, %v9435_v48  ;;  %vm2468_vm0 = vweird.f32 %v9456_v61 }
 0x1f7   : > { %v9462_v55 = vadd.f32 1.0, %v7175_v47  ;;  %v7177_v31 = vpop.eup %7176  ;;  %vm9516_vm2 = vmor %vm2467_vm1, %vm2468_vm0 }
 0x1f8   : > { %v9433_v1 = vpop.f32.mrf.mxu2  ;;  %v2464_v46 = vsub.f32 1.0, %v2463_v24  ;;  %v9477_v47 = vpop.eup %7178  ;;  %v9481_v39 = vadd.f32 1.0, %v7177_v31 }
 0x1f9   : > { %v9437_v40 = vpop.f32.mrf.mxu3  ;;  %7182 = vrcp.f32 %v9462_v55  ;;  %v2478_v38 = vmul.f32 %v9477_v47, %v9452_v41  ;;  %vm2483_vm6 = vweird.f32 %v9477_v47  ;;  %vm2497_vm8 = vweird.f32 %v9462_v55 }
 0x1fa   : > { %v7181_v52 = vpop.eup %7180  ;;  %v2465_v24 = vmul.f32 %v9456_v61, %v2464_v46  ;;  %7184 = vpow2.f32 %v6117_v36  ;;  %v2471_v36 = vand.u32 2147483647, %v9435_v48  ;;  %vm9574_vm7 = vmor %vm2482_vm4, %vm2483_vm6  ;;  %vm2512_vm13 = vweird.f32 %v9481_v39 }
 0x1fb   : > { %v9464_v26 = vpop.f32.mrf.mxu0  ;;  %v9473_v30 = vpop.f32.mrf.mxu1  ;;  %7186 = vrcp.f32 %v9481_v39 }
 0x1fc   : > { %v2466_v56 = vadd.f32 %v9456_v61, %v2465_v24  ;;  %vm9528_vm3 = vcmp.eq.f32.partialorder %v2471_v36, 8.507059e+37  ;;  %v6120_v36 = vmul.f32 -1.442695, %v9426_v8 }
 0x1fd   : > { %1661 = vmatmul.bf16.gmra.mxu2 %v8152_v23 }
 0x1fe   : > { %1710 = vmatmul.bf16.gmra.mxu3 %v8154_v27  ;;  %v2479_v27 = vsub.f32 1.0, %v2478_v38  ;;  %v2486_v38 = vand.u32 2147483647, %v9452_v41 }
 0x200   : > { %v1466_v21 = vpop.f32.mrf.mxu2  ;;  %vm9545_vm5 = vcmp.eq.f32.partialorder %v2486_v38, 8.507059e+37  ;;  %v6291_v38 = vor.u32 %v6768_v15, %v6290_v51 }
 0x201   : > { %v1467_v54 = vadd.f32 %v1466_v21, %v9249_v49  ;;  %v1515_v2 = vpop.f32.mrf.mxu3  ;;  %v6371_v21 = vor.u32 %v6788_v29, %v6370_v10  ;;  %v1589_v29 = vadd.f32 %v9379_v22, %v1540_v34  ;;  %v9500_v22 = vadd.f32 1.0, %v7181_v52 }
 0x203   : > { %v9454_v58 = vadd.f32 %v1515_v2, %v1467_v54  ;;  %v6242_v54 = vld [vmem:[#allocation8 + $0xc0] sm:$0xf]  ;;  %v6756_v2 = vld [vmem:[#allocation8 + $0xc4] sm:$0xf0]  ;;  %3738 = vmatpush.bf16.msra.mxu3 %v6371_v21  ;;  %3606 = vmatmul.bf16.gmra.mxu0 %v12202_v50  ;;  %v9497_v50 = vpop.f32.mrf.mxu0  ;;  %v9507_v45 = vpop.f32.mrf.mxu1  ;;  %7188 = vtanh.f32 %v1589_v29  ;;  %v1545_v29 = vadd.f32 %v9374_v33, %v9469_v5  ;;  %vm2527_vm1 = vweird.f32 %v9500_v22 }
 0x204   : > { %v6243_v14 = vor.u32 %v6756_v2, %v6242_v54  ;;  %v6298_v54 = vld [vmem:[#allocation8 + $0x130] sm:$0xf]  ;;  %v6770_v2 = vld [vmem:[#allocation8 + $0x134] sm:$0xf0] }
 0x205   : > { %v6299_v46 = vor.u32 %v6770_v2, %v6298_v54  ;;  %v1591_v54 = vadd.f32 %v9407_v6, %v1542_v57  ;;  %v6119_v6 = vmul.f32 -1.442695, %v9402_v0  ;;  %v2480_v2 = vmul.f32 %v9477_v47, %v2479_v27  ;;  %v6362_v0 = vld [vmem:[#allocation8 + $0x1b0] sm:$0xf]  ;;  %v6754_v27 = vld [vmem:[#allocation8 + $0xb4] sm:$0xf0] }
 0x206   : > { %3640 = vmatpush.bf16.msrb.mxu1 %v6243_v14  ;;  %v9494_v14 = vpop.eup %7182  ;;  %v1594_v9 = vadd.f32 %v9431_v44, %v1545_v29  ;;  %v2501_v29 = vand.u32 2147483647, %v9462_v55 }
 0x207   : > { %3690 = vmatpush.bf16.msra.mxu2 %v6299_v46  ;;  %v7185_v52 = vpop.eup %7184  ;;  %vm2498_vm9 = vweird.f32 %v9494_v14 }
 0x208   : > { %v9466_v25 = vpop.f32.mrf.mxu2  ;;  %v9514_v24 = vpop.eup %7186  ;;  %v9535_v16 = vadd.f32 1.0, %v7185_v52  ;;  %vm9593_vm10 = vcmp.eq.f32.partialorder %v2501_v29, 8.507059e+37  ;;  %v6210_v29 = vld [vmem:[#allocation8 + $0x80] sm:$0xf]  ;;  %vm9611_vm11 = vmor %vm2497_vm8, %vm2498_vm9 }
 0x209   : > { %v9471_v18 = vpop.f32.mrf.mxu3  ;;  %vm2513_vm12 = vweird.f32 %v9514_v24 }
 0x20a   : > { %vm9650_vm14 = vmor %vm2512_vm13, %vm2513_vm12  ;;  %vm2542_vm4 = vweird.f32 %v9535_v16 }
 0x20b   : > { %v9554_v8 = vpop.f32.mrf.mxu0  ;;  %3691 = vmatpush.bf16.msra.mxu2 %v6291_v38 }
 0x20d   : > { %1666 = vmatmul.bf16.gmra.mxu2 %v8172_v32 }
 0x20e   : > { %1715 = vmatmul.bf16.gmra.mxu3 %v12170_v35  ;;  %v6118_v35 = vmul.f32 -1.442695, %v9383_v20  ;;  %v2493_v20 = vmul.f32 %v9494_v14, %v9462_v55 }
 0x210   : > { %v1471_v10 = vpop.f32.mrf.mxu2  ;;  %7190 = vpow2.f32 %v6118_v35  ;;  %v2494_v63 = vsub.f32 1.0, %v2493_v20  ;;  %v6226_v35 = vld [vmem:[#allocation8 + $0xa0] sm:$0xf] }
 0x211   : > { %v1472_v31 = vadd.f32 %v1471_v10, %v9249_v49  ;;  %v1520_v21 = vpop.f32.mrf.mxu3  ;;  %v2473_v10 = vand.u32 2147483648, %v9435_v48  ;;  %7192 = vrcp.f32 %v9500_v22  ;;  %v2470_v48 = vsel %vm9516_vm2, %v9456_v61, %v2466_v56 }
 0x212   : > { %7194 = vtanh.f32 %v1591_v54  ;;  %v2508_v61 = vmul.f32 %v9514_v24, %v9481_v39  ;;  %v6363_v56 = vor.u32 %v6786_v7, %v6362_v0  ;;  %v2481_v7 = vadd.f32 %v9477_v47, %v2480_v2  ;;  %v6282_v0 = vld [vmem:[#allocation8 + $0x110] sm:$0xf]  ;;  %v6766_v2 = vld [vmem:[#allocation8 + $0x114] sm:$0xf0] }
 0x213   : > { %v9502_v34 = vadd.f32 %v1520_v21, %v1472_v31  ;;  %v2488_v21 = vand.u32 2147483648, %v9452_v41  ;;  %v2474_v57 = vor.u32 1.1754944e-38, %v2473_v10  ;;  %v6234_v10 = vld [vmem:[#allocation8 + $0xb0] sm:$0xf]  ;;  %v7189_v31 = vpop.eup %7188  ;;  %7196 = vpow2.f32 %v6119_v6  ;;  %3611 = vmatmul.bf16.gmra.mxu0 %v8190_v62 }
 0x214   : > { %3739 = vmatpush.bf16.msra.mxu3 %v6363_v56  ;;  %v2495_v44 = vmul.f32 %v9494_v14, %v2494_v63  ;;  %7198 = vrcp.f32 %v9535_v16  ;;  %v1464_v6 = vadd.f32 %v9433_v1, %v9249_v49  ;;  %v2509_v51 = vsub.f32 1.0, %v2508_v61  ;;  %v9565_v56 = vpop.f32.mrf.mxu1  ;;  %v6274_v1 = vld [vmem:[#allocation8 + $0x100] sm:$0xf] }
 0x215   : > { %v2475_v20 = vsel %vm9528_vm3, %v2474_v57, %v2470_v48  ;;  %v9549_v52 = vor.u32 1.1754944e-38, %v2488_v21  ;;  %v6235_v48 = vor.u32 %v6754_v27, %v6234_v10  ;;  %v6752_v57 = vld [vmem:[#allocation8 + $0xa4] sm:$0xf0]  ;;  %7200 = vpow2.f32 %v6120_v36 }
 0x216   : > { %v3022_v15 = vmul.f32 %v7189_v31, %v2475_v20  ;;  %v6227_v63 = vor.u32 %v6752_v57, %v6226_v35  ;;  %v2503_v27 = vand.u32 2147483648, %v9462_v55  ;;  %v1547_v61 = vadd.f32 %v9400_v19, %v9469_v5 }
 0x217   : > { %3641 = vmatpush.bf16.msrb.mxu1 %v6235_v48  ;;  %v6283_v31 = vor.u32 %v6766_v2, %v6282_v0  ;;  %v2485_v20 = vsel %vm9574_vm7, %v9477_v47, %v2481_v7  ;;  %7202 = vtanh.f32 %v1594_v9  ;;  %v2496_v57 = vadd.f32 %v9494_v14, %v2495_v44  ;;  %v6218_v0 = vld [vmem:[#allocation8 + $0x90] sm:$0xf]  ;;  %v6750_v2 = vld [vmem:[#allocation8 + $0x94] sm:$0xf0]  ;;  %v6764_v44 = vld [vmem:[#allocation8 + $0x104] sm:$0xf0] }
 0x218   : > { %v9533_v46 = vpop.f32.mrf.mxu2  ;;  %v1513_v19 = vadd.f32 %v9437_v40, %v1464_v6  ;;  %7204 = vtanh.f32 %v3022_v15  ;;  %v2510_v9 = vmul.f32 %v9514_v24, %v2509_v51  ;;  %v6219_v7 = vor.u32 %v6750_v2, %v6218_v0  ;;  %v6748_v15 = vld [vmem:[#allocation8 + $0x84] sm:$0xf0] }
 0x219   : > { %v9537_v33 = vpop.f32.mrf.mxu3  ;;  %v2504_v62 = vor.u32 1.1754944e-38, %v2503_v27  ;;  %v1596_v40 = vadd.f32 %v9449_v13, %v1547_v61  ;;  %3692 = vmatpush.bf16.msra.mxu2 %v6283_v31  ;;  %v2490_v51 = vsel %vm9545_vm5, %v9549_v52, %v2485_v20  ;;  %v6275_v61 = vor.u32 %v6764_v44, %v6274_v1 }
 0x21a   : > { %12215 = vst [vmem:[#allocation42_spill] sm:$0xff] %v9537_v33  ;;  %v7191_v33 = vpop.eup %7190  ;;  %v2500_v31 = vsel %vm9611_vm11, %v9494_v14, %v2496_v57  ;;  %v1550_v54 = vadd.f32 %v9428_v42, %v9469_v5  ;;  %v6121_v52 = vmul.f32 -1.442695, %v1513_v19  ;;  %v2511_v55 = vadd.f32 %v9514_v24, %v2510_v9 }
 0x21b   : > { %v9556_v21 = vpop.eup %7192  ;;  %v9581_v36 = vadd.f32 1.0, %v7191_v33  ;;  %3642 = vmatpush.bf16.msrb.mxu1 %v6227_v63  ;;  %v2505_v19 = vsel %vm9593_vm10, %v2504_v62, %v2500_v31  ;;  %v1552_v2 = vadd.f32 %v9445_v60, %v9469_v5  ;;  %v6354_v31 = vld [vmem:[#allocation8 + $0x1a0] sm:$0xf]  ;;  %v1555_v47 = vadd.f32 %v9464_v26, %v9469_v5 }
 0x21c   : > { %v9568_v10 = vpop.eup %7194  ;;  %v2523_v41 = vmul.f32 %v9556_v21, %v9500_v22  ;;  %v9641_v9 = vpop.f32.mrf.mxu1  ;;  %v1599_v62 = vadd.f32 %v9473_v30, %v1550_v54  ;;  %v2515_v60 = vsel %vm9650_vm14, %v9514_v24, %v2511_v55  ;;  %vm2528_vm0 = vweird.f32 %v9556_v21 }
 0x21d   : > { %1671 = vmatmul.bf16.gmra.mxu2 %v12181_v59  ;;  %v7197_v35 = vpop.eup %7196  ;;  %7206 = vrcp.f32 %v9581_v36  ;;  %v3023_v1 = vmul.f32 %v9568_v10, %v2490_v51  ;;  %v1601_v24 = vadd.f32 %v9507_v45, %v1552_v2  ;;  %vm9679_vm2 = vmor %vm2527_vm1, %vm2528_vm0  ;;  %vm2557_vm9 = vweird.f32 %v9581_v36 }
 0x21e   : > { %1720 = vmatmul.bf16.gmra.mxu3 %v12182_v3  ;;  %v9598_v3 = vpop.eup %7198  ;;  %v2524_v63 = vsub.f32 1.0, %v2523_v41  ;;  %v9615_v13 = vadd.f32 1.0, %v7197_v35  ;;  %v2518_v41 = vand.u32 2147483648, %v9481_v39  ;;  %v9626_v35 = vpop.f32.mrf.mxu0  ;;  %7208 = vtanh.f32 %v1596_v40  ;;  %3693 = vmatpush.bf16.msra.mxu2 %v6275_v61 }
 0x21f   : > { %3643 = vmatpush.bf16.msrb.mxu1 %v6219_v7  ;;  %v2538_v14 = vmul.f32 %v9598_v3, %v9535_v16  ;;  %v9670_v61 = vperm.slane %v9246_v37, 5  ;;  %vm2543_vm5 = vweird.f32 %v9598_v3 }
 0x220   : > { %v1476_v48 = vpop.f32.mrf.mxu2  ;;  %v2525_v0 = vmul.f32 %v9556_v21, %v2524_v63  ;;  %7210 = vrcp.f32 %v9615_v13  ;;  %v2519_v40 = vor.u32 1.1754944e-38, %v2518_v41  ;;  %vm9728_vm7 = vmor %vm2542_vm4, %vm2543_vm5  ;;  %vm2572_vm12 = vweird.f32 %v9615_v13 }
 0x221   : > { %v1477_v33 = vadd.f32 %v1476_v48, %v9249_v49  ;;  %v1525_v38 = vpop.f32.mrf.mxu3  ;;  %v7201_v48 = vpop.eup %7200  ;;  %7212 = vpow2.f32 %v6121_v52 }
 0x222   : > { %v7203_v20 = vpop.eup %7202  ;;  %v9631_v57 = vadd.f32 1.0, %v7201_v48  ;;  %v2533_v48 = vand.u32 2147483648, %v9500_v22  ;;  %v2526_v51 = vadd.f32 %v9556_v21, %v2525_v0 }
 0x223   : > { %v9602_v6 = vadd.f32 %v1525_v38, %v1477_v33  ;;  %v2516_v33 = vand.u32 2147483647, %v9481_v39  ;;  %v6211_v38 = vor.u32 %v6748_v15, %v6210_v29  ;;  %v9633_v42 = vpop.eup %7204  ;;  %v2531_v29 = vand.u32 2147483647, %v9500_v22  ;;  %3616 = vmatmul.bf16.gmra.mxu0 %v8128_v12 }
 0x224   : > { %v9645_v39 = vpop.eup %7206  ;;  %v3024_v10 = vmul.f32 %v7203_v20, %v2505_v19  ;;  %v2539_v15 = vsub.f32 1.0, %v2538_v14  ;;  %7214 = vrcp.f32 %v9631_v57  ;;  %v2534_v55 = vor.u32 1.1754944e-38, %v2533_v48 }
 0x225   : > { %vm2517_vm15 = vcmp.eq.f32.partialorder %v2516_v33, 8.507059e+37  ;;  %3644 = vmatpush.bf16.msrb.mxu1 %v6211_v38  ;;  %v2553_v30 = vmul.f32 %v9645_v39, %v9581_v36  ;;  %v7209_v63 = vpop.eup %7208  ;;  %7216 = vtanh.f32 %v1599_v62  ;;  %v6784_v33 = vld [vmem:[#allocation8 + $0x1a4] sm:$0xf0]  ;;  %vm9683_vm3 = vcmp.eq.f32.partialorder %v2531_v29, 8.507059e+37 }
 0x226   : > { %v2520_v27 = vsel %vm2517_vm15, %v2519_v40, %v2515_v60  ;;  %v9673_v54 = vpop.eup %7210  ;;  %7218 = vtanh.f32 %v3023_v1  ;;  %v6355_v45 = vor.u32 %v6784_v33, %v6354_v31  ;;  %v2540_v41 = vmul.f32 %v9598_v3, %v2539_v15  ;;  %v9691_v19 = vpop.f32.mrf.mxu0 }
 0x227   : > { %v7213_v52 = vpop.eup %7212  ;;  %7220 = vtanh.f32 %v3024_v10  ;;  %v3025_v38 = vmul.f32 %v7209_v63, %v2520_v27  ;;  %v2554_v22 = vsub.f32 1.0, %v2553_v30  ;;  %v2530_v14 = vsel %vm9679_vm2, %v9556_v21, %v2526_v51  ;;  %v1608_v10 = vpop.f32.mrf.mxu1 }
 0x228   : > { %v9643_v7 = vpop.f32.mrf.mxu2  ;;  %3645 = vmatmul.bf16.vlgmr.msrb.gmra.mxu1 %v12193_v28  ;;  %7222 = vtanh.f32 %v1601_v24  ;;  %3740 = vmatpush.bf16.msra.mxu3 %v6355_v45  ;;  %v2546_v1 = vand.u32 2147483647, %v9535_v16  ;;  %v6122_v62 = vmul.f32 -1.442695, %v9454_v58  ;;  %v2568_v21 = vmul.f32 %v9673_v54, %v9615_v13 }
 0x229   : > { %v9655_v44 = vpop.f32.mrf.mxu3  ;;  %v9704_v29 = vadd.f32 1.0, %v7213_v52  ;;  %v2535_v48 = vsel %vm9683_vm3, %v2534_v55, %v2530_v14  ;;  %v2541_v26 = vadd.f32 %v9598_v3, %v2540_v41  ;;  %v1557_v58 = vadd.f32 %v9497_v50, %v9469_v5 }
 0x22a   : > { %v9693_v2 = vpop.eup %7214  ;;  %7224 = vtanh.f32 %v3025_v38  ;;  %v2548_v24 = vand.u32 2147483648, %v9535_v16  ;;  %v2555_v27 = vmul.f32 %v9645_v39, %v2554_v22  ;;  %vm9719_vm6 = vcmp.eq.f32.partialorder %v2546_v1, 8.507059e+37 }
 0x22b   : > { %v7217_v15 = vpop.eup %7216  ;;  %v2583_v63 = vmul.f32 %v9693_v2, %v9631_v57  ;;  %v1604_v45 = vadd.f32 %v9565_v56, %v1555_v47  ;;  %7226 = vpow2.f32 %v6122_v62  ;;  %v2569_v37 = vsub.f32 1.0, %v2568_v21 }
 0x22c   : > { %v9711_v51 = vpop.eup %7218  ;;  %v3026_v20 = vmul.f32 %v7217_v15, %v2535_v48  ;;  %v2561_v41 = vand.u32 2147483647, %v9581_v36  ;;  %7228 = vrcp.f32 %v9704_v29  ;;  %v2545_v56 = vsel %vm9728_vm7, %v9598_v3, %v2541_v26  ;;  %v6782_v48 = vld [vmem:[#allocation8 + $0x194] sm:$0xf0] }
 0x22d   : > { %3694 = vmatmul.bf16.vlgmr.msra.gmra.mxu2 %v8901_v43  ;;  %v9717_v31 = vpop.eup %7220  ;;  %v2563_v38 = vand.u32 2147483648, %v9581_v36  ;;  %v1606_v22 = vadd.f32 %v9641_v9, %v1557_v58  ;;  %v2549_v14 = vor.u32 1.1754944e-38, %v2548_v24  ;;  %v2556_v16 = vadd.f32 %v9645_v39, %v2555_v27  ;;  %v6196_v58 = vld [vmem:[#allocation8 + $0x68] sm:$0xf0] }
 0x22e   : > { %v7223_v52 = vpop.eup %7222  ;;  %vm2558_vm8 = vweird.f32 %v9645_v39  ;;  %v1560_v47 = vadd.f32 %v9554_v8, %v9469_v5  ;;  %v2570_v21 = vmul.f32 %v9673_v54, %v2569_v37  ;;  %v1469_v15 = vadd.f32 %v9466_v25, %v9249_v49  ;;  %v9752_v36 = vpop.f32.mrf.mxu0 }
 0x22f   : > { %v2550_v9 = vsel %vm9719_vm6, %v2549_v14, %v2545_v56  ;;  %vm9756_vm10 = vmor %vm2557_vm9, %vm2558_vm8  ;;  %vm9760_vm11 = vcmp.eq.f32.partialorder %v2561_v41, 8.507059e+37  ;;  %v1610_v33 = vpop.f32.mrf.mxu1  ;;  %v2576_v37 = vand.u32 2147483647, %v9615_v13  ;;  %vm2573_vm13 = vweird.f32 %v9673_v54 }
 0x230   : > { %v1637_v0 = vpop.f32.mrf.mxu2  ;;  %v2560_v25 = vsel %vm9756_vm10, %v9645_v39, %v2556_v16  ;;  %v1609_v55 = vadd.f32 %v1608_v10, %v1560_v47  ;;  %v2571_v56 = vadd.f32 %v9673_v54, %v2570_v21  ;;  %v1518_v39 = vadd.f32 %v9471_v18, %v1469_v15  ;;  %vm9796_vm15 = vmor %vm2572_vm12, %vm2573_vm13 }
 0x231   : > { %v1638_v60 = vadd.f32 %v1637_v0, %v9670_v61  ;;  %v1686_v40 = vpop.f32.mrf.mxu3  ;;  %v2584_v0 = vsub.f32 1.0, %v2583_v63  ;;  %vm2588_vm14 = vweird.f32 %v9693_v2  ;;  %vm2587_vm0 = vweird.f32 %v9631_v57 }
 0x232   : > { %v2575_v21 = vsel %vm9796_vm15, %v9673_v54, %v2571_v56  ;;  %v2591_v15 = vand.u32 2147483647, %v9631_v57  ;;  %vm9811_vm1 = vmor %vm2587_vm0, %vm2588_vm14  ;;  %vm2577_vm2 = vcmp.eq.f32.partialorder %v2576_v37, 8.507059e+37  ;;  %vm2602_vm4 = vweird.f32 %v9704_v29 }
 0x233   : > { %v1687_v30 = vadd.f32 %v1686_v40, %v1638_v60  ;;  %v6346_v60 = vld [vmem:[#allocation8 + $0x190] sm:$0xf]  ;;  %v9745_v40 = vpop.eup %7224  ;;  %v2585_v27 = vmul.f32 %v9693_v2, %v2584_v0  ;;  %3621 = vmatmul.bf16.gmra.mxu0 %v8152_v23  ;;  %v6761_v23 = vld [vmem:[#allocation8 + $0xf4] sm:$0xf] }
 0x234   : > { %v7227_v26 = vpop.eup %7226  ;;  %vm2592_vm3 = vcmp.eq.f32.partialorder %v2591_v15, 8.507059e+37  ;;  %v6204_v15 = vld [vmem:[#allocation8 + $0x78] sm:$0xf0] }
 0x235   : > { %v6128_v50 = vmul.f32 -1.442695, %v1687_v30  ;;  %v2564_v30 = vor.u32 1.1754944e-38, %v2563_v38  ;;  %v9764_v63 = vpop.eup %7228  ;;  %v9788_v18 = vadd.f32 1.0, %v7227_v26  ;;  %v2586_v16 = vadd.f32 %v9693_v2, %v2585_v27 }
 0x236   : > { %v2598_v0 = vmul.f32 %v9764_v63, %v9704_v29  ;;  %v9819_v54 = vpop.f32.mrf.mxu0  ;;  %vm2603_vm5 = vweird.f32 %v9764_v63 }
 0x237   : > { %7230 = vpow2.f32 %v6128_v50  ;;  %v2565_v10 = vsel %vm9760_vm11, %v2564_v30, %v2560_v25  ;;  %vm9864_vm6 = vmor %vm2602_vm4, %vm2603_vm5  ;;  %vm2617_vm11 = vweird.f32 %v9788_v18 }
 0x238   : > { %v1639_v1 = vpop.f32.mrf.mxu2  ;;  %7232 = vtanh.f32 %v1604_v45  ;;  %v6347_v45 = vor.u32 %v6782_v48, %v6346_v60  ;;  %3650 = vmatmul.bf16.gmra.mxu1 %v12198_v17  ;;  %v6123_v48 = vmul.f32 -1.442695, %v1518_v39  ;;  %v6172_v17 = vld [vmem:[#allocation8 + $0x38] sm:$0xf0] }
 0x239   : > { %v1640_v3 = vadd.f32 %v1639_v1, %v9670_v61  ;;  %v1688_v62 = vpop.f32.mrf.mxu3  ;;  %7234 = vtanh.f32 %v3026_v20  ;;  %v3027_v20 = vmul.f32 %v7223_v52, %v2550_v9 }
 0x23a   : > { %7236 = vtanh.f32 %v1606_v22  ;;  %3741 = vmatpush.bf16.msra.mxu3 %v6347_v45  ;;  %v2578_v22 = vand.u32 2147483648, %v9615_v13  ;;  %v1562_v13 = vadd.f32 %v9626_v35, %v9469_v5  ;;  %v1565_v45 = vadd.f32 %v9691_v19, %v9469_v5 }
 0x23b   : > { %v1689_v24 = vadd.f32 %v1688_v62, %v1640_v3  ;;  %v2593_v62 = vand.u32 2147483648, %v9631_v57  ;;  %v2590_v57 = vsel %vm9811_vm1, %v9693_v2, %v2586_v16  ;;  %v6780_v3 = vld [vmem:[#allocation8 + $0x184] sm:$0xf0] }
 0x23c   : > { %v2579_v8 = vor.u32 1.1754944e-38, %v2578_v22  ;;  %v1611_v37 = vadd.f32 %v1610_v33, %v1562_v13 }
 0x23d   : > { %v7231_v50 = vpop.eup %7230  ;;  %v6129_v41 = vmul.f32 -1.442695, %v1689_v24  ;;  %3699 = vmatmul.bf16.gmra.mxu2 %v9003_v11  ;;  %v2599_v24 = vsub.f32 1.0, %v2598_v0  ;;  %v2594_v27 = vor.u32 1.1754944e-38, %v2593_v62 }
 0x23e   : > { %v9777_v38 = vadd.f32 1.0, %v7231_v50  ;;  %v7233_v52 = vpop.eup %7232  ;;  %v2580_v25 = vsel %vm2577_vm2, %v2579_v8, %v2575_v21  ;;  %v6745_v21 = vld [vmem:[#allocation8 + $0x74] sm:$0xf]  ;;  %v6743_v8 = vld [vmem:[#allocation8 + $0x64] sm:$0xf] }
 0x23f   : > { %7238 = vpow2.f32 %v6129_v41  ;;  %v9784_v14 = vpop.eup %7234  ;;  %v3028_v26 = vmul.f32 %v7233_v52, %v2565_v10  ;;  %v2595_v2 = vsel %vm2592_vm3, %v2594_v27, %v2590_v57  ;;  %v2600_v52 = vmul.f32 %v9764_v63, %v2599_v24 }
 0x240   : > { %7240 = vrcp.f32 %v9777_v38  ;;  %v1642_v1 = vpop.f32.mrf.mxu2  ;;  %v7237_v47 = vpop.eup %7236  ;;  %v6124_v57 = vmul.f32 -1.442695, %v9502_v34  ;;  %v6739_v34 = vld [vmem:[#allocation8 + $0x44] sm:$0xf]  ;;  %vm2787_vm10 = vweird.f32 %v9777_v38 }
 0x241   : > { %7242 = vtanh.f32 %v1609_v55  ;;  %v1643_v60 = vadd.f32 %v1642_v1, %v9670_v61  ;;  %v1691_v9 = vpop.f32.mrf.mxu3  ;;  %v1613_v55 = vpop.f32.mrf.mxu1  ;;  %v3029_v39 = vmul.f32 %v7237_v47, %v2580_v25  ;;  %v6338_v1 = vld [vmem:[#allocation8 + $0x180] sm:$0xf]  ;;  %v9840_v24 = vadd.f32 %v9764_v63, %v2600_v52 }
 0x242   : > { %7244 = vtanh.f32 %v3027_v20  ;;  %v1614_v19 = vadd.f32 %v1613_v55, %v1565_v45  ;;  %v9855_v55 = vpop.f32.mrf.mxu0 }
 0x243   : > { %v1692_v30 = vadd.f32 %v1691_v9, %v1643_v60  ;;  %7246 = vrcp.f32 %v9788_v18  ;;  %v2608_v60 = vand.u32 2147483648, %v9704_v29  ;;  %v6339_v9 = vor.u32 %v6780_v3, %v6338_v1  ;;  %3626 = vmatmul.bf16.gmra.mxu0 %v8172_v32 }
 0x244   : > { %7248 = vpow2.f32 %v6123_v48  ;;  %v2606_v48 = vand.u32 2147483647, %v9704_v29 }
 0x245   : > { %v7239_v35 = vpop.eup %7238  ;;  %v6130_v50 = vmul.f32 -1.442695, %v1692_v30  ;;  %7250 = vtanh.f32 %v3028_v26  ;;  %v6207_v26 = vor.u32 %v6745_v21, %v6204_v15  ;;  %3742 = vmatpush.bf16.msra.mxu3 %v6339_v9  ;;  %v6741_v21 = vld [vmem:[#allocation8 + $0x54] sm:$0xf]  ;;  %v6188_v15 = vld [vmem:[#allocation8 + $0x58] sm:$0xf0] }
 0x246   : > { %v9823_v20 = vpop.eup %7240  ;;  %v9825_v41 = vadd.f32 1.0, %v7239_v35  ;;  %vm9894_vm7 = vcmp.eq.f32.partialorder %v2606_v48, 8.507059e+37 }
 0x247   : > { %v7243_v56 = vpop.eup %7242  ;;  %v2783_v0 = vmul.f32 %v9823_v20, %v9777_v38  ;;  %3784 = vmatpush.bf16.msra.mxu0 %v6207_v26  ;;  %v2791_v26 = vand.u32 2147483647, %v9777_v38  ;;  %vm2788_vm8 = vweird.f32 %v9823_v20 }
 0x248   : > { %7252 = vrcp.f32 %v9825_v41  ;;  %v1644_v10 = vpop.f32.mrf.mxu2  ;;  %v9829_v22 = vpop.eup %7244  ;;  %v3030_v47 = vmul.f32 %v7243_v56, %v2595_v2  ;;  %3655 = vmatmul.bf16.gmra.mxu1 %v12203_v4  ;;  %v6199_v56 = vor.u32 %v6743_v8, %v6196_v58  ;;  %v2793_v8 = vand.u32 2147483648, %v9777_v38  ;;  %vm9917_vm12 = vmor %vm2787_vm10, %vm2788_vm8 }
 0x249   : > { %7254 = vpow2.f32 %v6130_v50  ;;  %v1645_v33 = vadd.f32 %v1644_v10, %v9670_v61  ;;  %v1693_v16 = vpop.f32.mrf.mxu3  ;;  %v9834_v62 = vpop.eup %7246  ;;  %v2784_v27 = vsub.f32 1.0, %v2783_v0  ;;  %v1474_v10 = vadd.f32 %v9533_v46, %v9249_v49 }
 0x24a   : > { %7256 = vtanh.f32 %v1611_v37  ;;  %v7249_v30 = vpop.eup %7248  ;;  %v2613_v25 = vmul.f32 %v9834_v62, %v9788_v18  ;;  %v9852_v37 = vor.u32 1.1754944e-38, %v2608_v60  ;;  %v2808_v48 = vand.u32 2147483648, %v9825_v41  ;;  %v9927_v38 = vpop.f32.mrf.mxu0 }
 0x24b   : > { %v1694_v13 = vadd.f32 %v1693_v16, %v1645_v33  ;;  %7258 = vtanh.f32 %v3029_v39  ;;  %v9844_v35 = vpop.eup %7250  ;;  %v9858_v39 = vadd.f32 1.0, %v7249_v30  ;;  %v9881_v16 = vadd.f32 %v9752_v36, %v9469_v5  ;;  %3785 = vmatpush.bf16.msra.mxu0 %v6199_v56  ;;  %v6777_v30 = vld [vmem:[#allocation8 + $0x174] sm:$0xf]  ;;  %v6332_v33 = vld [vmem:[#allocation8 + $0x178] sm:$0xf0] }
 0x24c   : > { %7260 = vtanh.f32 %v1614_v19  ;;  %v2614_v46 = vsub.f32 1.0, %v2613_v25  ;;  %v2785_v3 = vmul.f32 %v9823_v20, %v2784_v27  ;;  %v6191_v36 = vor.u32 %v6741_v21, %v6188_v15  ;;  %v12246_v27 = vld [vmem:[#allocation42_spill] sm:$0xff] }
 0x24d   : > { %v6131_v45 = vmul.f32 -1.442695, %v1694_v13  ;;  %3704 = vmatmul.bf16.gmra.mxu2 %v9094_v53  ;;  %7262 = vtanh.f32 %v3030_v47  ;;  %v2806_v21 = vand.u32 2147483647, %v9825_v41  ;;  %v6335_v15 = vor.u32 %v6777_v30, %v6332_v33 }
 0x24e   : > { %v9850_v50 = vpop.eup %7252  ;;  %v2786_v32 = vadd.f32 %v9823_v20, %v2785_v3  ;;  %vm9921_vm13 = vcmp.eq.f32.partialorder %v2791_v26, 8.507059e+37  ;;  %vm2802_vm14 = vweird.f32 %v9825_v41  ;;  %vm2618_vm1 = vweird.f32 %v9834_v62 }
 0x24f   : > { %v7255_v2 = vpop.eup %7254  ;;  %v2798_v19 = vmul.f32 %v9850_v50, %v9825_v41  ;;  %7264 = vpow2.f32 %v6131_v45  ;;  %v1523_v45 = vadd.f32 %v12246_v27, %v1474_v10  ;;  %vm2803_vm9 = vweird.f32 %v9850_v50  ;;  %3786 = vmatpush.bf16.msra.mxu0 %v6191_v36  ;;  %3882 = vmatpush.bf16.msrb.mxu2 %v6335_v15  ;;  %vm9987_vm3 = vmor %vm2617_vm11, %vm2618_vm1 }
 0x250   : > { %v9872_v0 = vpop.eup %7256  ;;  %7266 = vpow2.f32 %v6124_v57  ;;  %v1647_v1 = vpop.f32.mrf.mxu2  ;;  %v9889_v58 = vadd.f32 1.0, %v7255_v2  ;;  %v6180_v2 = vld [vmem:[#allocation8 + $0x48] sm:$0xf0]  ;;  %vm9931_vm15 = vmor %vm2802_vm14, %vm2803_vm9  ;;  %vm2807_vm0 = vcmp.eq.f32.partialorder %v2806_v21, 8.507059e+37  ;;  %v12255_v25 = vand.u32 2147483647, %v9788_v18 }
 0x251   : > { %v2799_v47 = vsub.f32 1.0, %v2798_v19  ;;  %v1648_v60 = vadd.f32 %v1647_v1, %v9670_v61  ;;  %v1696_v9 = vpop.f32.mrf.mxu3  ;;  %v9885_v13 = vpop.eup %7258  ;;  %7268 = vrcp.f32 %v9858_v39  ;;  %v6183_v53 = vor.u32 %v6739_v34, %v6180_v2  ;;  %v6396_v2 = vld [vmem:[#allocation8 + $0x1f8] sm:$0xf0]  ;;  %v6164_v34 = vld [vmem:[#allocation8 + $0x28] sm:$0xf0] }
 0x252   : > { %v9891_v57 = vpop.eup %7260  ;;  %v1615_v19 = vpop.f32.mrf.mxu1  ;;  %v6125_v33 = vmul.f32 -1.442695, %v1523_v45  ;;  %7270 = vrcp.f32 %v9889_v58  ;;  %vm9968_vm2 = vcmp.eq.f32.partialorder %v12255_v25, 8.507059e+37 }
 0x253   : > { %v2800_v1 = vmul.f32 %v9850_v50, %v2799_v47  ;;  %v1697_v29 = vadd.f32 %v1696_v9, %v1648_v60  ;;  %v9900_v56 = vpop.eup %7262  ;;  %v2615_v9 = vmul.f32 %v9834_v62, %v2614_v46  ;;  %v2809_v46 = vor.u32 1.1754944e-38, %v2808_v48  ;;  %3787 = vmatpush.bf16.msra.mxu0 %v6183_v53 }
 0x254   : > { %v1616_v21 = vadd.f32 %v1615_v19, %v9881_v16  ;;  %v12253_v53 = vsel %vm9864_vm6, %v9764_v63, %v9840_v24  ;;  %3631 = vmatmul.bf16.gmra.mxu0 %v12181_v59  ;;  %vm2632_vm6 = vweird.f32 %v9858_v39 }
 0x255   : > { %v7265_v4 = vpop.eup %7264  ;;  %v2801_v10 = vadd.f32 %v9850_v50, %v2800_v1  ;;  %v6132_v47 = vmul.f32 -1.442695, %v1697_v29  ;;  %v6793_v1 = vld [vmem:[#allocation8 + $0x1f4] sm:$0xf]  ;;  %v2610_v16 = vsel %vm9894_vm7, %v9852_v37, %v12253_v53  ;;  %v2616_v19 = vadd.f32 %v9834_v62, %v2615_v9 }
 0x256   : > { %v9908_v60 = vpop.eup %7266  ;;  %v9912_v27 = vadd.f32 1.0, %v7265_v4  ;;  %v2794_v4 = vor.u32 1.1754944e-38, %v2793_v8  ;;  %v2790_v8 = vsel %vm9917_vm12, %v9823_v20, %v2786_v32  ;;  %v12259_v9 = vld [vmem:[#allocation36_spill] sm:$0xff]  ;;  %vm2817_vm7 = vweird.f32 %v9889_v58 }
 0x257   : > { %7272 = vpow2.f32 %v6132_v47  ;;  %v9935_v36 = vpop.eup %7268  ;;  %v2805_v45 = vsel %vm9931_vm15, %v9850_v50, %v2801_v10  ;;  %v6399_v47 = vor.u32 %v6793_v1, %v6396_v2  ;;  %v6268_v50 = vld [vmem:[#allocation8 + $0xf8] sm:$0xf0]  ;;  %v6735_v10 = vld [vmem:[#allocation8 + $0x24] sm:$0xf]  ;;  %v9981_v2 = vadd.f32 1.0, %v9908_v60 }
 0x258   : > { %v1649_v26 = vpop.f32.mrf.mxu2  ;;  %7274 = vrcp.f32 %v9912_v27  ;;  %v2795_v48 = vsel %vm9921_vm13, %v2794_v4, %v2790_v8  ;;  %v2810_v15 = vsel %vm2807_vm0, %v2809_v46, %v2805_v45  ;;  %v12254_v4 = vld [vmem:[#allocation34_spill] sm:$0xff]  ;;  %3660 = vmatmul.bf16.gmra.mxu1 %v12259_v9  ;;  %v2628_v1 = vmul.f32 %v9935_v36, %v9858_v39 }
 0x259   : > { %v1650_v41 = vadd.f32 %v1649_v26, %v9670_v61  ;;  %v1698_v30 = vpop.f32.mrf.mxu3  ;;  %v6737_v26 = vld [vmem:[#allocation8 + $0x34] sm:$0xf]  ;;  %v3054_v32 = vmul.f32 %v9633_v42, %v2795_v48  ;;  %v3055_v20 = vmul.f32 %v9711_v51, %v2810_v15  ;;  %v1570_v42 = vadd.f32 %v9819_v54, %v9469_v5  ;;  %3931 = vmatpush.bf16.msrb.mxu3 %v6399_v47 }
 0x25a   : > { %v6175_v3 = vor.u32 %v6737_v26, %v6172_v17  ;;  %v6271_v51 = vor.u32 %v6761_v23, %v6268_v50  ;;  %v9961_v17 = vpop.eup %7270  ;;  %v1618_v29 = vpop.f32.mrf.mxu1  ;;  %v12258_v23 = vand.u32 2147483648, %v9788_v18  ;;  %7276 = vpow2.f32 %v6125_v33  ;;  %v6733_v18 = vld [vmem:[#allocation8 + $0x14] sm:$0xf] }
 0x25b   : > { %v1699_v11 = vadd.f32 %v1698_v30, %v1650_v41  ;;  %v3086_v63 = vpack.c.bf16 %v3054_v32, %v3054_v32  ;;  %v3087_v24 = vpack.c.bf16 %v3055_v20, %v3055_v20  ;;  %v3031_v30 = vmul.f32 %v9872_v0, %v2610_v16  ;;  %v6156_v20 = vld [vmem:[#allocation8 + $0x18] sm:$0xf0]  ;;  %v10000_v50 = vpop.f32.mrf.mxu0  ;;  %v6148_v16 = vld [vmem:[#allocation8 + $0x8] sm:$0xf0] }
 0x25c   : > { %v2624_v54 = vor.u32 1.1754944e-38, %v12258_v23  ;;  %3788 = vmatpush.bf16.msra.mxu0 %v6175_v3  ;;  %3833 = vmatpush.bf16.msra.mxu1 %v6271_v51  ;;  %v1619_v0 = vadd.f32 %v1618_v29, %v1570_v42  ;;  %v2620_v15 = vsel %vm9987_vm3, %v9834_v62, %v2616_v19  ;;  %v2813_v47 = vmul.f32 %v9961_v17, %v9889_v58  ;;  %v6775_v42 = vld [vmem:[#allocation8 + $0x164] sm:$0xf]  ;;  %v6324_v51 = vld [vmem:[#allocation8 + $0x168] sm:$0xf0] }
 0x25d   : > { %v6133_v52 = vmul.f32 -1.442695, %v1699_v11  ;;  %3709 = vmatmul.bf16.gmra.mxu2 %v12254_v4  ;;  %v7273_v37 = vpop.eup %7272  ;;  %v6167_v11 = vor.u32 %v6735_v10, %v6164_v34  ;;  %v3166_v8 = vunpack.c.l.b16 %v3086_v63  ;;  %v3167_v45 = vunpack.c.l.b16 %v3087_v24  ;;  %v6731_v34 = vld [vmem:[#allocation8 + $0x4] sm:$0xf] }
 0x25e   : > { %v9975_v41 = vpop.eup %7274  ;;  %v2638_v3 = vand.u32 2147483648, %v9858_v39  ;;  %v10004_v10 = vadd.f32 1.0, %v7273_v37  ;;  %v6159_v62 = vor.u32 %v6733_v18, %v6156_v20  ;;  %v2629_v29 = vsub.f32 1.0, %v2628_v1  ;;  %v6791_v18 = vld [vmem:[#allocation8 + $0x1e4] sm:$0xf] }
 0x25f   : > { %7278 = vpow2.f32 %v6133_v52  ;;  %v9997_v32 = vpack.c.b16 %v3167_v45, %v3166_v8  ;;  %v2625_v52 = vsel %vm9968_vm2, %v2624_v54, %v2620_v15  ;;  %v6327_v63 = vor.u32 %v6775_v42, %v6324_v51  ;;  %v6388_v20 = vld [vmem:[#allocation8 + $0x1e8] sm:$0xf0] }
 0x260   : > { %7280 = vtanh.f32 %v1616_v21  ;;  %v1652_v48 = vpop.f32.mrf.mxu2  ;;  %v2828_v21 = vmul.f32 %v9975_v41, %v9912_v27  ;;  %3789 = vmatpush.bf16.msra.mxu0 %v6167_v11  ;;  %v7277_v19 = vpop.eup %7276  ;;  %v2636_v37 = vand.u32 2147483647, %v9858_v39  ;;  %v2814_v25 = vsub.f32 1.0, %v2813_v47 }
 0x261   : > { %v1653_v60 = vadd.f32 %v1652_v48, %v9670_v61  ;;  %v1701_v26 = vpop.f32.mrf.mxu3  ;;  %7282 = vtanh.f32 %v3031_v30  ;;  %3743 = vmatmul.bf16.vlgmr.msra.gmra.mxu3 %v9997_v32  ;;  %v6151_v45 = vor.u32 %v6731_v34, %v6148_v16  ;;  %3883 = vmatpush.bf16.msrb.mxu2 %v6327_v63  ;;  %v10016_v46 = vmul.f32 %v9891_v57, %v2625_v52  ;;  %v6260_v16 = vld [vmem:[#allocation8 + $0xe8] sm:$0xf0] }
 0x262   : > { %7284 = vtanh.f32 %v1619_v0  ;;  %v2829_v11 = vsub.f32 1.0, %v2828_v21  ;;  %v10018_v54 = vor.u32 1.1754944e-38, %v2638_v3  ;;  %v1572_v1 = vadd.f32 %v9855_v55, %v9469_v5 }
 0x263   : > { %v1702_v53 = vadd.f32 %v1701_v26, %v1653_v60  ;;  %7286 = vrcp.f32 %v9981_v2  ;;  %v10023_v33 = vadd.f32 1.0, %v7277_v19  ;;  %v2630_v0 = vmul.f32 %v9935_v36, %v2629_v29  ;;  %v10038_v21 = vpop.f32.mrf.mxu0 }
 0x264   : > { %3790 = vmatpush.bf16.msra.mxu0 %v6159_v62  ;;  %7288 = vrcp.f32 %v10004_v10  ;;  %vm2633_vm4 = vweird.f32 %v9935_v36  ;;  %v2823_v15 = vand.u32 2147483648, %v9889_v58  ;;  %v2815_v55 = vmul.f32 %v9961_v17, %v2814_v25 }
 0x265   : > { %v7279_v24 = vpop.eup %7278  ;;  %v6134_v8 = vmul.f32 -1.442695, %v1702_v53  ;;  %vm2818_vm5 = vweird.f32 %v9961_v17  ;;  %v2821_v26 = vand.u32 2147483647, %v9889_v58  ;;  %v2830_v34 = vmul.f32 %v9975_v41, %v2829_v11  ;;  %v6759_v53 = vld [vmem:[#allocation8 + $0xe4] sm:$0xf]  ;;  %v1620_v11 = vpop.f32.mrf.mxu1  ;;  %vm10098_vm15 = vmor %vm2632_vm6, %vm2633_vm4 }
 0x266   : > { %v10011_v23 = vpop.eup %7280  ;;  %v10013_v30 = vadd.f32 1.0, %v7279_v24  ;;  %v2824_v62 = vor.u32 1.1754944e-38, %v2823_v15  ;;  %v2816_v19 = vadd.f32 %v9961_v17, %v2815_v55  ;;  %vm2832_vm8 = vweird.f32 %v9912_v27  ;;  %vm10049_vm10 = vmor %vm2817_vm7, %vm2818_vm5 }
 0x267   : > { %v10029_v57 = vpop.eup %7282  ;;  %vm2833_vm9 = vweird.f32 %v9975_v41  ;;  %v2831_v58 = vadd.f32 %v9975_v41, %v2830_v34  ;;  %v2836_v52 = vand.u32 2147483647, %v9912_v27  ;;  %v2838_v63 = vand.u32 2147483648, %v9912_v27 }
 0x268   : > { %7290 = vrcp.f32 %v10013_v30  ;;  %v1654_v48 = vpop.f32.mrf.mxu2  ;;  %v10035_v3 = vpop.eup %7284  ;;  %3791 = vmatpush.bf16.msra.mxu0 %v6151_v45  ;;  %v6391_v24 = vor.u32 %v6791_v18, %v6388_v20  ;;  %v12264_v45 = vld [vmem:[#allocation24_spill] sm:$0xff]  ;;  %vm2822_vm11 = vcmp.eq.f32.partialorder %v2821_v26, 8.507059e+37  ;;  %vm10062_vm12 = vmor %vm2832_vm8, %vm2833_vm9  ;;  %vm10070_vm13 = vcmp.eq.f32.partialorder %v2636_v37, 8.507059e+37  ;;  %v12270_v20 = vld [vmem:[#allocation23_spill] sm:$0xff] }
 0x269   : > { %v1655_v47 = vadd.f32 %v1654_v48, %v9670_v61  ;;  %v1703_v60 = vpop.f32.mrf.mxu3  ;;  %7292 = vpow2.f32 %v6134_v8  ;;  %v10042_v42 = vpop.eup %7286  ;;  %v2820_v48 = vsel %vm10049_vm10, %v9961_v17, %v2816_v19  ;;  %v2653_v18 = vand.u32 2147483648, %v9981_v2  ;;  %3665 = vmatmul.bf16.gmra.mxu1 %v12270_v20 }
 0x26a   : > { %v10056_v25 = vpop.eup %7288  ;;  %7294 = vrcp.f32 %v10023_v33  ;;  %v2825_v17 = vsel %vm2822_vm11, %v2824_v62, %v2820_v48  ;;  %v2835_v26 = vsel %vm10062_vm12, %v9975_v41, %v2831_v58  ;;  %3932 = vmatpush.bf16.msrb.mxu3 %v6391_v24  ;;  %v2643_v34 = vmul.f32 %v10042_v42, %v9981_v2  ;;  %v6316_v48 = vld [vmem:[#allocation8 + $0x158] sm:$0xf0] }
 0x26b   : > { %v1704_v51 = vadd.f32 %v1703_v60, %v1655_v47  ;;  %v12267_v47 = vld [vmem:[#allocation22_spill] sm:$0xff]  ;;  %v6263_v60 = vor.u32 %v6759_v53, %v6260_v16  ;;  %v2839_v53 = vor.u32 1.1754944e-38, %v2838_v63  ;;  %v3056_v37 = vmul.f32 %v9717_v31, %v2825_v17  ;;  %v6773_v31 = vld [vmem:[#allocation8 + $0x154] sm:$0xf] }
 0x26c   : > { %3792 = vmatmul.bf16.vlgmr.msra.gmra.mxu0 %v12267_v47  ;;  %v6126_v19 = vmul.f32 -1.442695, %v9602_v6  ;;  %v1621_v29 = vadd.f32 %v1620_v11, %v1572_v1  ;;  %vm2837_vm14 = vcmp.eq.f32.partialorder %v2836_v52, 8.507059e+37  ;;  %v2843_v41 = vmul.f32 %v10056_v25, %v10004_v10  ;;  %v10091_v1 = vpop.f32.mrf.mxu0  ;;  %v6757_v47 = vld [vmem:[#allocation8 + $0xd4] sm:$0xf] }
 0x26d   : > { %v6135_v8 = vmul.f32 -1.442695, %v1704_v51  ;;  %3714 = vmatmul.bf16.gmra.mxu2 %v12264_v45  ;;  %3834 = vmatpush.bf16.msra.mxu1 %v6263_v60  ;;  %v2631_v51 = vadd.f32 %v9935_v36, %v2630_v0  ;;  %v2651_v15 = vand.u32 2147483647, %v9981_v2  ;;  %v3088_v6 = vpack.c.bf16 %v3056_v37, %v3056_v37 }
 0x26e   : > { %v10067_v27 = vpop.eup %7290  ;;  %v6319_v52 = vor.u32 %v6773_v31, %v6316_v48  ;;  %v2644_v11 = vsub.f32 1.0, %v2643_v34  ;;  %v1479_v60 = vadd.f32 %v9643_v7, %v9249_v49  ;;  %v2844_v37 = vsub.f32 1.0, %v2843_v41  ;;  %v6380_v48 = vld [vmem:[#allocation8 + $0x1d8] sm:$0xf0] }
 0x26f   : > { %7296 = vpow2.f32 %v6135_v8  ;;  %v7293_v16 = vpop.eup %7292  ;;  %v2858_v58 = vmul.f32 %v10067_v27, %v10013_v30  ;;  %v2840_v8 = vsel %vm2837_vm14, %v2839_v53, %v2835_v26  ;;  %v2635_v26 = vsel %vm10098_vm15, %v9935_v36, %v2631_v51 }
 0x270   : > { %v1657_v62 = vpop.f32.mrf.mxu2  ;;  %v3057_v0 = vmul.f32 %v9745_v40, %v2840_v8  ;;  %7298 = vtanh.f32 %v10016_v46  ;;  %v10104_v40 = vpop.eup %7294  ;;  %v10109_v46 = vadd.f32 1.0, %v7293_v16  ;;  %3884 = vmatpush.bf16.msrb.mxu2 %v6319_v52  ;;  %v10111_v53 = vor.u32 1.1754944e-38, %v2653_v18 }
 0x271   : > { %v1658_v24 = vadd.f32 %v1657_v62, %v9670_v61  ;;  %v1706_v63 = vpop.f32.mrf.mxu3  ;;  %7300 = vtanh.f32 %v1621_v29  ;;  %v2859_v62 = vsub.f32 1.0, %v2858_v58  ;;  %v3168_v7 = vunpack.c.l.b16 %v3088_v6 }
 0x272   : > { %v3089_v34 = vpack.c.bf16 %v3057_v0, %v3057_v0  ;;  %7302 = vpow2.f32 %v6126_v19  ;;  %v2640_v36 = vsel %vm10070_vm13, %v10018_v54, %v2635_v26  ;;  %v2645_v16 = vmul.f32 %v10042_v42, %v2644_v11 }
 0x273   : > { %v1707_v17 = vadd.f32 %v1706_v63, %v1658_v24  ;;  %v10117_v63 = vmul.f32 %v10104_v40, %v10023_v33  ;;  %v1528_v18 = vadd.f32 %v9655_v44, %v1479_v60  ;;  %7304 = vrcp.f32 %v10109_v46  ;;  %v6789_v44 = vld [vmem:[#allocation8 + $0x1d4] sm:$0xf]  ;;  %v6252_v60 = vld [vmem:[#allocation8 + $0xd8] sm:$0xf0] }
 0x274   : > { %v3169_v24 = vunpack.c.l.b16 %v3089_v34  ;;  %v2851_v29 = vand.u32 2147483647, %v10004_v10  ;;  %v2853_v41 = vand.u32 2147483648, %v10004_v10  ;;  %v2845_v31 = vmul.f32 %v10056_v25, %v2844_v37  ;;  %v10139_v6 = vpop.f32.mrf.mxu0 }
 0x275   : > { %v7297_v39 = vpop.eup %7296  ;;  %v6136_v49 = vmul.f32 -1.442695, %v1707_v17  ;;  %vm2848_vm0 = vweird.f32 %v10056_v25  ;;  %vm2647_vm1 = vweird.f32 %v9981_v2  ;;  %vm2847_vm2 = vweird.f32 %v10004_v10 }
 0x276   : > { %v10113_v8 = vadd.f32 1.0, %v7297_v39  ;;  %v10125_v51 = vpack.c.b16 %v3169_v24, %v3168_v7  ;;  %v10129_v58 = vpop.eup %7298  ;;  %v2854_v52 = vor.u32 1.1754944e-38, %v2853_v41  ;;  %v2860_v11 = vmul.f32 %v10067_v27, %v2859_v62  ;;  %vm10148_vm5 = vmor %vm2847_vm2, %vm2848_vm0  ;;  %v12275_v24 = vld [vmem:[#allocation39_spill] sm:$0xff] }
 0x277   : > { %v10135_v0 = vpop.eup %7300  ;;  %v2846_v34 = vadd.f32 %v10056_v25, %v2845_v31  ;;  %vm2862_vm3 = vweird.f32 %v10013_v30  ;;  %vm2863_vm4 = vweird.f32 %v10067_v27  ;;  %v2866_v37 = vand.u32 2147483647, %v10013_v30 }
 0x278   : > { %v1659_v19 = vpop.f32.mrf.mxu2  ;;  %7306 = vrcp.f32 %v10113_v8  ;;  %3748 = vmatmul.bf16.gmra.mxu3 %v10125_v51  ;;  %v7303_v17 = vpop.eup %7302  ;;  %v2861_v10 = vadd.f32 %v10067_v27, %v2860_v11  ;;  %v2868_v62 = vand.u32 2147483648, %v10013_v30  ;;  %vm2852_vm6 = vcmp.eq.f32.partialorder %v2851_v29, 8.507059e+37  ;;  %vm10159_vm7 = vmor %vm2862_vm3, %vm2863_vm4 }
 0x279   : > { %v1660_v55 = vadd.f32 %v1659_v19, %v9670_v61  ;;  %v1708_v54 = vpop.f32.mrf.mxu3  ;;  %7308 = vpow2.f32 %v6136_v49  ;;  %v6383_v49 = vor.u32 %v6789_v44, %v6380_v48  ;;  %v2850_v19 = vsel %vm10148_vm5, %v10056_v25, %v2846_v34  ;;  %v10164_v31 = vpop.eup %7304  ;;  %v12281_v25 = vld [vmem:[#allocation27_spill] sm:$0xff] }
 0x27a   : > { %v3033_v30 = vmul.f32 %v10011_v23, %v2640_v36  ;;  %vm2648_vm8 = vweird.f32 %v10042_v42  ;;  %vm10170_vm9 = vcmp.eq.f32.partialorder %v2651_v15, 8.507059e+37  ;;  %3670 = vmatmul.bf16.gmra.mxu1 %v12281_v25  ;;  %v2855_v29 = vsel %vm2852_vm6, %v2854_v52, %v2850_v19 }
 0x27b   : > { %v1709_v26 = vadd.f32 %v1708_v54, %v1660_v55  ;;  %v12278_v55 = vld [vmem:[#allocation25_spill] sm:$0xff]  ;;  %v6255_v54 = vor.u32 %v6757_v47, %v6252_v60  ;;  %v2865_v48 = vsel %vm10159_vm7, %v10067_v27, %v2861_v10  ;;  %3933 = vmatpush.bf16.msrb.mxu3 %v6383_v49  ;;  %v2668_v23 = vand.u32 2147483648, %v10023_v33  ;;  %vm10198_vm11 = vmor %vm2647_vm1, %vm2648_vm8 }
 0x27c   : > { %3797 = vmatmul.bf16.gmra.mxu0 %v12278_v55  ;;  %v2869_v36 = vor.u32 1.1754944e-38, %v2868_v62  ;;  %v3058_v47 = vmul.f32 %v9784_v14, %v2855_v29  ;;  %v10182_v60 = vadd.f32 1.0, %v7303_v17  ;;  %v6127_v52 = vmul.f32 -1.442695, %v1528_v18  ;;  %v6308_v14 = vld [vmem:[#allocation8 + $0x148] sm:$0xf0]  ;;  %v10192_v18 = vpop.f32.mrf.mxu0 }
 0x27d   : > { %v6137_v7 = vmul.f32 -1.442695, %v1709_v26  ;;  %3719 = vmatmul.bf16.gmra.mxu2 %v12275_v24  ;;  %3835 = vmatpush.bf16.msra.mxu1 %v6255_v54  ;;  %v2646_v26 = vadd.f32 %v10042_v42, %v2645_v16  ;;  %vm2867_vm10 = vcmp.eq.f32.partialorder %v2866_v37, 8.507059e+37  ;;  %v2659_v27 = vsub.f32 1.0, %v10117_v63 }
 0x27e   : > { %v10178_v11 = vpop.eup %7306  ;;  %v2873_v39 = vmul.f32 %v10164_v31, %v10109_v46  ;;  %v2870_v62 = vsel %vm2867_vm10, %v2869_v36, %v2865_v48  ;;  %v3090_v16 = vpack.c.bf16 %v3058_v47, %v3058_v47  ;;  %v2666_v41 = vand.u32 2147483647, %v10023_v33 }
 0x27f   : > { %7310 = vpow2.f32 %v6137_v7  ;;  %v7309_v15 = vpop.eup %7308  ;;  %v6771_v7 = vld [vmem:[#allocation8 + $0x144] sm:$0xf]  ;;  %v2888_v17 = vmul.f32 %v10178_v11, %v10113_v8  ;;  %v3059_v19 = vmul.f32 %v9829_v22, %v2870_v62  ;;  %v10203_v55 = vor.u32 1.1754944e-38, %v2668_v23 }
 0x280   : > { %v1662_v34 = vpop.f32.mrf.mxu2  ;;  %v6311_v37 = vor.u32 %v6771_v7, %v6308_v14  ;;  %7312 = vtanh.f32 %v3033_v30  ;;  %v2650_v22 = vsel %vm10198_vm11, %v10042_v42, %v2646_v26  ;;  %v10208_v29 = vadd.f32 1.0, %v7309_v15  ;;  %v6372_v14 = vld [vmem:[#allocation8 + $0x1c8] sm:$0xf0] }
 0x281   : > { %v1663_v10 = vadd.f32 %v1662_v34, %v9670_v61  ;;  %v1711_v49 = vpop.f32.mrf.mxu3  ;;  %7314 = vpow2.f32 %v6127_v52  ;;  %v3091_v30 = vpack.c.bf16 %v3059_v19, %v3059_v19  ;;  %v2660_v2 = vmul.f32 %v10104_v40, %v2659_v27 }
 0x282   : > { %3885 = vmatpush.bf16.msrb.mxu2 %v6311_v37  ;;  %7316 = vrcp.f32 %v10182_v60  ;;  %v2874_v36 = vsub.f32 1.0, %v2873_v39  ;;  %v2889_v34 = vsub.f32 1.0, %v2888_v17  ;;  %v2655_v42 = vsel %vm10170_vm9, %v10111_v53, %v2650_v22  ;;  %v6244_v22 = vld [vmem:[#allocation8 + $0xc8] sm:$0xf0] }
 0x283   : > { %v1712_v54 = vadd.f32 %v1711_v49, %v1663_v10  ;;  %v3170_v10 = vunpack.c.l.b16 %v3090_v16  ;;  %v3171_v49 = vunpack.c.l.b16 %v3091_v30  ;;  %vm2662_vm12 = vweird.f32 %v10023_v33  ;;  %v1623_v16 = vpop.f32.mrf.mxu1 }
 0x284   : > { %vm2663_vm13 = vweird.f32 %v10104_v40  ;;  %v1575_v15 = vadd.f32 %v9927_v38, %v9469_v5  ;;  %v2881_v27 = vand.u32 2147483647, %v10109_v46  ;;  %v2883_v39 = vand.u32 2147483648, %v10109_v46  ;;  %v6787_v38 = vld [vmem:[#allocation8 + $0x1c4] sm:$0xf] }
 0x285   : > { %v7311_v48 = vpop.eup %7310  ;;  %v6138_v47 = vmul.f32 -1.442695, %v1712_v54  ;;  %v10222_v26 = vpack.c.b16 %v3171_v49, %v3170_v10  ;;  %v2875_v7 = vmul.f32 %v10164_v31, %v2874_v36  ;;  %vm2878_vm14 = vweird.f32 %v10164_v31  ;;  %v6755_v54 = vld [vmem:[#allocation8 + $0xc4] sm:$0xf]  ;;  %vm10285_vm6 = vmor %vm2662_vm12, %vm2663_vm13 }
 0x286   : > { %v10212_v23 = vadd.f32 1.0, %v7311_v48  ;;  %v10226_v62 = vpop.eup %7312  ;;  %v10233_v19 = vadd.f32 %v10104_v40, %v2660_v2  ;;  %vm2877_vm15 = vweird.f32 %v10109_v46  ;;  %v2884_v37 = vor.u32 1.1754944e-38, %v2883_v39  ;;  %v6300_v46 = vld [vmem:[#allocation8 + $0x138] sm:$0xf0] }
 0x287   : > { %7318 = vpow2.f32 %v6138_v47  ;;  %12284 = vst [vmem:[#allocation42_spill] sm:$0xff] %v10222_v26  ;;  %v7315_v17 = vpop.eup %7314  ;;  %v2890_v63 = vmul.f32 %v10178_v11, %v2889_v34  ;;  %v2876_v36 = vadd.f32 %v10164_v31, %v2875_v7  ;;  %vm2892_vm0 = vweird.f32 %v10113_v8  ;;  %v10247_v47 = vpop.f32.mrf.mxu0  ;;  %vm10251_vm3 = vmor %vm2877_vm15, %vm2878_vm14 }
 0x288   : > { %7320 = vrcp.f32 %v10208_v29  ;;  %v1664_v52 = vpop.f32.mrf.mxu2  ;;  %3753 = vmatmul.bf16.gmra.mxu3 %v10222_v26  ;;  %v10238_v30 = vpop.eup %7316  ;;  %vm2893_vm1 = vweird.f32 %v10178_v11  ;;  %vm10243_vm2 = vcmp.eq.f32.partialorder %v2666_v41, 8.507059e+37  ;;  %12287 = vst [vmem:[#allocation34_spill] sm:$0xff] %v10247_v47  ;;  %v2896_v10 = vand.u32 2147483647, %v10113_v8  ;;  %v12293_v26 = vld [vmem:[#allocation29_spill] sm:$0xff] }
 0x289   : > { %7322 = vrcp.f32 %v10212_v23  ;;  %v1665_v53 = vadd.f32 %v1664_v52, %v9670_v61  ;;  %v1713_v44 = vpop.f32.mrf.mxu3  ;;  %v2891_v34 = vadd.f32 %v10178_v11, %v2890_v63  ;;  %v2898_v49 = vand.u32 2147483648, %v10113_v8  ;;  %vm10262_vm5 = vmor %vm2892_vm0, %vm2893_vm1 }
 0x28a   : > { %v6375_v52 = vor.u32 %v6787_v38, %v6372_v14  ;;  %vm2882_vm4 = vcmp.eq.f32.partialorder %v2881_v27, 8.507059e+37  ;;  %v6247_v63 = vor.u32 %v6755_v54, %v6244_v22  ;;  %v1624_v8 = vadd.f32 %v1623_v16, %v1575_v15  ;;  %v12294_v14 = vld [vmem:[#allocation31_spill] sm:$0xff]  ;;  %v6769_v22 = vld [vmem:[#allocation8 + $0x134] sm:$0xf] }
 0x28b   : > { %v1714_v48 = vadd.f32 %v1713_v44, %v1665_v53  ;;  %v12290_v53 = vld [vmem:[#allocation40_spill] sm:$0xff]  ;;  %v2880_v44 = vsel %vm10251_vm3, %v10164_v31, %v2876_v36  ;;  %3675 = vmatmul.bf16.gmra.mxu1 %v12294_v14  ;;  %v2895_v31 = vsel %vm10262_vm5, %v10178_v11, %v2891_v34  ;;  %v3034_v36 = vmul.f32 %v10035_v3, %v2655_v42  ;;  %v1625_v7 = vpop.f32.mrf.mxu1 }
 0x28c   : > { %3802 = vmatmul.bf16.gmra.mxu0 %v12293_v26  ;;  %3934 = vmatpush.bf16.msrb.mxu3 %v6375_v52  ;;  %v2899_v26 = vor.u32 1.1754944e-38, %v2898_v49  ;;  %v10279_v15 = vadd.f32 1.0, %v7315_v17  ;;  %v2683_v11 = vand.u32 2147483648, %v10182_v60  ;;  %vm2897_vm7 = vcmp.eq.f32.partialorder %v2896_v10, 8.507059e+37 }
 0x28d   : > { %v7319_v39 = vpop.eup %7318  ;;  %v6139_v41 = vmul.f32 -1.442695, %v1714_v48  ;;  %3724 = vmatmul.bf16.gmra.mxu2 %v12290_v53  ;;  %v2885_v48 = vsel %vm2882_vm4, %v2884_v37, %v2880_v44  ;;  %3836 = vmatpush.bf16.msra.mxu1 %v6247_v63  ;;  %v6303_v52 = vor.u32 %v6769_v22, %v6300_v46  ;;  %vm2907_vm9 = vweird.f32 %v10208_v29 }
 0x28e   : > { %v10267_v47 = vpop.eup %7320  ;;  %v10269_v38 = vadd.f32 1.0, %v7319_v39  ;;  %v3060_v54 = vmul.f32 %v9844_v35, %v2885_v48  ;;  %v2665_v35 = vsel %vm10285_vm6, %v10104_v40, %v10233_v19  ;;  %v2900_v37 = vsel %vm2897_vm7, %v2899_v26, %v2895_v31 }
 0x28f   : > { %v10275_v27 = vpop.eup %7322  ;;  %7324 = vpow2.f32 %v6139_v41  ;;  %v2903_v42 = vmul.f32 %v10267_v47, %v10208_v29  ;;  %v3061_v49 = vmul.f32 %v9885_v13, %v2900_v37  ;;  %v10303_v39 = vmul.f32 %v10238_v30, %v10182_v60  ;;  %3886 = vmatpush.bf16.msrb.mxu2 %v6303_v52  ;;  %v10318_v16 = vpop.f32.mrf.mxu0  ;;  %v12303_v41 = vld [vmem:[#allocation41_spill] sm:$0xff] }
 0x290   : > { %7326 = vrcp.f32 %v10269_v38  ;;  %v1667_v3 = vpop.f32.mrf.mxu2  ;;  %v2918_v34 = vmul.f32 %v10275_v27, %v10212_v23  ;;  %v3092_v10 = vpack.c.bf16 %v3060_v54, %v3060_v54  ;;  %v1577_v40 = vadd.f32 %v10000_v50, %v9469_v5  ;;  %12297 = vst [vmem:[#allocation36_spill] sm:$0xff] %v10318_v16 }
 0x291   : > { %v1668_v33 = vadd.f32 %v1667_v3, %v9670_v61  ;;  %v1716_v17 = vpop.f32.mrf.mxu3  ;;  %7328 = vtanh.f32 %v1624_v8  ;;  %v10308_v44 = vor.u32 1.1754944e-38, %v2683_v11  ;;  %v3093_v63 = vpack.c.bf16 %v3061_v49, %v3061_v49  ;;  %v6364_v49 = vld [vmem:[#allocation8 + $0x1b8] sm:$0xf0] }
 0x292   : > { %7330 = vtanh.f32 %v3034_v36  ;;  %v2670_v48 = vsel %vm10243_vm2, %v10203_v55, %v2665_v35  ;;  %v2904_v8 = vsub.f32 1.0, %v2903_v42  ;;  %v2919_v5 = vsub.f32 1.0, %v2918_v34 }
 0x293   : > { %v1717_v19 = vadd.f32 %v1716_v17, %v1668_v33  ;;  %7332 = vrcp.f32 %v10279_v15  ;;  %v3172_v36 = vunpack.c.l.b16 %v3092_v10  ;;  %v3173_v54 = vunpack.c.l.b16 %v3093_v63  ;;  %v6236_v63 = vld [vmem:[#allocation8 + $0xb8] sm:$0xf0] }
 0x294   : > { %v10321_v3 = vadd.f32 %v1625_v7, %v1577_v40  ;;  %v2911_v33 = vand.u32 2147483647, %v10208_v29  ;;  %v10325_v55 = vmul.f32 %v10135_v0, %v2670_v48  ;;  %v2913_v42 = vand.u32 2147483648, %v10208_v29  ;;  %v6785_v0 = vld [vmem:[#allocation8 + $0x1b4] sm:$0xf] }
 0x295   : > { %v7325_v13 = vpop.eup %7324  ;;  %v6140_v31 = vmul.f32 -1.442695, %v1717_v19  ;;  %v10328_v2 = vpack.c.b16 %v3173_v54, %v3172_v36  ;;  %v2905_v34 = vmul.f32 %v10267_v47, %v2904_v8  ;;  %vm2908_vm8 = vweird.f32 %v10267_v47  ;;  %v6753_v7 = vld [vmem:[#allocation8 + $0xb4] sm:$0xf]  ;;  %v6292_v29 = vld [vmem:[#allocation8 + $0x128] sm:$0xf0] }
 0x296   : > { %v10314_v26 = vpop.eup %7326  ;;  %v10316_v50 = vadd.f32 1.0, %v7325_v13  ;;  %vm10344_vm10 = vcmp.eq.f32.partialorder %v2911_v33, 8.507059e+37  ;;  %v2914_v40 = vor.u32 1.1754944e-38, %v2913_v42  ;;  %v2920_v19 = vmul.f32 %v10275_v27, %v2919_v5  ;;  %v6751_v36 = vld [vmem:[#allocation8 + $0xa4] sm:$0xf]  ;;  %vm10356_vm13 = vmor %vm2907_vm9, %vm2908_vm8  ;;  %v12307_v54 = vld [vmem:[#allocation35_spill] sm:$0xff] }
 0x297   : > { %7334 = vpow2.f32 %v6140_v31  ;;  %12298 = vst [vmem:[#allocation24_spill] sm:$0xff] %v10328_v2  ;;  %v10331_v17 = vpop.eup %7328  ;;  %v10335_v37 = vmul.f32 %v10314_v26, %v10269_v38  ;;  %v2906_v8 = vadd.f32 %v10267_v47, %v2905_v34  ;;  %vm2922_vm11 = vweird.f32 %v10212_v23  ;;  %v6767_v31 = vld [vmem:[#allocation8 + $0x124] sm:$0xf] }
 0x298   : > { %7336 = vrcp.f32 %v10316_v50  ;;  %v1669_v35 = vpop.f32.mrf.mxu2  ;;  %v10340_v10 = vpop.eup %7330  ;;  %3758 = vmatmul.bf16.gmra.mxu3 %v10328_v2  ;;  %vm2923_vm12 = vweird.f32 %v10275_v27  ;;  %v2921_v5 = vadd.f32 %v10275_v27, %v2920_v19  ;;  %v2926_v33 = vand.u32 2147483647, %v10212_v23  ;;  %v12306_v19 = vld [vmem:[#allocation33_spill] sm:$0xff] }
 0x299   : > { %v1670_v22 = vadd.f32 %v1669_v35, %v9670_v61  ;;  %v1718_v46 = vpop.f32.mrf.mxu3  ;;  %v10349_v13 = vpop.eup %7332  ;;  %v2928_v35 = vand.u32 2147483648, %v10212_v23  ;;  %v6367_v42 = vor.u32 %v6785_v0, %v6364_v49  ;;  %v2910_v11 = vsel %vm10356_vm13, %v10267_v47, %v2906_v8  ;;  %vm10369_vm14 = vmor %vm2922_vm11, %vm2923_vm12  ;;  %v6765_v0 = vld [vmem:[#allocation8 + $0x114] sm:$0xf]  ;;  %v6284_v49 = vld [vmem:[#allocation8 + $0x118] sm:$0xf0] }
 0x29a   : > { %v6239_v14 = vor.u32 %v6753_v7, %v6236_v63  ;;  %v6295_v53 = vor.u32 %v6767_v31, %v6292_v29  ;;  %v2915_v23 = vsel %vm10344_vm10, %v2914_v40, %v2910_v11  ;;  %v2925_v47 = vsel %vm10369_vm14, %v10275_v27, %v2921_v5 }
 0x29b   : > { %v1719_v48 = vadd.f32 %v1718_v46, %v1670_v22  ;;  %v6228_v22 = vld [vmem:[#allocation8 + $0xa8] sm:$0xf0]  ;;  %3680 = vmatmul.bf16.gmra.mxu1 %v12307_v54  ;;  %3935 = vmatpush.bf16.msrb.mxu3 %v6367_v42  ;;  %v2929_v63 = vor.u32 1.1754944e-38, %v2928_v35  ;;  %v3062_v8 = vmul.f32 %v9900_v56, %v2915_v23  ;;  %vm2927_vm15 = vcmp.eq.f32.partialorder %v2926_v33, 8.507059e+37  ;;  %v6749_v42 = vld [vmem:[#allocation8 + $0x94] sm:$0xf] }
 0x29c   : > { %3807 = vmatmul.bf16.gmra.mxu0 %v12306_v19  ;;  %3837 = vmatpush.bf16.msra.mxu1 %v6239_v14  ;;  %v6231_v11 = vor.u32 %v6751_v36, %v6228_v22  ;;  %v6287_v40 = vor.u32 %v6765_v0, %v6284_v49  ;;  %v6220_v35 = vld [vmem:[#allocation8 + $0x98] sm:$0xf0]  ;;  %v10394_v56 = vmul.f32 %v10349_v13, %v10279_v15  ;;  %v6747_v33 = vld [vmem:[#allocation8 + $0x84] sm:$0xf]  ;;  %v6212_v49 = vld [vmem:[#allocation8 + $0x88] sm:$0xf0]  ;;  %vm2937_vm0 = vweird.f32 %v10269_v38 }
 0x29d   : > { %v7335_v46 = vpop.eup %7334  ;;  %v6141_v34 = vmul.f32 -1.442695, %v1719_v48  ;;  %3729 = vmatmul.bf16.gmra.mxu2 %v12303_v41  ;;  %v2934_v48 = vsub.f32 1.0, %v10335_v37  ;;  %v10389_v37 = vpop.f32.mrf.mxu0  ;;  %v2930_v29 = vsel %vm2927_vm15, %v2929_v63, %v2925_v47  ;;  %v3094_v5 = vpack.c.bf16 %v3062_v8, %v3062_v8 }
 0x29e   : > { %v10374_v16 = vpop.eup %7336  ;;  %v10377_v41 = vadd.f32 1.0, %v7335_v46  ;;  %3887 = vmatpush.bf16.msrb.mxu2 %v6295_v53  ;;  %v3063_v53 = vmul.f32 %v10029_v57, %v2930_v29  ;;  %v6223_v14 = vor.u32 %v6749_v42, %v6220_v35  ;;  %v6763_v46 = vld [vmem:[#allocation8 + $0x104] sm:$0xf]  ;;  %v6215_v47 = vor.u32 %v6747_v33, %v6212_v49  ;;  %v6356_v42 = vld [vmem:[#allocation8 + $0x1a8] sm:$0xf0] }
 0x29f   : > { %v2948_v7 = vmul.f32 %v10374_v16, %v10316_v50  ;;  %7338 = vpow2.f32 %v6141_v34  ;;  %v6276_v34 = vld [vmem:[#allocation8 + $0x108] sm:$0xf0]  ;;  %v2935_v36 = vmul.f32 %v10314_v26, %v2934_v48  ;;  %v3174_v19 = vunpack.c.l.b16 %v3094_v5 }
 0x2a0   : > { %7340 = vrcp.f32 %v10377_v41  ;;  %v1672_v52 = vpop.f32.mrf.mxu2  ;;  %3838 = vmatpush.bf16.msra.mxu1 %v6231_v11  ;;  %v6279_v0 = vor.u32 %v6763_v46, %v6276_v34  ;;  %v3095_v23 = vpack.c.bf16 %v3063_v53, %v3063_v53  ;;  %vm2938_vm1 = vweird.f32 %v10314_v26 }
 0x2a1   : > { %v2949_v2 = vsub.f32 1.0, %v2948_v7  ;;  %v1673_v27 = vadd.f32 %v1672_v52, %v9670_v61  ;;  %v1721_v31 = vpop.f32.mrf.mxu3  ;;  %v2936_v7 = vadd.f32 %v10314_v26, %v2935_v36  ;;  %vm10401_vm2 = vmor %vm2937_vm0, %vm2938_vm1  ;;  %v2941_v48 = vand.u32 2147483647, %v10269_v38 }
 0x2a2   : > { %3888 = vmatpush.bf16.msrb.mxu2 %v6287_v40  ;;  %v2943_v52 = vand.u32 2147483648, %v10269_v38  ;;  %vm2952_vm3 = vweird.f32 %v10316_v50  ;;  %vm2678_vm5 = vweird.f32 %v10238_v30  ;;  %vm2953_vm6 = vweird.f32 %v10374_v16 }
 0x2a3   : > { %v1722_v22 = vadd.f32 %v1721_v31, %v1673_v27  ;;  %v2950_v11 = vmul.f32 %v10374_v16, %v2949_v2  ;;  %v3175_v31 = vunpack.c.l.b16 %v3095_v23  ;;  %v2940_v29 = vsel %vm10401_vm2, %v10314_v26, %v2936_v7  ;;  %v6783_v2 = vld [vmem:[#allocation8 + $0x1a4] sm:$0xf]  ;;  %vm10433_vm8 = vmor %vm2952_vm3, %vm2953_vm6 }
 0x2a4   : > { %3839 = vmatpush.bf16.msra.mxu1 %v6223_v14  ;;  %vm2942_vm4 = vcmp.eq.f32.partialorder %v2941_v48, 8.507059e+37  ;;  %v2944_v38 = vor.u32 1.1754944e-38, %v2943_v52  ;;  %v2956_v33 = vand.u32 2147483647, %v10316_v50  ;;  %vm2677_vm7 = vweird.f32 %v10182_v60 }
 0x2a5   : > { %v7339_v57 = vpop.eup %7338  ;;  %v6142_v63 = vmul.f32 -1.442695, %v1722_v22  ;;  %v10420_v35 = vpack.c.b16 %v3175_v31, %v3174_v19  ;;  %v2951_v26 = vadd.f32 %v10374_v16, %v2950_v11  ;;  %v2698_v36 = vand.u32 2147483648, %v10279_v15  ;;  %v10429_v22 = vpop.f32.mrf.mxu0  ;;  %vm10485_vm15 = vmor %vm2677_vm7, %vm2678_vm5 }
 0x2a6   : > { %v10408_v40 = vpop.eup %7340  ;;  %v10410_v27 = vadd.f32 1.0, %v7339_v57  ;;  %3889 = vmatpush.bf16.msrb.mxu2 %v6279_v0  ;;  %v2945_v14 = vsel %vm2942_vm4, %v2944_v38, %v2940_v29  ;;  %v6359_v23 = vor.u32 %v6783_v2, %v6356_v42  ;;  %v12312_v7 = vsub.f32 1.0, %v10303_v39  ;;  %v10442_v8 = vpop.f32.mrf.mxu1 }
 0x2a7   : > { %v2963_v5 = vmul.f32 %v10408_v40, %v10377_v41  ;;  %7342 = vpow2.f32 %v6142_v63  ;;  %v3064_v49 = vmul.f32 %v10129_v58, %v2945_v14  ;;  %v2955_v48 = vsel %vm10433_vm8, %v10374_v16, %v2951_v26 }
 0x2a8   : > { %7344 = vrcp.f32 %v10410_v27  ;;  %v1674_v53 = vpop.f32.mrf.mxu2  ;;  %3763 = vmatmul.bf16.gmra.mxu3 %v10420_v35  ;;  %v2675_v57 = vmul.f32 %v10238_v30, %v12312_v7  ;;  %3840 = vmatpush.bf16.msra.mxu1 %v6215_v47  ;;  %v2689_v11 = vsub.f32 1.0, %v10394_v56  ;;  %vm2957_vm9 = vcmp.eq.f32.partialorder %v2956_v33, 8.507059e+37 }
 0x2a9   : > { %v2964_v46 = vsub.f32 1.0, %v2963_v5  ;;  %v1675_v34 = vadd.f32 %v1674_v53, %v9670_v61  ;;  %v1723_v19 = vpop.f32.mrf.mxu3  ;;  %v2958_v61 = vand.u32 2147483648, %v10316_v50  ;;  %3936 = vmatpush.bf16.msrb.mxu3 %v6359_v23  ;;  %vm2967_vm10 = vweird.f32 %v10377_v41 }
 0x2aa   : > { %vm2968_vm11 = vweird.f32 %v10408_v40  ;;  %v2971_v16 = vand.u32 2147483647, %v10377_v41  ;;  %v12313_v56 = vand.u32 2147483647, %v10182_v60  ;;  %v3096_v2 = vpack.c.bf16 %v3064_v49, %v3064_v49 }
 0x2ab   : > { %v1724_v63 = vadd.f32 %v1723_v19, %v1675_v34  ;;  %v2965_v52 = vmul.f32 %v10408_v40, %v2964_v46  ;;  %v2959_v50 = vor.u32 1.1754944e-38, %v2958_v61  ;;  %3841 = vmatmul.bf16.vlgmr.msra.gmra.mxu1 %v12193_v28  ;;  %vm10464_vm13 = vmor %vm2967_vm10, %vm2968_vm11  ;;  %v6781_v46 = vld [vmem:[#allocation8 + $0x194] sm:$0xf]  ;;  %v6348_v34 = vld [vmem:[#allocation8 + $0x198] sm:$0xf0]  ;;  %v2676_v14 = vadd.f32 %v10238_v30, %v2675_v57 }
 0x2ac   : > { %3812 = vmatmul.bf16.gmra.mxu0 %v8128_v12  ;;  %vm10457_vm12 = vcmp.eq.f32.partialorder %v12313_v56, 8.507059e+37  ;;  %v2690_v28 = vmul.f32 %v10349_v13, %v2689_v11  ;;  %vm2972_vm14 = vcmp.eq.f32.partialorder %v2971_v16, 8.507059e+37  ;;  %v6351_v49 = vor.u32 %v6781_v46, %v6348_v34 }
 0x2ad   : > { %v7343_v58 = vpop.eup %7342  ;;  %v6143_v39 = vmul.f32 -1.442695, %v1724_v63  ;;  %3890 = vmatmul.bf16.vlgmr.msrb.gmra.mxu2 %v8901_v43  ;;  %v2966_v47 = vadd.f32 %v10408_v40, %v2965_v52  ;;  %v2960_v38 = vsel %vm2957_vm9, %v2959_v50, %v2955_v48  ;;  %v2973_v43 = vand.u32 2147483648, %v10377_v41  ;;  %v10498_v60 = vpop.f32.mrf.mxu0 }
 0x2ae   : > { %v7345_v31 = vpop.eup %7344  ;;  %v10461_v5 = vadd.f32 1.0, %v7343_v58  ;;  %v3065_v53 = vmul.f32 %v10226_v62, %v2960_v38  ;;  %v3176_v62 = vunpack.c.l.b16 %v3096_v2  ;;  %v10489_v57 = vpop.f32.mrf.mxu1  ;;  %v2986_v63 = vand.u32 2147483647, %v10410_v27  ;;  %3937 = vmatpush.bf16.msrb.mxu3 %v6351_v49  ;;  %v12322_v49 = vld [vmem:[#allocation37_spill] sm:$0xff] }
 0x2af   : > { %v2978_v42 = vmul.f32 %v7345_v31, %v10410_v27  ;;  %7346 = vpow2.f32 %v6143_v39  ;;  %v2970_v26 = vsel %vm10464_vm13, %v10408_v40, %v2966_v47  ;;  %v2974_v41 = vor.u32 1.1754944e-38, %v2973_v43 }
 0x2b0   : > { %7348 = vrcp.f32 %v10461_v5  ;;  %v10477_v33 = vpop.f32.mrf.mxu2  ;;  %v3097_v0 = vpack.c.bf16 %v3065_v53, %v3065_v53  ;;  %v2988_v40 = vand.u32 2147483648, %v10410_v27  ;;  %vm2983_vm0 = vweird.f32 %v7345_v31 }
 0x2b1   : > { %7350 = vtanh.f32 %v10325_v55  ;;  %v2979_v19 = vsub.f32 1.0, %v2978_v42  ;;  %v2975_v61 = vsel %vm2972_vm14, %v2974_v41, %v2970_v26  ;;  %v2680_v48 = vsel %vm10485_vm15, %v10238_v30, %v2676_v14 }
 0x2b2   : > { %v3177_v7 = vunpack.c.l.b16 %v3097_v0  ;;  %v2691_v52 = vadd.f32 %v10349_v13, %v2690_v28  ;;  %vm2693_vm1 = vweird.f32 %v10349_v13  ;;  %7352 = vtanh.f32 %v10321_v3  ;;  %v6817_v0 = vld [vmem:[#allocation10 + $0xb0] sm:$0xf0] }
 0x2b3   : > { %v2980_v55 = vmul.f32 %v7345_v31, %v2979_v19  ;;  %vm2982_vm2 = vweird.f32 %v10410_v27  ;;  %v3066_v39 = vmul.f32 %v10340_v10, %v2975_v61  ;;  %vm2692_vm3 = vweird.f32 %v10279_v15  ;;  %v6474_v61 = vld [vmem:[#allocation10 + $0x90] sm:$0xf] }
 0x2b4   : > { %v10500_v50 = vpack.c.b16 %v3177_v7, %v3176_v62  ;;  %v2696_v30 = vand.u32 2147483647, %v10279_v15  ;;  %vm2984_vm4 = vmor %vm2982_vm2, %vm2983_vm0  ;;  %v2989_v3 = vor.u32 1.1754944e-38, %v2988_v40  ;;  %v2685_v38 = vsel %vm10457_vm12, %v10308_v44, %v2680_v48  ;;  %v6340_v15 = vld [vmem:[#allocation8 + $0x188] sm:$0xf0] }
 0x2b5   : > { %v7347_v11 = vpop.eup %7346  ;;  %v2981_v58 = vadd.f32 %v7345_v31, %v2980_v55  ;;  %vm10516_vm5 = vmor %vm2692_vm3, %vm2693_vm1  ;;  %vm2987_vm6 = vcmp.eq.f32.partialorder %v2986_v63, 8.507059e+37  ;;  %v2699_v29 = vor.u32 1.1754944e-38, %v2698_v36  ;;  %v3098_v26 = vpack.c.bf16 %v3066_v39, %v3066_v39  ;;  %v6486_v36 = vld [vmem:[#allocation10 + $0xa8] sm:$0xf]  ;;  %v6814_v40 = vld [vmem:[#allocation10 + $0x98] sm:$0xf0] }
 0x2b6   : > { %v10504_v47 = vpop.eup %7348  ;;  %v10508_v16 = vadd.f32 1.0, %v7347_v11  ;;  %v2695_v12 = vsel %vm10516_vm5, %v10349_v13, %v2691_v52  ;;  %v3036_v34 = vmul.f32 %v10331_v17, %v2685_v38  ;;  %vm2697_vm7 = vcmp.eq.f32.partialorder %v2696_v30, 8.507059e+37  ;;  %v6779_v13 = vld [vmem:[#allocation8 + $0x184] sm:$0xf]  ;;  %v10533_v28 = vpop.f32.mrf.mxu1  ;;  %v12324_v39 = vld [vmem:[#allocation28_spill] sm:$0xff] }
 0x2b7   : > { %v7351_v56 = vpop.eup %7350  ;;  %v2993_v27 = vmul.f32 %v10504_v47, %v10461_v5  ;;  %v2985_v2 = vsel %vm2984_vm4, %v7345_v31, %v2981_v58  ;;  %v3001_v31 = vand.u32 2147483647, %v10461_v5  ;;  %v2700_v14 = vsel %vm2697_vm7, %v2699_v29, %v2695_v12  ;;  %v12323_v55 = vld [vmem:[#allocation26_spill] sm:$0xff]  ;;  %v10542_v58 = vpop.f32.mrf.mxu0 }
 0x2b8   : > { %7354 = vrcp.f32 %v10508_v16  ;;  %v10526_v43 = vpop.f32.mrf.mxu2  ;;  %v2990_v44 = vsel %vm2987_vm6, %v2989_v3, %v2985_v2  ;;  %v7353_v46 = vpop.eup %7352  ;;  %3768 = vmatmul.bf16.gmra.mxu3 %v10500_v50  ;;  %vm2998_vm8 = vweird.f32 %v10504_v47  ;;  %vm2997_vm9 = vweird.f32 %v10461_v5  ;;  %v6462_v2 = vld [vmem:[#allocation10 + $0x78] sm:$0xf]  ;;  %v6811_v12 = vld [vmem:[#allocation10 + $0x80] sm:$0xf0] }
 0x2b9   : > { %v2994_v42 = vsub.f32 1.0, %v2993_v27  ;;  %v3067_v53 = vmul.f32 %v7351_v56, %v2990_v44  ;;  %v3003_v17 = vand.u32 2147483648, %v10461_v5  ;;  %v6343_v62 = vor.u32 %v6779_v13, %v6340_v15  ;;  %vm2999_vm10 = vmor %vm2997_vm9, %vm2998_vm8 }
 0x2ba   : > { %v3178_v23 = vunpack.c.l.b16 %v3098_v26  ;;  %v6487_v48 = vor.u32 %v6817_v0, %v6486_v36  ;;  %7356 = vtanh.f32 %v3036_v34  ;;  %v3037_v11 = vmul.f32 %v7353_v46, %v2700_v14  ;;  %v6450_v46 = vld [vmem:[#allocation10 + $0x60] sm:$0xf]  ;;  %v6808_v34 = vld [vmem:[#allocation10 + $0x68] sm:$0xf0] }
 0x2bb   : > { %v3099_v41 = vpack.c.bf16 %v3067_v53, %v3067_v53  ;;  %v2995_v19 = vmul.f32 %v10504_v47, %v2994_v42  ;;  %3846 = vmatmul.bf16.gmra.mxu1 %v12324_v39  ;;  %3938 = vmatpush.bf16.msrb.mxu3 %v6343_v62  ;;  %v6475_v38 = vor.u32 %v6814_v40, %v6474_v61  ;;  %v3004_v27 = vor.u32 1.1754944e-38, %v3003_v17  ;;  %v12326_v39 = vld [vmem:[#allocation30_spill] sm:$0xff] }
 0x2bc   : > { %3817 = vmatmul.bf16.gmra.mxu0 %v12323_v55  ;;  %vm3002_vm11 = vcmp.eq.f32.partialorder %v3001_v31, 8.507059e+37  ;;  %7358 = vtanh.f32 %v3037_v11  ;;  %v3018_v5 = vand.u32 2147483648, %v10508_v16  ;;  %v3016_v53 = vand.u32 2147483647, %v10508_v16  ;;  %v6426_v55 = vld [vmem:[#allocation10 + $0x30] sm:$0xf] }
 0x2bd   : > { %3895 = vmatmul.bf16.gmra.mxu2 %v12322_v49  ;;  %v3179_v7 = vunpack.c.l.b16 %v3099_v41  ;;  %v2996_v63 = vadd.f32 %v10504_v47, %v2995_v19  ;;  %4356 = vmatpush.bf16.msrb.mxu0 %v6487_v48  ;;  %v6463_v26 = vor.u32 %v6811_v12, %v6462_v2  ;;  %vm3012_vm13 = vweird.f32 %v10508_v16  ;;  %v6438_v49 = vld [vmem:[#allocation10 + $0x48] sm:$0xf]  ;;  %v6414_v2 = vld [vmem:[#allocation10 + $0x18] sm:$0xf]  ;;  %v6799_v12 = vld [vmem:[#allocation10 + $0x20] sm:$0xf0] }
 0x2be   : > { %v7355_v52 = vpop.eup %7354  ;;  %v10557_v13 = vpop.f32.mrf.mxu1  ;;  %v3019_v31 = vor.u32 1.1754944e-38, %v3018_v5  ;;  %vm3017_vm15 = vcmp.eq.f32.partialorder %v3016_v53, 8.507059e+37  ;;  %v6451_v15 = vor.u32 %v6808_v34, %v6450_v46  ;;  %v12325_v48 = vld [vmem:[#allocation38_spill] sm:$0xff]  ;;  %v6415_v5 = vor.u32 %v6799_v12, %v6414_v2  ;;  %v6796_v53 = vld [vmem:[#allocation10 + $0x8] sm:$0xf0] }
 0x2bf   : > { %v3008_v30 = vmul.f32 %v7355_v52, %v10508_v16  ;;  %v10550_v3 = vpack.c.b16 %v3179_v7, %v3178_v23  ;;  %v3000_v56 = vsel %vm2999_vm10, %v10504_v47, %v2996_v63  ;;  %vm3013_vm12 = vweird.f32 %v7355_v52  ;;  %v10560_v0 = vpop.f32.mrf.mxu0  ;;  %v6805_v23 = vld [vmem:[#allocation10 + $0x50] sm:$0xf0]  ;;  %v6802_v63 = vld [vmem:[#allocation10 + $0x38] sm:$0xf0]  ;;  %v6835_v2 = vld [vmem:[#allocation10 + $0x140] sm:$0xf0] }
 0x2c0   : > { %v10553_v10 = vpop.f32.mrf.mxu2  ;;  %v3005_v29 = vsel %vm3002_vm11, %v3004_v27, %v3000_v56  ;;  %v7357_v47 = vpop.eup %7356  ;;  %vm3014_vm14 = vmor %vm3012_vm13, %vm3013_vm12  ;;  %v6439_v7 = vor.u32 %v6805_v23, %v6438_v49  ;;  %v6427_v27 = vor.u32 %v6802_v63, %v6426_v55  ;;  %v6813_v12 = vld [vmem:[#allocation10 + $0x94] sm:$0xf] }
 0x2c1   : > { %v3009_v44 = vsub.f32 1.0, %v3008_v30  ;;  %4357 = vmatpush.bf16.msrb.mxu0 %v6475_v38  ;;  %v3068_v41 = vmul.f32 %v7357_v47, %v3005_v29  ;;  %v12327_v30 = vld [vmem:[#allocation32_spill] sm:$0xff] }
 0x2c2   : > { %v7359_v36 = vpop.eup %7358 }
 0x2c3   : > { %v3010_v42 = vmul.f32 %v7355_v52, %v3009_v44  ;;  %v3100_v40 = vpack.c.bf16 %v3068_v41, %v3068_v41  ;;  %v6841_v41 = vld [vmem:[#allocation10 + $0x170] sm:$0xf0] }
 0x2c5   : > { %v3011_v14 = vadd.f32 %v7355_v52, %v3010_v42  ;;  %4358 = vmatpush.bf16.msrb.mxu0 %v6463_v26  ;;  %v6402_v42 = vld [vmem:[#allocation10] sm:$0xf]  ;;  %v10579_v26 = vld [vmem:[%s12025_s4] sm:$0x3] }
 0x2c6   : > { %v10568_v56 = vpop.f32.mrf.mxu1  ;;  %v6403_v47 = vor.u32 %v6796_v53, %v6402_v42  ;;  %v10582_v46 = vperm.slane %v10579_v26, 0 }
 0x2c7   : > { %v3015_v19 = vsel %vm3014_vm14, %v7355_v52, %v3011_v14  ;;  %v3180_v52 = vunpack.c.l.b16 %v3100_v40  ;;  %v10572_v44 = vpop.f32.mrf.mxu0  ;;  %v6582_v14 = vld [vmem:[#allocation10 + $0x168] sm:$0xf] }
 0x2c8   : > { %v3020_v17 = vsel %vm3017_vm15, %v3019_v31, %v3015_v19  ;;  %v10562_v62 = vpop.f32.mrf.mxu2  ;;  %3773 = vmatmul.bf16.gmra.mxu3 %v10550_v3  ;;  %v6583_v31 = vor.u32 %v6841_v41, %v6582_v14  ;;  %v3600_v40 = vadd.f32 %v10091_v1, %v10582_v46  ;;  %v6838_v1 = vld [vmem:[#allocation10 + $0x158] sm:$0xf0]  ;;  %v3605_v53 = vadd.f32 %v10192_v18, %v10582_v46 }
 0x2c9   : > { %v3069_v61 = vmul.f32 %v7359_v36, %v3020_v17  ;;  %4359 = vmatpush.bf16.msrb.mxu0 %v6451_v15  ;;  %v3598_v15 = vadd.f32 %v10038_v21, %v10582_v46 }
 0x2ca   : > { %4405 = vmatpush.bf16.msrb.mxu1 %v6583_v31  ;;  %v3654_v41 = vadd.f32 %v10557_v13, %v3605_v53  ;;  %v6810_v31 = vld [vmem:[#allocation10 + $0x7c] sm:$0xf]  ;;  %v12331_v53 = vld [vmem:[#allocation40_spill] sm:$0xff] }
 0x2cb   : > { %v3101_v16 = vpack.c.bf16 %v3069_v61, %v3069_v61  ;;  %3851 = vmatmul.bf16.gmra.mxu1 %v12327_v30  ;;  %v3647_v17 = vadd.f32 %v10442_v8, %v3598_v15  ;;  %v6464_v15 = vld [vmem:[#allocation10 + $0x84] sm:$0xf0] }
 0x2cc   : > { %3822 = vmatmul.bf16.gmra.mxu0 %v12326_v39  ;;  %v6488_v39 = vld [vmem:[#allocation10 + $0xb4] sm:$0xf0]  ;;  %v6467_v18 = vor.u32 %v6810_v31, %v6464_v15  ;;  %v6798_v31 = vld [vmem:[#allocation10 + $0x1c] sm:$0xf]  ;;  %v6416_v15 = vld [vmem:[#allocation10 + $0x24] sm:$0xf0] }
 0x2cd   : > { %3900 = vmatmul.bf16.gmra.mxu2 %v12325_v48  ;;  %v3181_v11 = vunpack.c.l.b16 %v3101_v16  ;;  %4360 = vmatpush.bf16.msrb.mxu0 %v6439_v7  ;;  %v3696_v49 = vadd.f32 %v10477_v33, %v3647_v17 }
 0x2ce   : > { %v10584_v34 = vpop.f32.mrf.mxu1 }
 0x2cf   : > { %v10570_v38 = vpack.c.b16 %v3181_v11, %v3180_v52  ;;  %v10587_v19 = vpop.f32.mrf.mxu0  ;;  %v6816_v11 = vld [vmem:[#allocation10 + $0xac] sm:$0xf] }
 0x2d0   : > { %v10574_v29 = vpop.f32.mrf.mxu2 }
 0x2d1   : > { %4361 = vmatpush.bf16.msrb.mxu0 %v6427_v27  ;;  %v6558_v27 = vld [vmem:[#allocation10 + $0x138] sm:$0xf] }
 0x2d2   : > { %v6559_v42 = vor.u32 %v6835_v2, %v6558_v27  ;;  %v6428_v27 = vld [vmem:[#allocation10 + $0x3c] sm:$0xf0] }
 0x2d5   : > { %4362 = vmatpush.bf16.msrb.mxu0 %v6415_v5 }
 0x2d6   : > { %v10597_v61 = vpop.f32.mrf.mxu1 }
 0x2d7   : > { %v10602_v23 = vpop.f32.mrf.mxu0 }
 0x2d8   : > { %3778 = vmatmul.bf16.gmra.mxu3 %v10570_v38  ;;  %v10591_v36 = vpop.f32.mrf.mxu2 }
 0x2d9   : > { %4363 = vmatpush.bf16.msrb.mxu0 %v6403_v47 }
 0x2db   : > { %3856 = vmatmul.bf16.gmra.mxu1 %v12259_v9  ;;  %v6570_v9 = vld [vmem:[#allocation10 + $0x150] sm:$0xf] }
 0x2dc   : > { %3827 = vmatmul.bf16.gmra.mxu0 %v12181_v59  ;;  %v3649_v59 = vadd.f32 %v10489_v57, %v3600_v40  ;;  %v6571_v8 = vor.u32 %v6838_v1, %v6570_v9  ;;  %v6807_v40 = vld [vmem:[#allocation10 + $0x64] sm:$0xf] }
 0x2dd   : > { %3905 = vmatmul.bf16.gmra.mxu2 %v12254_v4 }
 0x2de   : > { %v3698_v33 = vadd.f32 %v10526_v43, %v3649_v59  ;;  %v10614_v7 = vpop.f32.mrf.mxu1  ;;  %4406 = vmatpush.bf16.msrb.mxu1 %v6571_v8  ;;  %v3603_v43 = vadd.f32 %v10139_v6, %v10582_v46  ;;  %v6476_v6 = vld [vmem:[#allocation10 + $0x9c] sm:$0xf0] }
 0x2df   : > { %v10618_v63 = vpop.f32.mrf.mxu0  ;;  %v6479_v47 = vor.u32 %v6813_v12, %v6476_v6 }
 0x2e0   : > { %v10604_v16 = vpop.f32.mrf.mxu2 }
 0x2e2   : > { %4407 = vmatpush.bf16.msrb.mxu1 %v6559_v42 }
 0x2e4   : > { %v3744_v21 = vpop.f32.mrf.mxu3 }
 0x2e5   : > { %v3745_v4 = vadd.f32 %v3744_v21, %v3696_v49 }
 0x2e6   : > { %v10628_v52 = vpop.f32.mrf.mxu1 }
 0x2e7   : > { %3980 = vst [vmem:[%s10609_s19] sm:$0xff] %v3745_v4  ;;  %v10631_v30 = vpop.f32.mrf.mxu0 }
 0x2e8   : > { %3939 = vmatmul.bf16.vlgmr.msrb.gmra.mxu3 %v9997_v32  ;;  %v10620_v48 = vpop.f32.mrf.mxu2 }
 0x2eb   : > { %3861 = vmatmul.bf16.gmra.mxu1 %v12270_v20  ;;  %v6491_v20 = vor.u32 %v6816_v11, %v6488_v39  ;;  %v6801_v11 = vld [vmem:[#allocation10 + $0x34] sm:$0xf] }
 0x2ec   : > { %v3746_v55 = vpop.f32.mrf.mxu3  ;;  %v6431_v42 = vor.u32 %v6801_v11, %v6428_v27 }
 0x2ed   : > { %3910 = vmatmul.bf16.gmra.mxu2 %v12264_v45  ;;  %v3747_v57 = vadd.f32 %v3746_v55, %v3698_v33  ;;  %v3652_v45 = vadd.f32 %v10533_v28, %v3603_v43  ;;  %v6804_v33 = vld [vmem:[#allocation10 + $0x4c] sm:$0xf]  ;;  %v6440_v55 = vld [vmem:[#allocation10 + $0x54] sm:$0xf0]  ;;  %v12329_v43 = vld [vmem:[#allocation42_spill] sm:$0xff] }
 0x2ee   : > { %4454 = vmatpush.bf16.msra.mxu2 %v6491_v20  ;;  %v10643_v17 = vpop.f32.mrf.mxu1 }
 0x2ef   : > { %3982 = vst [vmem:[%s10609_s19 + $0x10] sm:$0xff] %v3747_v57  ;;  %v10623_v32 = vpack.c.bf16 %v3747_v57, %v3745_v4  ;;  %v3701_v28 = vadd.f32 %v10553_v10, %v3652_v45  ;;  %v6452_v10 = vld [vmem:[#allocation10 + $0x6c] sm:$0xf0]  ;;  %v3703_v4 = vadd.f32 %v10562_v62, %v3654_v41  ;;  %v6443_v57 = vor.u32 %v6804_v33, %v6440_v55  ;;  %v6546_v62 = vld [vmem:[#allocation10 + $0x120] sm:$0xf]  ;;  %v12333_v55 = vld [vmem:[#allocation24_spill] sm:$0xff] }
 0x2f0   : > { %v10634_v5 = vpop.f32.mrf.mxu2  ;;  %v6455_v49 = vor.u32 %v6807_v40, %v6452_v10  ;;  %v6832_v45 = vld [vmem:[#allocation10 + $0x128] sm:$0xf0]  ;;  %v6404_v40 = vld [vmem:[#allocation10 + $0xc] sm:$0xf0] }
 0x2f1   : > { %4364 = vmatmul.bf16.vlgmr.msrb.gmra.mxu0 %v10623_v32  ;;  %v6547_v20 = vor.u32 %v6832_v45, %v6546_v62  ;;  %v12334_v45 = vld [vmem:[#allocation41_spill] sm:$0xff] }
 0x2f2   : > { %4455 = vmatpush.bf16.msra.mxu2 %v6479_v47 }
 0x2f3   : > { %4408 = vmatpush.bf16.msrb.mxu1 %v6547_v20 }
 0x2f6   : > { %4456 = vmatpush.bf16.msra.mxu2 %v6467_v18  ;;  %v6795_v18 = vld [vmem:[#allocation10 + $0x4] sm:$0xf] }
 0x2f7   : > { %v10658_v39 = vpop.f32.mrf.mxu1  ;;  %v6407_v10 = vor.u32 %v6795_v18, %v6404_v40 }
 0x2f8   : > { %3944 = vmatmul.bf16.gmra.mxu3 %v10125_v51  ;;  %v10650_v59 = vpop.f32.mrf.mxu2 }
 0x2fa   : > { %4457 = vmatpush.bf16.msra.mxu2 %v6455_v49  ;;  %v3613_v49 = vadd.f32 %v10389_v37, %v10582_v46  ;;  %v6534_v37 = vld [vmem:[#allocation10 + $0x108] sm:$0xf] }
 0x2fb   : > { %v3749_v14 = vpop.f32.mrf.mxu3  ;;  %3866 = vmatmul.bf16.gmra.mxu1 %v12281_v25  ;;  %v10648_v25 = vpop.f32.mrf.mxu0 }
 0x2fc   : > { %v3750_v51 = vadd.f32 %v3749_v14, %v3701_v28  ;;  %v12332_v14 = vld [vmem:[#allocation31_spill] sm:$0xff] }
 0x2fd   : > { %3915 = vmatmul.bf16.gmra.mxu2 %v12275_v24  ;;  %v12328_v24 = vld [vmem:[#allocation34_spill] sm:$0xff] }
 0x2fe   : > { %3984 = vst [vmem:[%s10609_s19 + $0x20] sm:$0xff] %v3750_v51  ;;  %v3608_v21 = vadd.f32 %v12328_v24, %v10582_v46  ;;  %4458 = vmatpush.bf16.msra.mxu2 %v6443_v57 }
 0x300   : > { %v3657_v1 = vadd.f32 %v10568_v56, %v3608_v21  ;;  %v12330_v56 = vld [vmem:[#allocation36_spill] sm:$0xff]  ;;  %v10674_v21 = vpop.f32.mrf.mxu1 }
 0x301   : > { %v3610_v2 = vadd.f32 %v12330_v56, %v10582_v46 }
 0x302   : > { %v3706_v12 = vadd.f32 %v10574_v29, %v3657_v1  ;;  %4459 = vmatpush.bf16.msra.mxu2 %v6431_v42  ;;  %v6419_v29 = vor.u32 %v6798_v31, %v6416_v15 }
 0x303   : > { %v3751_v13 = vpop.f32.mrf.mxu3  ;;  %v10664_v28 = vpop.f32.mrf.mxu0  ;;  %v3659_v41 = vadd.f32 %v10584_v34, %v3610_v2  ;;  %v3662_v34 = vadd.f32 %v10597_v61, %v3613_v49 }
 0x304   : > { %v3752_v9 = vadd.f32 %v3751_v13, %v3703_v4 }
 0x305   : > { %v3708_v24 = vadd.f32 %v10591_v36, %v3659_v41  ;;  %v6829_v36 = vld [vmem:[#allocation10 + $0x110] sm:$0xf0]  ;;  %v3711_v61 = vadd.f32 %v10604_v16, %v3662_v34 }
 0x306   : > { %3986 = vst [vmem:[%s10609_s19 + $0x30] sm:$0xff] %v3752_v9  ;;  %v10654_v8 = vpack.c.bf16 %v3752_v9, %v3750_v51  ;;  %v10667_v51 = vpop.f32.mrf.mxu2  ;;  %4460 = vmatpush.bf16.msra.mxu2 %v6419_v29  ;;  %v6535_v57 = vor.u32 %v6829_v36, %v6534_v37  ;;  %v6818_v37 = vld [vmem:[#allocation10 + $0xb8] sm:$0xf0]  ;;  %v3625_v36 = vadd.f32 %v10572_v44, %v10582_v46  ;;  %v6572_v44 = vld [vmem:[#allocation10 + $0x15c] sm:$0xf0] }
 0x308   : > { %3949 = vmatmul.bf16.gmra.mxu3 %v12329_v43  ;;  %4369 = vmatmul.bf16.gmra.mxu0 %v10654_v8  ;;  %v3615_v43 = vadd.f32 %v10429_v22, %v10582_v46  ;;  %v10691_v20 = vpop.f32.mrf.mxu1  ;;  %v3618_v22 = vadd.f32 %v10498_v60, %v10582_v46  ;;  %v3620_v60 = vadd.f32 %v10542_v58, %v10582_v46 }
 0x309   : > { %4409 = vmatpush.bf16.msrb.mxu1 %v6535_v57  ;;  %v3623_v58 = vadd.f32 %v10560_v0, %v10582_v46  ;;  %v6840_v0 = vld [vmem:[#allocation10 + $0x16c] sm:$0xf] }
 0x30a   : > { %4461 = vmatpush.bf16.msra.mxu2 %v6407_v10  ;;  %v3664_v27 = vadd.f32 %v10614_v7, %v3615_v43  ;;  %v6522_v7 = vld [vmem:[#allocation10 + $0xf0] sm:$0xf]  ;;  %v3669_v15 = vadd.f32 %v10643_v17, %v3620_v60  ;;  %v6510_v17 = vld [vmem:[#allocation10 + $0xd8] sm:$0xf] }
 0x30b   : > { %v3754_v6 = vpop.f32.mrf.mxu3  ;;  %3871 = vmatmul.bf16.gmra.mxu1 %v12332_v14  ;;  %v10677_v9 = vpop.f32.mrf.mxu0 }
 0x30c   : > { %v3755_v47 = vadd.f32 %v3754_v6, %v3706_v12  ;;  %v3713_v16 = vadd.f32 %v10620_v48, %v3664_v27  ;;  %v3667_v6 = vadd.f32 %v10628_v52, %v3618_v22  ;;  %v6837_v27 = vld [vmem:[#allocation10 + $0x154] sm:$0xf] }
 0x30d   : > { %3920 = vmatmul.bf16.gmra.mxu2 %v12331_v53 }
 0x30e   : > { %3988 = vst [vmem:[%s10609_s19 + $0x40] sm:$0xff] %v3755_v47  ;;  %v10682_v33 = vpop.f32.mrf.mxu2  ;;  %v3716_v48 = vadd.f32 %v10634_v5, %v3667_v6  ;;  %v3718_v5 = vadd.f32 %v10650_v59, %v3669_v15  ;;  %v6584_v59 = vld [vmem:[#allocation10 + $0x174] sm:$0xf0] }
 0x30f   : > { %v6587_v57 = vor.u32 %v6840_v0, %v6584_v59  ;;  %v6820_v59 = vld [vmem:[#allocation10 + $0xc8] sm:$0xf0] }
 0x310   : > { %v10706_v53 = vpop.f32.mrf.mxu1 }
 0x311   : > { %4503 = vmatpush.bf16.msra.mxu3 %v6587_v57  ;;  %v6806_v57 = vld [vmem:[#allocation10 + $0x58] sm:$0xf0] }
 0x313   : > { %v3756_v4 = vpop.f32.mrf.mxu3  ;;  %v10695_v56 = vpop.f32.mrf.mxu0 }
 0x314   : > { %v3757_v13 = vadd.f32 %v3756_v4, %v3708_v24  ;;  %v3672_v24 = vadd.f32 %v10658_v39, %v3623_v58 }
 0x316   : > { %3990 = vst [vmem:[%s10609_s19 + $0x50] sm:$0xff] %v3757_v13  ;;  %v10680_v1 = vpack.c.bf16 %v3757_v13, %v3755_v47  ;;  %v10697_v2 = vpop.f32.mrf.mxu2  ;;  %v6826_v47 = vld [vmem:[#allocation10 + $0xf8] sm:$0xf0]  ;;  %v6823_v13 = vld [vmem:[#allocation10 + $0xe0] sm:$0xf0]  ;;  %v3721_v39 = vadd.f32 %v10667_v51, %v3672_v24  ;;  %v6575_v51 = vor.u32 %v6837_v27, %v6572_v44 }
 0x317   : > { %v6523_v14 = vor.u32 %v6826_v47, %v6522_v7  ;;  %v6511_v34 = vor.u32 %v6823_v13, %v6510_v17  ;;  %v6560_v7 = vld [vmem:[#allocation10 + $0x144] sm:$0xf0]  ;;  %v6470_v47 = vld [vmem:[#allocation10 + $0x80] sm:$0xf]  ;;  %v6548_v24 = vld [vmem:[#allocation10 + $0x12c] sm:$0xf0] }
 0x318   : > { %3954 = vmatmul.bf16.gmra.mxu3 %v12333_v55  ;;  %4374 = vmatmul.bf16.gmra.mxu0 %v10680_v1  ;;  %v10720_v29 = vpop.f32.mrf.mxu1  ;;  %v6494_v55 = vld [vmem:[#allocation10 + $0xb0] sm:$0xf]  ;;  %v6458_v13 = vld [vmem:[#allocation10 + $0x68] sm:$0xf] }
 0x319   : > { %4410 = vmatpush.bf16.msrb.mxu1 %v6523_v14  ;;  %v6495_v43 = vor.u32 %v6818_v37, %v6494_v55  ;;  %v6812_v14 = vld [vmem:[#allocation10 + $0x88] sm:$0xf0]  ;;  %4504 = vmatpush.bf16.msra.mxu3 %v6575_v51  ;;  %v6825_v51 = vld [vmem:[#allocation10 + $0xf4] sm:$0xf] }
 0x31a   : > { %v6828_v55 = vld [vmem:[#allocation10 + $0x10c] sm:$0xf] }
 0x31b   : > { %v3759_v62 = vpop.f32.mrf.mxu3  ;;  %3876 = vmatmul.bf16.gmra.mxu1 %v12307_v54  ;;  %v10713_v41 = vpop.f32.mrf.mxu0  ;;  %4552 = vmatpush.bf16.msra.mxu0 %v6495_v43  ;;  %v3630_v43 = vadd.f32 %v10602_v23, %v10582_v46 }
 0x31c   : > { %v3760_v11 = vadd.f32 %v3759_v62, %v3711_v61 }
 0x31d   : > { %3925 = vmatmul.bf16.gmra.mxu2 %v12334_v45  ;;  %4411 = vmatpush.bf16.msrb.mxu1 %v6511_v34  ;;  %v3674_v45 = vadd.f32 %v10674_v21, %v3625_v36  ;;  %v3628_v21 = vadd.f32 %v10587_v19, %v10582_v46  ;;  %v6809_v19 = vld [vmem:[#allocation10 + $0x70] sm:$0xf0]  ;;  %v6498_v34 = vld [vmem:[#allocation10 + $0xc0] sm:$0xf]  ;;  %v6536_v36 = vld [vmem:[#allocation10 + $0x114] sm:$0xf0]  ;;  %v3679_v44 = vadd.f32 %v10706_v53, %v3630_v43 }
 0x31e   : > { %3992 = vst [vmem:[%s10609_s19 + $0x60] sm:$0xff] %v3760_v11  ;;  %v10715_v52 = vpop.f32.mrf.mxu2  ;;  %v6499_v37 = vor.u32 %v6820_v59, %v6498_v34  ;;  %v3633_v53 = vadd.f32 %v10618_v63, %v10582_v46 }
 0x320   : > { %v10738_v61 = vpop.f32.mrf.mxu1 }
 0x321   : > { %4412 = vmatpush.bf16.msrb.mxu1 %v6499_v37  ;;  %v6842_v37 = vld [vmem:[#allocation10 + $0x178] sm:$0xf0] }
 0x323   : > { %v3761_v12 = vpop.f32.mrf.mxu3  ;;  %v10725_v40 = vpop.f32.mrf.mxu0 }
 0x324   : > { %v3762_v42 = vadd.f32 %v3761_v12, %v3713_v16  ;;  %v6482_v16 = vld [vmem:[#allocation10 + $0x98] sm:$0xf]  ;;  %v6815_v12 = vld [vmem:[#allocation10 + $0xa0] sm:$0xf0] }
 0x325   : > { %v6483_v6 = vor.u32 %v6815_v12, %v6482_v16  ;;  %v6524_v16 = vld [vmem:[#allocation10 + $0xfc] sm:$0xf0] }
 0x326   : > { %3994 = vst [vmem:[%s10609_s19 + $0x70] sm:$0xff] %v3762_v42  ;;  %v10704_v54 = vpack.c.bf16 %v3762_v42, %v3760_v11  ;;  %v10727_v49 = vpop.f32.mrf.mxu2  ;;  %v6834_v42 = vld [vmem:[#allocation10 + $0x13c] sm:$0xf]  ;;  %v6527_v23 = vor.u32 %v6825_v51, %v6524_v16 }
 0x327   : > { %v6563_v60 = vor.u32 %v6834_v42, %v6560_v7  ;;  %4553 = vmatpush.bf16.msra.mxu0 %v6483_v6  ;;  %v6434_v42 = vld [vmem:[#allocation10 + $0x38] sm:$0xf]  ;;  %v6822_v6 = vld [vmem:[#allocation10 + $0xdc] sm:$0xf] }
 0x328   : > { %3959 = vmatmul.bf16.gmra.mxu3 %v10420_v35  ;;  %4379 = vmatmul.bf16.gmra.mxu0 %v10704_v54  ;;  %v10750_v58 = vpop.f32.mrf.mxu1 }
 0x329   : > { %4505 = vmatpush.bf16.msra.mxu3 %v6563_v60  ;;  %v6800_v60 = vld [vmem:[#allocation10 + $0x28] sm:$0xf0] }
 0x32b   : > { %v3764_v31 = vpop.f32.mrf.mxu3  ;;  %v10742_v11 = vpop.f32.mrf.mxu0 }
 0x32c   : > { %v3765_v35 = vadd.f32 %v3764_v31, %v3716_v48  ;;  %v3723_v48 = vadd.f32 %v10682_v33, %v3674_v45  ;;  %v6471_v31 = vor.u32 %v6812_v14, %v6470_v47  ;;  %v6459_v33 = vor.u32 %v6809_v19, %v6458_v13  ;;  %v6512_v47 = vld [vmem:[#allocation10 + $0xe4] sm:$0xf0]  ;;  %v6422_v14 = vld [vmem:[#allocation10 + $0x20] sm:$0xf]  ;;  %v6819_v13 = vld [vmem:[#allocation10 + $0xc4] sm:$0xf] }
 0x32d   : > { %4462 = vmatmul.bf16.vlgmr.msra.gmra.mxu2 %v10623_v32  ;;  %v6500_v19 = vld [vmem:[#allocation10 + $0xcc] sm:$0xf0] }
 0x32e   : > { %3996 = vst [vmem:[%s10609_s19 + $0x80] sm:$0xff] %v3765_v35  ;;  %v10745_v22 = vpop.f32.mrf.mxu2  ;;  %4554 = vmatpush.bf16.msra.mxu0 %v6471_v31  ;;  %v6503_v63 = vor.u32 %v6819_v13, %v6500_v19 }
 0x330   : > { %v10768_v12 = vpop.f32.mrf.mxu1 }
 0x332   : > { %4555 = vmatpush.bf16.msra.mxu0 %v6459_v33  ;;  %v6410_v33 = vld [vmem:[#allocation10 + $0x8] sm:$0xf] }
 0x333   : > { %v3766_v18 = vpop.f32.mrf.mxu3  ;;  %v10756_v0 = vpop.f32.mrf.mxu0 }
 0x334   : > { %v3767_v10 = vadd.f32 %v3766_v18, %v3718_v5  ;;  %v3677_v5 = vadd.f32 %v10691_v20, %v3628_v21  ;;  %v6515_v21 = vor.u32 %v6822_v6, %v6512_v47 }
 0x336   : > { %3998 = vst [vmem:[%s10609_s19 + $0x90] sm:$0xff] %v3767_v10  ;;  %v10731_v4 = vpack.c.bf16 %v3767_v10, %v3765_v35  ;;  %v6831_v10 = vld [vmem:[#allocation10 + $0x124] sm:$0xf]  ;;  %v10760_v20 = vpop.f32.mrf.mxu2 }
 0x337   : > { %v6551_v17 = vor.u32 %v6831_v10, %v6548_v24  ;;  %v3682_v24 = vadd.f32 %v10720_v29, %v3633_v53  ;;  %v3635_v29 = vadd.f32 %v10631_v30, %v10582_v46 }
 0x338   : > { %3964 = vmatmul.bf16.gmra.mxu3 %v10500_v50  ;;  %4384 = vmatmul.bf16.gmra.mxu0 %v10731_v4  ;;  %v3847_v34 = vpop.f32.mrf.mxu1 }
 0x339   : > { %4506 = vmatpush.bf16.msra.mxu3 %v6551_v17 }
 0x33b   : > { %v3769_v50 = vpop.f32.mrf.mxu3  ;;  %v10773_v31 = vpop.f32.mrf.mxu0 }
 0x33c   : > { %v3770_v62 = vadd.f32 %v3769_v50, %v3721_v39  ;;  %v6446_v39 = vld [vmem:[#allocation10 + $0x50] sm:$0xf]  ;;  %v3726_v50 = vadd.f32 %v10697_v2, %v3677_v5  ;;  %v6803_v2 = vld [vmem:[#allocation10 + $0x40] sm:$0xf0] }
 0x33d   : > { %4467 = vmatmul.bf16.gmra.mxu2 %v10654_v8  ;;  %v6435_v7 = vor.u32 %v6803_v2, %v6434_v42 }
 0x33e   : > { %4000 = vst [vmem:[%s10609_s19 + $0xa0] sm:$0xff] %v3770_v62 }
 0x343   : > { %v3771_v35 = vpop.f32.mrf.mxu3 }
 0x344   : > { %v3772_v15 = vadd.f32 %v3771_v35, %v3723_v48  ;;  %v3728_v48 = vadd.f32 %v10715_v52, %v3679_v44  ;;  %v6423_v35 = vor.u32 %v6800_v60, %v6422_v14  ;;  %v6797_v52 = vld [vmem:[#allocation10 + $0x10] sm:$0xf0] }
 0x345   : > { %v6411_v59 = vor.u32 %v6797_v52, %v6410_v33 }
 0x346   : > { %4002 = vst [vmem:[%s10609_s19 + $0xb0] sm:$0xff] %v3772_v15  ;;  %v10754_v18 = vpack.c.bf16 %v3772_v15, %v3770_v62  ;;  %v6447_v62 = vor.u32 %v6806_v57, %v6446_v39  ;;  %v3893_v15 = vpop.f32.mrf.mxu2 }
 0x348   : > { %3969 = vmatmul.bf16.gmra.mxu3 %v10550_v3  ;;  %4389 = vmatmul.bf16.gmra.mxu0 %v10754_v18  ;;  %v6539_v3 = vor.u32 %v6828_v55, %v6536_v36  ;;  %v6590_v55 = vld [vmem:[#allocation10 + $0x170] sm:$0xf]  ;;  %v3731_v36 = vadd.f32 %v10727_v49, %v3682_v24  ;;  %v3849_v49 = vpop.f32.mrf.mxu1 }
 0x349   : > { %4556 = vmatpush.bf16.msra.mxu0 %v6447_v62  ;;  %v6591_v39 = vor.u32 %v6842_v37, %v6590_v55  ;;  %v3684_v62 = vadd.f32 %v10738_v61, %v3635_v29  ;;  %v6578_v61 = vld [vmem:[#allocation10 + $0x158] sm:$0xf] }
 0x34a   : > { %4507 = vmatpush.bf16.msra.mxu3 %v6539_v3  ;;  %v10788_v3 = vperm.slane %v10579_v26, 1 }
 0x34b   : > { %v3774_v45 = vpop.f32.mrf.mxu3  ;;  %4601 = vmatpush.bf16.msra.mxu1 %v6591_v39  ;;  %v3733_v30 = vadd.f32 %v10745_v22, %v3684_v62  ;;  %v6554_v39 = vld [vmem:[#allocation10 + $0x128] sm:$0xf] }
 0x34c   : > { %v3775_v27 = vadd.f32 %v3774_v45, %v3726_v50  ;;  %v3794_v46 = vadd.f32 %v10648_v25, %v10788_v3  ;;  %v3796_v25 = vadd.f32 %v10664_v28, %v10788_v3  ;;  %v3799_v60 = vadd.f32 %v10677_v9, %v10788_v3 }
 0x34d   : > { %4472 = vmatmul.bf16.gmra.mxu2 %v10680_v1  ;;  %4557 = vmatpush.bf16.msra.mxu0 %v6435_v7  ;;  %v3801_v9 = vadd.f32 %v10695_v56, %v10788_v3 }
 0x34e   : > { %4004 = vst [vmem:[%s10609_s19 + $0xc0] sm:$0xff] %v3775_v27  ;;  %4508 = vmatpush.bf16.msra.mxu3 %v6527_v23  ;;  %v3896_v50 = vpop.f32.mrf.mxu2  ;;  %v3843_v44 = vadd.f32 %v10750_v58, %v3794_v46  ;;  %v6839_v23 = vld [vmem:[#allocation10 + $0x160] sm:$0xf0]  ;;  %v3845_v7 = vadd.f32 %v10768_v12, %v3796_v25  ;;  %v3848_v53 = vadd.f32 %v3847_v34, %v3799_v60  ;;  %v6566_v12 = vld [vmem:[#allocation10 + $0x140] sm:$0xf] }
 0x34f   : > { %v6579_v42 = vor.u32 %v6839_v23, %v6578_v61 }
 0x350   : > { %v3892_v22 = vadd.f32 %v10760_v20, %v3843_v44  ;;  %v3852_v6 = vpop.f32.mrf.mxu1  ;;  %v3894_v28 = vadd.f32 %v3893_v15, %v3845_v7  ;;  %v3897_v15 = vadd.f32 %v3896_v50, %v3848_v53 }
 0x351   : > { %4558 = vmatpush.bf16.msra.mxu0 %v6423_v35  ;;  %4602 = vmatpush.bf16.msra.mxu1 %v6579_v42 }
 0x352   : > { %4509 = vmatpush.bf16.msra.mxu3 %v6515_v21 }
 0x353   : > { %v3776_v5 = vpop.f32.mrf.mxu3 }
 0x354   : > { %v3777_v10 = vadd.f32 %v3776_v5, %v3728_v48  ;;  %v6836_v5 = vld [vmem:[#allocation10 + $0x148] sm:$0xf0] }
 0x355   : > { %4559 = vmatpush.bf16.msra.mxu0 %v6411_v59  ;;  %v6567_v24 = vor.u32 %v6836_v5, %v6566_v12 }
 0x356   : > { %4006 = vst [vmem:[%s10609_s19 + $0xd0] sm:$0xff] %v3777_v10  ;;  %v10777_v17 = vpack.c.bf16 %v3777_v10, %v3775_v27  ;;  %4510 = vmatpush.bf16.msra.mxu3 %v6503_v63  ;;  %v3898_v26 = vpop.f32.mrf.mxu2  ;;  %v3850_v63 = vadd.f32 %v3849_v49, %v3801_v9 }
 0x357   : > { %4603 = vmatpush.bf16.msra.mxu1 %v6567_v24  ;;  %v6530_v24 = vld [vmem:[#allocation10 + $0xf8] sm:$0xf] }
 0x358   : > { %3974 = vmatmul.bf16.gmra.mxu3 %v10570_v38  ;;  %4394 = vmatmul.bf16.gmra.mxu0 %v10777_v17  ;;  %v10785_v38 = vpop.f32.mrf.mxu0  ;;  %v3854_v35 = vpop.f32.mrf.mxu1  ;;  %v3899_v34 = vadd.f32 %v3898_v26, %v3850_v63 }
 0x35b   : > { %v3779_v57 = vpop.f32.mrf.mxu3 }
 0x35c   : > { %v3780_v43 = vadd.f32 %v3779_v57, %v3731_v36  ;;  %v6833_v57 = vld [vmem:[#allocation10 + $0x130] sm:$0xf0] }
 0x35d   : > { %4477 = vmatmul.bf16.gmra.mxu2 %v10704_v54  ;;  %v6555_v50 = vor.u32 %v6833_v57, %v6554_v39 }
 0x35e   : > { %4008 = vst [vmem:[%s10609_s19 + $0xe0] sm:$0xff] %v3780_v43  ;;  %v3901_v14 = vpop.f32.mrf.mxu2 }
 0x35f   : > { %4604 = vmatpush.bf16.msra.mxu1 %v6555_v50  ;;  %v6518_v50 = vld [vmem:[#allocation10 + $0xe0] sm:$0xf] }
 0x360   : > { %v10796_v51 = vpop.f32.mrf.mxu0  ;;  %v3857_v52 = vpop.f32.mrf.mxu1 }
 0x363   : > { %v3781_v45 = vpop.f32.mrf.mxu3 }
 0x364   : > { %v3782_v27 = vadd.f32 %v3781_v45, %v3733_v30 }
 0x366   : > { %4010 = vst [vmem:[%s10609_s19 + $0xf0] sm:$0xff] %v3782_v27  ;;  %v10799_v16 = vpack.c.bf16 %v3782_v27, %v3780_v43  ;;  %v3903_v13 = vpop.f32.mrf.mxu2 }
 0x368   : > { %4399 = vmatmul.bf16.gmra.mxu0 %v10799_v16  ;;  %v10808_v47 = vpop.f32.mrf.mxu0  ;;  %v3859_v62 = vpop.f32.mrf.mxu1 }
 0x36b   : > { %v3940_v2 = vpop.f32.mrf.mxu3 }
 0x36c   : > { %v3941_v58 = vadd.f32 %v3940_v2, %v3892_v22  ;;  %v6542_v2 = vld [vmem:[#allocation10 + $0x110] sm:$0xf] }
 0x36d   : > { %4482 = vmatmul.bf16.gmra.mxu2 %v10731_v4 }
 0x36e   : > { %3981 = vst [vmem:[%s10609_s19 + $0x8] sm:$0xff] %v3941_v58  ;;  %v3906_v37 = vpop.f32.mrf.mxu2 }
 0x370   : > { %v10820_v10 = vpop.f32.mrf.mxu0  ;;  %v3862_v61 = vpop.f32.mrf.mxu1 }
 0x373   : > { %v3942_v21 = vpop.f32.mrf.mxu3 }
 0x374   : > { %v3943_v20 = vadd.f32 %v3942_v21, %v3894_v28 }
 0x376   : > { %3983 = vst [vmem:[%s10609_s19 + $0x18] sm:$0xff] %v3943_v20  ;;  %v10813_v48 = vpack.c.bf16 %v3943_v20, %v3941_v58  ;;  %v3908_v27 = vpop.f32.mrf.mxu2  ;;  %v3811_v58 = vadd.f32 %v10756_v0, %v10788_v3  ;;  %v3814_v20 = vadd.f32 %v10773_v31, %v10788_v3  ;;  %v6827_v31 = vld [vmem:[#allocation10 + $0x100] sm:$0xf0] }
 0x378   : > { %4413 = vmatmul.bf16.vlgmr.msrb.gmra.mxu1 %v10813_v48  ;;  %4511 = vmatmul.bf16.vlgmr.msra.gmra.mxu3 %v10813_v48  ;;  %v10826_v56 = vpop.f32.mrf.mxu0  ;;  %v3860_v28 = vadd.f32 %v3859_v62, %v3811_v58  ;;  %v3864_v21 = vpop.f32.mrf.mxu1  ;;  %v3863_v5 = vadd.f32 %v3862_v61, %v3814_v20  ;;  %v3821_v62 = vadd.f32 %v10808_v47, %v10788_v3  ;;  %v6506_v58 = vld [vmem:[#allocation10 + $0xc8] sm:$0xf] }
 0x379   : > { %4560 = vmatmul.bf16.vlgmr.msra.gmra.mxu0 %v10623_v32  ;;  %v3804_v32 = vadd.f32 %v10713_v41, %v10788_v3  ;;  %v3806_v41 = vadd.f32 %v10725_v40, %v10788_v3 }
 0x37b   : > { %v3945_v19 = vpop.f32.mrf.mxu3  ;;  %v3853_v29 = vadd.f32 %v3852_v6, %v3804_v32  ;;  %v3855_v49 = vadd.f32 %v3854_v35, %v3806_v41 }
 0x37c   : > { %v3946_v33 = vadd.f32 %v3945_v19, %v3897_v15 }
 0x37d   : > { %4487 = vmatmul.bf16.gmra.mxu2 %v10754_v18  ;;  %v3902_v43 = vadd.f32 %v3901_v14, %v3853_v29  ;;  %v3904_v44 = vadd.f32 %v3903_v13, %v3855_v49  ;;  %v3816_v13 = vadd.f32 %v10785_v38, %v10788_v3 }
 0x37e   : > { %3985 = vst [vmem:[%s10609_s19 + $0x28] sm:$0xff] %v3946_v33  ;;  %v3911_v42 = vpop.f32.mrf.mxu2 }
 0x37f   : > { %v3912_v19 = vadd.f32 %v3911_v42, %v3863_v5 }
 0x380   : > { %v10837_v45 = vpop.f32.mrf.mxu0  ;;  %v3867_v15 = vpop.f32.mrf.mxu1 }
 0x383   : > { %v3947_v59 = vpop.f32.mrf.mxu3 }
 0x384   : > { %v3948_v55 = vadd.f32 %v3947_v59, %v3899_v34  ;;  %v3865_v59 = vadd.f32 %v3864_v21, %v3816_v13 }
 0x386   : > { %3987 = vst [vmem:[%s10609_s19 + $0x38] sm:$0xff] %v3948_v55  ;;  %v10829_v36 = vpack.c.bf16 %v3948_v55, %v3946_v33  ;;  %v3913_v35 = vpop.f32.mrf.mxu2  ;;  %v6531_v33 = vor.u32 %v6827_v31, %v6530_v24  ;;  %v3819_v55 = vadd.f32 %v10796_v51, %v10788_v3  ;;  %v6824_v51 = vld [vmem:[#allocation10 + $0xe8] sm:$0xf0] }
 0x388   : > { %4418 = vmatmul.bf16.gmra.mxu1 %v10829_v36  ;;  %4516 = vmatmul.bf16.gmra.mxu3 %v10829_v36  ;;  %v10845_v22 = vpop.f32.mrf.mxu0  ;;  %v3868_v57 = vadd.f32 %v3867_v15, %v3819_v55 }
 0x389   : > { %4565 = vmatmul.bf16.gmra.mxu0 %v10654_v8  ;;  %v3809_v8 = vadd.f32 %v10742_v11, %v10788_v3  ;;  %v6830_v11 = vld [vmem:[#allocation10 + $0x118] sm:$0xf0] }
 0x38a   : > { %v6543_v7 = vor.u32 %v6830_v11, %v6542_v2 }
 0x38b   : > { %v3950_v46 = vpop.f32.mrf.mxu3  ;;  %v3858_v23 = vadd.f32 %v3857_v52, %v3809_v8 }
 0x38c   : > { %v3951_v30 = vadd.f32 %v3950_v46, %v3902_v43  ;;  %4605 = vmatpush.bf16.msra.mxu1 %v6543_v7 }
 0x38d   : > { %4492 = vmatmul.bf16.gmra.mxu2 %v10777_v17  ;;  %v3907_v6 = vadd.f32 %v3906_v37, %v3858_v23  ;;  %v3869_v37 = vpop.f32.mrf.mxu1 }
 0x38e   : > { %3989 = vst [vmem:[%s10609_s19 + $0x48] sm:$0xff] %v3951_v30  ;;  %v3916_v34 = vpop.f32.mrf.mxu2 }
 0x38f   : > { %v3917_v46 = vadd.f32 %v3916_v34, %v3868_v57 }
 0x390   : > { %v10856_v53 = vpop.f32.mrf.mxu0  ;;  %4606 = vmatpush.bf16.msra.mxu1 %v6531_v33 }
 0x393   : > { %v3952_v26 = vpop.f32.mrf.mxu3 }
 0x394   : > { %v3953_v40 = vadd.f32 %v3952_v26, %v3904_v44  ;;  %v3870_v44 = vadd.f32 %v3869_v37, %v3821_v62 }
 0x395   : > { %v3872_v8 = vpop.f32.mrf.mxu1 }
 0x396   : > { %3991 = vst [vmem:[%s10609_s19 + $0x58] sm:$0xff] %v3953_v40  ;;  %v10843_v25 = vpack.c.bf16 %v3953_v40, %v3951_v30  ;;  %v3918_v43 = vpop.f32.mrf.mxu2  ;;  %v6519_v30 = vor.u32 %v6824_v51, %v6518_v50 }
 0x397   : > { %v3919_v61 = vadd.f32 %v3918_v43, %v3870_v44 }
 0x398   : > { %4423 = vmatmul.bf16.gmra.mxu1 %v10843_v25  ;;  %4521 = vmatmul.bf16.gmra.mxu3 %v10843_v25  ;;  %v10866_v52 = vpop.f32.mrf.mxu0 }
 0x399   : > { %4570 = vmatmul.bf16.gmra.mxu0 %v10680_v1  ;;  %v3909_v1 = vadd.f32 %v3908_v27, %v3860_v28  ;;  %4607 = vmatpush.bf16.msra.mxu1 %v6519_v30 }
 0x39b   : > { %v3955_v14 = vpop.f32.mrf.mxu3 }
 0x39c   : > { %v3956_v60 = vadd.f32 %v3955_v14, %v3907_v6  ;;  %v6821_v6 = vld [vmem:[#allocation10 + $0xd0] sm:$0xf0] }
 0x39d   : > { %4497 = vmatmul.bf16.gmra.mxu2 %v10799_v16  ;;  %v3874_v11 = vpop.f32.mrf.mxu1 }
 0x39e   : > { %3993 = vst [vmem:[%s10609_s19 + $0x68] sm:$0xff] %v3956_v60  ;;  %v3921_v40 = vpop.f32.mrf.mxu2 }
 0x3a0   : > { %v10871_v38 = vpop.f32.mrf.mxu0 }
 0x3a3   : > { %v3957_v12 = vpop.f32.mrf.mxu3 }
 0x3a4   : > { %v3958_v0 = vadd.f32 %v3957_v12, %v3909_v1  ;;  %v3829_v12 = vadd.f32 %v10837_v45, %v10788_v3  ;;  %v3831_v45 = vadd.f32 %v10845_v22, %v10788_v3 }
 0x3a6   : > { %3995 = vst [vmem:[%s10609_s19 + $0x78] sm:$0xff] %v3958_v0  ;;  %v10859_v9 = vpack.c.bf16 %v3958_v0, %v3956_v60  ;;  %v6507_v60 = vor.u32 %v6821_v6, %v6506_v58  ;;  %v3923_v28 = vpop.f32.mrf.mxu2 }
 0x3a8   : > { %4428 = vmatmul.bf16.gmra.mxu1 %v10859_v9  ;;  %4526 = vmatmul.bf16.gmra.mxu3 %v10859_v9  ;;  %v10882_v26 = vpop.f32.mrf.mxu0 }
 0x3a9   : > { %4575 = vmatmul.bf16.gmra.mxu0 %v10704_v54  ;;  %v3914_v54 = vadd.f32 %v3913_v35, %v3865_v59  ;;  %4608 = vmatpush.bf16.msra.mxu1 %v6507_v60  ;;  %v3877_v35 = vpop.f32.mrf.mxu1 }
 0x3aa   : > { %v3878_v24 = vadd.f32 %v3877_v35, %v3829_v12 }
 0x3ab   : > { %v3960_v63 = vpop.f32.mrf.mxu3 }
 0x3ac   : > { %v3961_v32 = vadd.f32 %v3960_v63, %v3912_v19 }
 0x3ae   : > { %3997 = vst [vmem:[%s10609_s19 + $0x88] sm:$0xff] %v3961_v32 }
 0x3b0   : > { %v4375_v7 = vpop.f32.mrf.mxu0 }
 0x3b1   : > { %v3879_v19 = vpop.f32.mrf.mxu1 }
 0x3b3   : > { %v3962_v29 = vpop.f32.mrf.mxu3 }
 0x3b4   : > { %v3963_v39 = vadd.f32 %v3962_v29, %v3914_v54 }
 0x3b6   : > { %3999 = vst [vmem:[%s10609_s19 + $0x98] sm:$0xff] %v3963_v39  ;;  %v10874_v41 = vpack.c.bf16 %v3963_v39, %v3961_v32  ;;  %v3880_v32 = vadd.f32 %v3879_v19, %v3831_v45 }
 0x3b8   : > { %4433 = vmatmul.bf16.gmra.mxu1 %v10874_v41  ;;  %4531 = vmatmul.bf16.gmra.mxu3 %v10874_v41  ;;  %v4377_v15 = vpop.f32.mrf.mxu0 }
 0x3b9   : > { %4580 = vmatmul.bf16.gmra.mxu0 %v10731_v4  ;;  %v3824_v4 = vadd.f32 %v10820_v10, %v10788_v3  ;;  %v3826_v10 = vadd.f32 %v10826_v56, %v10788_v3  ;;  %v3926_v56 = vpop.f32.mrf.mxu2  ;;  %v10912_v3 = vld [vmem:[#allocation11] sm:$0x7] }
 0x3ba   : > { %v3927_v13 = vadd.f32 %v3926_v56, %v3878_v24  ;;  %v10915_v22 = vperm.slane %v10912_v3, 0 }
 0x3bb   : > { %v3965_v49 = vpop.f32.mrf.mxu3  ;;  %v3873_v2 = vadd.f32 %v3872_v8, %v3824_v4  ;;  %v3875_v1 = vadd.f32 %v3874_v11, %v3826_v10 }
 0x3bc   : > { %v3966_v27 = vadd.f32 %v3965_v49, %v3917_v46  ;;  %v4366_v39 = vadd.f32 %v10856_v53, %v10915_v22  ;;  %v4373_v44 = vadd.f32 %v10882_v26, %v10915_v22 }
 0x3bd   : > { %v3922_v14 = vadd.f32 %v3921_v40, %v3873_v2 }
 0x3be   : > { %4001 = vst [vmem:[%s10609_s19 + $0xa8] sm:$0xff] %v3966_v27 }
 0x3c0   : > { %v4380_v34 = vpop.f32.mrf.mxu0 }
 0x3c1   : > { %v3928_v59 = vpop.f32.mrf.mxu2  ;;  %v4381_v26 = vadd.f32 %v4380_v34, %v10915_v22 }
 0x3c2   : > { %v3929_v55 = vadd.f32 %v3928_v59, %v3880_v32  ;;  %v4368_v32 = vadd.f32 %v10866_v52, %v10915_v22 }
 0x3c3   : > { %v3967_v23 = vpop.f32.mrf.mxu3 }
 0x3c4   : > { %v3968_v42 = vadd.f32 %v3967_v23, %v3919_v61  ;;  %v4376_v23 = vadd.f32 %v4375_v7, %v10915_v22 }
 0x3c6   : > { %4003 = vst [vmem:[%s10609_s19 + $0xb8] sm:$0xff] %v3968_v42  ;;  %v10887_v47 = vpack.c.bf16 %v3968_v42, %v3966_v27 }
 0x3c8   : > { %4438 = vmatmul.bf16.gmra.mxu1 %v10887_v47  ;;  %4536 = vmatmul.bf16.gmra.mxu3 %v10887_v47 }
 0x3c9   : > { %4585 = vmatmul.bf16.gmra.mxu0 %v10754_v18  ;;  %v3924_v18 = vadd.f32 %v3923_v28, %v3875_v1  ;;  %v10919_v43 = vpop.f32.mrf.mxu2 }
 0x3cb   : > { %v3970_v21 = vpop.f32.mrf.mxu3 }
 0x3cc   : > { %v3971_v20 = vadd.f32 %v3970_v21, %v3922_v14 }
 0x3ce   : > { %4005 = vst [vmem:[%s10609_s19 + $0xc8] sm:$0xff] %v3971_v20 }
 0x3d1   : > { %v10922_v30 = vpop.f32.mrf.mxu2 }
 0x3d3   : > { %v3972_v0 = vpop.f32.mrf.mxu3 }
 0x3d4   : > { %v3973_v5 = vadd.f32 %v3972_v0, %v3924_v18 }
 0x3d6   : > { %4007 = vst [vmem:[%s10609_s19 + $0xd8] sm:$0xff] %v3973_v5  ;;  %v10898_v31 = vpack.c.bf16 %v3973_v5, %v3971_v20 }
 0x3d8   : > { %4443 = vmatmul.bf16.gmra.mxu1 %v10898_v31  ;;  %4541 = vmatmul.bf16.gmra.mxu3 %v10898_v31 }
 0x3d9   : > { %4590 = vmatmul.bf16.gmra.mxu0 %v10777_v17  ;;  %v4382_v17 = vpop.f32.mrf.mxu0  ;;  %v10927_v53 = vpop.f32.mrf.mxu2 }
 0x3db   : > { %v3975_v33 = vpop.f32.mrf.mxu3 }
 0x3dc   : > { %v3976_v63 = vadd.f32 %v3975_v33, %v3927_v13 }
 0x3de   : > { %4009 = vst [vmem:[%s10609_s19 + $0xe8] sm:$0xff] %v3976_v63 }
 0x3e1   : > { %v4385_v57 = vpop.f32.mrf.mxu0  ;;  %v10931_v61 = vpop.f32.mrf.mxu2 }
 0x3e2   : > { %v4386_v35 = vadd.f32 %v4385_v57, %v10915_v22 }
 0x3e3   : > { %v3977_v54 = vpop.f32.mrf.mxu3 }
 0x3e4   : > { %v3978_v37 = vadd.f32 %v3977_v54, %v3929_v55 }
 0x3e6   : > { %4011 = vst [vmem:[%s10609_s19 + $0xf8] sm:$0xff] %v3978_v37  ;;  %v10907_v29 = vpack.c.bf16 %v3978_v37, %v3976_v63 }
 0x3e8   : > { %4448 = vmatmul.bf16.gmra.mxu1 %v10907_v29  ;;  %4546 = vmatmul.bf16.gmra.mxu3 %v10907_v29 }
 0x3e9   : > { %4595 = vmatmul.bf16.gmra.mxu0 %v10799_v16  ;;  %v4387_v46 = vpop.f32.mrf.mxu0  ;;  %v4371_v16 = vadd.f32 %v10871_v38, %v10915_v22  ;;  %v4378_v38 = vadd.f32 %v4377_v15, %v10915_v22  ;;  %v10938_v11 = vpop.f32.mrf.mxu2 }
 0x3f1   : > { %v4390_v8 = vpop.f32.mrf.mxu0  ;;  %v10945_v7 = vpop.f32.mrf.mxu2 }
 0x3f2   : > { %v4391_v24 = vadd.f32 %v4390_v8, %v10915_v22 }
 0x3f5   : > { %v4414_v50 = vpop.f32.mrf.mxu1 }
 0x3f6   : > { %v4415_v51 = vadd.f32 %v4414_v50, %v4366_v39 }
 0x3f8   : > { %4609 = vmatmul.bf16.vlgmr.msra.gmra.mxu1 %v10813_v48  ;;  %v6592_v63 = vmul.f32 -1.442695, %v4415_v51 }
 0x3f9   : > { %v4392_v48 = vpop.f32.mrf.mxu0  ;;  %v10951_v1 = vpop.f32.mrf.mxu2 }
 0x3fa   : > { %v4393_v34 = vadd.f32 %v4392_v48, %v10915_v22  ;;  %7360 = vpow2.f32 %v6592_v63 }
 0x3fd   : > { %v4416_v62 = vpop.f32.mrf.mxu1 }
 0x3fe   : > { %v4417_v55 = vadd.f32 %v4416_v62, %v4368_v32 }
 0x400   : > { %v6593_v39 = vmul.f32 -1.442695, %v4417_v55  ;;  %v7361_v50 = vpop.eup %7360 }
 0x401   : > { %v10959_v5 = vpop.f32.mrf.mxu2 }
 0x402   : > { %7362 = vpow2.f32 %v6593_v39 }
 0x405   : > { %v4419_v49 = vpop.f32.mrf.mxu1 }
 0x406   : > { %v4420_v27 = vadd.f32 %v4419_v49, %v4371_v16  ;;  %v10988_v16 = vadd.f32 1.0, %v7361_v50 }
 0x408   : > { %4614 = vmatmul.bf16.gmra.mxu1 %v10829_v36  ;;  %v4395_v36 = vpop.f32.mrf.mxu0  ;;  %vm4719_vm1 = vweird.f32 %v10988_v16 }
 0x409   : > { %v10967_v13 = vpop.f32.mrf.mxu2 }
 0x40d   : > { %v4421_v40 = vpop.f32.mrf.mxu1 }
 0x40e   : > { %v4422_v4 = vadd.f32 %v4421_v40, %v4373_v44  ;;  %v7363_v44 = vpop.eup %7362 }
 0x410   : > { %v4397_v14 = vpop.f32.mrf.mxu0  ;;  %v6595_v8 = vmul.f32 -1.442695, %v4422_v4 }
 0x411   : > { %v4398_v40 = vadd.f32 %v4397_v14, %v10915_v22 }
 0x415   : > { %v4424_v42 = vpop.f32.mrf.mxu1 }
 0x416   : > { %v10934_v2 = vadd.f32 %v4424_v42, %v4376_v23 }
 0x418   : > { %4619 = vmatmul.bf16.gmra.mxu1 %v10843_v25  ;;  %v4383_v25 = vadd.f32 %v4382_v17, %v10915_v22  ;;  %v4400_v20 = vpop.f32.mrf.mxu0  ;;  %v10981_v17 = vpop.f32.mrf.mxu2  ;;  %v6596_v4 = vmul.f32 -1.442695, %v10934_v2 }
 0x41d   : > { %v4426_v58 = vpop.f32.mrf.mxu1 }
 0x41e   : > { %v10940_v6 = vadd.f32 %v4426_v58, %v4378_v38 }
 0x420   : > { %v10957_v0 = vpop.f32.mrf.mxu0  ;;  %v10993_v49 = vpop.f32.mrf.mxu2  ;;  %v6597_v32 = vmul.f32 -1.442695, %v10940_v6 }
 0x425   : > { %v4429_v10 = vpop.f32.mrf.mxu1 }
 0x426   : > { %v10943_v60 = vadd.f32 %v4429_v10, %v4381_v26  ;;  %v4401_v26 = vadd.f32 %v4400_v20, %v10915_v22 }
 0x428   : > { %4624 = vmatmul.bf16.gmra.mxu1 %v10859_v9  ;;  %v4388_v9 = vadd.f32 %v4387_v46, %v10915_v22  ;;  %v10965_v45 = vpop.f32.mrf.mxu0  ;;  %v6594_v46 = vmul.f32 -1.442695, %v4420_v27  ;;  %v11001_v27 = vadd.f32 1.0, %v7363_v44  ;;  %v11009_v58 = vpop.f32.mrf.mxu2 }
 0x42a   : > { %7364 = vpow2.f32 %v6594_v46  ;;  %vm4734_vm4 = vweird.f32 %v11001_v27 }
 0x42b   : > { %7366 = vrcp.f32 %v10988_v16 }
 0x42c   : > { %7368 = vpow2.f32 %v6595_v8  ;;  %v4725_v8 = vand.u32 2147483648, %v10988_v16 }
 0x42d   : > { %v4431_v28 = vpop.f32.mrf.mxu1  ;;  %7370 = vrcp.f32 %v11001_v27 }
 0x42e   : > { %v10949_v21 = vadd.f32 %v4431_v28, %v4383_v25  ;;  %7372 = vpow2.f32 %v6596_v4 }
 0x430   : > { %v10977_v54 = vpop.f32.mrf.mxu0  ;;  %v7365_v38 = vpop.eup %7364 }
 0x431   : > { %v11012_v10 = vadd.f32 1.0, %v7365_v38  ;;  %v11059_v6 = vpop.f32.mrf.mxu2 }
 0x433   : > { %7374 = vrcp.f32 %v11012_v10  ;;  %vm4749_vm8 = vweird.f32 %v11012_v10 }
 0x435   : > { %v4434_v12 = vpop.f32.mrf.mxu1 }
 0x436   : > { %v10954_v18 = vadd.f32 %v4434_v12, %v4386_v35  ;;  %v11019_v12 = vperm.slane %v10912_v3, 1 }
 0x438   : > { %4629 = vmatmul.bf16.gmra.mxu1 %v10874_v41  ;;  %v10972_v41 = vpop.f32.mrf.mxu3  ;;  %v10990_v62 = vpop.f32.mrf.mxu0  ;;  %v4469_v63 = vadd.f32 %v10927_v53, %v11019_v12  ;;  %v11052_v53 = vadd.f32 %v10938_v11, %v11019_v12 }
 0x43d   : > { %v4436_v15 = vpop.f32.mrf.mxu1 }
 0x43e   : > { %v10962_v56 = vadd.f32 %v4436_v15, %v4388_v9 }
 0x440   : > { %v10983_v57 = vpop.f32.mrf.mxu3 }
 0x445   : > { %v4439_v19 = vpop.f32.mrf.mxu1 }
 0x446   : > { %v10969_v33 = vadd.f32 %v4439_v19, %v4391_v24  ;;  %v4464_v24 = vadd.f32 %v10919_v43, %v11019_v12  ;;  %v4466_v19 = vadd.f32 %v10922_v30, %v11019_v12  ;;  %v11048_v30 = vadd.f32 %v10931_v61, %v11019_v12 }
 0x447   : > { %v11069_v61 = vadd.f32 %v10959_v5, %v11019_v12 }
 0x448   : > { %4634 = vmatmul.bf16.gmra.mxu1 %v10887_v47  ;;  %v4396_v47 = vadd.f32 %v4395_v36, %v10915_v22  ;;  %v10997_v48 = vpop.f32.mrf.mxu3  ;;  %v11003_v36 = vpop.eup %7366  ;;  %v4513_v11 = vadd.f32 %v10972_v41, %v4464_v24  ;;  %v4515_v44 = vadd.f32 %v10983_v57, %v4466_v19  ;;  %v11100_v57 = vadd.f32 %v10993_v49, %v11019_v12 }
 0x449   : > { %v7369_v14 = vpop.eup %7368  ;;  %v4715_v25 = vmul.f32 %v11003_v36, %v10988_v16  ;;  %vm4720_vm0 = vweird.f32 %v11003_v36  ;;  %v6598_v24 = vmul.f32 -1.442695, %v10943_v60  ;;  %v4753_v60 = vand.u32 2147483647, %v11012_v10 }
 0x44a   : > { %v11024_v9 = vadd.f32 1.0, %v7369_v14  ;;  %v11027_v20 = vpop.eup %7370  ;;  %vm11109_vm3 = vmor %vm4719_vm1, %vm4720_vm0  ;;  %v4726_v14 = vor.u32 1.1754944e-38, %v4725_v8  ;;  %v4755_v8 = vand.u32 2147483648, %v11012_v10 }
 0x44b   : > { %v4716_v15 = vsub.f32 1.0, %v4715_v25  ;;  %v4730_v55 = vmul.f32 %v11027_v20, %v11001_v27  ;;  %vm4735_vm5 = vweird.f32 %v11027_v20  ;;  %vm11162_vm9 = vcmp.eq.f32.partialorder %v4753_v60, 8.507059e+37 }
 0x44c   : > { %7376 = vrcp.f32 %v11024_v9  ;;  %vm11157_vm7 = vmor %vm4734_vm4, %vm4735_vm5  ;;  %vm4764_vm11 = vweird.f32 %v11024_v9 }
 0x44d   : > { %v4441_v59 = vpop.f32.mrf.mxu1  ;;  %7378 = vpow2.f32 %v6597_v32  ;;  %v4731_v5 = vsub.f32 1.0, %v4730_v55 }
 0x44e   : > { %v10979_v37 = vadd.f32 %v4441_v59, %v4393_v34  ;;  %v7373_v34 = vpop.eup %7372  ;;  %v4403_v59 = vadd.f32 %v10957_v0, %v10915_v22  ;;  %v11056_v22 = vadd.f32 %v10945_v7, %v11019_v12  ;;  %v11076_v7 = vadd.f32 %v10967_v13, %v11019_v12 }
 0x44f   : > { %v11061_v39 = vpop.eup %7374  ;;  %v11079_v46 = vadd.f32 1.0, %v7373_v34  ;;  %v11089_v13 = vadd.f32 %v10981_v17, %v11019_v12  ;;  %7380 = vtanh.f32 %v4513_v11  ;;  %v4738_v17 = vand.u32 2147483647, %v11001_v27 }
 0x450   : > { %v11021_v2 = vpop.f32.mrf.mxu3  ;;  %vm4750_vm10 = vweird.f32 %v11061_v39 }
 0x451   : > { %7382 = vrcp.f32 %v11079_v46  ;;  %vm11133_vm6 = vcmp.eq.f32.partialorder %v4738_v17, 8.507059e+37  ;;  %v4520_v4 = vadd.f32 %v11021_v2, %v11048_v30  ;;  %vm11194_vm12 = vmor %vm4749_vm8, %vm4750_vm10  ;;  %vm4779_vm0 = vweird.f32 %v11079_v46 }
 0x452   : > { %v11093_v38 = vpop.eup %7376  ;;  %7384 = vtanh.f32 %v4515_v44 }
 0x453   : > { %v7379_v25 = vpop.eup %7378  ;;  %vm4765_vm13 = vweird.f32 %v11093_v38 }
 0x454   : > { %vm11224_vm15 = vmor %vm4764_vm11, %vm4765_vm13 }
 0x455   : > { %v4444_v51 = vpop.f32.mrf.mxu1  ;;  %v7381_v55 = vpop.eup %7380 }
 0x456   : > { %v10986_v52 = vadd.f32 %v4444_v51, %v4396_v47  ;;  %v11065_v47 = vadd.f32 %v10951_v1, %v11019_v12  ;;  %v4723_v51 = vand.u32 2147483647, %v10988_v16 }
 0x458   : > { %4639 = vmatmul.bf16.gmra.mxu1 %v10898_v31  ;;  %v11005_v31 = vpop.f32.mrf.mxu0  ;;  %vm11102_vm2 = vcmp.eq.f32.partialorder %v4723_v51, 8.507059e+37  ;;  %v11143_v51 = vpop.eup %7382 }
 0x459   : > { %v7385_v44 = vpop.eup %7384  ;;  %vm4780_vm1 = vweird.f32 %v11143_v51 }
 0x45d   : > { %v4446_v23 = vpop.f32.mrf.mxu1 }
 0x45e   : > { %v10999_v42 = vadd.f32 %v4446_v23, %v4398_v40  ;;  %v4745_v40 = vmul.f32 %v11061_v39, %v11012_v10  ;;  %v4522_v23 = vpop.f32.mrf.mxu3 }
 0x460   : > { %v11044_v43 = vpop.f32.mrf.mxu0 }
 0x465   : > { %v4449_v28 = vpop.f32.mrf.mxu1 }
 0x466   : > { %v11016_v35 = vadd.f32 %v4449_v28, %v4401_v26  ;;  %v4518_v26 = vadd.f32 %v10997_v48, %v4469_v63  ;;  %v4746_v48 = vsub.f32 1.0, %v4745_v40  ;;  %v4740_v63 = vand.u32 2147483648, %v11001_v27  ;;  %v4524_v2 = vpop.f32.mrf.mxu3 }
 0x467   : > { %v4775_v27 = vmul.f32 %v11143_v51, %v11079_v46 }
 0x468   : > { %4644 = vmatmul.bf16.gmra.mxu1 %v10907_v29  ;;  %v11039_v29 = vperm.slane %v10912_v3, 2  ;;  %v4717_v3 = vmul.f32 %v11003_v36, %v4716_v15  ;;  %v4760_v15 = vmul.f32 %v11093_v38, %v11024_v9  ;;  %v11130_v32 = vpop.f32.mrf.mxu0  ;;  %7386 = vtanh.f32 %v4518_v26 }
 0x469   : > { %7388 = vpow2.f32 %v6598_v24 }
 0x46a   : > { %v4562_v1 = vadd.f32 %v10965_v45, %v11039_v29  ;;  %v4718_v41 = vadd.f32 %v11003_v36, %v4717_v3  ;;  %v4564_v45 = vadd.f32 %v10977_v54, %v11039_v29  ;;  %v4732_v54 = vmul.f32 %v11027_v20, %v4731_v5 }
 0x46b   : > { %v11116_v49 = vadd.f32 %v10990_v62, %v11039_v29  ;;  %v11128_v62 = vadd.f32 %v11009_v58, %v11019_v12  ;;  %v4761_v5 = vsub.f32 1.0, %v4760_v15  ;;  %v11149_v40 = vadd.f32 %v11005_v31, %v11039_v29 }
 0x46c   : > { %v4722_v28 = vsel %vm11109_vm3, %v11003_v36, %v4718_v41  ;;  %v4733_v58 = vadd.f32 %v11027_v20, %v4732_v54  ;;  %v4741_v41 = vor.u32 1.1754944e-38, %v4740_v63  ;;  %v11168_v31 = vadd.f32 %v11059_v6, %v11019_v12  ;;  %vm11268_vm3 = vmor %vm4779_vm0, %vm4780_vm1 }
 0x46d   : > { %v4451_v0 = vpop.f32.mrf.mxu1  ;;  %v4727_v3 = vsel %vm11102_vm2, %v4726_v14, %v4722_v28  ;;  %v4523_v14 = vadd.f32 %v4522_v23, %v11052_v53  ;;  %v4756_v28 = vor.u32 1.1754944e-38, %v4755_v8  ;;  %v4762_v6 = vmul.f32 %v11093_v38, %v4761_v5 }
 0x46e   : > { %v11072_v50 = vadd.f32 %v4451_v0, %v4403_v59  ;;  %v4495_v59 = vpop.f32.mrf.mxu2  ;;  %v11141_v0 = vadd.f32 1.0, %v7379_v25  ;;  %v5274_v17 = vmul.f32 %v7381_v55, %v4727_v3  ;;  %v4737_v30 = vsel %vm11157_vm7, %v11027_v20, %v4733_v58  ;;  %v7387_v54 = vpop.eup %7386 }
 0x46f   : > { %v4768_v15 = vand.u32 2147483647, %v11024_v9  ;;  %v11183_v20 = vadd.f32 %v11044_v43, %v11039_v29  ;;  %v7389_v53 = vpop.eup %7388  ;;  %v4742_v23 = vsel %vm11133_vm6, %v4741_v41, %v4737_v30  ;;  %v11190_v63 = vadd.f32 %v4495_v59, %v11019_v12 }
 0x470   : > { %v4776_v43 = vsub.f32 1.0, %v4775_v27  ;;  %v6599_v36 = vmul.f32 -1.442695, %v10949_v21  ;;  %v4763_v59 = vadd.f32 %v11093_v38, %v4762_v6  ;;  %v11212_v21 = vadd.f32 1.0, %v7389_v53 }
 0x471   : > { %vm11208_vm14 = vcmp.eq.f32.partialorder %v4768_v15, 8.507059e+37  ;;  %v4525_v41 = vadd.f32 %v4524_v2, %v11056_v22  ;;  %vm4794_vm4 = vweird.f32 %v11141_v0 }
 0x472   : > { %v4777_v30 = vmul.f32 %v11143_v51, %v4776_v43  ;;  %v4767_v22 = vsel %vm11224_vm15, %v11093_v38, %v4763_v59  ;;  %v4800_v38 = vand.u32 2147483648, %v11141_v0 }
 0x474   : > { %v4778_v15 = vadd.f32 %v11143_v51, %v4777_v30 }
 0x475   : > { %v4610_v19 = vpop.f32.mrf.mxu1 }
 0x476   : > { %v4611_v34 = vadd.f32 %v4610_v19, %v4562_v1  ;;  %v4747_v1 = vmul.f32 %v11061_v39, %v4746_v48  ;;  %v4770_v19 = vand.u32 2147483648, %v11024_v9  ;;  %v4498_v58 = vpop.f32.mrf.mxu2  ;;  %v4527_v9 = vpop.f32.mrf.mxu3  ;;  %v4782_v8 = vsel %vm11268_vm3, %v11143_v51, %v4778_v15 }
 0x477   : > { %v11230_v27 = vadd.f32 %v4498_v58, %v11019_v12  ;;  %v11274_v58 = vor.u32 1.1754944e-38, %v4800_v38 }
 0x478   : > { %v6608_v11 = vmul.f32 -1.442695, %v4611_v34  ;;  %v4748_v25 = vadd.f32 %v11061_v39, %v4747_v1  ;;  %v5275_v1 = vmul.f32 %v7385_v44, %v4742_v23  ;;  %v4771_v5 = vor.u32 1.1754944e-38, %v4770_v19 }
 0x47a   : > { %7390 = vpow2.f32 %v6608_v11  ;;  %v4752_v3 = vsel %vm11194_vm12, %v11061_v39, %v4748_v25  ;;  %v11216_v39 = vadd.f32 %v11130_v32, %v11039_v29  ;;  %v4783_v32 = vand.u32 2147483647, %v11079_v46 }
 0x47b   : > { %7392 = vrcp.f32 %v11141_v0  ;;  %v4757_v44 = vsel %vm11162_vm9, %v4756_v28, %v4752_v3  ;;  %v4785_v25 = vand.u32 2147483648, %v11079_v46  ;;  %v6600_v46 = vmul.f32 -1.442695, %v10954_v18 }
 0x47c   : > { %7394 = vtanh.f32 %v4520_v4  ;;  %v11244_v6 = vmul.f32 %v7387_v54, %v4757_v44  ;;  %vm11252_vm2 = vcmp.eq.f32.partialorder %v4783_v32, 8.507059e+37  ;;  %vm4809_vm12 = vweird.f32 %v11212_v21 }
 0x47d   : > { %v4612_v48 = vpop.f32.mrf.mxu1  ;;  %7396 = vtanh.f32 %v4523_v14  ;;  %v4786_v60 = vor.u32 1.1754944e-38, %v4785_v25  ;;  %v4815_v25 = vand.u32 2147483648, %v11212_v21 }
 0x47e   : > { %v4613_v24 = vadd.f32 %v4612_v48, %v4564_v45  ;;  %v4576_v45 = vpop.f32.mrf.mxu0 }
 0x47f   : > { %v11259_v43 = vadd.f32 %v4576_v45, %v11039_v29  ;;  %v4798_v45 = vand.u32 2147483647, %v11141_v0 }
 0x480   : > { %v7391_v34 = vpop.eup %7390  ;;  %v6609_v55 = vmul.f32 -1.442695, %v4613_v24  ;;  %v4528_v24 = vadd.f32 %v4527_v9, %v11065_v47  ;;  %v4787_v9 = vsel %vm11252_vm2, %v4786_v60, %v4782_v8 }
 0x481   : > { %v11204_v10 = vadd.f32 1.0, %v7391_v34  ;;  %v11206_v11 = vpop.eup %7392  ;;  %vm11302_vm7 = vcmp.eq.f32.partialorder %v4798_v45, 8.507059e+37 }
 0x482   : > { %7398 = vpow2.f32 %v6609_v55  ;;  %v7395_v4 = vpop.eup %7394  ;;  %v4790_v16 = vmul.f32 %v11206_v11, %v11141_v0  ;;  %vm4795_vm6 = vweird.f32 %v11206_v11 }
 0x483   : > { %7400 = vrcp.f32 %v11204_v10  ;;  %v11238_v14 = vpop.eup %7396  ;;  %v5043_v51 = vand.u32 2147483647, %v11204_v10  ;;  %vm5039_vm8 = vweird.f32 %v11204_v10  ;;  %vm11324_vm11 = vmor %vm4794_vm4, %vm4795_vm6 }
 0x484   : > { %7402 = vpow2.f32 %v6599_v36  ;;  %v11318_v59 = vmul.f32 %v11238_v14, %v4787_v9  ;;  %v11335_v14 = vor.u32 1.1754944e-38, %v4815_v25  ;;  %v6601_v9 = vmul.f32 -1.442695, %v10962_v56 }
 0x485   : > { %v4615_v2 = vpop.f32.mrf.mxu1  ;;  %7404 = vtanh.f32 %v5274_v17  ;;  %v4772_v17 = vsel %vm11208_vm14, %v4771_v5, %v4767_v22  ;;  %v5045_v22 = vand.u32 2147483648, %v11204_v10  ;;  %vm5044_vm10 = vcmp.eq.f32.partialorder %v5043_v51, 8.507059e+37 }
 0x486   : > { %7406 = vrcp.f32 %v11212_v21  ;;  %v4616_v28 = vadd.f32 %v4615_v2, %v11116_v49  ;;  %v4791_v49 = vsub.f32 1.0, %v4790_v16  ;;  %v4578_v36 = vpop.f32.mrf.mxu0  ;;  %v11262_v3 = vmul.f32 %v7395_v4, %v4772_v17 }
 0x487   : > { %7408 = vtanh.f32 %v4525_v41  ;;  %v11289_v26 = vadd.f32 %v4578_v36, %v11039_v29  ;;  %v5046_v19 = vor.u32 1.1754944e-38, %v5045_v22 }
 0x488   : > { %v7399_v48 = vpop.eup %7398  ;;  %v6610_v53 = vmul.f32 -1.442695, %v4616_v28  ;;  %7410 = vtanh.f32 %v5275_v1  ;;  %v4792_v4 = vmul.f32 %v11206_v11, %v4791_v49 }
 0x489   : > { %v7401_v23 = vpop.eup %7400  ;;  %v11256_v54 = vadd.f32 1.0, %v7399_v48 }
 0x48a   : > { %v7403_v34 = vpop.eup %7402  ;;  %7412 = vpow2.f32 %v6610_v53  ;;  %v5035_v55 = vmul.f32 %v7401_v23, %v11204_v10  ;;  %vm5040_vm5 = vweird.f32 %v7401_v23 }
 0x48b   : > { %v7405_v47 = vpop.eup %7404  ;;  %7414 = vrcp.f32 %v11256_v54  ;;  %v11286_v44 = vadd.f32 1.0, %v7403_v34  ;;  %vm5041_vm9 = vmor %vm5039_vm8, %vm5040_vm5  ;;  %v5060_v0 = vand.u32 2147483648, %v11256_v54  ;;  %vm5054_vm15 = vweird.f32 %v11256_v54 }
 0x48c   : > { %v11277_v1 = vpop.eup %7406  ;;  %7416 = vtanh.f32 %v4528_v24  ;;  %v5036_v5 = vsub.f32 1.0, %v5035_v55  ;;  %v4793_v24 = vadd.f32 %v11206_v11, %v4792_v4 }
 0x48d   : > { %v11283_v41 = vpop.eup %7408  ;;  %v4617_v30 = vpop.f32.mrf.mxu1  ;;  %v4805_v2 = vmul.f32 %v11277_v1, %v11212_v21  ;;  %7418 = vpow2.f32 %v6600_v46  ;;  %vm4810_vm14 = vweird.f32 %v11277_v1  ;;  %v4830_v45 = vand.u32 2147483648, %v11286_v44 }
 0x48e   : > { %v4618_v32 = vadd.f32 %v4617_v30, %v11149_v40  ;;  %v5037_v16 = vmul.f32 %v7401_v23, %v5036_v5  ;;  %v11294_v18 = vpop.eup %7410  ;;  %v4529_v40 = vpop.f32.mrf.mxu3  ;;  %7420 = vrcp.f32 %v11286_v44  ;;  %v4797_v5 = vsel %vm11324_vm11, %v11206_v11, %v4793_v24  ;;  %vm11382_vm3 = vmor %vm4809_vm12, %vm4810_vm14 }
 0x48f   : > { %v4806_v36 = vsub.f32 1.0, %v4805_v2  ;;  %v4530_v10 = vadd.f32 %v4529_v40, %v11069_v61  ;;  %v4581_v8 = vpop.f32.mrf.mxu0 }
 0x490   : > { %v7413_v28 = vpop.eup %7412  ;;  %v6611_v48 = vmul.f32 -1.442695, %v4618_v32  ;;  %v5038_v17 = vadd.f32 %v7401_v23, %v5037_v16  ;;  %v5058_v32 = vand.u32 2147483647, %v11256_v54  ;;  %v11347_v51 = vadd.f32 %v4581_v8, %v11039_v29 }
 0x491   : > { %v7415_v15 = vpop.eup %7414  ;;  %v11309_v53 = vadd.f32 1.0, %v7413_v28  ;;  %v4807_v11 = vmul.f32 %v11277_v1, %v4806_v36  ;;  %v4802_v28 = vsel %vm11302_vm7, %v11274_v58, %v4797_v5  ;;  %v4828_v36 = vand.u32 2147483647, %v11286_v44 }
 0x492   : > { %v11312_v49 = vpop.eup %7416  ;;  %7422 = vpow2.f32 %v6611_v48  ;;  %v5042_v34 = vsel %vm5041_vm9, %v7401_v23, %v5038_v17  ;;  %v5050_v60 = vmul.f32 %v7415_v15, %v11256_v54  ;;  %v4813_v23 = vand.u32 2147483647, %v11212_v21 }
 0x493   : > { %7424 = vrcp.f32 %v11309_v53  ;;  %v5047_v55 = vsel %vm5044_vm10, %v5046_v19, %v5042_v34  ;;  %v7419_v30 = vpop.eup %7418  ;;  %vm5055_vm13 = vweird.f32 %v7415_v15  ;;  %v5061_v17 = vor.u32 1.1754944e-38, %v5060_v0 }
 0x494   : > { %v11329_v46 = vmul.f32 %v7405_v47, %v5047_v55  ;;  %v5051_v61 = vsub.f32 1.0, %v5050_v60  ;;  %7426 = vtanh.f32 %v11244_v6  ;;  %v11342_v16 = vpop.eup %7420  ;;  %v11354_v40 = vadd.f32 1.0, %v7419_v30  ;;  %vm5056_vm0 = vmor %vm5054_vm15, %vm5055_vm13 }
 0x495   : > { %v4620_v4 = vpop.f32.mrf.mxu1  ;;  %7428 = vtanh.f32 %v4530_v10  ;;  %vm11359_vm1 = vcmp.eq.f32.partialorder %v4813_v23, 8.507059e+37  ;;  %vm5059_vm2 = vcmp.eq.f32.partialorder %v5058_v32, 8.507059e+37  ;;  %v4808_v58 = vadd.f32 %v11277_v1, %v4807_v11 }
 0x496   : > { %v4621_v22 = vadd.f32 %v4620_v4, %v11183_v20  ;;  %5322 = vmax.xlane.f32.xlu0 %v11329_v46  ;;  %v5052_v47 = vmul.f32 %v7415_v15, %v5051_v61  ;;  %v4532_v56 = vpop.f32.mrf.mxu3  ;;  %v4820_v38 = vmul.f32 %v11342_v16, %v11286_v44  ;;  %v5075_v61 = vand.u32 2147483648, %v11309_v53 }
 0x497   : > { %v4533_v23 = vadd.f32 %v4532_v56, %v11076_v7  ;;  %v5073_v0 = vand.u32 2147483647, %v11309_v53  ;;  %v11390_v7 = vmul.f32 %v11283_v41, %v4802_v28  ;;  %v4812_v30 = vsel %vm11382_vm3, %v11277_v1, %v4808_v58 }
 0x498   : > { %v7423_v6 = vpop.eup %7422  ;;  %v6612_v20 = vmul.f32 -1.442695, %v4621_v22  ;;  %v5053_v2 = vadd.f32 %v7415_v15, %v5052_v47  ;;  %v4821_v21 = vsub.f32 1.0, %v4820_v38  ;;  %v4583_v47 = vpop.f32.mrf.mxu0  ;;  %vm5069_vm5 = vweird.f32 %v11309_v53 }
 0x499   : > { %v7425_v25 = vpop.eup %7424  ;;  %v11356_v48 = vadd.f32 1.0, %v7423_v6  ;;  %v5076_v1 = vor.u32 1.1754944e-38, %v5075_v61  ;;  %vm4824_vm7 = vweird.f32 %v11286_v44  ;;  %vm5074_vm8 = vcmp.eq.f32.partialorder %v5073_v0, 8.507059e+37 }
 0x49a   : > { %7430 = vpow2.f32 %v6612_v20  ;;  %v5057_v19 = vsel %vm5056_vm0, %v7415_v15, %v5053_v2  ;;  %v5065_v54 = vmul.f32 %v7425_v25, %v11309_v53  ;;  %v7427_v34 = vpop.eup %7426  ;;  %vm5070_vm4 = vweird.f32 %v7425_v25 }
 0x49b   : > { %7432 = vrcp.f32 %v11356_v48  ;;  %v5062_v60 = vsel %vm5059_vm2, %v5061_v17, %v5057_v19  ;;  %v11372_v15 = vpop.eup %7428  ;;  %vm5071_vm6 = vmor %vm5069_vm5, %vm5070_vm4  ;;  %v4817_v53 = vsel %vm11359_vm1, %v11335_v14, %v4812_v30  ;;  %v11411_v28 = vadd.f32 %v4583_v47, %v11039_v29 }
 0x49c   : > { %7434 = vpow2.f32 %v6601_v9  ;;  %v11370_v10 = vmul.f32 %v11294_v18, %v5062_v60  ;;  %v5066_v55 = vsub.f32 1.0, %v5065_v54  ;;  %v11398_v9 = vor.u32 1.1754944e-38, %v4830_v45 }
 0x49d   : > { %7436 = vrcp.f32 %v11354_v40  ;;  %v4622_v8 = vpop.f32.mrf.mxu1  ;;  %v4822_v56 = vmul.f32 %v11342_v16, %v4821_v21  ;;  %vm4825_vm9 = vweird.f32 %v11342_v16  ;;  %v4843_v38 = vand.u32 2147483647, %v11354_v40 }
 0x49e   : > { %v4623_v18 = vadd.f32 %v4622_v8, %v11216_v39  ;;  %5324 = vmax.xlane.f32.xlu0 %v11370_v10  ;;  %v5067_v4 = vmul.f32 %v7425_v25, %v5066_v55  ;;  %7438 = vtanh.f32 %v11262_v3  ;;  %v6602_v39 = vmul.f32 -1.442695, %v10969_v33  ;;  %v4534_v19 = vpop.f32.mrf.mxu3  ;;  %vm11450_vm15 = vmor %vm4824_vm7, %vm4825_vm9 }
 0x49f   : > { %7440 = vtanh.f32 %v4533_v23  ;;  %v5090_v60 = vand.u32 2147483648, %v11356_v48  ;;  %vm11422_vm10 = vcmp.eq.f32.partialorder %v4828_v36, 8.507059e+37  ;;  %v5088_v23 = vand.u32 2147483647, %v11356_v48 }
 0x4a0   : > { %v7431_v22 = vpop.eup %7430  ;;  %v6613_v32 = vmul.f32 -1.442695, %v4623_v18  ;;  %v5068_v11 = vadd.f32 %v7425_v25, %v5067_v4  ;;  %v11432_v61 = vmul.f32 %v11312_v49, %v4817_v53  ;;  %v4845_v36 = vand.u32 2147483648, %v11354_v40 }
 0x4a1   : > { %v7433_v6 = vpop.eup %7432  ;;  %v11400_v41 = vadd.f32 1.0, %v7431_v22  ;;  %vm5084_vm12 = vweird.f32 %v11356_v48  ;;  %v4535_v49 = vadd.f32 %v4534_v19, %v11089_v13  ;;  %v5091_v22 = vor.u32 1.1754944e-38, %v5090_v60 }
 0x4a2   : > { %v7435_v20 = vpop.eup %7434  ;;  %7442 = vpow2.f32 %v6613_v32  ;;  %v5072_v3 = vsel %vm5071_vm6, %v7425_v25, %v5068_v11  ;;  %v5080_v33 = vmul.f32 %v7433_v6, %v11356_v48  ;;  %vm5085_vm11 = vweird.f32 %v7433_v6 }
 0x4a3   : > { %v11405_v2 = vpop.eup %7436  ;;  %7444 = vrcp.f32 %v11400_v41  ;;  %v5077_v17 = vsel %vm5074_vm8, %v5076_v1, %v5072_v3  ;;  %v11419_v24 = vadd.f32 1.0, %v7435_v20  ;;  %vm5086_vm13 = vmor %vm5084_vm12, %vm5085_vm11  ;;  %vm5089_vm14 = vcmp.eq.f32.partialorder %v5088_v23, 8.507059e+37 }
 0x4a4   : > { %7446 = vpow2.f32 %v6602_v39  ;;  %v11415_v25 = vmul.f32 %v7427_v34, %v5077_v17  ;;  %v5081_v54 = vsub.f32 1.0, %v5080_v33  ;;  %v7439_v58 = vpop.eup %7438  ;;  %v4835_v5 = vmul.f32 %v11405_v2, %v11354_v40  ;;  %v4586_v39 = vpop.f32.mrf.mxu0 }
 0x4a5   : > { %v4625_v14 = vpop.f32.mrf.mxu1  ;;  %v11429_v8 = vpop.eup %7440  ;;  %7448 = vtanh.f32 %v11318_v59  ;;  %v11454_v11 = vor.u32 1.1754944e-38, %v4845_v36  ;;  %v6603_v20 = vmul.f32 -1.442695, %v10979_v37  ;;  %vm4839_vm0 = vweird.f32 %v11354_v40 }
 0x4a6   : > { %v4626_v45 = vadd.f32 %v4625_v14, %v11259_v43  ;;  %5326 = vmax.xlane.f32.xlu1 %v11415_v25  ;;  %v5082_v34 = vmul.f32 %v7433_v6, %v5081_v54  ;;  %v4823_v43 = vadd.f32 %v11342_v16, %v4822_v56  ;;  %7450 = vrcp.f32 %v11419_v24  ;;  %v4537_v54 = vpop.f32.mrf.mxu3 }
 0x4a7   : > { %v4836_v13 = vsub.f32 1.0, %v4835_v5  ;;  %v11467_v17 = vadd.f32 %v4586_v39, %v11039_v29  ;;  %v5105_v19 = vand.u32 2147483648, %v11400_v41  ;;  %vm4840_vm2 = vweird.f32 %v11405_v2 }
 0x4a8   : > { %v7443_v18 = vpop.eup %7442  ;;  %v6614_v4 = vmul.f32 -1.442695, %v4626_v45  ;;  %v5083_v0 = vadd.f32 %v7433_v6, %v5082_v34  ;;  %v4860_v34 = vand.u32 2147483648, %v11419_v24  ;;  %vm5099_vm3 = vweird.f32 %v11400_v41  ;;  %vm11515_vm7 = vmor %vm4839_vm0, %vm4840_vm2 }
 0x4a9   : > { %v7445_v30 = vpop.eup %7444  ;;  %v11442_v21 = vadd.f32 1.0, %v7443_v18  ;;  %v4837_v45 = vmul.f32 %v11405_v2, %v4836_v13  ;;  %v4538_v18 = vadd.f32 %v4537_v54, %v11100_v57  ;;  %vm11496_vm6 = vcmp.eq.f32.partialorder %v4843_v38, 8.507059e+37 }
 0x4aa   : > { %v7447_v47 = vpop.eup %7446  ;;  %7452 = vpow2.f32 %v6614_v4  ;;  %v5087_v59 = vsel %vm5086_vm13, %v7433_v6, %v5083_v0  ;;  %v5095_v32 = vmul.f32 %v7445_v30, %v11400_v41  ;;  %v4827_v6 = vsel %vm11450_vm15, %v11342_v16, %v4823_v43 }
 0x4ab   : > { %7454 = vrcp.f32 %v11442_v21  ;;  %v5092_v1 = vsel %vm5089_vm14, %v5091_v22, %v5087_v59  ;;  %v7449_v44 = vpop.eup %7448  ;;  %v11464_v53 = vadd.f32 1.0, %v7447_v47  ;;  %vm5100_vm1 = vweird.f32 %v7445_v30 }
 0x4ac   : > { %v11461_v3 = vmul.f32 %v7439_v58, %v5092_v1  ;;  %v5096_v33 = vsub.f32 1.0, %v5095_v32  ;;  %7456 = vtanh.f32 %v4535_v49  ;;  %v5103_v58 = vand.u32 2147483647, %v11400_v41  ;;  %v11473_v14 = vpop.eup %7450  ;;  %vm5101_vm4 = vmor %vm5099_vm3, %vm5100_vm1  ;;  %v4588_v47 = vpop.f32.mrf.mxu0 }
 0x4ad   : > { %v4627_v56 = vpop.f32.mrf.mxu1  ;;  %v4832_v60 = vsel %vm11422_vm10, %v11398_v9, %v4827_v6  ;;  %7458 = vpow2.f32 %v6603_v20  ;;  %v5106_v9 = vor.u32 1.1754944e-38, %v5105_v19  ;;  %v4838_v49 = vadd.f32 %v11405_v2, %v4837_v45 }
 0x4ae   : > { %v4628_v16 = vadd.f32 %v4627_v56, %v11289_v26  ;;  %5328 = vmax.xlane.f32.xlu1 %v11461_v3  ;;  %v5097_v37 = vmul.f32 %v7445_v30, %v5096_v33  ;;  %7460 = vrcp.f32 %v11464_v53  ;;  %vm5104_vm5 = vcmp.eq.f32.partialorder %v5103_v58, 8.507059e+37  ;;  %v4539_v54 = vpop.f32.mrf.mxu3 }
 0x4af   : > { %v4850_v41 = vmul.f32 %v11473_v14, %v11419_v24  ;;  %v6604_v39 = vmul.f32 -1.442695, %v10986_v52  ;;  %v11505_v48 = vmul.f32 %v11372_v15, %v4832_v60  ;;  %v11507_v13 = vor.u32 1.1754944e-38, %v4860_v34 }
 0x4b0   : > { %v7453_v23 = vpop.eup %7452  ;;  %v6615_v26 = vmul.f32 -1.442695, %v4628_v16  ;;  %v5098_v5 = vadd.f32 %v7445_v30, %v5097_v37  ;;  %v5120_v6 = vand.u32 2147483648, %v11442_v21  ;;  %v5118_v33 = vand.u32 2147483647, %v11442_v21 }
 0x4b1   : > { %v7455_v36 = vpop.eup %7454  ;;  %v11484_v43 = vadd.f32 1.0, %v7453_v23  ;;  %v4851_v56 = vsub.f32 1.0, %v4850_v41  ;;  %v11528_v40 = vadd.f32 %v4588_v47, %v11039_v29  ;;  %vm5114_vm9 = vweird.f32 %v11442_v21 }
 0x4b2   : > { %7462 = vpow2.f32 %v6615_v26  ;;  %v5102_v55 = vsel %vm5101_vm4, %v7445_v30, %v5098_v5  ;;  %v5110_v4 = vmul.f32 %v7455_v36, %v11442_v21  ;;  %v11488_v0 = vpop.eup %7456  ;;  %v4858_v30 = vand.u32 2147483647, %v11419_v24 }
 0x4b3   : > { %7464 = vrcp.f32 %v11484_v43  ;;  %v5107_v57 = vsel %vm5104_vm5, %v5106_v9, %v5102_v55  ;;  %v7459_v38 = vpop.eup %7458  ;;  %vm5115_vm8 = vweird.f32 %v7455_v36  ;;  %vm4855_vm10 = vweird.f32 %v11473_v14 }
 0x4b4   : > { %v11502_v59 = vmul.f32 %v7449_v44, %v5107_v57  ;;  %v5111_v32 = vsub.f32 1.0, %v5110_v4  ;;  %7466 = vtanh.f32 %v11390_v7  ;;  %v11522_v44 = vpop.eup %7460  ;;  %v4842_v7 = vsel %vm11515_vm7, %v11405_v2, %v4838_v49  ;;  %vm5116_vm11 = vmor %vm5114_vm9, %vm5115_vm8 }
 0x4b5   : > { %v4630_v1 = vpop.f32.mrf.mxu1  ;;  %7468 = vtanh.f32 %v4538_v18  ;;  %v11532_v58 = vadd.f32 1.0, %v7459_v38  ;;  %v5121_v2 = vor.u32 1.1754944e-38, %v5120_v6  ;;  %vm4854_vm12 = vweird.f32 %v11419_v24 }
 0x4b6   : > { %v4631_v20 = vadd.f32 %v4630_v1, %v11347_v51  ;;  %5330 = vmax.xlane.f32.xlu2 %v11502_v59  ;;  %v5112_v15 = vmul.f32 %v7455_v36, %v5111_v32  ;;  %7470 = vpow2.f32 %v6604_v39  ;;  %vm5119_vm13 = vcmp.eq.f32.partialorder %v5118_v33, 8.507059e+37  ;;  %vm11582_vm3 = vmor %vm4854_vm12, %vm4855_vm10 }
 0x4b7   : > { %v4852_v21 = vmul.f32 %v11473_v14, %v4851_v56  ;;  %v4540_v26 = vadd.f32 %v4539_v54, %v11128_v62  ;;  %v4865_v18 = vmul.f32 %v11522_v44, %v11464_v53  ;;  %v4847_v4 = vsel %vm11496_vm6, %v11454_v11, %v4842_v7  ;;  %v4591_v7 = vpop.f32.mrf.mxu0 }
 0x4b8   : > { %v7463_v19 = vpop.eup %7462  ;;  %v6616_v51 = vmul.f32 -1.442695, %v4631_v20  ;;  %v5113_v16 = vadd.f32 %v7455_v36, %v5112_v15  ;;  %v6605_v62 = vmul.f32 -1.442695, %v10999_v42  ;;  %v5135_v41 = vand.u32 2147483648, %v11484_v43 }
 0x4b9   : > { %v7465_v37 = vpop.eup %7464  ;;  %v11534_v60 = vadd.f32 1.0, %v7463_v19  ;;  %vm11555_vm14 = vcmp.eq.f32.partialorder %v4858_v30, 8.507059e+37  ;;  %v5133_v11 = vand.u32 2147483647, %v11484_v43  ;;  %v4853_v22 = vadd.f32 %v11473_v14, %v4852_v21 }
 0x4ba   : > { %7472 = vpow2.f32 %v6616_v51  ;;  %v5117_v45 = vsel %vm5116_vm11, %v7455_v36, %v5113_v16  ;;  %v5125_v34 = vmul.f32 %v7465_v37, %v11484_v43  ;;  %v7467_v23 = vpop.eup %7466  ;;  %vm5130_vm15 = vweird.f32 %v7465_v37 }
 0x4bb   : > { %7474 = vrcp.f32 %v11534_v60  ;;  %v5122_v5 = vsel %vm5119_vm13, %v5121_v2, %v5117_v45  ;;  %v11547_v36 = vpop.eup %7468  ;;  %v4873_v42 = vand.u32 2147483647, %v11464_v53  ;;  %v4875_v32 = vand.u32 2147483648, %v11464_v53 }
 0x4bc   : > { %v11544_v9 = vmul.f32 %v7467_v23, %v5122_v5  ;;  %v5126_v55 = vsub.f32 1.0, %v5125_v34  ;;  %7476 = vtanh.f32 %v11432_v61  ;;  %v7471_v57 = vpop.eup %7470  ;;  %v4866_v30 = vsub.f32 1.0, %v4865_v18 }
 0x4bd   : > { %7478 = vrcp.f32 %v11532_v58  ;;  %v4632_v49 = vpop.f32.mrf.mxu1  ;;  %vm5129_vm0 = vweird.f32 %v11484_v43  ;;  %v11568_v52 = vadd.f32 1.0, %v7471_v57  ;;  %v5136_v15 = vor.u32 1.1754944e-38, %v5135_v41 }
 0x4be   : > { %v4633_v61 = vadd.f32 %v4632_v49, %v11411_v28  ;;  %5332 = vmax.xlane.f32.xlu2 %v11544_v9  ;;  %v5127_v39 = vmul.f32 %v7465_v37, %v5126_v55  ;;  %7480 = vtanh.f32 %v4540_v26  ;;  %vm5131_vm1 = vmor %vm5129_vm0, %vm5130_vm15  ;;  %vm5134_vm2 = vcmp.eq.f32.partialorder %v5133_v11, 8.507059e+37 }
 0x4bf   : > { %7482 = vpow2.f32 %v6605_v62  ;;  %v5282_v43 = vmul.f32 %v11429_v8, %v4847_v4  ;;  %v11586_v16 = vor.u32 1.1754944e-38, %v4875_v32  ;;  %v4857_v2 = vsel %vm11582_vm3, %v11473_v14, %v4853_v22 }
 0x4c0   : > { %v7473_v1 = vpop.eup %7472  ;;  %v6617_v6 = vmul.f32 -1.442695, %v4633_v61  ;;  %v5128_v38 = vadd.f32 %v7465_v37, %v5127_v39  ;;  %v4867_v24 = vmul.f32 %v11522_v44, %v4866_v30  ;;  %vm4869_vm4 = vweird.f32 %v11464_v53 }
 0x4c1   : > { %v11566_v28 = vpop.eup %7474  ;;  %v11570_v20 = vadd.f32 1.0, %v7473_v1  ;;  %v11601_v23 = vadd.f32 %v4591_v7, %v11039_v29  ;;  %v5150_v26 = vand.u32 2147483648, %v11534_v60  ;;  %v5148_v5 = vand.u32 2147483647, %v11534_v60 }
 0x4c2   : > { %v7477_v33 = vpop.eup %7476  ;;  %7484 = vpow2.f32 %v6617_v6  ;;  %v5132_v56 = vsel %vm5131_vm1, %v7465_v37, %v5128_v38  ;;  %v5140_v19 = vmul.f32 %v11566_v28, %v11534_v60  ;;  %vm5145_vm5 = vweird.f32 %v11566_v28 }
 0x4c3   : > { %v11575_v54 = vpop.eup %7478  ;;  %7486 = vrcp.f32 %v11570_v20  ;;  %v5137_v37 = vsel %vm5134_vm2, %v5136_v15, %v5132_v56  ;;  %v4862_v55 = vsel %vm11555_vm14, %v11507_v13, %v4857_v2  ;;  %vm4870_vm6 = vweird.f32 %v11522_v44 }
 0x4c4   : > { %v11592_v45 = vmul.f32 %v7477_v33, %v5137_v37  ;;  %v5141_v8 = vsub.f32 1.0, %v5140_v19  ;;  %7488 = vtanh.f32 %v11505_v48  ;;  %v11595_v34 = vpop.eup %7480  ;;  %v4880_v4 = vmul.f32 %v11575_v54, %v11532_v58  ;;  %vm11648_vm12 = vmor %vm4869_vm4, %vm4870_vm6 }
 0x4c5   : > { %7490 = vrcp.f32 %v11568_v52  ;;  %v4635_v21 = vpop.f32.mrf.mxu1  ;;  %v7483_v18 = vpop.eup %7482  ;;  %v6606_v49 = vmul.f32 -1.442695, %v11016_v35  ;;  %vm5144_vm7 = vweird.f32 %v11534_v60  ;;  %v4868_v39 = vadd.f32 %v11522_v44, %v4867_v24 }
 0x4c6   : > { %v4636_v14 = vadd.f32 %v4635_v21, %v11467_v17  ;;  %5334 = vmax.xlane.f32.xlu0 %v11592_v45  ;;  %v5142_v48 = vmul.f32 %v11566_v28, %v5141_v8  ;;  %v4888_v17 = vand.u32 2147483647, %v11532_v58  ;;  %v4890_v13 = vand.u32 2147483648, %v11532_v58  ;;  %vm5146_vm8 = vmor %vm5144_vm7, %vm5145_vm5  ;;  %v4542_v35 = vpop.f32.mrf.mxu3 }
 0x4c7   : > { %v5151_v11 = vor.u32 1.1754944e-38, %v5150_v26  ;;  %vm11625_vm9 = vcmp.eq.f32.partialorder %v4873_v42, 8.507059e+37  ;;  %vm5149_vm10 = vcmp.eq.f32.partialorder %v5148_v5, 8.507059e+37  ;;  %v4881_v6 = vsub.f32 1.0, %v4880_v4 }
 0x4c8   : > { %v7485_v62 = vpop.eup %7484  ;;  %v6618_v41 = vmul.f32 -1.442695, %v4636_v14  ;;  %v5143_v57 = vadd.f32 %v11566_v28, %v5142_v48  ;;  %v11633_v38 = vadd.f32 1.0, %v7483_v18  ;;  %v5283_v42 = vmul.f32 %v11488_v0, %v4862_v55  ;;  %v4593_v18 = vpop.f32.mrf.mxu0 }
 0x4c9   : > { %v7487_v61 = vpop.eup %7486  ;;  %v11621_v47 = vadd.f32 1.0, %v7485_v62  ;;  %vm4884_vm11 = vweird.f32 %v11532_v58  ;;  %v4543_v56 = vadd.f32 %v4542_v35, %v11168_v31  ;;  %v5165_v51 = vand.u32 2147483648, %v11570_v20 }
 0x4ca   : > { %v7489_v22 = vpop.eup %7488  ;;  %7492 = vpow2.f32 %v6618_v41  ;;  %v5147_v60 = vsel %vm5146_vm8, %v11566_v28, %v5143_v57  ;;  %v5155_v1 = vmul.f32 %v7487_v61, %v11570_v20  ;;  %v11640_v28 = vor.u32 1.1754944e-38, %v4890_v13 }
 0x4cb   : > { %v11631_v30 = vpop.eup %7490  ;;  %7494 = vrcp.f32 %v11621_v47  ;;  %v5152_v15 = vsel %vm5149_vm10, %v5151_v11, %v5147_v60  ;;  %vm5160_vm13 = vweird.f32 %v7487_v61  ;;  %v5163_v31 = vand.u32 2147483647, %v11570_v20 }
 0x4cc   : > { %7496 = vpow2.f32 %v6606_v49  ;;  %v11637_v33 = vmul.f32 %v7489_v22, %v5152_v15  ;;  %v5156_v7 = vsub.f32 1.0, %v5155_v1  ;;  %v4882_v8 = vmul.f32 %v11575_v54, %v4881_v6 }
 0x4cd   : > { %v4637_v19 = vpop.f32.mrf.mxu1  ;;  %7498 = vtanh.f32 %v5282_v43  ;;  %v4872_v43 = vsel %vm11648_vm12, %v11522_v44, %v4868_v39  ;;  %v4895_v53 = vmul.f32 %v11631_v30, %v11568_v52  ;;  %vm5159_vm14 = vweird.f32 %v11570_v20 }
 0x4ce   : > { %v4638_v37 = vadd.f32 %v4637_v19, %v11528_v40  ;;  %5336 = vmax.xlane.f32.xlu1 %v11637_v33  ;;  %v5157_v2 = vmul.f32 %v7487_v61, %v5156_v7  ;;  %7500 = vrcp.f32 %v11633_v38  ;;  %v6607_v40 = vmul.f32 -1.442695, %v11072_v50  ;;  %vm5161_vm0 = vmor %vm5159_vm14, %vm5160_vm13  ;;  %v4544_v19 = vpop.f32.mrf.mxu3 }
 0x4cf   : > { %vm4885_vm15 = vweird.f32 %v11575_v54  ;;  %7502 = vtanh.f32 %v4543_v56  ;;  %v5166_v48 = vor.u32 1.1754944e-38, %v5165_v51  ;;  %vm5164_vm1 = vcmp.eq.f32.partialorder %v5163_v31, 8.507059e+37 }
 0x4d0   : > { %v7493_v24 = vpop.eup %7492  ;;  %v6619_v21 = vmul.f32 -1.442695, %v4638_v37  ;;  %v5158_v26 = vadd.f32 %v7487_v61, %v5157_v2  ;;  %v4877_v20 = vsel %vm11625_vm9, %v11586_v16, %v4872_v43  ;;  %v4883_v62 = vadd.f32 %v11575_v54, %v4882_v8  ;;  %vm11695_vm3 = vmor %vm4884_vm11, %vm4885_vm15 }
 0x4d1   : > { %v11664_v14 = vpop.eup %7494  ;;  %v11667_v44 = vadd.f32 1.0, %v7493_v24  ;;  %vm11678_vm2 = vcmp.eq.f32.partialorder %v4888_v17, 8.507059e+37  ;;  %v4896_v57 = vsub.f32 1.0, %v4895_v53  ;;  %v4594_v16 = vadd.f32 %v4593_v18, %v11039_v29 }
 0x4d2   : > { %v7497_v5 = vpop.eup %7496  ;;  %7504 = vpow2.f32 %v6619_v21  ;;  %v5162_v55 = vsel %vm5161_vm0, %v7487_v61, %v5158_v26  ;;  %v5170_v50 = vmul.f32 %v11664_v14, %v11621_v47  ;;  %v5180_v17 = vand.u32 2147483648, %v11621_v47 }
 0x4d3   : > { %v7499_v4 = vpop.eup %7498  ;;  %7506 = vrcp.f32 %v11667_v44  ;;  %v5167_v41 = vsel %vm5164_vm1, %v5166_v48, %v5162_v55  ;;  %v11688_v11 = vadd.f32 1.0, %v7497_v5  ;;  %vm4899_vm4 = vweird.f32 %v11568_v52 }
 0x4d4   : > { %7508 = vpow2.f32 %v6607_v40  ;;  %v11683_v61 = vmul.f32 %v7499_v4, %v5167_v41  ;;  %v5171_v39 = vsub.f32 1.0, %v5170_v50  ;;  %v11685_v13 = vpop.eup %7500  ;;  %vm5175_vm5 = vweird.f32 %v11664_v14 }
 0x4d5   : > { %v4640_v22 = vpop.f32.mrf.mxu1  ;;  %7510 = vtanh.f32 %v5283_v42  ;;  %v5178_v1 = vand.u32 2147483647, %v11621_v47  ;;  %v11705_v6 = vpop.eup %7502  ;;  %v5284_v58 = vmul.f32 %v11547_v36, %v4877_v20  ;;  %v4887_v15 = vsel %vm11695_vm3, %v11575_v54, %v4883_v62 }
 0x4d6   : > { %v4641_v35 = vadd.f32 %v4640_v22, %v11601_v23  ;;  %5338 = vmax.xlane.f32.xlu2 %v11683_v61  ;;  %v5172_v60 = vmul.f32 %v11664_v14, %v5171_v39  ;;  %v4903_v42 = vand.u32 2147483647, %v11568_v52  ;;  %v4905_v23 = vand.u32 2147483648, %v11568_v52 }
 0x4d7   : > { %v4897_v56 = vmul.f32 %v11631_v30, %v4896_v57  ;;  %vm5174_vm6 = vweird.f32 %v11621_v47  ;;  %v4910_v36 = vmul.f32 %v11685_v13, %v11633_v38  ;;  %7512 = vrcp.f32 %v11688_v11 }
 0x4d8   : > { %v7505_v7 = vpop.eup %7504  ;;  %v6620_v51 = vmul.f32 -1.442695, %v4641_v35  ;;  %v5173_v0 = vadd.f32 %v11664_v14, %v5172_v60  ;;  %vm5176_vm7 = vmor %vm5174_vm6, %vm5175_vm5  ;;  %v5181_v2 = vor.u32 1.1754944e-38, %v5180_v17  ;;  %vm5179_vm8 = vcmp.eq.f32.partialorder %v5178_v1, 8.507059e+37 }
 0x4d9   : > { %v7507_v37 = vpop.eup %7506  ;;  %v11719_v54 = vadd.f32 1.0, %v7505_v7  ;;  %vm4900_vm9 = vweird.f32 %v11631_v30  ;;  %v4545_v53 = vadd.f32 %v4544_v19, %v11190_v63  ;;  %v4892_v40 = vsel %vm11678_vm2, %v11640_v28, %v4887_v15  ;;  %v4547_v7 = vpop.f32.mrf.mxu3 }
 0x4da   : > { %v7509_v31 = vpop.eup %7508  ;;  %7514 = vpow2.f32 %v6620_v51  ;;  %v5177_v43 = vsel %vm5176_vm7, %v11664_v14, %v5173_v0  ;;  %v5185_v8 = vmul.f32 %v7507_v37, %v11667_v44  ;;  %v4898_v21 = vadd.f32 %v11631_v30, %v4897_v56  ;;  %v4596_v14 = vpop.f32.mrf.mxu0  ;;  %vm11750_vm12 = vmor %vm4899_vm4, %vm4900_vm9 }
 0x4db   : > { %v7511_v47 = vpop.eup %7510  ;;  %7516 = vrcp.f32 %v11719_v54  ;;  %v5182_v24 = vsel %vm5179_vm8, %v5181_v2, %v5177_v43  ;;  %vm11732_vm10 = vcmp.eq.f32.partialorder %v4903_v42, 8.507059e+37  ;;  %v4911_v18 = vsub.f32 1.0, %v4910_v36 }
 0x4dc   : > { %v11736_v48 = vmul.f32 %v7511_v47, %v5182_v24  ;;  %v5186_v5 = vsub.f32 1.0, %v5185_v8  ;;  %v11738_v55 = vadd.f32 1.0, %v7509_v31  ;;  %v5195_v50 = vand.u32 2147483648, %v11667_v44 }
 0x4dd   : > { %v4642_v63 = vpop.f32.mrf.mxu1  ;;  %7518 = vtanh.f32 %v5284_v58  ;;  %vm5190_vm11 = vweird.f32 %v7507_v37  ;;  %v5193_v20 = vand.u32 2147483647, %v11667_v44  ;;  %v11743_v62 = vpop.eup %7512  ;;  %v5285_v49 = vmul.f32 %v11595_v34, %v4892_v40 }
 0x4de   : > { %v4643_v4 = vadd.f32 %v4642_v63, %v4594_v16  ;;  %5340 = vmax.xlane.f32.xlu0 %v11736_v48  ;;  %v5187_v28 = vmul.f32 %v7507_v37, %v5186_v5  ;;  %v4906_v57 = vor.u32 1.1754944e-38, %v4905_v23  ;;  %7520 = vtanh.f32 %v4545_v53 }
 0x4df   : > { %v4597_v39 = vadd.f32 %v4596_v14, %v11039_v29  ;;  %v4902_v22 = vsel %vm11750_vm12, %v11631_v30, %v4898_v21  ;;  %vm5189_vm13 = vweird.f32 %v11667_v44  ;;  %v4912_v52 = vmul.f32 %v11685_v13, %v4911_v18 }
 0x4e0   : > { %v7515_v16 = vpop.eup %7514  ;;  %v6621_v17 = vmul.f32 -1.442695, %v4643_v4  ;;  %v5188_v32 = vadd.f32 %v7507_v37, %v5187_v28  ;;  %7522 = vrcp.f32 %v11738_v55  ;;  %vm5191_vm14 = vmor %vm5189_vm13, %vm5190_vm11  ;;  %v5196_v60 = vor.u32 1.1754944e-38, %v5195_v50 }
 0x4e1   : > { %v7517_v34 = vpop.eup %7516  ;;  %v11761_v35 = vadd.f32 1.0, %v7515_v16  ;;  %vm5194_vm15 = vcmp.eq.f32.partialorder %v5193_v20, 8.507059e+37  ;;  %v4918_v15 = vand.u32 2147483647, %v11633_v38  ;;  %v4925_v44 = vmul.f32 %v11743_v62, %v11688_v11  ;;  %v4500_v20 = vpop.f32.mrf.mxu2 }
 0x4e2   : > { %7524 = vpow2.f32 %v6621_v17  ;;  %v5192_v1 = vsel %vm5191_vm14, %v7507_v37, %v5188_v32  ;;  %v5200_v58 = vmul.f32 %v7517_v34, %v11719_v54  ;;  %vm4915_vm0 = vweird.f32 %v11685_v13 }
 0x4e3   : > { %v7519_v30 = vpop.eup %7518  ;;  %7526 = vrcp.f32 %v11761_v35  ;;  %v5197_v42 = vsel %vm5194_vm15, %v5196_v60, %v5192_v1  ;;  %v4920_v23 = vand.u32 2147483648, %v11633_v38  ;;  %v4907_v0 = vsel %vm11732_vm10, %v4906_v57, %v4902_v22 }
 0x4e4   : > { %v11771_v56 = vmul.f32 %v7519_v30, %v5197_v42  ;;  %v5201_v19 = vsub.f32 1.0, %v5200_v58  ;;  %v11773_v51 = vpop.eup %7520  ;;  %v4913_v37 = vadd.f32 %v11685_v13, %v4912_v52  ;;  %v5210_v2 = vand.u32 2147483648, %v11719_v54 }
 0x4e5   : > { %v4645_v36 = vpop.f32.mrf.mxu1  ;;  %7528 = vtanh.f32 %v5285_v49  ;;  %vm5205_vm1 = vweird.f32 %v7517_v34  ;;  %v5208_v8 = vand.u32 2147483647, %v11719_v54  ;;  %vm4914_vm2 = vweird.f32 %v11633_v38 }
 0x4e6   : > { %v4646_v31 = vadd.f32 %v4645_v36, %v4597_v39  ;;  %5342 = vmax.xlane.f32.xlu1 %v11771_v56  ;;  %v5202_v43 = vmul.f32 %v7517_v34, %v5201_v19  ;;  %v11781_v47 = vpop.eup %7522  ;;  %vm11784_vm3 = vcmp.eq.f32.partialorder %v4918_v15, 8.507059e+37  ;;  %v4926_v24 = vsub.f32 1.0, %v4925_v44  ;;  %vm11791_vm4 = vmor %vm4914_vm2, %vm4915_vm0 }
 0x4e7   : > { %v4548_v40 = vadd.f32 %v4547_v7, %v11230_v27  ;;  %v4921_v14 = vor.u32 1.1754944e-38, %v4920_v23  ;;  %vm5204_vm5 = vweird.f32 %v11719_v54  ;;  %v5286_v63 = vmul.f32 %v11705_v6, %v4907_v0  ;;  %v4598_v27 = vpop.f32.mrf.mxu0 }
 0x4e8   : > { %v7525_v21 = vpop.eup %7524  ;;  %v6622_v5 = vmul.f32 -1.442695, %v4646_v31  ;;  %v5203_v18 = vadd.f32 %v7517_v34, %v5202_v43  ;;  %v4917_v50 = vsel %vm11791_vm4, %v11685_v13, %v4913_v37  ;;  %vm5206_vm6 = vmor %vm5204_vm5, %vm5205_vm1  ;;  %v5211_v28 = vor.u32 1.1754944e-38, %v5210_v2  ;;  %v4549_v31 = vpop.f32.mrf.mxu3 }
 0x4e9   : > { %v7527_v38 = vpop.eup %7526  ;;  %v11800_v4 = vadd.f32 1.0, %v7525_v21  ;;  %vm5209_vm7 = vcmp.eq.f32.partialorder %v5208_v8, 8.507059e+37  ;;  %v4927_v57 = vmul.f32 %v11743_v62, %v4926_v24  ;;  %v4940_v6 = vmul.f32 %v11781_v47, %v11738_v55 }
 0x4ea   : > { %7530 = vpow2.f32 %v6622_v5  ;;  %v5207_v49 = vsel %vm5206_vm6, %v7517_v34, %v5203_v18  ;;  %v5215_v41 = vmul.f32 %v7527_v38, %v11761_v35  ;;  %v4599_v39 = vadd.f32 %v4598_v27, %v11039_v29 }
 0x4eb   : > { %v7529_v54 = vpop.eup %7528  ;;  %7532 = vrcp.f32 %v11800_v4  ;;  %v5212_v13 = vsel %vm5209_vm7, %v5211_v28, %v5207_v49  ;;  %v4501_v17 = vadd.f32 %v4500_v20, %v11019_v12  ;;  %v4922_v32 = vsel %vm11784_vm3, %v4921_v14, %v4917_v50 }
 0x4ec   : > { %7534 = vtanh.f32 %v4548_v40  ;;  %v11809_v16 = vmul.f32 %v7529_v54, %v5212_v13  ;;  %v5216_v22 = vsub.f32 1.0, %v5215_v41  ;;  %v5225_v52 = vand.u32 2147483648, %v11761_v35 }
 0x4ed   : > { %v4647_v34 = vpop.f32.mrf.mxu1  ;;  %7536 = vtanh.f32 %v5286_v63  ;;  %vm5220_vm8 = vweird.f32 %v7527_v38  ;;  %v5223_v58 = vand.u32 2147483647, %v11761_v35  ;;  %v4928_v29 = vadd.f32 %v11743_v62, %v4927_v57 }
 0x4ee   : > { %v4648_v60 = vadd.f32 %v4647_v34, %v4599_v39  ;;  %5344 = vmax.xlane.f32.xlu2 %v11809_v16  ;;  %v5217_v1 = vmul.f32 %v7527_v38, %v5216_v22  ;;  %vm4929_vm9 = vweird.f32 %v11688_v11  ;;  %vm4930_vm10 = vweird.f32 %v11743_v62 }
 0x4ef   : > { %v4941_v12 = vsub.f32 1.0, %v4940_v6  ;;  %v4935_v15 = vand.u32 2147483648, %v11688_v11  ;;  %vm5219_vm11 = vweird.f32 %v11761_v35  ;;  %v5287_v7 = vmul.f32 %v11773_v51, %v4922_v32  ;;  %vm11829_vm13 = vmor %vm4929_vm9, %vm4930_vm10 }
 0x4f0   : > { %v7531_v30 = vpop.eup %7530  ;;  %v6623_v44 = vmul.f32 -1.442695, %v4648_v60  ;;  %v5218_v42 = vadd.f32 %v7527_v38, %v5217_v1  ;;  %v4933_v19 = vand.u32 2147483647, %v11688_v11  ;;  %vm5221_vm12 = vmor %vm5219_vm11, %vm5220_vm8  ;;  %v5226_v37 = vor.u32 1.1754944e-38, %v5225_v52 }
 0x4f1   : > { %v7533_v23 = vpop.eup %7532  ;;  %v11824_v0 = vadd.f32 1.0, %v7531_v30  ;;  %vm5224_vm14 = vcmp.eq.f32.partialorder %v5223_v58, 8.507059e+37  ;;  %v4932_v8 = vsel %vm11829_vm13, %v11743_v62, %v4928_v29  ;;  %v4942_v53 = vmul.f32 %v11781_v47, %v4941_v12 }
 0x4f2   : > { %v7535_v36 = vpop.eup %7534  ;;  %7538 = vpow2.f32 %v6623_v44  ;;  %v5222_v35 = vsel %vm5221_vm12, %v7527_v38, %v5218_v42  ;;  %v5230_v51 = vmul.f32 %v7533_v23, %v11800_v4  ;;  %v4936_v24 = vor.u32 1.1754944e-38, %v4935_v15 }
 0x4f3   : > { %v7537_v43 = vpop.eup %7536  ;;  %7540 = vrcp.f32 %v11824_v0  ;;  %v5227_v11 = vsel %vm5224_vm14, %v5226_v37, %v5222_v35  ;;  %vm4934_vm15 = vcmp.eq.f32.partialorder %v4933_v19, 8.507059e+37  ;;  %v4550_v26 = vadd.f32 %v4549_v31, %v4501_v17 }
 0x4f4   : > { %v11839_v40 = vmul.f32 %v7537_v43, %v5227_v11  ;;  %v5231_v21 = vsub.f32 1.0, %v5230_v51  ;;  %v5240_v14 = vand.u32 2147483648, %v11800_v4  ;;  %7542 = vtanh.f32 %v5287_v7 }
 0x4f5   : > { %v4937_v5 = vsel %vm4934_vm15, %v4936_v24, %v4932_v8  ;;  %vm5235_vm0 = vweird.f32 %v7533_v23  ;;  %v5238_v62 = vand.u32 2147483647, %v11800_v4  ;;  %v4943_v38 = vadd.f32 %v11781_v47, %v4942_v53 }
 0x4f6   : > { %5346 = vmax.xlane.f32.xlu0 %v11839_v40  ;;  %v5232_v18 = vmul.f32 %v7533_v23, %v5231_v21  ;;  %vm4945_vm1 = vweird.f32 %v11781_v47  ;;  %vm4944_vm2 = vweird.f32 %v11738_v55  ;;  %v4950_v50 = vand.u32 2147483648, %v11738_v55 }
 0x4f7   : > { %vm5234_vm3 = vweird.f32 %v11800_v4  ;;  %v5288_v20 = vmul.f32 %v7535_v36, %v4937_v5  ;;  %v4948_v49 = vand.u32 2147483647, %v11738_v55  ;;  %v5241_v54 = vor.u32 1.1754944e-38, %v5240_v14  ;;  %vm11850_vm5 = vmor %vm4944_vm2, %vm4945_vm1 }
 0x4f8   : > { %v7539_v63 = vpop.eup %7538  ;;  %v5233_v27 = vadd.f32 %v7533_v23, %v5232_v18  ;;  %vm5236_vm4 = vmor %vm5234_vm3, %vm5235_vm0  ;;  %7544 = vtanh.f32 %v4550_v26  ;;  %vm5239_vm6 = vcmp.eq.f32.partialorder %v5238_v62, 8.507059e+37  ;;  %v4947_v4 = vsel %vm11850_vm5, %v11781_v47, %v4943_v38 }
 0x4f9   : > { %v7541_v28 = vpop.eup %7540  ;;  %v5033_v41 = vadd.f32 1.0, %v7539_v63  ;;  %v4951_v55 = vor.u32 1.1754944e-38, %v4950_v50  ;;  %vm4949_vm7 = vcmp.eq.f32.partialorder %v4948_v49, 8.507059e+37  ;;  %v5255_v34 = vand.u32 2147483648, %v11824_v0 }
 0x4fa   : > { %v5237_v6 = vsel %vm5236_vm4, %v7533_v23, %v5233_v27  ;;  %v5245_v13 = vmul.f32 %v7541_v28, %v11824_v0  ;;  %v7543_v39 = vpop.eup %7542  ;;  %vm5250_vm8 = vweird.f32 %v7541_v28  ;;  %v5253_v1 = vand.u32 2147483647, %v11824_v0 }
 0x4fb   : > { %7546 = vrcp.f32 %v5033_v41  ;;  %v5242_v22 = vsel %vm5239_vm6, %v5241_v54, %v5237_v6  ;;  %v4952_v52 = vsel %vm4949_vm7, %v4951_v55, %v4947_v4  ;;  %vm5249_vm9 = vweird.f32 %v11824_v0 }
 0x4fc   : > { %v11858_v17 = vmul.f32 %v7543_v39, %v5242_v22  ;;  %v5246_v32 = vsub.f32 1.0, %v5245_v13  ;;  %7548 = vtanh.f32 %v5288_v20  ;;  %vm5251_vm10 = vmor %vm5249_vm9, %vm5250_vm8  ;;  %v5256_v30 = vor.u32 1.1754944e-38, %v5255_v34 }
 0x4fd   : > { %vm5254_vm11 = vcmp.eq.f32.partialorder %v5253_v1, 8.507059e+37  ;;  %v5270_v37 = vand.u32 2147483648, %v5033_v41  ;;  %v5268_v2 = vand.u32 2147483647, %v5033_v41  ;;  %vm5264_vm13 = vweird.f32 %v5033_v41 }
 0x4fe   : > { %5348 = vmax.xlane.f32.xlu1 %v11858_v17  ;;  %v5247_v60 = vmul.f32 %v7541_v28, %v5246_v32  ;;  %v7545_v58 = vpop.eup %7544 }
 0x4ff   : > { %v5289_v12 = vmul.f32 %v7545_v58, %v4952_v52  ;;  %v5271_v35 = vor.u32 1.1754944e-38, %v5270_v37  ;;  %vm5269_vm15 = vcmp.eq.f32.partialorder %v5268_v2, 8.507059e+37 }
 0x500   : > { %v5248_v29 = vadd.f32 %v7541_v28, %v5247_v60 }
 0x501   : > { %v7547_v47 = vpop.eup %7546  ;;  %7550 = vtanh.f32 %v5289_v12 }
 0x502   : > { %v5252_v15 = vsel %vm5251_vm10, %v7541_v28, %v5248_v29  ;;  %v5260_v44 = vmul.f32 %v7547_v47, %v5033_v41  ;;  %v7549_v42 = vpop.eup %7548  ;;  %vm5265_vm12 = vweird.f32 %v7547_v47 }
 0x503   : > { %v5257_v23 = vsel %vm5254_vm11, %v5256_v30, %v5252_v15  ;;  %vm5266_vm14 = vmor %vm5264_vm13, %vm5265_vm12 }
 0x504   : > { %v11864_v7 = vmul.f32 %v7549_v42, %v5257_v23  ;;  %v5261_v19 = vsub.f32 1.0, %v5260_v44 }
 0x506   : > { %5350 = vmax.xlane.f32.xlu2 %v11864_v7  ;;  %v5262_v36 = vmul.f32 %v7547_v47, %v5261_v19 }
 0x507   : > { %v7551_v8 = vpop.eup %7550 }
 0x508   : > { %v5263_v0 = vadd.f32 %v7547_v47, %v5262_v36 }
 0x509   : > { %v5323_v31 = vpop.xlane.xlu0 %5322 }
 0x50a   : > { %v5354_v51 = vsub.f32 %v11329_v46, %v5323_v31  ;;  %v5267_v43 = vsel %vm5266_vm14, %v7547_v47, %v5263_v0 }
 0x50b   : > { %v5272_v53 = vsel %vm5269_vm15, %v5271_v35, %v5267_v43 }
 0x50c   : > { %v5370_v11 = vmul.f32 1.442695, %v5354_v51  ;;  %v11868_v24 = vmul.f32 %v7551_v8, %v5272_v53 }
 0x50e   : > { %7552 = vpow2.f32 %v5370_v11  ;;  %5352 = vmax.xlane.f32.xlu0 %v11868_v24 }
 0x511   : > { %v5325_v21 = vpop.xlane.xlu0 %5324 }
 0x512   : > { %v5355_v26 = vsub.f32 %v11370_v10, %v5325_v21 }
 0x514   : > { %v11872_v14 = vpop.eup %7552  ;;  %v5372_v5 = vmul.f32 1.442695, %v5355_v26 }
 0x515   : > { %5402 = vadd.xlane.f32.xlu1 %v11872_v14 }
 0x516   : > { %7554 = vpow2.f32 %v5372_v5 }
 0x519   : > { %v5327_v46 = vpop.xlane.xlu1 %5326 }
 0x51a   : > { %v5356_v18 = vsub.f32 %v11415_v25, %v5327_v46 }
 0x51c   : > { %v11876_v62 = vpop.eup %7554  ;;  %v5374_v38 = vmul.f32 1.442695, %v5356_v18 }
 0x51d   : > { %5404 = vadd.xlane.f32.xlu2 %v11876_v62 }
 0x51e   : > { %7556 = vpow2.f32 %v5374_v38 }
 0x521   : > { %v5329_v63 = vpop.xlane.xlu1 %5328 }
 0x522   : > { %v5357_v50 = vsub.f32 %v11461_v3, %v5329_v63 }
 0x524   : > { %v11880_v27 = vpop.eup %7556  ;;  %v5376_v10 = vmul.f32 1.442695, %v5357_v50 }
 0x525   : > { %5406 = vadd.xlane.f32.xlu0 %v11880_v27 }
 0x526   : > { %7558 = vpow2.f32 %v5376_v10 }
 0x529   : > { %v5331_v28 = vpop.xlane.xlu2 %5330 }
 0x52a   : > { %v5358_v20 = vsub.f32 %v11502_v59, %v5331_v28 }
 0x52c   : > { %v11884_v49 = vpop.eup %7558  ;;  %v5378_v25 = vmul.f32 1.442695, %v5358_v20 }
 0x52d   : > { %5408 = vadd.xlane.f32.xlu1 %v11884_v49 }
 0x52e   : > { %7560 = vpow2.f32 %v5378_v25 }
 0x531   : > { %v5333_v41 = vpop.xlane.xlu2 %5332 }
 0x532   : > { %v5359_v54 = vsub.f32 %v11544_v9, %v5333_v41 }
 0x534   : > { %v11888_v57 = vpop.eup %7560  ;;  %v5380_v3 = vmul.f32 1.442695, %v5359_v54 }
 0x535   : > { %5410 = vadd.xlane.f32.xlu2 %v11888_v57 }
 0x536   : > { %7562 = vpow2.f32 %v5380_v3 }
 0x539   : > { %v5335_v6 = vpop.xlane.xlu0 %5334 }
 0x53a   : > { %v5360_v13 = vsub.f32 %v11592_v45, %v5335_v6 }
 0x53c   : > { %v11892_v39 = vpop.eup %7562  ;;  %v5382_v59 = vmul.f32 1.442695, %v5360_v13 }
 0x53d   : > { %5412 = vadd.xlane.f32.xlu0 %v11892_v39 }
 0x53e   : > { %7564 = vpow2.f32 %v5382_v59 }
 0x541   : > { %v5337_v4 = vpop.xlane.xlu1 %5336 }
 0x542   : > { %v5361_v22 = vsub.f32 %v11637_v33, %v5337_v4 }
 0x544   : > { %v11896_v55 = vpop.eup %7564  ;;  %v5384_v9 = vmul.f32 1.442695, %v5361_v22 }
 0x545   : > { %5414 = vadd.xlane.f32.xlu1 %v11896_v55 }
 0x546   : > { %7566 = vpow2.f32 %v5384_v9 }
 0x549   : > { %v5339_v32 = vpop.xlane.xlu2 %5338 }
 0x54a   : > { %v5362_v34 = vsub.f32 %v11683_v61, %v5339_v32 }
 0x54c   : > { %v11900_v52 = vpop.eup %7566  ;;  %v5386_v45 = vmul.f32 1.442695, %v5362_v34 }
 0x54d   : > { %5416 = vadd.xlane.f32.xlu2 %v11900_v52 }
 0x54e   : > { %7568 = vpow2.f32 %v5386_v45 }
 0x551   : > { %v5341_v60 = vpop.xlane.xlu0 %5340 }
 0x552   : > { %v5363_v1 = vsub.f32 %v11736_v48, %v5341_v60 }
 0x554   : > { %v11904_v58 = vpop.eup %7568  ;;  %v5388_v33 = vmul.f32 1.442695, %v5363_v1 }
 0x555   : > { %5418 = vadd.xlane.f32.xlu0 %v11904_v58 }
 0x556   : > { %7570 = vpow2.f32 %v5388_v33 }
 0x559   : > { %v5343_v29 = vpop.xlane.xlu1 %5342 }
 0x55a   : > { %v5364_v47 = vsub.f32 %v11771_v56, %v5343_v29 }
 0x55c   : > { %v11908_v12 = vpop.eup %7570  ;;  %v5390_v61 = vmul.f32 1.442695, %v5364_v47 }
 0x55d   : > { %5420 = vadd.xlane.f32.xlu1 %v11908_v12 }
 0x55e   : > { %7572 = vpow2.f32 %v5390_v61 }
 0x561   : > { %v5345_v30 = vpop.xlane.xlu2 %5344 }
 0x562   : > { %v5365_v15 = vsub.f32 %v11809_v16, %v5345_v30 }
 0x564   : > { %v11912_v44 = vpop.eup %7572  ;;  %v5392_v48 = vmul.f32 1.442695, %v5365_v15 }
 0x565   : > { %5422 = vadd.xlane.f32.xlu2 %v11912_v44 }
 0x566   : > { %7574 = vpow2.f32 %v5392_v48 }
 0x569   : > { %v5347_v42 = vpop.xlane.xlu0 %5346 }
 0x56a   : > { %v5366_v23 = vsub.f32 %v11839_v40, %v5347_v42 }
 0x56c   : > { %v11916_v19 = vpop.eup %7574  ;;  %v5394_v56 = vmul.f32 1.442695, %v5366_v23 }
 0x56d   : > { %5424 = vadd.xlane.f32.xlu0 %v11916_v19 }
 0x56e   : > { %7576 = vpow2.f32 %v5394_v56 }
 0x571   : > { %v5349_v37 = vpop.xlane.xlu1 %5348 }
 0x572   : > { %v5367_v36 = vsub.f32 %v11858_v17, %v5349_v37 }
 0x574   : > { %v11920_v2 = vpop.eup %7576  ;;  %v5396_v16 = vmul.f32 1.442695, %v5367_v36 }
 0x575   : > { %5426 = vadd.xlane.f32.xlu1 %v11920_v2 }
 0x576   : > { %7578 = vpow2.f32 %v5396_v16 }
 0x579   : > { %v5351_v0 = vpop.xlane.xlu2 %5350 }
 0x57a   : > { %v5368_v40 = vsub.f32 %v11864_v7, %v5351_v0 }
 0x57c   : > { %v11924_v31 = vpop.eup %7578  ;;  %v5398_v35 = vmul.f32 1.442695, %v5368_v40 }
 0x57d   : > { %5428 = vadd.xlane.f32.xlu2 %v11924_v31 }
 0x57e   : > { %7580 = vpow2.f32 %v5398_v35 }
 0x581   : > { %v5353_v51 = vpop.xlane.xlu0 %5352 }
 0x582   : > { %v5369_v17 = vsub.f32 %v11868_v24, %v5353_v51 }
 0x584   : > { %v11928_v43 = vpop.eup %7580  ;;  %v5400_v8 = vmul.f32 1.442695, %v5369_v17 }
 0x585   : > { %5430 = vadd.xlane.f32.xlu0 %v11928_v43 }
 0x586   : > { %7582 = vpow2.f32 %v5400_v8 }
 0x588   : > { %v5403_v53 = vpop.xlane.xlu1 %5402 }
 0x589   : > { %7584 = vrcp.f32 %v5403_v53 }
 0x58c   : > { %v11937_v7 = vpop.eup %7582 }
 0x58d   : > { %5432 = vadd.xlane.f32.xlu1 %v11937_v7 }
 0x58f   : > { %v7585_v11 = vpop.eup %7584 }
 0x590   : > { %7824 = shalt.err (!%p7821_p9)
}
 0x591   : > { %s7922_s17 = smov 256   ;;  %s7923_s10 = smov 16   ;;  %v5450_v24 = vmul.f32 %v7585_v11, %v11872_v14  ;;  %v5405_v21 = vpop.xlane.xlu2 %5404 }
 0x592   : > { %6884 = dma.vmem_to_hbm [thread:$0]  (%p8061_p0), %s5502_s25, 4096, %s5504_s11, %s5483_s18, %s7922_s17, %s7922_s17, %s7923_s10   ;;  %7586 = vrcp.f32 %v5405_v21 }
 0x593   : > { %s11954_s22 = scalar_lea.vmem [#allocation14], %s5695_s9  ;;  %s6845_s9 = sshll.u32 %s7995_s12, 7 }
 0x594   : > { %5466 = vst [vmem:[%s11954_s22] sm:$0xff] %v5450_v24  ;;  %s5517_s11 = scalar_lea.hbm %s12029_s8, %s6845_s9  ;;  %s5518_s18 = sshll.u32 %s11954_s22, 4  ;;  %s5519_s18 = int_to_ptr.vmem [resolvable:$true] %s5518_s18 }
 0x595   : > { %s5520_s26 = sshll.u32 %s5517_s11, 4  ;;  %s5488_s2 = scalar_lea.sflag [#allocation15], %s8094_s16  ;;  %s5521_s26 = int_to_ptr.hbm [resolvable:$true] %s5520_s26 }
 0x596   : > { %s7839_s12 = sshra.s32 %s5521_s26, 4  ;;  %s7845_s13 = scalar_lea.hbm %s12029_s8, 256  ;;  %s7840_s12 = int_to_ptr.hbm [resolvable:$true] %s7839_s12 }
 0x597   : > { %s7841_s3 = scalar_lea.hbm %s7840_s12, 128  ;;  %p7846_p2 = scmp.lt.s32.totalorder %s7840_s12, %s12029_s8 }
 0x598   : > { %v7587_v26 = vpop.eup %7586  ;;  %v5407_v46 = vpop.xlane.xlu0 %5406  ;;  %p7842_p10 = scmp.ne.s32.totalorder %s7840_s12, %s7841_s3  ;;  %p7847_p4 = scmp.lt.s32.totalorder %s7845_s13, %s7841_s3 }
 0x599   : > { %v5451_v5 = vmul.f32 %v7587_v26, %v11876_v62  ;;  %7588 = vrcp.f32 %v5407_v46 }
 0x59a   : > { %p7843_p11 = pnand %p7842_p10, %p8061_p0  ;;  %p7848_p1 = por %p7847_p4, %p7846_p2 }
 0x59b   : > { %5467 = vst [vmem:[%s11954_s22 + $0x8] sm:$0xff] %v5451_v5 }
 0x59c   : > { %p7844_p12 = pneg %p7843_p11 }
 0x59e   : > { %p7849_p3 = pnand %p7848_p1, %p7844_p12 }
 0x59f   : > { %v7589_v18 = vpop.eup %7588 }
 0x5a0   : > { %v5452_v14 = vmul.f32 %v7589_v18, %v11880_v27  ;;  %v5409_v38 = vpop.xlane.xlu1 %5408 }
 0x5a1   : > { %7590 = vrcp.f32 %v5409_v38 }
 0x5a2   : > { %5468 = vst [vmem:[%s11954_s22 + $0x10] sm:$0xff] %v5452_v14 }
 0x5a7   : > { %v7591_v63 = vpop.eup %7590 }
 0x5a8   : > { %v5453_v50 = vmul.f32 %v7591_v63, %v11884_v49  ;;  %v5411_v10 = vpop.xlane.xlu2 %5410 }
 0x5a9   : > { %7592 = vrcp.f32 %v5411_v10 }
 0x5aa   : > { %5469 = vst [vmem:[%s11954_s22 + $0x18] sm:$0xff] %v5453_v50 }
 0x5af   : > { %v7593_v28 = vpop.eup %7592 }
 0x5b0   : > { %v5454_v62 = vmul.f32 %v7593_v28, %v11888_v57  ;;  %v5413_v20 = vpop.xlane.xlu0 %5412 }
 0x5b1   : > { %7594 = vrcp.f32 %v5413_v20 }
 0x5b2   : > { %5470 = vst [vmem:[%s11954_s22 + $0x20] sm:$0xff] %v5454_v62 }
 0x5b7   : > { %v7595_v25 = vpop.eup %7594 }
 0x5b8   : > { %v5455_v27 = vmul.f32 %v7595_v25, %v11892_v39  ;;  %v5415_v41 = vpop.xlane.xlu1 %5414 }
 0x5b9   : > { %7596 = vrcp.f32 %v5415_v41 }
 0x5ba   : > { %5471 = vst [vmem:[%s11954_s22 + $0x28] sm:$0xff] %v5455_v27 }
 0x5bf   : > { %v7597_v54 = vpop.eup %7596 }
 0x5c0   : > { %v5456_v49 = vmul.f32 %v7597_v54, %v11896_v55  ;;  %v5417_v3 = vpop.xlane.xlu2 %5416 }
 0x5c1   : > { %7598 = vrcp.f32 %v5417_v3 }
 0x5c2   : > { %5472 = vst [vmem:[%s11954_s22 + $0x30] sm:$0xff] %v5456_v49 }
 0x5c7   : > { %v7599_v6 = vpop.eup %7598 }
 0x5c8   : > { %v5457_v57 = vmul.f32 %v7599_v6, %v11900_v52  ;;  %v5419_v13 = vpop.xlane.xlu0 %5418 }
 0x5c9   : > { %7600 = vrcp.f32 %v5419_v13 }
 0x5ca   : > { %5473 = vst [vmem:[%s11954_s22 + $0x38] sm:$0xff] %v5457_v57 }
 0x5cf   : > { %v7601_v59 = vpop.eup %7600 }
 0x5d0   : > { %v5458_v39 = vmul.f32 %v7601_v59, %v11904_v58  ;;  %v5421_v4 = vpop.xlane.xlu1 %5420 }
 0x5d1   : > { %7602 = vrcp.f32 %v5421_v4 }
 0x5d2   : > { %5474 = vst [vmem:[%s11954_s22 + $0x40] sm:$0xff] %v5458_v39 }
 0x5d7   : > { %v7603_v22 = vpop.eup %7602 }
 0x5d8   : > { %v5459_v55 = vmul.f32 %v7603_v22, %v11908_v12  ;;  %v5423_v9 = vpop.xlane.xlu2 %5422 }
 0x5d9   : > { %7604 = vrcp.f32 %v5423_v9 }
 0x5da   : > { %5475 = vst [vmem:[%s11954_s22 + $0x48] sm:$0xff] %v5459_v55 }
 0x5df   : > { %v7605_v32 = vpop.eup %7604 }
 0x5e0   : > { %v5460_v34 = vmul.f32 %v7605_v32, %v11912_v44  ;;  %v5425_v52 = vpop.xlane.xlu0 %5424 }
 0x5e1   : > { %7606 = vrcp.f32 %v5425_v52 }
 0x5e2   : > { %5476 = vst [vmem:[%s11954_s22 + $0x50] sm:$0xff] %v5460_v34 }
 0x5e7   : > { %v7607_v45 = vpop.eup %7606 }
 0x5e8   : > { %v5461_v60 = vmul.f32 %v7607_v45, %v11916_v19  ;;  %v5427_v1 = vpop.xlane.xlu1 %5426 }
 0x5e9   : > { %7608 = vrcp.f32 %v5427_v1 }
 0x5ea   : > { %5477 = vst [vmem:[%s11954_s22 + $0x58] sm:$0xff] %v5461_v60 }
 0x5ef   : > { %v7609_v58 = vpop.eup %7608 }
 0x5f0   : > { %v5462_v33 = vmul.f32 %v7609_v58, %v11920_v2  ;;  %v5429_v29 = vpop.xlane.xlu2 %5428 }
 0x5f1   : > { %7610 = vrcp.f32 %v5429_v29 }
 0x5f2   : > { %5478 = vst [vmem:[%s11954_s22 + $0x60] sm:$0xff] %v5462_v33 }
 0x5f7   : > { %v7611_v47 = vpop.eup %7610 }
 0x5f8   : > { %v5463_v12 = vmul.f32 %v7611_v47, %v11924_v31  ;;  %v5431_v61 = vpop.xlane.xlu0 %5430 }
 0x5f9   : > { %7612 = vrcp.f32 %v5431_v61 }
 0x5fa   : > { %5479 = vst [vmem:[%s11954_s22 + $0x68] sm:$0xff] %v5463_v12 }
 0x5ff   : > { %v7613_v30 = vpop.eup %7612 }
 0x600   : > { %v5464_v15 = vmul.f32 %v7613_v30, %v11928_v43  ;;  %v5433_v44 = vpop.xlane.xlu1 %5432 }
 0x601   : > { %7614 = vrcp.f32 %v5433_v44 }
 0x602   : > { %5480 = vst [vmem:[%s11954_s22 + $0x70] sm:$0xff] %v5464_v15 }
 0x607   : > { %v7615_v48 = vpop.eup %7614 }
 0x608   : > { %v5465_v42 = vmul.f32 %v7615_v48, %v11937_v7 }
 0x60a   : > { %5481 = vst [vmem:[%s11954_s22 + $0x78] sm:$0xff] %v5465_v42 }
 0x60b   : > { %7852 = shalt.err (!%p7849_p3)
}
 0x60c   : > { %s7924_s16 = smov 128   ;;  %s7925_s10 = smov 8  }
 0x60d   : > { %6885 = dma.vmem_to_hbm [thread:$0]  (%p8061_p0), %s5519_s18, 2048, %s5521_s26, %s5488_s2, %s7924_s16, %s7924_s16, %s7925_s10  }
 0x60e PF: > { %s5535_s22 = sand.u32 1, %s7895_s27   ;;  %p12395_p5 = scmp.ge.s32.totalorder %s7907_s30, 2 }
 0x60f   : > { %s5536_s9 = scalar_lea.sflag [#allocation4], %s5535_s22 }
 0x610   : > { %p6909_p13 = pnand %p12395_p5, %p8067_p6 }
 0x612   : > { %p6910_p7 = pneg %p6909_p13 }
 0x614   : > { %7886 = dma.done.wait (%p6910_p7), %s5536_s9, 4096  }
 0x615   : > { %7888 = vsyncadd (%p6910_p7), %s5536_s9, 4294963200  ;;  %s5546_s24 = scalar_lea.sflag [#allocation15], %s5535_s22 }
 0x616   : > { %7890 = dma.done.wait (%p6910_p7), %s5546_s24, 2048  }
 0x617   : > { %7892 = vsyncadd (%p6910_p7), %s5546_s24, 4294965248  ;;  %p28_p0 = scmp.ge.s32.totalorder %s8037_s14, 4   ;;  %s12396_s27 = smov %s7899_s28 }
 0x618   : > { %s12397_s28 = smov %s7903_s29  ;;  %s12398_s29 = smov %s8049_s20 }
 0x619   : > { %s12399_s30 = smov %s8037_s14  ;;  %30 = sbr.rel (!%p28_p0) target bundleno = 14 (0xe), region = 130 }
 0x61e   :  { %5552 = vsyncpa [#allocation3], 1 }
 0x61f   :  { %5554 = vsyncpa [#allocation3 + $0x1], 1 }
 0x620   :  { %5555 = vsyncpa [#allocation6], 1 }
 0x621   :  { %5556 = vsyncpa [#allocation9], 1 }
 0x622   :  { %5557 = vsyncpa [#allocation12], 1 }
 0x623   :  { %5558 = vsyncpa [#allocation4], 1 }
 0x624   :  { %5560 = vsyncpa [#allocation4 + $0x1], 1 }
 0x625   :  { %5561 = vsyncpa [#allocation15], 1 }
 0x626   :  { %5563 = vsyncpa [#allocation15 + $0x1], 1 }

</bundles_post_ra>
